<compile_context>
chip_gen: v6e
topology: v6e:2x2x1
jax: 0.10.0
libtpu: 0.0.40
codegen_flags: <defaults>
</compile_context>

<pallas_src>
import jax
import jax.numpy as jnp
from jax.experimental import pallas as pl
from jax.experimental.pallas import tpu as pltpu


# ------------------------------------------------------------------ kernel --

def _maskgen_kernel(
    # flattened NHWC network inputs (f32); source also feeds the final multiply
    src_ref, tgt_ref,
    # encoder-1 / encoder-2 folded conv weights (bf16), layers 1..4
    e1w1, e1w2, e1w3, e1w4,
    e2w1, e2w2, e2w3, e2w4,
    # encoder BatchNorm gamma/beta stacked as (2, Co) f32, layers 2..4
    e1gb2, e1gb3, e1gb4,
    e2gb2, e2gb3, e2gb4,
    # decoder folded transposed-conv weights (bf16); layer 1 split into the
    # two channel-concat halves so no in-kernel concat is needed
    dw1a, dw1b, dw2, dw3, dw4,
    # decoder BatchNorm gamma/beta (2, Co) f32, layers 1..3
    dgb1, dgb2, dgb3,
    # per-BN-layer 0/1 matrices: R (Dflat, Co) sums spatial positions per
    # channel, B = R.T (Co, Dflat) broadcasts per-channel values back
    re2, be2, re3, be3,
    rd1, bd1, rd2, bd2, rd3, bd3,
    # output: syn, flattened NHWC (f32)
    o_ref,
):
    f32 = jnp.float32

    def mm(x, w_ref):                       # bf16 MXU GEMM, f32 accumulation
        return jnp.dot(x.astype(jnp.bfloat16), w_ref[...],
                       preferred_element_type=f32)

    def mmf(x, w_ref):                      # small f32 GEMM (BN stats plumbing)
        return jnp.dot(x, w_ref[...], preferred_element_type=f32)

    def lrelu(x):                           # LeakyReLU(0.2)
        return jnp.where(x > 0, x, 0.2 * x)

    def bn(y, gb_ref, r_ref=None, b_ref=None):
        # BatchNorm2d (training-mode batch stats, eps=1e-5) on the
        # channel-fastest flattened activation y: (N, Ho*Wo*Co).
        gamma = gb_ref[0:1, :]
        beta = gb_ref[1:2, :]
        cnt = float(y.shape[0] * y.shape[1] // gb_ref.shape[1])   # N * Ho * Wo
        s1 = jnp.sum(y, axis=0, keepdims=True)
        s2 = jnp.sum(y * y, axis=0, keepdims=True)
        if r_ref is not None:               # fold spatial positions into channels
            s1 = mmf(s1, r_ref)
            s2 = mmf(s2, r_ref)
        mean = s1 / cnt
        var = s2 / cnt - mean * mean
        scale = jax.lax.rsqrt(var + 1e-5) * gamma            # (1, Co)
        shift = beta - mean * scale                          # (1, Co)
        if b_ref is not None:               # broadcast back to (1, Dflat)
            scale = mmf(scale, b_ref)
            shift = mmf(shift, b_ref)
        return y * scale + shift

    def encoder(x, w1, w2, w3, w4, gb2, gb3, gb4):
        h = lrelu(mm(x, w1))                                  # conv1 (no BN)
        h = lrelu(bn(mm(h, w2), gb2, re2, be2))               # conv2 + BN
        h = lrelu(bn(mm(h, w3), gb3, re3, be3))               # conv3 + BN
        h = lrelu(bn(mm(h, w4), gb4))                         # conv4 + BN (1x1)
        return h                                              # (N, 8*ngf)

    src = src_ref[...]
    f1 = encoder(src, e1w1, e1w2, e1w3, e1w4, e1gb2, e1gb3, e1gb4)
    f2 = encoder(tgt_ref[...], e2w1, e2w2, e2w3, e2w4, e2gb2, e2gb3, e2gb4)

    # decoder; torch.cat((f1, f2), channel) folded into the split dw1a / dw1b
    h = mm(f1, dw1a) + mm(f2, dw1b)
    h = jnp.maximum(bn(h, dgb1, rd1, bd1), 0.0)
    h = jnp.maximum(bn(mm(h, dw2), dgb2, rd2, bd2), 0.0)
    h = jnp.maximum(bn(mm(h, dw3), dgb3, rd3, bd3), 0.0)
    logits = mm(h, dw4)
    mask = 1.0 / (1.0 + jnp.exp(-logits))                     # sigmoid
    o_ref[...] = src * mask * 2.0


# ----------------------------------------------------------------- wrapper --

@jax.jit
def mask_generator_forward(source_nchw, target_nchw, params):
    n, c, h, w = source_nchw.shape
    dflat = h * w * c
    src = jnp.transpose(source_nchw, (0, 2, 3, 1)).reshape(n, dflat)
    tgt = jnp.transpose(target_nchw, (0, 2, 3, 1)).reshape(n, dflat)
    args = (src.astype(jnp.float32), tgt.astype(jnp.float32)) + tuple(params)

    gemm_elems = sum(int(a.size) for a in args if a.dtype == jnp.bfloat16)
    bytes_in = sum(int(a.size) * a.dtype.itemsize for a in args)
    cost = pl.CostEstimate(flops=2 * n * gemm_elems,
                           transcendentals=n * dflat,
                           bytes_accessed=bytes_in + n * dflat * 4)

    vmem = pl.BlockSpec(memory_space=pltpu.MemorySpace.VMEM)
    syn_flat = pl.pallas_call(
        _maskgen_kernel,
        out_shape=jax.ShapeDtypeStruct((n, dflat), jnp.float32),
        in_specs=[vmem] * len(args),
        out_specs=vmem,
        cost_estimate=cost,
    )(*args)
    return jnp.transpose(syn_flat.reshape(n, h, w, c), (0, 3, 1, 2))


# --------------------------------------------------- weight folding / pack --

def _fold_conv(w_oihw, hin, win, stride=2, pad=1):
    """Fold Conv2d(k,s,p,bias=False) into BigW such that
    flatten_nhwc(conv(x)) == flatten_nhwc(x) @ BigW (exact, by linearity)."""
    co, ci, kh, kw = w_oihw.shape
    din = hin * win * ci
    basis = jnp.eye(din, dtype=jnp.float32).reshape(din, hin, win, ci)
    w_hwio = jnp.transpose(w_oihw, (2, 3, 1, 0))
    y = jax.lax.conv_general_dilated(
        basis, w_hwio, (stride, stride), [(pad, pad), (pad, pad)],
        dimension_numbers=("NHWC", "HWIO", "NHWC"),
        precision=jax.lax.Precision.HIGHEST)
    return y.reshape(din, -1)


def _fold_deconv(w_iohw, hin, win, stride=2, pad=1):
    """Fold ConvTranspose2d(k,s,p,bias=False) (PyTorch (Cin,Cout,kh,kw) weight)
    into BigW via the dilated-conv + flipped-kernel identity."""
    ci, co, kh, kw = w_iohw.shape
    din = hin * win * ci
    basis = jnp.eye(din, dtype=jnp.float32).reshape(din, hin, win, ci)
    w_hwio = jnp.transpose(w_iohw[:, :, ::-1, ::-1], (2, 3, 0, 1))
    y = jax.lax.conv_general_dilated(
        basis, w_hwio, (1, 1),
        [(kh - 1 - pad, kh - 1 - pad), (kw - 1 - pad, kw - 1 - pad)],
        lhs_dilation=(stride, stride),
        dimension_numbers=("NHWC", "HWIO", "NHWC"),
        precision=jax.lax.Precision.HIGHEST)
    return y.reshape(din, -1)


def _bn_plumbing(hw_out, co):
    """R (hw_out^2*co, co) sums spatial positions per channel; B = R.T
    broadcasts per-channel values back over the flat layout."""
    r = jnp.tile(jnp.eye(co, dtype=jnp.float32), (hw_out * hw_out, 1))
    return r, r.T


def init_raw_params(key, nc=3, ngf=8):
    """Random weights in PyTorch layouts (Conv2d OIHW, ConvTranspose2d IOHW),
    BatchNorm gamma=1 / beta=0 (PyTorch defaults); all layers bias-free as in
    the reference module."""
    enc_ch = [(nc, ngf), (ngf, ngf * 2), (ngf * 2, ngf * 4), (ngf * 4, ngf * 8)]
    dec_ch = [(ngf * 8 * 2, ngf * 4), (ngf * 4, ngf * 2), (ngf * 2, ngf), (ngf, nc)]
    keys = iter(jax.random.split(key, 2 * len(enc_ch) + len(dec_ch)))
    raw = {"enc1_w": [], "enc2_w": [], "enc1_bn": [], "enc2_bn": [],
           "dec_w": [], "dec_bn": []}
    for name in ("enc1_w", "enc2_w"):
        for ci, co in enc_ch:
            raw[name].append(
                0.02 * jax.random.normal(next(keys), (co, ci, 4, 4), jnp.float32))
    for _, co in enc_ch[1:]:
        for name in ("enc1_bn", "enc2_bn"):
            raw[name].append((jnp.ones((co,), jnp.float32),
                              jnp.zeros((co,), jnp.float32)))
    for ci, co in dec_ch:
        raw["dec_w"].append(
            0.02 * jax.random.normal(next(keys), (ci, co, 4, 4), jnp.float32))
    for _, co in dec_ch[:3]:
        raw["dec_bn"].append((jnp.ones((co,), jnp.float32),
                              jnp.zeros((co,), jnp.float32)))
    return raw


def pack_params(raw, nc=3, ngf=8, hw=16):
    """Fold every layer into a dense bf16 GEMM matrix + BN plumbing, in the
    positional order expected by _maskgen_kernel (after src, tgt)."""
    enc_sp = [hw, hw // 2, hw // 4, hw // 8]          # conv input spatial sizes
    dec_sp = [hw // 16, hw // 8, hw // 4, hw // 2]    # deconv input spatial
    e1w = [_fold_conv(raw["enc1_w"][i], enc_sp[i], enc_sp[i]).astype(jnp.bfloat16)
           for i in range(4)]
    e2w = [_fold_conv(raw["enc2_w"][i], enc_sp[i], enc_sp[i]).astype(jnp.bfloat16)
           for i in range(4)]
    e1gb = [jnp.stack(raw["enc1_bn"][i], 0) for i in range(3)]
    e2gb = [jnp.stack(raw["enc2_bn"][i], 0) for i in range(3)]
    dw = [_fold_deconv(raw["dec_w"][i], dec_sp[i], dec_sp[i]).astype(jnp.bfloat16)
          for i in range(4)]
    dw1a, dw1b = dw[0][:ngf * 8], dw[0][ngf * 8:]     # the torch.cat halves
    dgb = [jnp.stack(raw["dec_bn"][i], 0) for i in range(3)]
    re2, be2 = _bn_plumbing(hw // 4, ngf * 2)         # enc L2 out: 4x4 x 2ngf
    re3, be3 = _bn_plumbing(hw // 8, ngf * 4)         # enc L3 out: 2x2 x 4ngf
    rd1, bd1 = _bn_plumbing(hw // 8, ngf * 4)         # dec L1 out: 2x2 x 4ngf
    rd2, bd2 = _bn_plumbing(hw // 4, ngf * 2)         # dec L2 out: 4x4 x 2ngf
    rd3, bd3 = _bn_plumbing(hw // 2, ngf)             # dec L3 out: 8x8 x  ngf
    return tuple(e1w + e2w + e1gb + e2gb
                 + [dw1a, dw1b, dw[1], dw[2], dw[3]] + dgb
                 + [re2, be2, re3, be3, rd1, bd1, rd2, bd2, rd3, bd3])


# --------------------------------------------- plain-XLA numerics reference --

def _ref_conv(x, w_oihw, stride=2, pad=1):
    w = jnp.transpose(w_oihw, (2, 3, 1, 0)).astype(jnp.bfloat16)
    return jax.lax.conv_general_dilated(
        x.astype(jnp.bfloat16), w, (stride, stride), [(pad, pad), (pad, pad)],
        dimension_numbers=("NHWC", "HWIO", "NHWC"),
        preferred_element_type=jnp.float32)


def _ref_deconv(x, w_iohw, stride=2, pad=1):
    kh, kw = w_iohw.shape[2:]
    w = jnp.transpose(w_iohw[:, :, ::-1, ::-1], (2, 3, 0, 1)).astype(jnp.bfloat16)
    return jax.lax.conv_general_dilated(
        x.astype(jnp.bfloat16), w, (1, 1),
        [(kh - 1 - pad, kh - 1 - pad), (kw - 1 - pad, kw - 1 - pad)],
        lhs_dilation=(stride, stride),
        dimension_numbers=("NHWC", "HWIO", "NHWC"),
        preferred_element_type=jnp.float32)


def _ref_bn(x, gamma, beta, eps=1e-5):
    mean = jnp.mean(x, axis=(0, 1, 2), keepdims=True)
    var = jnp.mean(jnp.square(x - mean), axis=(0, 1, 2), keepdims=True)
    return (x - mean) * jax.lax.rsqrt(var + eps) * gamma + beta


def reference_forward(source_nchw, target_nchw, raw):
    """Direct translation of the PyTorch module with matching bf16 operands."""
    src = jnp.transpose(source_nchw, (0, 2, 3, 1)).astype(jnp.float32)
    tgt = jnp.transpose(target_nchw, (0, 2, 3, 1)).astype(jnp.float32)

    def enc(x, ws, bns):
        h = x
        for i in range(4):
            h = _ref_conv(h, ws[i])
            if i > 0:
                h = _ref_bn(h, *bns[i - 1])
            h = jnp.where(h > 0, h, 0.2 * h)
        return h

    f1 = enc(src, raw["enc1_w"], raw["enc1_bn"])
    f2 = enc(tgt, raw["enc2_w"], raw["enc2_bn"])
    h = jnp.concatenate([f1, f2], axis=-1)
    for i in range(3):
        h = jnp.maximum(_ref_bn(_ref_deconv(h, raw["dec_w"][i]),
                                *raw["dec_bn"][i]), 0.0)
    mask = jax.nn.sigmoid(_ref_deconv(h, raw["dec_w"][3]))
    syn = src * mask * 2.0
    return jnp.transpose(syn, (0, 3, 1, 2))


# --------------------------------------------------------------------- main --

if __name__ == "__main__":
    key = jax.random.PRNGKey(0)
    k_src, k_tgt, k_par = jax.random.split(key, 3)

    N, NC, HW, NGF = 2, 3, 16, 8      # spatial 16 -> 8 -> 4 -> 2 -> 1 -> 16
    source = jax.random.normal(k_src, (N, NC, HW, HW), jnp.float32)
    target = jax.random.normal(k_tgt, (N, NC, HW, HW), jnp.float32)

    raw = init_raw_params(k_par, nc=NC, ngf=NGF)
    params = pack_params(raw, nc=NC, ngf=NGF, hw=HW)

    syn = jax.block_until_ready(mask_generator_forward(source, target, params))
    assert syn.shape == (N, NC, HW, HW), syn.shape
    assert bool(jnp.all(jnp.isfinite(syn)))

    # sanity check against a plain-XLA reference with matched bf16 operands
    ref = jax.block_until_ready(jax.jit(reference_forward)(source, target, raw))
    assert bool(jnp.allclose(syn, ref, atol=5e-2, rtol=5e-2)), \
        float(jnp.max(jnp.abs(syn - ref)))

    print("KERNEL_OK")
</pallas_src>

<mosaic_0001>
module attributes {stable_mosaic.version = 11 : i64} {
  func.func @_maskgen_kernel(%arg0: memref<2x768xf32, #tpu.memory_space<vmem>>, %arg1: memref<2x768xf32, #tpu.memory_space<vmem>>, %arg2: memref<768x512xbf16, #tpu.memory_space<vmem>>, %arg3: memref<512x256xbf16, #tpu.memory_space<vmem>>, %arg4: memref<256x128xbf16, #tpu.memory_space<vmem>>, %arg5: memref<128x64xbf16, #tpu.memory_space<vmem>>, %arg6: memref<768x512xbf16, #tpu.memory_space<vmem>>, %arg7: memref<512x256xbf16, #tpu.memory_space<vmem>>, %arg8: memref<256x128xbf16, #tpu.memory_space<vmem>>, %arg9: memref<128x64xbf16, #tpu.memory_space<vmem>>, %arg10: memref<2x16xf32, #tpu.memory_space<vmem>>, %arg11: memref<2x32xf32, #tpu.memory_space<vmem>>, %arg12: memref<2x64xf32, #tpu.memory_space<vmem>>, %arg13: memref<2x16xf32, #tpu.memory_space<vmem>>, %arg14: memref<2x32xf32, #tpu.memory_space<vmem>>, %arg15: memref<2x64xf32, #tpu.memory_space<vmem>>, %arg16: memref<64x128xbf16, #tpu.memory_space<vmem>>, %arg17: memref<64x128xbf16, #tpu.memory_space<vmem>>, %arg18: memref<128x256xbf16, #tpu.memory_space<vmem>>, %arg19: memref<256x512xbf16, #tpu.memory_space<vmem>>, %arg20: memref<512x768xbf16, #tpu.memory_space<vmem>>, %arg21: memref<2x32xf32, #tpu.memory_space<vmem>>, %arg22: memref<2x16xf32, #tpu.memory_space<vmem>>, %arg23: memref<2x8xf32, #tpu.memory_space<vmem>>, %arg24: memref<256x16xf32, #tpu.memory_space<vmem>>, %arg25: memref<16x256xf32, #tpu.memory_space<vmem>>, %arg26: memref<128x32xf32, #tpu.memory_space<vmem>>, %arg27: memref<32x128xf32, #tpu.memory_space<vmem>>, %arg28: memref<128x32xf32, #tpu.memory_space<vmem>>, %arg29: memref<32x128xf32, #tpu.memory_space<vmem>>, %arg30: memref<256x16xf32, #tpu.memory_space<vmem>>, %arg31: memref<16x256xf32, #tpu.memory_space<vmem>>, %arg32: memref<512x8xf32, #tpu.memory_space<vmem>>, %arg33: memref<8x512xf32, #tpu.memory_space<vmem>>, %arg34: memref<2x768xf32, #tpu.memory_space<vmem>>) attributes {dimension_semantics = [], scalar_prefetch = 0 : i64, scratch_operands = 0 : i64, tpu.core_type = #tpu.core_type<tc>} {
    %c0 = arith.constant 0 : index
    %c0_0 = arith.constant 0 : index
    %0 = vector.load %arg0[%c0, %c0_0] : memref<2x768xf32, #tpu.memory_space<vmem>>, vector<2x768xf32>
    %1 = arith.truncf %0 : vector<2x768xf32> to vector<2x768xbf16>
    %c0_1 = arith.constant 0 : index
    %c0_2 = arith.constant 0 : index
    %2 = vector.load %arg2[%c0_1, %c0_2] : memref<768x512xbf16, #tpu.memory_space<vmem>>, vector<768x512xbf16>
    %cst = arith.constant dense<0.000000e+00> : vector<2x512xf32>
    %3 = tpu.matmul %1, %2, %cst {dimension_numbers = #tpu.dot_dimension_numbers<[1], [0], [0], [1], [0, 0, 1, 1], [], []>} : vector<2x768xbf16>, vector<768x512xbf16>, vector<2x512xf32> -> vector<2x512xf32>
    %cst_3 = arith.constant 0.000000e+00 : f32
    %4 = vector.broadcast %cst_3 : f32 to vector<2x512xf32>
    %5 = arith.cmpf ogt, %3, %4 : vector<2x512xf32>
    %cst_4 = arith.constant 2.000000e-01 : f32
    %6 = vector.broadcast %cst_4 : f32 to vector<2x512xf32>
    %7 = arith.mulf %6, %3 : vector<2x512xf32>
    %8 = arith.select %5, %3, %7 : vector<2x512xi1>, vector<2x512xf32>
    %9 = arith.truncf %8 : vector<2x512xf32> to vector<2x512xbf16>
    %c0_5 = arith.constant 0 : index
    %c0_6 = arith.constant 0 : index
    %10 = vector.load %arg3[%c0_5, %c0_6] : memref<512x256xbf16, #tpu.memory_space<vmem>>, vector<512x256xbf16>
    %cst_7 = arith.constant dense<0.000000e+00> : vector<2x256xf32>
    %11 = tpu.matmul %9, %10, %cst_7 {dimension_numbers = #tpu.dot_dimension_numbers<[1], [0], [0], [1], [0, 0, 1, 1], [], []>} : vector<2x512xbf16>, vector<512x256xbf16>, vector<2x256xf32> -> vector<2x256xf32>
    %c0_8 = arith.constant 0 : index
    %c0_9 = arith.constant 0 : index
    %12 = vector.load %arg10[%c0_8, %c0_9] : memref<2x16xf32, #tpu.memory_space<vmem>>, vector<1x16xf32>
    %c1 = arith.constant 1 : index
    %c0_10 = arith.constant 0 : index
    %13 = vector.load %arg10[%c1, %c0_10] : memref<2x16xf32, #tpu.memory_space<vmem>>, vector<1x16xf32>
    %cst_11 = arith.constant dense<0.000000e+00> : vector<256xf32>
    %14 = vector.multi_reduction <add>, %11, %cst_11 [0] : vector<2x256xf32> to vector<256xf32>
    %15 = vector.shape_cast %14 : vector<256xf32> to vector<1x256xf32>
    %16 = arith.mulf %11, %11 : vector<2x256xf32>
    %cst_12 = arith.constant dense<0.000000e+00> : vector<256xf32>
    %17 = vector.multi_reduction <add>, %16, %cst_12 [0] : vector<2x256xf32> to vector<256xf32>
    %18 = vector.shape_cast %17 : vector<256xf32> to vector<1x256xf32>
    %c0_13 = arith.constant 0 : index
    %c0_14 = arith.constant 0 : index
    %19 = vector.load %arg24[%c0_13, %c0_14] : memref<256x16xf32, #tpu.memory_space<vmem>>, vector<256x16xf32>
    %cst_15 = arith.constant dense<0.000000e+00> : vector<1x16xf32>
    %20 = tpu.matmul %15, %19, %cst_15 {dimension_numbers = #tpu.dot_dimension_numbers<[1], [0], [0], [1], [0, 0, 1, 1], [], []>} : vector<1x256xf32>, vector<256x16xf32>, vector<1x16xf32> -> vector<1x16xf32>
    %c0_16 = arith.constant 0 : index
    %c0_17 = arith.constant 0 : index
    %21 = vector.load %arg24[%c0_16, %c0_17] : memref<256x16xf32, #tpu.memory_space<vmem>>, vector<256x16xf32>
    %cst_18 = arith.constant dense<0.000000e+00> : vector<1x16xf32>
    %22 = tpu.matmul %18, %21, %cst_18 {dimension_numbers = #tpu.dot_dimension_numbers<[1], [0], [0], [1], [0, 0, 1, 1], [], []>} : vector<1x256xf32>, vector<256x16xf32>, vector<1x16xf32> -> vector<1x16xf32>
    %cst_19 = arith.constant 3.200000e+01 : f32
    %23 = vector.broadcast %cst_19 : f32 to vector<1x16xf32>
    %24 = arith.divf %20, %23 : vector<1x16xf32>
    %cst_20 = arith.constant 3.200000e+01 : f32
    %25 = vector.broadcast %cst_20 : f32 to vector<1x16xf32>
    %26 = arith.divf %22, %25 : vector<1x16xf32>
    %27 = arith.mulf %24, %24 : vector<1x16xf32>
    %28 = arith.subf %26, %27 : vector<1x16xf32>
    %cst_21 = arith.constant 9.99999974E-6 : f32
    %29 = vector.broadcast %cst_21 : f32 to vector<1x16xf32>
    %30 = arith.addf %28, %29 : vector<1x16xf32>
    %31 = math.rsqrt %30 : vector<1x16xf32>
    %32 = arith.mulf %31, %12 : vector<1x16xf32>
    %33 = arith.mulf %24, %32 : vector<1x16xf32>
    %34 = arith.subf %13, %33 : vector<1x16xf32>
    %c0_22 = arith.constant 0 : index
    %c0_23 = arith.constant 0 : index
    %35 = vector.load %arg25[%c0_22, %c0_23] : memref<16x256xf32, #tpu.memory_space<vmem>>, vector<16x256xf32>
    %cst_24 = arith.constant dense<0.000000e+00> : vector<1x256xf32>
    %36 = tpu.matmul %32, %35, %cst_24 {dimension_numbers = #tpu.dot_dimension_numbers<[1], [0], [0], [1], [0, 0, 1, 1], [], []>} : vector<1x16xf32>, vector<16x256xf32>, vector<1x256xf32> -> vector<1x256xf32>
    %c0_25 = arith.constant 0 : index
    %c0_26 = arith.constant 0 : index
    %37 = vector.load %arg25[%c0_25, %c0_26] : memref<16x256xf32, #tpu.memory_space<vmem>>, vector<16x256xf32>
    %cst_27 = arith.constant dense<0.000000e+00> : vector<1x256xf32>
    %38 = tpu.matmul %34, %37, %cst_27 {dimension_numbers = #tpu.dot_dimension_numbers<[1], [0], [0], [1], [0, 0, 1, 1], [], []>} : vector<1x16xf32>, vector<16x256xf32>, vector<1x256xf32> -> vector<1x256xf32>
    %39 = vector.broadcast %36 : vector<1x256xf32> to vector<2x256xf32>
    %40 = arith.mulf %11, %39 : vector<2x256xf32>
    %41 = vector.broadcast %38 : vector<1x256xf32> to vector<2x256xf32>
    %42 = arith.addf %40, %41 : vector<2x256xf32>
    %cst_28 = arith.constant 0.000000e+00 : f32
    %43 = vector.broadcast %cst_28 : f32 to vector<2x256xf32>
    %44 = arith.cmpf ogt, %42, %43 : vector<2x256xf32>
    %cst_29 = arith.constant 2.000000e-01 : f32
    %45 = vector.broadcast %cst_29 : f32 to vector<2x256xf32>
    %46 = arith.mulf %45, %42 : vector<2x256xf32>
    %47 = arith.select %44, %42, %46 : vector<2x256xi1>, vector<2x256xf32>
    %48 = arith.truncf %47 : vector<2x256xf32> to vector<2x256xbf16>
    %c0_30 = arith.constant 0 : index
    %c0_31 = arith.constant 0 : index
    %49 = vector.load %arg4[%c0_30, %c0_31] : memref<256x128xbf16, #tpu.memory_space<vmem>>, vector<256x128xbf16>
    %cst_32 = arith.constant dense<0.000000e+00> : vector<2x128xf32>
    %50 = tpu.matmul %48, %49, %cst_32 {dimension_numbers = #tpu.dot_dimension_numbers<[1], [0], [0], [1], [0, 0, 1, 1], [], []>} : vector<2x256xbf16>, vector<256x128xbf16>, vector<2x128xf32> -> vector<2x128xf32>
    %c0_33 = arith.constant 0 : index
    %c0_34 = arith.constant 0 : index
    %51 = vector.load %arg11[%c0_33, %c0_34] : memref<2x32xf32, #tpu.memory_space<vmem>>, vector<1x32xf32>
    %c1_35 = arith.constant 1 : index
    %c0_36 = arith.constant 0 : index
    %52 = vector.load %arg11[%c1_35, %c0_36] : memref<2x32xf32, #tpu.memory_space<vmem>>, vector<1x32xf32>
    %cst_37 = arith.constant dense<0.000000e+00> : vector<128xf32>
    %53 = vector.multi_reduction <add>, %50, %cst_37 [0] : vector<2x128xf32> to vector<128xf32>
    %54 = vector.shape_cast %53 : vector<128xf32> to vector<1x128xf32>
    %55 = arith.mulf %50, %50 : vector<2x128xf32>
    %cst_38 = arith.constant dense<0.000000e+00> : vector<128xf32>
    %56 = vector.multi_reduction <add>, %55, %cst_38 [0] : vector<2x128xf32> to vector<128xf32>
    %57 = vector.shape_cast %56 : vector<128xf32> to vector<1x128xf32>
    %c0_39 = arith.constant 0 : index
    %c0_40 = arith.constant 0 : index
    %58 = vector.load %arg26[%c0_39, %c0_40] : memref<128x32xf32, #tpu.memory_space<vmem>>, vector<128x32xf32>
    %cst_41 = arith.constant dense<0.000000e+00> : vector<1x32xf32>
    %59 = tpu.matmul %54, %58, %cst_41 {dimension_numbers = #tpu.dot_dimension_numbers<[1], [0], [0], [1], [0, 0, 1, 1], [], []>} : vector<1x128xf32>, vector<128x32xf32>, vector<1x32xf32> -> vector<1x32xf32>
    %c0_42 = arith.constant 0 : index
    %c0_43 = arith.constant 0 : index
    %60 = vector.load %arg26[%c0_42, %c0_43] : memref<128x32xf32, #tpu.memory_space<vmem>>, vector<128x32xf32>
    %cst_44 = arith.constant dense<0.000000e+00> : vector<1x32xf32>
    %61 = tpu.matmul %57, %60, %cst_44 {dimension_numbers = #tpu.dot_dimension_numbers<[1], [0], [0], [1], [0, 0, 1, 1], [], []>} : vector<1x128xf32>, vector<128x32xf32>, vector<1x32xf32> -> vector<1x32xf32>
    %cst_45 = arith.constant 8.000000e+00 : f32
    %62 = vector.broadcast %cst_45 : f32 to vector<1x32xf32>
    %63 = arith.divf %59, %62 : vector<1x32xf32>
    %cst_46 = arith.constant 8.000000e+00 : f32
    %64 = vector.broadcast %cst_46 : f32 to vector<1x32xf32>
    %65 = arith.divf %61, %64 : vector<1x32xf32>
    %66 = arith.mulf %63, %63 : vector<1x32xf32>
    %67 = arith.subf %65, %66 : vector<1x32xf32>
    %cst_47 = arith.constant 9.99999974E-6 : f32
    %68 = vector.broadcast %cst_47 : f32 to vector<1x32xf32>
    %69 = arith.addf %67, %68 : vector<1x32xf32>
    %70 = math.rsqrt %69 : vector<1x32xf32>
    %71 = arith.mulf %70, %51 : vector<1x32xf32>
    %72 = arith.mulf %63, %71 : vector<1x32xf32>
    %73 = arith.subf %52, %72 : vector<1x32xf32>
    %c0_48 = arith.constant 0 : index
    %c0_49 = arith.constant 0 : index
    %74 = vector.load %arg27[%c0_48, %c0_49] : memref<32x128xf32, #tpu.memory_space<vmem>>, vector<32x128xf32>
    %cst_50 = arith.constant dense<0.000000e+00> : vector<1x128xf32>
    %75 = tpu.matmul %71, %74, %cst_50 {dimension_numbers = #tpu.dot_dimension_numbers<[1], [0], [0], [1], [0, 0, 1, 1], [], []>} : vector<1x32xf32>, vector<32x128xf32>, vector<1x128xf32> -> vector<1x128xf32>
    %c0_51 = arith.constant 0 : index
    %c0_52 = arith.constant 0 : index
    %76 = vector.load %arg27[%c0_51, %c0_52] : memref<32x128xf32, #tpu.memory_space<vmem>>, vector<32x128xf32>
    %cst_53 = arith.constant dense<0.000000e+00> : vector<1x128xf32>
    %77 = tpu.matmul %73, %76, %cst_53 {dimension_numbers = #tpu.dot_dimension_numbers<[1], [0], [0], [1], [0, 0, 1, 1], [], []>} : vector<1x32xf32>, vector<32x128xf32>, vector<1x128xf32> -> vector<1x128xf32>
    %78 = vector.broadcast %75 : vector<1x128xf32> to vector<2x128xf32>
    %79 = arith.mulf %50, %78 : vector<2x128xf32>
    %80 = vector.broadcast %77 : vector<1x128xf32> to vector<2x128xf32>
    %81 = arith.addf %79, %80 : vector<2x128xf32>
    %cst_54 = arith.constant 0.000000e+00 : f32
    %82 = vector.broadcast %cst_54 : f32 to vector<2x128xf32>
    %83 = arith.cmpf ogt, %81, %82 : vector<2x128xf32>
    %cst_55 = arith.constant 2.000000e-01 : f32
    %84 = vector.broadcast %cst_55 : f32 to vector<2x128xf32>
    %85 = arith.mulf %84, %81 : vector<2x128xf32>
    %86 = arith.select %83, %81, %85 : vector<2x128xi1>, vector<2x128xf32>
    %87 = arith.truncf %86 : vector<2x128xf32> to vector<2x128xbf16>
    %c0_56 = arith.constant 0 : index
    %c0_57 = arith.constant 0 : index
    %88 = vector.load %arg5[%c0_56, %c0_57] : memref<128x64xbf16, #tpu.memory_space<vmem>>, vector<128x64xbf16>
    %cst_58 = arith.constant dense<0.000000e+00> : vector<2x64xf32>
    %89 = tpu.matmul %87, %88, %cst_58 {dimension_numbers = #tpu.dot_dimension_numbers<[1], [0], [0], [1], [0, 0, 1, 1], [], []>} : vector<2x128xbf16>, vector<128x64xbf16>, vector<2x64xf32> -> vector<2x64xf32>
    %c0_59 = arith.constant 0 : index
    %c0_60 = arith.constant 0 : index
    %90 = vector.load %arg12[%c0_59, %c0_60] : memref<2x64xf32, #tpu.memory_space<vmem>>, vector<1x64xf32>
    %c1_61 = arith.constant 1 : index
    %c0_62 = arith.constant 0 : index
    %91 = vector.load %arg12[%c1_61, %c0_62] : memref<2x64xf32, #tpu.memory_space<vmem>>, vector<1x64xf32>
    %cst_63 = arith.constant dense<0.000000e+00> : vector<64xf32>
    %92 = vector.multi_reduction <add>, %89, %cst_63 [0] : vector<2x64xf32> to vector<64xf32>
    %93 = vector.shape_cast %92 : vector<64xf32> to vector<1x64xf32>
    %94 = arith.mulf %89, %89 : vector<2x64xf32>
    %cst_64 = arith.constant dense<0.000000e+00> : vector<64xf32>
    %95 = vector.multi_reduction <add>, %94, %cst_64 [0] : vector<2x64xf32> to vector<64xf32>
    %96 = vector.shape_cast %95 : vector<64xf32> to vector<1x64xf32>
    %cst_65 = arith.constant 2.000000e+00 : f32
    %97 = vector.broadcast %cst_65 : f32 to vector<1x64xf32>
    %98 = arith.divf %93, %97 : vector<1x64xf32>
    %cst_66 = arith.constant 2.000000e+00 : f32
    %99 = vector.broadcast %cst_66 : f32 to vector<1x64xf32>
    %100 = arith.divf %96, %99 : vector<1x64xf32>
    %101 = arith.mulf %98, %98 : vector<1x64xf32>
    %102 = arith.subf %100, %101 : vector<1x64xf32>
    %cst_67 = arith.constant 9.99999974E-6 : f32
    %103 = vector.broadcast %cst_67 : f32 to vector<1x64xf32>
    %104 = arith.addf %102, %103 : vector<1x64xf32>
    %105 = math.rsqrt %104 : vector<1x64xf32>
    %106 = arith.mulf %105, %90 : vector<1x64xf32>
    %107 = arith.mulf %98, %106 : vector<1x64xf32>
    %108 = arith.subf %91, %107 : vector<1x64xf32>
    %109 = vector.broadcast %106 : vector<1x64xf32> to vector<2x64xf32>
    %110 = arith.mulf %89, %109 : vector<2x64xf32>
    %111 = vector.broadcast %108 : vector<1x64xf32> to vector<2x64xf32>
    %112 = arith.addf %110, %111 : vector<2x64xf32>
    %cst_68 = arith.constant 0.000000e+00 : f32
    %113 = vector.broadcast %cst_68 : f32 to vector<2x64xf32>
    %114 = arith.cmpf ogt, %112, %113 : vector<2x64xf32>
    %cst_69 = arith.constant 2.000000e-01 : f32
    %115 = vector.broadcast %cst_69 : f32 to vector<2x64xf32>
    %116 = arith.mulf %115, %112 : vector<2x64xf32>
    %117 = arith.select %114, %112, %116 : vector<2x64xi1>, vector<2x64xf32>
    %c0_70 = arith.constant 0 : index
    %c0_71 = arith.constant 0 : index
    %118 = vector.load %arg1[%c0_70, %c0_71] : memref<2x768xf32, #tpu.memory_space<vmem>>, vector<2x768xf32>
    %119 = arith.truncf %118 : vector<2x768xf32> to vector<2x768xbf16>
    %c0_72 = arith.constant 0 : index
    %c0_73 = arith.constant 0 : index
    %120 = vector.load %arg6[%c0_72, %c0_73] : memref<768x512xbf16, #tpu.memory_space<vmem>>, vector<768x512xbf16>
    %cst_74 = arith.constant dense<0.000000e+00> : vector<2x512xf32>
    %121 = tpu.matmul %119, %120, %cst_74 {dimension_numbers = #tpu.dot_dimension_numbers<[1], [0], [0], [1], [0, 0, 1, 1], [], []>} : vector<2x768xbf16>, vector<768x512xbf16>, vector<2x512xf32> -> vector<2x512xf32>
    %cst_75 = arith.constant 0.000000e+00 : f32
    %122 = vector.broadcast %cst_75 : f32 to vector<2x512xf32>
    %123 = arith.cmpf ogt, %121, %122 : vector<2x512xf32>
    %cst_76 = arith.constant 2.000000e-01 : f32
    %124 = vector.broadcast %cst_76 : f32 to vector<2x512xf32>
    %125 = arith.mulf %124, %121 : vector<2x512xf32>
    %126 = arith.select %123, %121, %125 : vector<2x512xi1>, vector<2x512xf32>
    %127 = arith.truncf %126 : vector<2x512xf32> to vector<2x512xbf16>
    %c0_77 = arith.constant 0 : index
    %c0_78 = arith.constant 0 : index
    %128 = vector.load %arg7[%c0_77, %c0_78] : memref<512x256xbf16, #tpu.memory_space<vmem>>, vector<512x256xbf16>
    %cst_79 = arith.constant dense<0.000000e+00> : vector<2x256xf32>
    %129 = tpu.matmul %127, %128, %cst_79 {dimension_numbers = #tpu.dot_dimension_numbers<[1], [0], [0], [1], [0, 0, 1, 1], [], []>} : vector<2x512xbf16>, vector<512x256xbf16>, vector<2x256xf32> -> vector<2x256xf32>
    %c0_80 = arith.constant 0 : index
    %c0_81 = arith.constant 0 : index
    %130 = vector.load %arg13[%c0_80, %c0_81] : memref<2x16xf32, #tpu.memory_space<vmem>>, vector<1x16xf32>
    %c1_82 = arith.constant 1 : index
    %c0_83 = arith.constant 0 : index
    %131 = vector.load %arg13[%c1_82, %c0_83] : memref<2x16xf32, #tpu.memory_space<vmem>>, vector<1x16xf32>
    %cst_84 = arith.constant dense<0.000000e+00> : vector<256xf32>
    %132 = vector.multi_reduction <add>, %129, %cst_84 [0] : vector<2x256xf32> to vector<256xf32>
    %133 = vector.shape_cast %132 : vector<256xf32> to vector<1x256xf32>
    %134 = arith.mulf %129, %129 : vector<2x256xf32>
    %cst_85 = arith.constant dense<0.000000e+00> : vector<256xf32>
    %135 = vector.multi_reduction <add>, %134, %cst_85 [0] : vector<2x256xf32> to vector<256xf32>
    %136 = vector.shape_cast %135 : vector<256xf32> to vector<1x256xf32>
    %c0_86 = arith.constant 0 : index
    %c0_87 = arith.constant 0 : index
    %137 = vector.load %arg24[%c0_86, %c0_87] : memref<256x16xf32, #tpu.memory_space<vmem>>, vector<256x16xf32>
    %cst_88 = arith.constant dense<0.000000e+00> : vector<1x16xf32>
    %138 = tpu.matmul %133, %137, %cst_88 {dimension_numbers = #tpu.dot_dimension_numbers<[1], [0], [0], [1], [0, 0, 1, 1], [], []>} : vector<1x256xf32>, vector<256x16xf32>, vector<1x16xf32> -> vector<1x16xf32>
    %c0_89 = arith.constant 0 : index
    %c0_90 = arith.constant 0 : index
    %139 = vector.load %arg24[%c0_89, %c0_90] : memref<256x16xf32, #tpu.memory_space<vmem>>, vector<256x16xf32>
    %cst_91 = arith.constant dense<0.000000e+00> : vector<1x16xf32>
    %140 = tpu.matmul %136, %139, %cst_91 {dimension_numbers = #tpu.dot_dimension_numbers<[1], [0], [0], [1], [0, 0, 1, 1], [], []>} : vector<1x256xf32>, vector<256x16xf32>, vector<1x16xf32> -> vector<1x16xf32>
    %cst_92 = arith.constant 3.200000e+01 : f32
    %141 = vector.broadcast %cst_92 : f32 to vector<1x16xf32>
    %142 = arith.divf %138, %141 : vector<1x16xf32>
    %cst_93 = arith.constant 3.200000e+01 : f32
    %143 = vector.broadcast %cst_93 : f32 to vector<1x16xf32>
    %144 = arith.divf %140, %143 : vector<1x16xf32>
    %145 = arith.mulf %142, %142 : vector<1x16xf32>
    %146 = arith.subf %144, %145 : vector<1x16xf32>
    %cst_94 = arith.constant 9.99999974E-6 : f32
    %147 = vector.broadcast %cst_94 : f32 to vector<1x16xf32>
    %148 = arith.addf %146, %147 : vector<1x16xf32>
    %149 = math.rsqrt %148 : vector<1x16xf32>
    %150 = arith.mulf %149, %130 : vector<1x16xf32>
    %151 = arith.mulf %142, %150 : vector<1x16xf32>
    %152 = arith.subf %131, %151 : vector<1x16xf32>
    %c0_95 = arith.constant 0 : index
    %c0_96 = arith.constant 0 : index
    %153 = vector.load %arg25[%c0_95, %c0_96] : memref<16x256xf32, #tpu.memory_space<vmem>>, vector<16x256xf32>
    %cst_97 = arith.constant dense<0.000000e+00> : vector<1x256xf32>
    %154 = tpu.matmul %150, %153, %cst_97 {dimension_numbers = #tpu.dot_dimension_numbers<[1], [0], [0], [1], [0, 0, 1, 1], [], []>} : vector<1x16xf32>, vector<16x256xf32>, vector<1x256xf32> -> vector<1x256xf32>
    %c0_98 = arith.constant 0 : index
    %c0_99 = arith.constant 0 : index
    %155 = vector.load %arg25[%c0_98, %c0_99] : memref<16x256xf32, #tpu.memory_space<vmem>>, vector<16x256xf32>
    %cst_100 = arith.constant dense<0.000000e+00> : vector<1x256xf32>
    %156 = tpu.matmul %152, %155, %cst_100 {dimension_numbers = #tpu.dot_dimension_numbers<[1], [0], [0], [1], [0, 0, 1, 1], [], []>} : vector<1x16xf32>, vector<16x256xf32>, vector<1x256xf32> -> vector<1x256xf32>
    %157 = vector.broadcast %154 : vector<1x256xf32> to vector<2x256xf32>
    %158 = arith.mulf %129, %157 : vector<2x256xf32>
    %159 = vector.broadcast %156 : vector<1x256xf32> to vector<2x256xf32>
    %160 = arith.addf %158, %159 : vector<2x256xf32>
    %cst_101 = arith.constant 0.000000e+00 : f32
    %161 = vector.broadcast %cst_101 : f32 to vector<2x256xf32>
    %162 = arith.cmpf ogt, %160, %161 : vector<2x256xf32>
    %cst_102 = arith.constant 2.000000e-01 : f32
    %163 = vector.broadcast %cst_102 : f32 to vector<2x256xf32>
    %164 = arith.mulf %163, %160 : vector<2x256xf32>
    %165 = arith.select %162, %160, %164 : vector<2x256xi1>, vector<2x256xf32>
    %166 = arith.truncf %165 : vector<2x256xf32> to vector<2x256xbf16>
    %c0_103 = arith.constant 0 : index
    %c0_104 = arith.constant 0 : index
    %167 = vector.load %arg8[%c0_103, %c0_104] : memref<256x128xbf16, #tpu.memory_space<vmem>>, vector<256x128xbf16>
    %cst_105 = arith.constant dense<0.000000e+00> : vector<2x128xf32>
    %168 = tpu.matmul %166, %167, %cst_105 {dimension_numbers = #tpu.dot_dimension_numbers<[1], [0], [0], [1], [0, 0, 1, 1], [], []>} : vector<2x256xbf16>, vector<256x128xbf16>, vector<2x128xf32> -> vector<2x128xf32>
    %c0_106 = arith.constant 0 : index
    %c0_107 = arith.constant 0 : index
    %169 = vector.load %arg14[%c0_106, %c0_107] : memref<2x32xf32, #tpu.memory_space<vmem>>, vector<1x32xf32>
    %c1_108 = arith.constant 1 : index
    %c0_109 = arith.constant 0 : index
    %170 = vector.load %arg14[%c1_108, %c0_109] : memref<2x32xf32, #tpu.memory_space<vmem>>, vector<1x32xf32>
    %cst_110 = arith.constant dense<0.000000e+00> : vector<128xf32>
    %171 = vector.multi_reduction <add>, %168, %cst_110 [0] : vector<2x128xf32> to vector<128xf32>
    %172 = vector.shape_cast %171 : vector<128xf32> to vector<1x128xf32>
    %173 = arith.mulf %168, %168 : vector<2x128xf32>
    %cst_111 = arith.constant dense<0.000000e+00> : vector<128xf32>
    %174 = vector.multi_reduction <add>, %173, %cst_111 [0] : vector<2x128xf32> to vector<128xf32>
    %175 = vector.shape_cast %174 : vector<128xf32> to vector<1x128xf32>
    %c0_112 = arith.constant 0 : index
    %c0_113 = arith.constant 0 : index
    %176 = vector.load %arg26[%c0_112, %c0_113] : memref<128x32xf32, #tpu.memory_space<vmem>>, vector<128x32xf32>
    %cst_114 = arith.constant dense<0.000000e+00> : vector<1x32xf32>
    %177 = tpu.matmul %172, %176, %cst_114 {dimension_numbers = #tpu.dot_dimension_numbers<[1], [0], [0], [1], [0, 0, 1, 1], [], []>} : vector<1x128xf32>, vector<128x32xf32>, vector<1x32xf32> -> vector<1x32xf32>
    %c0_115 = arith.constant 0 : index
    %c0_116 = arith.constant 0 : index
    %178 = vector.load %arg26[%c0_115, %c0_116] : memref<128x32xf32, #tpu.memory_space<vmem>>, vector<128x32xf32>
    %cst_117 = arith.constant dense<0.000000e+00> : vector<1x32xf32>
    %179 = tpu.matmul %175, %178, %cst_117 {dimension_numbers = #tpu.dot_dimension_numbers<[1], [0], [0], [1], [0, 0, 1, 1], [], []>} : vector<1x128xf32>, vector<128x32xf32>, vector<1x32xf32> -> vector<1x32xf32>
    %cst_118 = arith.constant 8.000000e+00 : f32
    %180 = vector.broadcast %cst_118 : f32 to vector<1x32xf32>
    %181 = arith.divf %177, %180 : vector<1x32xf32>
    %cst_119 = arith.constant 8.000000e+00 : f32
    %182 = vector.broadcast %cst_119 : f32 to vector<1x32xf32>
    %183 = arith.divf %179, %182 : vector<1x32xf32>
    %184 = arith.mulf %181, %181 : vector<1x32xf32>
    %185 = arith.subf %183, %184 : vector<1x32xf32>
    %cst_120 = arith.constant 9.99999974E-6 : f32
    %186 = vector.broadcast %cst_120 : f32 to vector<1x32xf32>
    %187 = arith.addf %185, %186 : vector<1x32xf32>
    %188 = math.rsqrt %187 : vector<1x32xf32>
    %189 = arith.mulf %188, %169 : vector<1x32xf32>
    %190 = arith.mulf %181, %189 : vector<1x32xf32>
    %191 = arith.subf %170, %190 : vector<1x32xf32>
    %c0_121 = arith.constant 0 : index
    %c0_122 = arith.constant 0 : index
    %192 = vector.load %arg27[%c0_121, %c0_122] : memref<32x128xf32, #tpu.memory_space<vmem>>, vector<32x128xf32>
    %cst_123 = arith.constant dense<0.000000e+00> : vector<1x128xf32>
    %193 = tpu.matmul %189, %192, %cst_123 {dimension_numbers = #tpu.dot_dimension_numbers<[1], [0], [0], [1], [0, 0, 1, 1], [], []>} : vector<1x32xf32>, vector<32x128xf32>, vector<1x128xf32> -> vector<1x128xf32>
    %c0_124 = arith.constant 0 : index
    %c0_125 = arith.constant 0 : index
    %194 = vector.load %arg27[%c0_124, %c0_125] : memref<32x128xf32, #tpu.memory_space<vmem>>, vector<32x128xf32>
    %cst_126 = arith.constant dense<0.000000e+00> : vector<1x128xf32>
    %195 = tpu.matmul %191, %194, %cst_126 {dimension_numbers = #tpu.dot_dimension_numbers<[1], [0], [0], [1], [0, 0, 1, 1], [], []>} : vector<1x32xf32>, vector<32x128xf32>, vector<1x128xf32> -> vector<1x128xf32>
    %196 = vector.broadcast %193 : vector<1x128xf32> to vector<2x128xf32>
    %197 = arith.mulf %168, %196 : vector<2x128xf32>
    %198 = vector.broadcast %195 : vector<1x128xf32> to vector<2x128xf32>
    %199 = arith.addf %197, %198 : vector<2x128xf32>
    %cst_127 = arith.constant 0.000000e+00 : f32
    %200 = vector.broadcast %cst_127 : f32 to vector<2x128xf32>
    %201 = arith.cmpf ogt, %199, %200 : vector<2x128xf32>
    %cst_128 = arith.constant 2.000000e-01 : f32
    %202 = vector.broadcast %cst_128 : f32 to vector<2x128xf32>
    %203 = arith.mulf %202, %199 : vector<2x128xf32>
    %204 = arith.select %201, %199, %203 : vector<2x128xi1>, vector<2x128xf32>
    %205 = arith.truncf %204 : vector<2x128xf32> to vector<2x128xbf16>
    %c0_129 = arith.constant 0 : index
    %c0_130 = arith.constant 0 : index
    %206 = vector.load %arg9[%c0_129, %c0_130] : memref<128x64xbf16, #tpu.memory_space<vmem>>, vector<128x64xbf16>
    %cst_131 = arith.constant dense<0.000000e+00> : vector<2x64xf32>
    %207 = tpu.matmul %205, %206, %cst_131 {dimension_numbers = #tpu.dot_dimension_numbers<[1], [0], [0], [1], [0, 0, 1, 1], [], []>} : vector<2x128xbf16>, vector<128x64xbf16>, vector<2x64xf32> -> vector<2x64xf32>
    %c0_132 = arith.constant 0 : index
    %c0_133 = arith.constant 0 : index
    %208 = vector.load %arg15[%c0_132, %c0_133] : memref<2x64xf32, #tpu.memory_space<vmem>>, vector<1x64xf32>
    %c1_134 = arith.constant 1 : index
    %c0_135 = arith.constant 0 : index
    %209 = vector.load %arg15[%c1_134, %c0_135] : memref<2x64xf32, #tpu.memory_space<vmem>>, vector<1x64xf32>
    %cst_136 = arith.constant dense<0.000000e+00> : vector<64xf32>
    %210 = vector.multi_reduction <add>, %207, %cst_136 [0] : vector<2x64xf32> to vector<64xf32>
    %211 = vector.shape_cast %210 : vector<64xf32> to vector<1x64xf32>
    %212 = arith.mulf %207, %207 : vector<2x64xf32>
    %cst_137 = arith.constant dense<0.000000e+00> : vector<64xf32>
    %213 = vector.multi_reduction <add>, %212, %cst_137 [0] : vector<2x64xf32> to vector<64xf32>
    %214 = vector.shape_cast %213 : vector<64xf32> to vector<1x64xf32>
    %cst_138 = arith.constant 2.000000e+00 : f32
    %215 = vector.broadcast %cst_138 : f32 to vector<1x64xf32>
    %216 = arith.divf %211, %215 : vector<1x64xf32>
    %cst_139 = arith.constant 2.000000e+00 : f32
    %217 = vector.broadcast %cst_139 : f32 to vector<1x64xf32>
    %218 = arith.divf %214, %217 : vector<1x64xf32>
    %219 = arith.mulf %216, %216 : vector<1x64xf32>
    %220 = arith.subf %218, %219 : vector<1x64xf32>
    %cst_140 = arith.constant 9.99999974E-6 : f32
    %221 = vector.broadcast %cst_140 : f32 to vector<1x64xf32>
    %222 = arith.addf %220, %221 : vector<1x64xf32>
    %223 = math.rsqrt %222 : vector<1x64xf32>
    %224 = arith.mulf %223, %208 : vector<1x64xf32>
    %225 = arith.mulf %216, %224 : vector<1x64xf32>
    %226 = arith.subf %209, %225 : vector<1x64xf32>
    %227 = vector.broadcast %224 : vector<1x64xf32> to vector<2x64xf32>
    %228 = arith.mulf %207, %227 : vector<2x64xf32>
    %229 = vector.broadcast %226 : vector<1x64xf32> to vector<2x64xf32>
    %230 = arith.addf %228, %229 : vector<2x64xf32>
    %cst_141 = arith.constant 0.000000e+00 : f32
    %231 = vector.broadcast %cst_141 : f32 to vector<2x64xf32>
    %232 = arith.cmpf ogt, %230, %231 : vector<2x64xf32>
    %cst_142 = arith.constant 2.000000e-01 : f32
    %233 = vector.broadcast %cst_142 : f32 to vector<2x64xf32>
    %234 = arith.mulf %233, %230 : vector<2x64xf32>
    %235 = arith.select %232, %230, %234 : vector<2x64xi1>, vector<2x64xf32>
    %236 = arith.truncf %117 : vector<2x64xf32> to vector<2x64xbf16>
    %c0_143 = arith.constant 0 : index
    %c0_144 = arith.constant 0 : index
    %237 = vector.load %arg16[%c0_143, %c0_144] : memref<64x128xbf16, #tpu.memory_space<vmem>>, vector<64x128xbf16>
    %cst_145 = arith.constant dense<0.000000e+00> : vector<2x128xf32>
    %238 = tpu.matmul %236, %237, %cst_145 {dimension_numbers = #tpu.dot_dimension_numbers<[1], [0], [0], [1], [0, 0, 1, 1], [], []>} : vector<2x64xbf16>, vector<64x128xbf16>, vector<2x128xf32> -> vector<2x128xf32>
    %239 = arith.truncf %235 : vector<2x64xf32> to vector<2x64xbf16>
    %c0_146 = arith.constant 0 : index
    %c0_147 = arith.constant 0 : index
    %240 = vector.load %arg17[%c0_146, %c0_147] : memref<64x128xbf16, #tpu.memory_space<vmem>>, vector<64x128xbf16>
    %cst_148 = arith.constant dense<0.000000e+00> : vector<2x128xf32>
    %241 = tpu.matmul %239, %240, %cst_148 {dimension_numbers = #tpu.dot_dimension_numbers<[1], [0], [0], [1], [0, 0, 1, 1], [], []>} : vector<2x64xbf16>, vector<64x128xbf16>, vector<2x128xf32> -> vector<2x128xf32>
    %242 = arith.addf %238, %241 : vector<2x128xf32>
    %c0_149 = arith.constant 0 : index
    %c0_150 = arith.constant 0 : index
    %243 = vector.load %arg21[%c0_149, %c0_150] : memref<2x32xf32, #tpu.memory_space<vmem>>, vector<1x32xf32>
    %c1_151 = arith.constant 1 : index
    %c0_152 = arith.constant 0 : index
    %244 = vector.load %arg21[%c1_151, %c0_152] : memref<2x32xf32, #tpu.memory_space<vmem>>, vector<1x32xf32>
    %cst_153 = arith.constant dense<0.000000e+00> : vector<128xf32>
    %245 = vector.multi_reduction <add>, %242, %cst_153 [0] : vector<2x128xf32> to vector<128xf32>
    %246 = vector.shape_cast %245 : vector<128xf32> to vector<1x128xf32>
    %247 = arith.mulf %242, %242 : vector<2x128xf32>
    %cst_154 = arith.constant dense<0.000000e+00> : vector<128xf32>
    %248 = vector.multi_reduction <add>, %247, %cst_154 [0] : vector<2x128xf32> to vector<128xf32>
    %249 = vector.shape_cast %248 : vector<128xf32> to vector<1x128xf32>
    %c0_155 = arith.constant 0 : index
    %c0_156 = arith.constant 0 : index
    %250 = vector.load %arg28[%c0_155, %c0_156] : memref<128x32xf32, #tpu.memory_space<vmem>>, vector<128x32xf32>
    %cst_157 = arith.constant dense<0.000000e+00> : vector<1x32xf32>
    %251 = tpu.matmul %246, %250, %cst_157 {dimension_numbers = #tpu.dot_dimension_numbers<[1], [0], [0], [1], [0, 0, 1, 1], [], []>} : vector<1x128xf32>, vector<128x32xf32>, vector<1x32xf32> -> vector<1x32xf32>
    %c0_158 = arith.constant 0 : index
    %c0_159 = arith.constant 0 : index
    %252 = vector.load %arg28[%c0_158, %c0_159] : memref<128x32xf32, #tpu.memory_space<vmem>>, vector<128x32xf32>
    %cst_160 = arith.constant dense<0.000000e+00> : vector<1x32xf32>
    %253 = tpu.matmul %249, %252, %cst_160 {dimension_numbers = #tpu.dot_dimension_numbers<[1], [0], [0], [1], [0, 0, 1, 1], [], []>} : vector<1x128xf32>, vector<128x32xf32>, vector<1x32xf32> -> vector<1x32xf32>
    %cst_161 = arith.constant 8.000000e+00 : f32
    %254 = vector.broadcast %cst_161 : f32 to vector<1x32xf32>
    %255 = arith.divf %251, %254 : vector<1x32xf32>
    %cst_162 = arith.constant 8.000000e+00 : f32
    %256 = vector.broadcast %cst_162 : f32 to vector<1x32xf32>
    %257 = arith.divf %253, %256 : vector<1x32xf32>
    %258 = arith.mulf %255, %255 : vector<1x32xf32>
    %259 = arith.subf %257, %258 : vector<1x32xf32>
    %cst_163 = arith.constant 9.99999974E-6 : f32
    %260 = vector.broadcast %cst_163 : f32 to vector<1x32xf32>
    %261 = arith.addf %259, %260 : vector<1x32xf32>
    %262 = math.rsqrt %261 : vector<1x32xf32>
    %263 = arith.mulf %262, %243 : vector<1x32xf32>
    %264 = arith.mulf %255, %263 : vector<1x32xf32>
    %265 = arith.subf %244, %264 : vector<1x32xf32>
    %c0_164 = arith.constant 0 : index
    %c0_165 = arith.constant 0 : index
    %266 = vector.load %arg29[%c0_164, %c0_165] : memref<32x128xf32, #tpu.memory_space<vmem>>, vector<32x128xf32>
    %cst_166 = arith.constant dense<0.000000e+00> : vector<1x128xf32>
    %267 = tpu.matmul %263, %266, %cst_166 {dimension_numbers = #tpu.dot_dimension_numbers<[1], [0], [0], [1], [0, 0, 1, 1], [], []>} : vector<1x32xf32>, vector<32x128xf32>, vector<1x128xf32> -> vector<1x128xf32>
    %c0_167 = arith.constant 0 : index
    %c0_168 = arith.constant 0 : index
    %268 = vector.load %arg29[%c0_167, %c0_168] : memref<32x128xf32, #tpu.memory_space<vmem>>, vector<32x128xf32>
    %cst_169 = arith.constant dense<0.000000e+00> : vector<1x128xf32>
    %269 = tpu.matmul %265, %268, %cst_169 {dimension_numbers = #tpu.dot_dimension_numbers<[1], [0], [0], [1], [0, 0, 1, 1], [], []>} : vector<1x32xf32>, vector<32x128xf32>, vector<1x128xf32> -> vector<1x128xf32>
    %270 = vector.broadcast %267 : vector<1x128xf32> to vector<2x128xf32>
    %271 = arith.mulf %242, %270 : vector<2x128xf32>
    %272 = vector.broadcast %269 : vector<1x128xf32> to vector<2x128xf32>
    %273 = arith.addf %271, %272 : vector<2x128xf32>
    %cst_170 = arith.constant 0.000000e+00 : f32
    %274 = vector.broadcast %cst_170 : f32 to vector<2x128xf32>
    %275 = arith.maximumf %273, %274 : vector<2x128xf32>
    %276 = arith.truncf %275 : vector<2x128xf32> to vector<2x128xbf16>
    %c0_171 = arith.constant 0 : index
    %c0_172 = arith.constant 0 : index
    %277 = vector.load %arg18[%c0_171, %c0_172] : memref<128x256xbf16, #tpu.memory_space<vmem>>, vector<128x256xbf16>
    %cst_173 = arith.constant dense<0.000000e+00> : vector<2x256xf32>
    %278 = tpu.matmul %276, %277, %cst_173 {dimension_numbers = #tpu.dot_dimension_numbers<[1], [0], [0], [1], [0, 0, 1, 1], [], []>} : vector<2x128xbf16>, vector<128x256xbf16>, vector<2x256xf32> -> vector<2x256xf32>
    %c0_174 = arith.constant 0 : index
    %c0_175 = arith.constant 0 : index
    %279 = vector.load %arg22[%c0_174, %c0_175] : memref<2x16xf32, #tpu.memory_space<vmem>>, vector<1x16xf32>
    %c1_176 = arith.constant 1 : index
    %c0_177 = arith.constant 0 : index
    %280 = vector.load %arg22[%c1_176, %c0_177] : memref<2x16xf32, #tpu.memory_space<vmem>>, vector<1x16xf32>
    %cst_178 = arith.constant dense<0.000000e+00> : vector<256xf32>
    %281 = vector.multi_reduction <add>, %278, %cst_178 [0] : vector<2x256xf32> to vector<256xf32>
    %282 = vector.shape_cast %281 : vector<256xf32> to vector<1x256xf32>
    %283 = arith.mulf %278, %278 : vector<2x256xf32>
    %cst_179 = arith.constant dense<0.000000e+00> : vector<256xf32>
    %284 = vector.multi_reduction <add>, %283, %cst_179 [0] : vector<2x256xf32> to vector<256xf32>
    %285 = vector.shape_cast %284 : vector<256xf32> to vector<1x256xf32>
    %c0_180 = arith.constant 0 : index
    %c0_181 = arith.constant 0 : index
    %286 = vector.load %arg30[%c0_180, %c0_181] : memref<256x16xf32, #tpu.memory_space<vmem>>, vector<256x16xf32>
    %cst_182 = arith.constant dense<0.000000e+00> : vector<1x16xf32>
    %287 = tpu.matmul %282, %286, %cst_182 {dimension_numbers = #tpu.dot_dimension_numbers<[1], [0], [0], [1], [0, 0, 1, 1], [], []>} : vector<1x256xf32>, vector<256x16xf32>, vector<1x16xf32> -> vector<1x16xf32>
    %c0_183 = arith.constant 0 : index
    %c0_184 = arith.constant 0 : index
    %288 = vector.load %arg30[%c0_183, %c0_184] : memref<256x16xf32, #tpu.memory_space<vmem>>, vector<256x16xf32>
    %cst_185 = arith.constant dense<0.000000e+00> : vector<1x16xf32>
    %289 = tpu.matmul %285, %288, %cst_185 {dimension_numbers = #tpu.dot_dimension_numbers<[1], [0], [0], [1], [0, 0, 1, 1], [], []>} : vector<1x256xf32>, vector<256x16xf32>, vector<1x16xf32> -> vector<1x16xf32>
    %cst_186 = arith.constant 3.200000e+01 : f32
    %290 = vector.broadcast %cst_186 : f32 to vector<1x16xf32>
    %291 = arith.divf %287, %290 : vector<1x16xf32>
    %cst_187 = arith.constant 3.200000e+01 : f32
    %292 = vector.broadcast %cst_187 : f32 to vector<1x16xf32>
    %293 = arith.divf %289, %292 : vector<1x16xf32>
    %294 = arith.mulf %291, %291 : vector<1x16xf32>
    %295 = arith.subf %293, %294 : vector<1x16xf32>
    %cst_188 = arith.constant 9.99999974E-6 : f32
    %296 = vector.broadcast %cst_188 : f32 to vector<1x16xf32>
    %297 = arith.addf %295, %296 : vector<1x16xf32>
    %298 = math.rsqrt %297 : vector<1x16xf32>
    %299 = arith.mulf %298, %279 : vector<1x16xf32>
    %300 = arith.mulf %291, %299 : vector<1x16xf32>
    %301 = arith.subf %280, %300 : vector<1x16xf32>
    %c0_189 = arith.constant 0 : index
    %c0_190 = arith.constant 0 : index
    %302 = vector.load %arg31[%c0_189, %c0_190] : memref<16x256xf32, #tpu.memory_space<vmem>>, vector<16x256xf32>
    %cst_191 = arith.constant dense<0.000000e+00> : vector<1x256xf32>
    %303 = tpu.matmul %299, %302, %cst_191 {dimension_numbers = #tpu.dot_dimension_numbers<[1], [0], [0], [1], [0, 0, 1, 1], [], []>} : vector<1x16xf32>, vector<16x256xf32>, vector<1x256xf32> -> vector<1x256xf32>
    %c0_192 = arith.constant 0 : index
    %c0_193 = arith.constant 0 : index
    %304 = vector.load %arg31[%c0_192, %c0_193] : memref<16x256xf32, #tpu.memory_space<vmem>>, vector<16x256xf32>
    %cst_194 = arith.constant dense<0.000000e+00> : vector<1x256xf32>
    %305 = tpu.matmul %301, %304, %cst_194 {dimension_numbers = #tpu.dot_dimension_numbers<[1], [0], [0], [1], [0, 0, 1, 1], [], []>} : vector<1x16xf32>, vector<16x256xf32>, vector<1x256xf32> -> vector<1x256xf32>
    %306 = vector.broadcast %303 : vector<1x256xf32> to vector<2x256xf32>
    %307 = arith.mulf %278, %306 : vector<2x256xf32>
    %308 = vector.broadcast %305 : vector<1x256xf32> to vector<2x256xf32>
    %309 = arith.addf %307, %308 : vector<2x256xf32>
    %cst_195 = arith.constant 0.000000e+00 : f32
    %310 = vector.broadcast %cst_195 : f32 to vector<2x256xf32>
    %311 = arith.maximumf %309, %310 : vector<2x256xf32>
    %312 = arith.truncf %311 : vector<2x256xf32> to vector<2x256xbf16>
    %c0_196 = arith.constant 0 : index
    %c0_197 = arith.constant 0 : index
    %313 = vector.load %arg19[%c0_196, %c0_197] : memref<256x512xbf16, #tpu.memory_space<vmem>>, vector<256x512xbf16>
    %cst_198 = arith.constant dense<0.000000e+00> : vector<2x512xf32>
    %314 = tpu.matmul %312, %313, %cst_198 {dimension_numbers = #tpu.dot_dimension_numbers<[1], [0], [0], [1], [0, 0, 1, 1], [], []>} : vector<2x256xbf16>, vector<256x512xbf16>, vector<2x512xf32> -> vector<2x512xf32>
    %c0_199 = arith.constant 0 : index
    %c0_200 = arith.constant 0 : index
    %315 = vector.load %arg23[%c0_199, %c0_200] : memref<2x8xf32, #tpu.memory_space<vmem>>, vector<1x8xf32>
    %c1_201 = arith.constant 1 : index
    %c0_202 = arith.constant 0 : index
    %316 = vector.load %arg23[%c1_201, %c0_202] : memref<2x8xf32, #tpu.memory_space<vmem>>, vector<1x8xf32>
    %cst_203 = arith.constant dense<0.000000e+00> : vector<512xf32>
    %317 = vector.multi_reduction <add>, %314, %cst_203 [0] : vector<2x512xf32> to vector<512xf32>
    %318 = vector.shape_cast %317 : vector<512xf32> to vector<1x512xf32>
    %319 = arith.mulf %314, %314 : vector<2x512xf32>
    %cst_204 = arith.constant dense<0.000000e+00> : vector<512xf32>
    %320 = vector.multi_reduction <add>, %319, %cst_204 [0] : vector<2x512xf32> to vector<512xf32>
    %321 = vector.shape_cast %320 : vector<512xf32> to vector<1x512xf32>
    %c0_205 = arith.constant 0 : index
    %c0_206 = arith.constant 0 : index
    %322 = vector.load %arg32[%c0_205, %c0_206] : memref<512x8xf32, #tpu.memory_space<vmem>>, vector<512x8xf32>
    %cst_207 = arith.constant dense<0.000000e+00> : vector<1x8xf32>
    %323 = tpu.matmul %318, %322, %cst_207 {dimension_numbers = #tpu.dot_dimension_numbers<[1], [0], [0], [1], [0, 0, 1, 1], [], []>} : vector<1x512xf32>, vector<512x8xf32>, vector<1x8xf32> -> vector<1x8xf32>
    %c0_208 = arith.constant 0 : index
    %c0_209 = arith.constant 0 : index
    %324 = vector.load %arg32[%c0_208, %c0_209] : memref<512x8xf32, #tpu.memory_space<vmem>>, vector<512x8xf32>
    %cst_210 = arith.constant dense<0.000000e+00> : vector<1x8xf32>
    %325 = tpu.matmul %321, %324, %cst_210 {dimension_numbers = #tpu.dot_dimension_numbers<[1], [0], [0], [1], [0, 0, 1, 1], [], []>} : vector<1x512xf32>, vector<512x8xf32>, vector<1x8xf32> -> vector<1x8xf32>
    %cst_211 = arith.constant 1.280000e+02 : f32
    %326 = vector.broadcast %cst_211 : f32 to vector<1x8xf32>
    %327 = arith.divf %323, %326 : vector<1x8xf32>
    %cst_212 = arith.constant 1.280000e+02 : f32
    %328 = vector.broadcast %cst_212 : f32 to vector<1x8xf32>
    %329 = arith.divf %325, %328 : vector<1x8xf32>
    %330 = arith.mulf %327, %327 : vector<1x8xf32>
    %331 = arith.subf %329, %330 : vector<1x8xf32>
    %cst_213 = arith.constant 9.99999974E-6 : f32
    %332 = vector.broadcast %cst_213 : f32 to vector<1x8xf32>
    %333 = arith.addf %331, %332 : vector<1x8xf32>
    %334 = math.rsqrt %333 : vector<1x8xf32>
    %335 = arith.mulf %334, %315 : vector<1x8xf32>
    %336 = arith.mulf %327, %335 : vector<1x8xf32>
    %337 = arith.subf %316, %336 : vector<1x8xf32>
    %c0_214 = arith.constant 0 : index
    %c0_215 = arith.constant 0 : index
    %338 = vector.load %arg33[%c0_214, %c0_215] : memref<8x512xf32, #tpu.memory_space<vmem>>, vector<8x512xf32>
    %cst_216 = arith.constant dense<0.000000e+00> : vector<1x512xf32>
    %339 = tpu.matmul %335, %338, %cst_216 {dimension_numbers = #tpu.dot_dimension_numbers<[1], [0], [0], [1], [0, 0, 1, 1], [], []>} : vector<1x8xf32>, vector<8x512xf32>, vector<1x512xf32> -> vector<1x512xf32>
    %c0_217 = arith.constant 0 : index
    %c0_218 = arith.constant 0 : index
    %340 = vector.load %arg33[%c0_217, %c0_218] : memref<8x512xf32, #tpu.memory_space<vmem>>, vector<8x512xf32>
    %cst_219 = arith.constant dense<0.000000e+00> : vector<1x512xf32>
    %341 = tpu.matmul %337, %340, %cst_219 {dimension_numbers = #tpu.dot_dimension_numbers<[1], [0], [0], [1], [0, 0, 1, 1], [], []>} : vector<1x8xf32>, vector<8x512xf32>, vector<1x512xf32> -> vector<1x512xf32>
    %342 = vector.broadcast %339 : vector<1x512xf32> to vector<2x512xf32>
    %343 = arith.mulf %314, %342 : vector<2x512xf32>
    %344 = vector.broadcast %341 : vector<1x512xf32> to vector<2x512xf32>
    %345 = arith.addf %343, %344 : vector<2x512xf32>
    %cst_220 = arith.constant 0.000000e+00 : f32
    %346 = vector.broadcast %cst_220 : f32 to vector<2x512xf32>
    %347 = arith.maximumf %345, %346 : vector<2x512xf32>
    %348 = arith.truncf %347 : vector<2x512xf32> to vector<2x512xbf16>
    %c0_221 = arith.constant 0 : index
    %c0_222 = arith.constant 0 : index
    %349 = vector.load %arg20[%c0_221, %c0_222] : memref<512x768xbf16, #tpu.memory_space<vmem>>, vector<512x768xbf16>
    %cst_223 = arith.constant dense<0.000000e+00> : vector<2x768xf32>
    %350 = tpu.matmul %348, %349, %cst_223 {dimension_numbers = #tpu.dot_dimension_numbers<[1], [0], [0], [1], [0, 0, 1, 1], [], []>} : vector<2x512xbf16>, vector<512x768xbf16>, vector<2x768xf32> -> vector<2x768xf32>
    %cst_224 = arith.constant 0.000000e+00 : f32
    %351 = vector.broadcast %cst_224 : f32 to vector<2x768xf32>
    %352 = arith.subf %351, %350 : vector<2x768xf32>
    %353 = math.exp %352 : vector<2x768xf32>
    %cst_225 = arith.constant 1.000000e+00 : f32
    %354 = vector.broadcast %cst_225 : f32 to vector<2x768xf32>
    %355 = arith.addf %354, %353 : vector<2x768xf32>
    %cst_226 = arith.constant 1.000000e+00 : f32
    %356 = vector.broadcast %cst_226 : f32 to vector<2x768xf32>
    %357 = arith.divf %356, %355 : vector<2x768xf32>
    %358 = arith.mulf %0, %357 : vector<2x768xf32>
    %cst_227 = arith.constant 2.000000e+00 : f32
    %359 = vector.broadcast %cst_227 : f32 to vector<2x768xf32>
    %360 = arith.mulf %358, %359 : vector<2x768xf32>
    %c0_228 = arith.constant 0 : index
    %c0_229 = arith.constant 0 : index
    %361 = vector.load %arg34[%c0_228, %c0_229] : memref<2x768xf32, #tpu.memory_space<vmem>>, vector<2x768xf32>
    tpu.vector_store %arg34[%c0_228, %c0_229], %360 {strides = array<i32>} : memref<2x768xf32, #tpu.memory_space<vmem>>, vector<2x768xf32>,
    return
  }
}

</mosaic_0001>

<bundles_post_ra>
// kernel: mask_generator_forward.1
= control target key start
LH: loop header
LB: loop body
LE: loop exit
PB: predicated region body
PF: predicated region fallthrough
CT: control target
= control target key end

     0   :  { %s13597_s6 = smov 1   ;;  %s13598_s10 = smov 2   ;;  %s15536_s0 = inlined_call_operand.smem [shape: u32[35], index: -1, kind: input, shape index: {}] }
   0x1   :  { %s13670_s5 = sld [smem:[%s15536_s0]]   ;;  %s13599_s14 = smov 3  }
   0x2   :  { %s13675_s9 = sld [smem:[%s15536_s0 + %s13597_s6]]   ;;  %s13600_s18 = smov 4  }
   0x3   :  { %s13680_s13 = sld [smem:[%s15536_s0 + %s13598_s10]]   ;;  %s13601_s22 = smov 5  }
   0x4   :  { %s13685_s17 = sld [smem:[%s15536_s0 + %s13599_s14]]   ;;  %s13602_s26 = smov 6  }
   0x5   :  { %s13690_s21 = sld [smem:[%s15536_s0 + %s13600_s18]]   ;;  %s13603_s30 = smov 7  }
   0x6   :  { %s13695_s25 = sld [smem:[%s15536_s0 + %s13601_s22]]   ;;  %s13604_s4 = smov 8  }
   0x7   :  { %15589 = sst [smem:[#allocation41_spill]] %s13670_s5  ;;  %s13605_s10 = smov 9  }
   0x8   :  { %15590 = sst [smem:[#allocation42_spill]] %s13675_s9  ;;  %s13606_s15 = smov 10  }
   0x9   :  { %15591 = sst [smem:[#allocation43_spill]] %s13680_s13  ;;  %s13607_s20 = smov 11  }
   0xa   :  { %15592 = sst [smem:[#allocation44_spill]] %s13685_s17  ;;  %s13609_s1 = smov 13  }
   0xb   :  { %15593 = sst [smem:[#allocation45_spill]] %s13690_s21  ;;  %s13610_s7 = smov 14  }
   0xc   :  { %15594 = sst [smem:[#allocation46_spill]] %s13695_s25  ;;  %s13612_s22 = smov 16  }
   0xd   :  { %s13700_s29 = sld [smem:[%s15536_s0 + %s13602_s26]]   ;;  %s13608_s26 = smov 12  }
   0xe   :  { %s13705_s3 = sld [smem:[%s15536_s0 + %s13603_s30]]   ;;  %s13613_s28 = smov 17  }
   0xf   :  { %s13710_s8 = sld [smem:[%s15536_s0 + %s13604_s4]]  }
  0x10   :  { %s13715_s14 = sld [smem:[%s15536_s0 + %s13605_s10]]  }
  0x11   :  { %s13720_s19 = sld [smem:[%s15536_s0 + %s13606_s15]]   ;;  %s13611_s15 = smov 15  }
  0x12   :  { %s13725_s24 = sld [smem:[%s15536_s0 + %s13607_s20]]  }
  0x13   :  { %15595 = sst [smem:[#allocation47_spill]] %s13700_s29 }
  0x14   :  { %s13730_s30 = sld [smem:[%s15536_s0 + %s13608_s26]]  }
  0x15   :  { %15596 = sst [smem:[#allocation48_spill]] %s13710_s8 }
  0x16   :  { %15597 = sst [smem:[#allocation49_spill]] %s13715_s14 }
  0x17   :  { %15598 = sst [smem:[#allocation50_spill]] %s13720_s19 }
  0x18   :  { %s13735_s6 = sld [smem:[%s15536_s0 + %s13609_s1]]  }
  0x19   :  { %s13740_s12 = sld [smem:[%s15536_s0 + %s13610_s7]]   ;;  %s13614_s7 = smov 18  }
  0x1a   :  { %s13745_s20 = sld [smem:[%s15536_s0 + %s13611_s15]]   ;;  %s13615_s15 = smov 19  }
  0x1b   :  { %s13750_s27 = sld [smem:[%s15536_s0 + %s13612_s22]]   ;;  %s13616_s22 = smov 20  }
  0x1c   :  { %s13755_s4 = sld [smem:[%s15536_s0 + %s13613_s28]]   ;;  %s13617_s28 = smov 21  }
  0x1d   :  { %s13760_s14 = sld [smem:[%s15536_s0 + %s13614_s7]]   ;;  %s13618_s7 = smov 22  }
  0x1e   :  { %s13765_s8 = sld [smem:[%s15536_s0 + %s13615_s15]]   ;;  %s13619_s15 = smov 23  }
  0x1f   :  { %s13770_s9 = sld [smem:[%s15536_s0 + %s13616_s22]]   ;;  %s13620_s22 = smov 24  }
  0x20   :  { %s13775_s25 = sld [smem:[%s15536_s0 + %s13617_s28]]   ;;  %s13621_s28 = smov 25  }
  0x21   :  { %s13780_s29 = sld [smem:[%s15536_s0 + %s13618_s7]]   ;;  %s13622_s7 = smov 26  }
  0x22   :  { %s13785_s19 = sld [smem:[%s15536_s0 + %s13619_s15]]   ;;  %s13623_s15 = smov 27  }
  0x23   :  { %s13790_s21 = sld [smem:[%s15536_s0 + %s13620_s22]]   ;;  %s13624_s22 = smov 28  }
  0x24   :  { %s13795_s17 = sld [smem:[%s15536_s0 + %s13621_s28]]   ;;  %s13625_s28 = smov 29  }
  0x25   :  { %s13800_s5 = sld [smem:[%s15536_s0 + %s13622_s7]]   ;;  %s13626_s7 = smov 30  }
  0x26   :  { %s13805_s13 = sld [smem:[%s15536_s0 + %s13623_s15]]   ;;  %s13627_s15 = smov 31  }
  0x27   :  { %15599 = sst [smem:[#allocation51_spill]] %s13780_s29 }
  0x28   :  { %s13825_s29 = sld [smem:[%s15536_s0 + %s13627_s15]]  }
  0x29   :  { %15600 = sst [smem:[#allocation52_spill]] %s13790_s21 }
  0x2a   :  { %15601 = sst [smem:[#allocation53_spill]] %s13795_s17 }
  0x2b   :  { %15602 = sst [smem:[#allocation54_spill]] %s13800_s5 }
  0x2c   :  { %s13810_s21 = sld [smem:[%s15536_s0 + %s13624_s22]]   ;;  %s13628_s22 = smov 32  }
  0x2d   :  { %s13815_s17 = sld [smem:[%s15536_s0 + %s13625_s28]]   ;;  %s13629_s28 = smov 33  }
  0x2e   :  { %s13820_s5 = sld [smem:[%s15536_s0 + %s13626_s7]]   ;;  %s13630_s7 = smov 34  }
  0x32   :  { %15603 = sst [smem:[#allocation55_spill]] %s13810_s21 }
  0x33   :  { %15604 = sst [smem:[#allocation56_spill]] %s13815_s17 }
  0x34   :  { %15605 = sst [smem:[#allocation57_spill]] %s13820_s5 }
  0x35   :  { %s13830_s21 = sld [smem:[%s15536_s0 + %s13628_s22]]  }
  0x36   :  { %s13835_s17 = sld [smem:[%s15536_s0 + %s13629_s28]]  }
  0x37   :  { %s13840_s5 = sld [smem:[%s15536_s0 + %s13630_s7]]  }
  0x38   :  { %74 = vsyncpa [#allocation3], 0 }
  0x39   :  { %75 = vsyncpa [#allocation5], 0 }
  0x3a   :  { %76 = vsyncpa [#allocation8], 0 }
  0x3b   :  { %77 = vsyncpa [#allocation11], 0 }
  0x3c   :  { %78 = vsyncpa [#allocation14], 0 }
  0x3d   :  { %79 = vsyncpa [#allocation17], 0 }
  0x3e   :  { %80 = vsyncpa [#allocation20], 0 }
  0x3f   :  { %81 = vsyncpa [#allocation23], 0 }
  0x40   :  { %82 = vsyncpa [#allocation26], 0 }
  0x41   :  { %83 = vsyncpa [#allocation29], 0  ;;  %s13631_s15 = smov [#allocation4]   ;;  %s13632_s18 = smov [#allocation7]  }
  0x42   :  { %s122_s16 = sshll.u32 %s13631_s15, 4  ;;  %s142_s22 = sshll.u32 %s13632_s18, 4  ;;  %s123_s16 = int_to_ptr.vmem [resolvable:$true] %s122_s16  ;;  %s143_s22 = int_to_ptr.vmem [resolvable:$true] %s142_s22 }
  0x43   :  { %s13205_s23 = scalar_lea.vmem %s123_s16, 32  ;;  %p13210_p1 = scmp.lt.s32.totalorder %s123_s16, %s123_s16 }
  0x44   :  { %p13206_p0 = scmp.ne.s32.totalorder %s123_s16, %s13205_s23  ;;  %p13211_p2 = scmp.lt.s32.totalorder %s13205_s23, %s13205_s23 }
  0x46   :  { %p13212_p3 = por %p13211_p2, %p13210_p1 }
  0x48   :  { %p13213_p4 = pnand %p13212_p3, %p13206_p0 }
  0x4a   :  { %13216 = shalt.err (!%p13213_p4)
}
  0x4b   :  { %125 = dma.hbm_to_vmem [thread:$0]  %s13725_s24, 32, %s123_s16, [#allocation5]  }
  0x4c   :  { %s13225_s0 = scalar_lea.vmem %s143_s22, 32  ;;  %p13230_p6 = scmp.lt.s32.totalorder %s143_s22, %s143_s22 }
  0x4d   :  { %p13226_p5 = scmp.ne.s32.totalorder %s143_s22, %s13225_s0  ;;  %p13231_p7 = scmp.lt.s32.totalorder %s13225_s0, %s13225_s0 }
  0x4f   :  { %p13232_p8 = por %p13231_p7, %p13230_p6 }
  0x51   :  { %p13233_p9 = pnand %p13232_p8, %p13226_p5 }
  0x53   :  { %13236 = shalt.err (!%p13233_p9)
}
  0x54   :  { %145 = dma.hbm_to_vmem [thread:$0]  %s13735_s6, 32, %s143_s22, [#allocation8]  }
  0x55   :  { %s13633_s26 = smov [#allocation10]  }
  0x56   :  { %s162_s28 = sshll.u32 %s13633_s26, 4  ;;  %s163_s28 = int_to_ptr.vmem [resolvable:$true] %s162_s28 }
  0x57   :  { %s13245_s1 = scalar_lea.vmem %s163_s28, 32  ;;  %p13250_p11 = scmp.lt.s32.totalorder %s163_s28, %s163_s28 }
  0x58   :  { %p13246_p10 = scmp.ne.s32.totalorder %s163_s28, %s13245_s1  ;;  %p13251_p12 = scmp.lt.s32.totalorder %s13245_s1, %s13245_s1 }
  0x5a   :  { %p13252_p13 = por %p13251_p12, %p13250_p11 }
  0x5c   :  { %p13253_p0 = pnand %p13252_p13, %p13246_p10 }
  0x5e   :  { %13256 = shalt.err (!%p13253_p0)
}
  0x5f   :  { %165 = dma.hbm_to_vmem [thread:$0]  %s13745_s20, 32, %s163_s28, [#allocation11]  }
  0x60   :  { %s13634_s24 = smov [#allocation13]   ;;  %s13635_s7 = smov [#allocation16]  }
  0x61   :  { %s183_s2 = sshll.u32 %s13634_s24, 4  ;;  %s207_s10 = sshll.u32 %s13635_s7, 4  ;;  %s184_s2 = int_to_ptr.vmem [resolvable:$true] %s183_s2  ;;  %s208_s10 = int_to_ptr.vmem [resolvable:$true] %s207_s10 }
  0x62   :  { %s13265_s11 = scalar_lea.vmem %s184_s2, 512  ;;  %p13270_p2 = scmp.lt.s32.totalorder %s184_s2, %s184_s2 }
  0x63   :  { %p13266_p1 = scmp.ne.s32.totalorder %s184_s2, %s13265_s11  ;;  %p13271_p3 = scmp.lt.s32.totalorder %s13265_s11, %s13265_s11 }
  0x65   :  { %p13272_p4 = por %p13271_p3, %p13270_p2 }
  0x67   :  { %p13273_p5 = pnand %p13272_p4, %p13266_p1 }
  0x69   :  { %13276 = shalt.err (!%p13273_p5)
}
  0x6a   :  { %s13636_s6 = smov 64   ;;  %s13637_s15 = smov 4  }
  0x6b   :  { %189 = dma.hbm_to_vmem [thread:$0]  %s13755_s4, 512, %s184_s2, [#allocation14], %s13636_s6, %s13636_s6, %s13637_s15  }
  0x6c   :  { %s13285_s20 = scalar_lea.vmem %s208_s10, 8192  ;;  %p13290_p7 = scmp.lt.s32.totalorder %s208_s10, %s208_s10 }
  0x6d   :  { %p13286_p6 = scmp.ne.s32.totalorder %s208_s10, %s13285_s20  ;;  %p13291_p8 = scmp.lt.s32.totalorder %s13285_s20, %s13285_s20 }
  0x6f   :  { %p13292_p9 = por %p13291_p8, %p13290_p7 }
  0x71   :  { %p13293_p10 = pnand %p13292_p9, %p13286_p6 }
  0x73   :  { %13296 = shalt.err (!%p13293_p10)
}
  0x74   :  { %s13638_s16 = smov 256   ;;  %s13639_s18 = smov 16  }
  0x75   :  { %213 = dma.hbm_to_vmem [thread:$0]  %s13765_s8, 8192, %s208_s10, [#allocation17], %s13638_s16, %s13638_s16, %s13639_s18  }
  0x76   :  { %s13640_s22 = smov [#allocation19]   ;;  %s13641_s0 = smov [#allocation22]  }
  0x77   :  { %s232_s23 = sshll.u32 %s13640_s22, 4  ;;  %s252_s4 = sshll.u32 %s13641_s0, 4  ;;  %s233_s23 = int_to_ptr.vmem [resolvable:$true] %s232_s23  ;;  %s253_s4 = int_to_ptr.vmem [resolvable:$true] %s252_s4 }
  0x78   :  { %s13305_s26 = scalar_lea.vmem %s233_s23, 32  ;;  %p13310_p12 = scmp.lt.s32.totalorder %s233_s23, %s233_s23 }
  0x79   :  { %p13306_p11 = scmp.ne.s32.totalorder %s233_s23, %s13305_s26  ;;  %p13311_p13 = scmp.lt.s32.totalorder %s13305_s26, %s13305_s26 }
  0x7b   :  { %p13312_p0 = por %p13311_p13, %p13310_p12 }
  0x7d   :  { %p13313_p1 = pnand %p13312_p0, %p13306_p11 }
  0x7f   :  { %13316 = shalt.err (!%p13313_p1)
}
  0x80   :  { %235 = dma.hbm_to_vmem [thread:$0]  %s13775_s25, 32, %s233_s23, [#allocation20]  }
  0x81   :  { %s13325_s28 = scalar_lea.vmem %s253_s4, 32  ;;  %p13330_p3 = scmp.lt.s32.totalorder %s253_s4, %s253_s4 }
  0x82   :  { %p13326_p2 = scmp.ne.s32.totalorder %s253_s4, %s13325_s28  ;;  %p13331_p4 = scmp.lt.s32.totalorder %s13325_s28, %s13325_s28 }
  0x84   :  { %p13332_p5 = por %p13331_p4, %p13330_p3 }
  0x86   :  { %p13333_p6 = pnand %p13332_p5, %p13326_p2 }
  0x88   :  { %13336 = shalt.err (!%p13333_p6)
}
  0x89   :  { %255 = dma.hbm_to_vmem [thread:$0]  %s13785_s19, 32, %s253_s4, [#allocation23]  }
  0x8a   :  { %s13642_s8 = smov [#allocation25]   ;;  %s13643_s24 = smov [#allocation28]  }
  0x8b   :  { %s277_s1 = sshll.u32 %s13642_s8, 4  ;;  %s305_s2 = sshll.u32 %s13643_s24, 4  ;;  %s278_s1 = int_to_ptr.vmem [resolvable:$true] %s277_s1  ;;  %s306_s2 = int_to_ptr.vmem [resolvable:$true] %s305_s2 }
  0x8c   :  { %s13345_s7 = scalar_lea.vmem %s278_s1, 512  ;;  %p13350_p8 = scmp.lt.s32.totalorder %s278_s1, %s278_s1 }
  0x8d   :  { %p13346_p7 = scmp.ne.s32.totalorder %s278_s1, %s13345_s7  ;;  %p13351_p9 = scmp.lt.s32.totalorder %s13345_s7, %s13345_s7 }
  0x8f   :  { %p13352_p10 = por %p13351_p9, %p13350_p8 }
  0x91   :  { %p13353_p11 = pnand %p13352_p10, %p13346_p7 }
  0x93   :  { %13356 = shalt.err (!%p13353_p11)
}
  0x94   :  { %s13644_s25 = smov 128   ;;  %s13645_s10 = smov 8  }
  0x95   :  { %283 = dma.hbm_to_vmem [thread:$0]  %s13805_s13, 512, %s278_s1, [#allocation26], %s13644_s25, %s13644_s25, %s13645_s10  }
  0x96   :  { %s13365_s19 = scalar_lea.vmem %s306_s2, 512  ;;  %p13370_p13 = scmp.lt.s32.totalorder %s306_s2, %s306_s2 }
  0x97   :  { %p13366_p12 = scmp.ne.s32.totalorder %s306_s2, %s13365_s19  ;;  %p13371_p0 = scmp.lt.s32.totalorder %s13365_s19, %s13365_s19 }
  0x99   :  { %p13372_p1 = por %p13371_p0, %p13370_p13 }
  0x9b   :  { %p13373_p2 = pnand %p13372_p1, %p13366_p12 }
  0x9d   :  { %13376 = shalt.err (!%p13373_p2)
}
  0x9e   :  { %311 = dma.hbm_to_vmem [thread:$0]  %s13825_s29, 512, %s306_s2, [#allocation29], %s13638_s16, %s13638_s16, %s13639_s18  }
  0x9f   :  { %s13646_s11 = smov [#allocation2]   ;;  %s13647_s22 = smov [#allocation6]  }
  0xa0   :  { %s103_s20 = sshll.u32 %s13646_s11, 4  ;;  %s132_s23 = sshll.u32 %s13647_s22, 4  ;;  %s104_s20 = int_to_ptr.vmem [resolvable:$true] %s103_s20  ;;  %s133_s23 = int_to_ptr.vmem [resolvable:$true] %s132_s23 }
  0xa1   :  { %s13385_s0 = scalar_lea.vmem %s104_s20, 8192  ;;  %p13390_p4 = scmp.lt.s32.totalorder %s104_s20, %s104_s20 }
  0xa2   :  { %p13386_p3 = scmp.ne.s32.totalorder %s104_s20, %s13385_s0  ;;  %p13391_p5 = scmp.lt.s32.totalorder %s13385_s0, %s13385_s0 }
  0xa4   :  { %p13392_p6 = por %p13391_p5, %p13390_p4 }
  0xa6   :  { %p13393_p7 = pnand %p13392_p6, %p13386_p3 }
  0xa8   :  { %13396 = shalt.err (!%p13393_p7)
}
  0xa9   :  { %109 = dma.hbm_to_vmem [thread:$0]  %s13705_s3, 8192, %s104_s20, [#allocation3], %s13644_s25, %s13644_s25, %s13645_s10  }
  0xaa   :  { %s13405_s13 = scalar_lea.vmem %s133_s23, 32  ;;  %p13410_p9 = scmp.lt.s32.totalorder %s133_s23, %s133_s23 }
  0xab   :  { %p13406_p8 = scmp.ne.s32.totalorder %s133_s23, %s13405_s13  ;;  %p13411_p10 = scmp.lt.s32.totalorder %s13405_s13, %s13405_s13 }
  0xad   :  { %p13412_p11 = por %p13411_p10, %p13410_p9 }
  0xaf   :  { %p13413_p12 = pnand %p13412_p11, %p13406_p8 }
  0xb1   :  { %13416 = shalt.err (!%p13413_p12)
}
  0xb2   :  { %135 = dma.hbm_to_vmem [thread:$0]  %s13730_s30, 32, %s133_s23, [#allocation5]  }
  0xb3   :  { %s13648_s29 = smov [#allocation9]   ;;  %s13649_s26 = smov [#allocation12]  }
  0xb4   :  { %s152_s4 = sshll.u32 %s13648_s29, 4  ;;  %s171_s28 = sshll.u32 %s13649_s26, 4  ;;  %s153_s4 = int_to_ptr.vmem [resolvable:$true] %s152_s4  ;;  %s172_s28 = int_to_ptr.vmem [resolvable:$true] %s171_s28 }
  0xb5   :  { %s13425_s8 = scalar_lea.vmem %s153_s4, 32  ;;  %p13430_p0 = scmp.lt.s32.totalorder %s153_s4, %s153_s4 }
  0xb6   :  { %p13426_p13 = scmp.ne.s32.totalorder %s153_s4, %s13425_s8  ;;  %p13431_p1 = scmp.lt.s32.totalorder %s13425_s8, %s13425_s8 }
  0xb8   :  { %p13432_p2 = por %p13431_p1, %p13430_p0 }
  0xba   :  { %p13433_p3 = pnand %p13432_p2, %p13426_p13 }
  0xbc   :  { %13436 = shalt.err (!%p13433_p3)
}
  0xbd   :  { %155 = dma.hbm_to_vmem [thread:$0]  %s13740_s12, 32, %s153_s4, [#allocation8]  }
  0xbe   :  { %s13445_s3 = scalar_lea.vmem %s172_s28, 512  ;;  %p13450_p5 = scmp.lt.s32.totalorder %s172_s28, %s172_s28 }
  0xbf   :  { %p13446_p4 = scmp.ne.s32.totalorder %s172_s28, %s13445_s3  ;;  %p13451_p6 = scmp.lt.s32.totalorder %s13445_s3, %s13445_s3 }
  0xc1   :  { %p13452_p7 = por %p13451_p6, %p13450_p5 }
  0xc3   :  { %p13453_p8 = pnand %p13452_p7, %p13446_p4 }
  0xc5   :  { %13456 = shalt.err (!%p13453_p8)
}
  0xc6   :  { %177 = dma.hbm_to_vmem [thread:$0]  %s13750_s27, 512, %s172_s28, [#allocation11], %s13636_s6, %s13636_s6, %s13637_s15  }
  0xc7   :  { %s13650_s30 = smov [#allocation15]   ;;  %s13651_s24 = smov [#allocation18]  }
  0xc8   :  { %s195_s1 = sshll.u32 %s13650_s30, 4  ;;  %s219_s2 = sshll.u32 %s13651_s24, 4  ;;  %s196_s1 = int_to_ptr.vmem [resolvable:$true] %s195_s1  ;;  %s220_s2 = int_to_ptr.vmem [resolvable:$true] %s219_s2 }
  0xc9   :  { %s13465_s7 = scalar_lea.vmem %s196_s1, 2048  ;;  %p13470_p10 = scmp.lt.s32.totalorder %s196_s1, %s196_s1 }
  0xca   :  { %p13466_p9 = scmp.ne.s32.totalorder %s196_s1, %s13465_s7  ;;  %p13471_p11 = scmp.lt.s32.totalorder %s13465_s7, %s13465_s7 }
  0xcc   :  { %p13472_p12 = por %p13471_p11, %p13470_p10 }
  0xce   :  { %p13473_p13 = pnand %p13472_p12, %p13466_p9 }
  0xd0   :  { %13476 = shalt.err (!%p13473_p13)
}
  0xd1   :  { %201 = dma.hbm_to_vmem [thread:$0]  %s13760_s14, 2048, %s196_s1, [#allocation14], %s13644_s25, %s13644_s25, %s13645_s10  }
  0xd2   :  { %s13485_s12 = scalar_lea.vmem %s220_s2, 24576  ;;  %p13490_p1 = scmp.lt.s32.totalorder %s220_s2, %s220_s2 }
  0xd3   :  { %p13486_p0 = scmp.ne.s32.totalorder %s220_s2, %s13485_s12  ;;  %p13491_p2 = scmp.lt.s32.totalorder %s13485_s12, %s13485_s12 }
  0xd5   :  { %p13492_p3 = por %p13491_p2, %p13490_p1 }
  0xd7   :  { %p13493_p4 = pnand %p13492_p3, %p13486_p0 }
  0xd9   :  { %13496 = shalt.err (!%p13493_p4)
}
  0xda   :  { %s13652_s27 = smov 384   ;;  %s13653_s6 = smov 24  }
  0xdb   :  { %225 = dma.hbm_to_vmem [thread:$0]  %s13770_s9, 24576, %s220_s2, [#allocation17], %s13652_s27, %s13652_s27, %s13653_s6  }
  0xdc   :  { %s13654_s15 = smov [#allocation21]   ;;  %s13655_s11 = smov [#allocation24]  }
  0xdd   :  { %s242_s19 = sshll.u32 %s13654_s15, 4  ;;  %s263_s20 = sshll.u32 %s13655_s11, 4  ;;  %s243_s19 = int_to_ptr.vmem [resolvable:$true] %s242_s19  ;;  %s264_s20 = int_to_ptr.vmem [resolvable:$true] %s263_s20 }
  0xde   :  { %s13505_s22 = scalar_lea.vmem %s243_s19, 32  ;;  %p13510_p6 = scmp.lt.s32.totalorder %s243_s19, %s243_s19 }
  0xdf   :  { %p13506_p5 = scmp.ne.s32.totalorder %s243_s19, %s13505_s22  ;;  %p13511_p7 = scmp.lt.s32.totalorder %s13505_s22, %s13505_s22 }
  0xe1   :  { %p13512_p8 = por %p13511_p7, %p13510_p6 }
  0xe3   :  { %p13513_p9 = pnand %p13512_p8, %p13506_p5 }
  0xe5   :  { %13516 = shalt.err (!%p13513_p9)
}
  0xe6   :  { %s15606_s14 = sld [smem:[#allocation51_spill]]  ;;  %s13525_s23 = scalar_lea.vmem %s264_s20, 512 }
  0xe7   :  { %p13526_p10 = scmp.ne.s32.totalorder %s264_s20, %s13525_s23  ;;  %p13530_p11 = scmp.lt.s32.totalorder %s264_s20, %s264_s20 }
  0xe8   :  { %p13531_p12 = scmp.lt.s32.totalorder %s13525_s23, %s13525_s23 }
  0xea   :  { %p13532_p13 = por %p13531_p12, %p13530_p11 }
  0xec   :  { %245 = dma.hbm_to_vmem [thread:$0]  %s15606_s14, 32, %s243_s19, [#allocation20]  }
  0xed   :  { %p13533_p0 = pnand %p13532_p13, %p13526_p10 }
  0xef   :  { %13536 = shalt.err (!%p13533_p0)
}
  0xf0   :  { %s15607_s9 = sld [smem:[#allocation53_spill]]  ;;  %s13656_s0 = smov [#allocation27]  }
  0xf1   :  { %s291_s13 = sshll.u32 %s13656_s0, 4  ;;  %s13657_s29 = smov [#allocation30]   ;;  %s292_s13 = int_to_ptr.vmem [resolvable:$true] %s291_s13 }
  0xf2   :  { %s320_s4 = sshll.u32 %s13657_s29, 4  ;;  %s13545_s26 = scalar_lea.vmem %s292_s13, 512  ;;  %s321_s4 = int_to_ptr.vmem [resolvable:$true] %s320_s4 }
  0xf3   :  { %p13546_p1 = scmp.ne.s32.totalorder %s292_s13, %s13545_s26  ;;  %p13550_p2 = scmp.lt.s32.totalorder %s292_s13, %s292_s13 }
  0xf4   :  { %p13551_p3 = scmp.lt.s32.totalorder %s13545_s26, %s13545_s26 }
  0xf6   :  { %269 = dma.hbm_to_vmem [thread:$0]  %s15607_s9, 512, %s264_s20, [#allocation23], %s13638_s16, %s13638_s16, %s13639_s18  }
  0xf7   :  { %p13552_p4 = por %p13551_p3, %p13550_p2 }
  0xf9   :  { %p13553_p5 = pnand %p13552_p4, %p13546_p1 }
  0xfb   :  { %13556 = shalt.err (!%p13553_p5)
}
  0xfc   :  { %s15608_s28 = sld [smem:[#allocation56_spill]]  ;;  %s13565_s8 = scalar_lea.vmem %s321_s4, 512 }
  0xfd   :  { %p13566_p6 = scmp.ne.s32.totalorder %s321_s4, %s13565_s8  ;;  %p13570_p7 = scmp.lt.s32.totalorder %s321_s4, %s321_s4 }
  0xfe   :  { %p13571_p8 = scmp.lt.s32.totalorder %s13565_s8, %s13565_s8 }
 0x100   :  { %p13572_p9 = por %p13571_p8, %p13570_p7 }
 0x102   :  { %297 = dma.hbm_to_vmem [thread:$0]  %s15608_s28, 512, %s292_s13, [#allocation26], %s13644_s25, %s13644_s25, %s13645_s10  }
 0x103   :  { %p13573_p10 = pnand %p13572_p9, %p13566_p6 }
 0x105   :  { %13576 = shalt.err (!%p13573_p10)
}
 0x106   :  { %323 = dma.hbm_to_vmem [thread:$0]  %s13835_s17, 512, %s321_s4, [#allocation29]  }
 0x107   :  { %13577 = dma.done.wait [#allocation3], 8192  }
 0x108   :  { %13578 = vsyncadd [#allocation3], 4294959104 }
 0x109   :  { %13579 = dma.done.wait [#allocation5], 64  }
 0x10a   :  { %13580 = vsyncadd [#allocation5], 4294967232 }
 0x10b   :  { %13581 = dma.done.wait [#allocation8], 64  }
 0x10c   :  { %13582 = vsyncadd [#allocation8], 4294967232 }
 0x10d   :  { %13583 = dma.done.wait [#allocation11], 544  }
 0x10e   :  { %13584 = vsyncadd [#allocation11], 4294966752 }
 0x10f   :  { %13585 = dma.done.wait [#allocation14], 2560  }
 0x110   :  { %13586 = vsyncadd [#allocation14], 4294964736 }
 0x111   :  { %13587 = dma.done.wait [#allocation17], 32768  }
 0x112   :  { %13588 = vsyncadd [#allocation17], 4294934528 }
 0x113   :  { %13589 = dma.done.wait [#allocation20], 64  }
 0x114   :  { %13590 = vsyncadd [#allocation20], 4294967232 }
 0x115   :  { %13591 = dma.done.wait [#allocation23], 544  }
 0x116   :  { %13592 = vsyncadd [#allocation23], 4294966752 }
 0x117   :  { %13593 = dma.done.wait [#allocation26], 1024  }
 0x118   :  { %13594 = vsyncadd [#allocation26], 4294966272 }
 0x119   :  { %13595 = dma.done.wait [#allocation29], 1024  }
 0x11a   :  { %13596 = vsyncadd [#allocation29], 4294966272  ;;  %s15609_s17 = sld [smem:[#allocation43_spill]]  ;;  %v13658_v36 = vmov 1983009808   ;;  %v390_v38 = vlaneseq  ;;  %vm2305_vm4 = vcmask 1041408  }
 0x11b   :  { %v388_v37 = vunpack.c.l.s4 %v13658_v36  ;;  %s15610_s16 = sld [smem:[#allocation41_spill]]  ;;  %vm2522_vm5 = vcmask 130048   ;;  %vm13660_vm8 = vmmov 0   ;;  %vm3054_vm9 = vcmask 261120  }
 0x11c   :  { %v13927_v43 = vshrl.u32 %v390_v38, 7  ;;  %s15612_s18 = sld [smem:[#allocation44_spill]] }
 0x11d   :  { %v389_v42 = vunpack.c.0.s8 %v388_v37  ;;  %s15613_s25 = sld [smem:[#allocation52_spill]] }
 0x11e   :  { %s15614_s10 = sld [smem:[#allocation45_spill]] }
 0x11f   :  { %v13935_v49 = vsub.s32 %v389_v42, %v13927_v43  ;;  %s15615_s3 = sld [smem:[#allocation50_spill]] }
 0x120   :  { %v11862_v0 = vld [vmem:[%s15609_s17 + $0xe4] ss:$16 sps:$4 sm:$0xff]   ;;  %v11866_v2 = vld [vmem:[%s15609_s17 + $0xe0] ss:$16 sps:$4 sm:$0xff]   ;;  %v11994_v37 = vld [vmem:[%s15609_s17 + $0x4c] ss:$16 sps:$4 sm:$0xff]  }
 0x121   :  { %v11864_v1 = vld [vmem:[%s15609_s17 + $0x2e4] ss:$16 sps:$4 sm:$0xff]   ;;  %1575 = vmatprep.subr.bf16.mxu0 %v11862_v0  ;;  %v11867_v3 = vld [vmem:[%s15609_s17 + $0x2e0] ss:$16 sps:$4 sm:$0xff]   ;;  %15611 = vst [vmem:[#allocation58_spill] sm:$0xff] %v13935_v49  ;;  %s15616_s30 = sld [smem:[#allocation54_spill]] }
 0x122   :  { %1616 = vmatprep.subr.bf16.mxu1 %v11864_v1  ;;  %v11868_v4 = vld [vmem:[%s15609_s17 + $0xc4] ss:$16 sps:$4 sm:$0xff]   ;;  %1576 = vmatpush1.bf16.msra.mxu0 %v11866_v2  ;;  %v11872_v6 = vld [vmem:[%s15609_s17 + $0xc0] ss:$16 sps:$4 sm:$0xff]   ;;  %s15618_s1 = sld [smem:[#allocation47_spill]] }
 0x123   :  { %1617 = vmatpush1.bf16.msra.mxu1 %v11867_v3  ;;  %v11870_v5 = vld [vmem:[%s15609_s17 + $0x2c4] ss:$16 sps:$4 sm:$0xff]   ;;  %1577 = vmatprep.subr.bf16.mxu0 %v11868_v4  ;;  %v11873_v7 = vld [vmem:[%s15609_s17 + $0x2c0] ss:$16 sps:$4 sm:$0xff]   ;;  %s15619_s24 = sld [smem:[#allocation46_spill]] }
 0x124   :  { %1618 = vmatprep.subr.bf16.mxu1 %v11870_v5  ;;  %v11874_v8 = vld [vmem:[%s15609_s17 + $0xa4] ss:$16 sps:$4 sm:$0xff]   ;;  %v11878_v10 = vld [vmem:[%s15609_s17 + $0xa0] ss:$16 sps:$4 sm:$0xff]   ;;  %s15620_s2 = sld [smem:[#allocation42_spill]] }
 0x125   :  { %v11876_v9 = vld [vmem:[%s15609_s17 + $0x2a4] ss:$16 sps:$4 sm:$0xff]   ;;  %v11879_v11 = vld [vmem:[%s15609_s17 + $0x2a0] ss:$16 sps:$4 sm:$0xff]   ;;  %s15621_s7 = sld [smem:[#allocation48_spill]] }
 0x126   :  { %1578 = vmatpush1.bf16.msra.mxu0 %v11872_v6  ;;  %v11880_v12 = vld [vmem:[%s15609_s17 + $0x84] ss:$16 sps:$4 sm:$0xff]   ;;  %v11884_v14 = vld [vmem:[%s15609_s17 + $0x80] ss:$16 sps:$4 sm:$0xff]   ;;  %s15622_s12 = sld [smem:[#allocation49_spill]] }
 0x127   :  { %1619 = vmatpush1.bf16.msra.mxu1 %v11873_v7  ;;  %1579 = vmatprep.subr.bf16.mxu0 %v11874_v8  ;;  %v11882_v13 = vld [vmem:[%s15609_s17 + $0x284] ss:$16 sps:$4 sm:$0xff]   ;;  %v11885_v15 = vld [vmem:[%s15609_s17 + $0x280] ss:$16 sps:$4 sm:$0xff]   ;;  %s15623_s27 = sld [smem:[#allocation55_spill]] }
 0x128   :  { %1620 = vmatprep.subr.bf16.mxu1 %v11876_v9  ;;  %v11886_v16 = vld [vmem:[%s15609_s17 + $0x64] ss:$16 sps:$4 sm:$0xff]   ;;  %v11890_v18 = vld [vmem:[%s15609_s17 + $0x60] ss:$16 sps:$4 sm:$0xff]   ;;  %s15624_s6 = sld [smem:[#allocation57_spill]] }
 0x129   :  { %v11888_v17 = vld [vmem:[%s15609_s17 + $0x264] ss:$16 sps:$4 sm:$0xff]   ;;  %v11891_v19 = vld [vmem:[%s15609_s17 + $0x260] ss:$16 sps:$4 sm:$0xff]  }
 0x12a   :  { %1580 = vmatpush1.bf16.msra.mxu0 %v11878_v10  ;;  %v11892_v20 = vld [vmem:[%s15609_s17 + $0x44] ss:$16 sps:$4 sm:$0xff]   ;;  %v11896_v22 = vld [vmem:[%s15609_s17 + $0x40] ss:$16 sps:$4 sm:$0xff]  }
 0x12b   :  { %1621 = vmatpush1.bf16.msra.mxu1 %v11879_v11  ;;  %1581 = vmatprep.subr.bf16.mxu0 %v11880_v12  ;;  %v11894_v21 = vld [vmem:[%s15609_s17 + $0x244] ss:$16 sps:$4 sm:$0xff]   ;;  %v11897_v23 = vld [vmem:[%s15609_s17 + $0x240] ss:$16 sps:$4 sm:$0xff]  }
 0x12c   :  { %1622 = vmatprep.subr.bf16.mxu1 %v11882_v13  ;;  %v11898_v24 = vld [vmem:[%s15609_s17 + $0x24] ss:$16 sps:$4 sm:$0xff]   ;;  %v11902_v26 = vld [vmem:[%s15609_s17 + $0x20] ss:$16 sps:$4 sm:$0xff]  }
 0x12d   :  { %v11900_v25 = vld [vmem:[%s15609_s17 + $0x224] ss:$16 sps:$4 sm:$0xff]   ;;  %v11903_v27 = vld [vmem:[%s15609_s17 + $0x220] ss:$16 sps:$4 sm:$0xff]  }
 0x12e   :  { %1582 = vmatpush1.bf16.msra.mxu0 %v11884_v14  ;;  %v11904_v28 = vld [vmem:[%s15609_s17 + $0x4] ss:$16 sps:$4 sm:$0xff]   ;;  %v11908_v30 = vld [vmem:[%s15609_s17] ss:$16 sps:$4 sm:$0xff]  }
 0x12f   :  { %1623 = vmatpush1.bf16.msra.mxu1 %v11885_v15  ;;  %1583 = vmatprep.subr.bf16.mxu0 %v11886_v16  ;;  %v11906_v29 = vld [vmem:[%s15609_s17 + $0x204] ss:$16 sps:$4 sm:$0xff]   ;;  %v11909_v31 = vld [vmem:[%s15609_s17 + $0x200] ss:$16 sps:$4 sm:$0xff]   ;;  %v11964_v15 = vld [vmem:[%s15609_s17 + $0xec] ss:$16 sps:$4 sm:$0xff]  }
 0x130   :  { %1624 = vmatprep.subr.bf16.mxu1 %v11888_v17  ;;  %v11910_v32 = vld [vmem:[%s15609_s17 + $0x1e4] ss:$16 sps:$4 sm:$0xff]   ;;  %v11914_v34 = vld [vmem:[%s15609_s17 + $0x1e0] ss:$16 sps:$4 sm:$0xff]  }
 0x131   :  { %v11912_v33 = vld [vmem:[%s15609_s17 + $0x3e4] ss:$16 sps:$4 sm:$0xff]   ;;  %v11915_v35 = vld [vmem:[%s15609_s17 + $0x3e0] ss:$16 sps:$4 sm:$0xff]  }
 0x132   :  { %1584 = vmatpush1.bf16.msra.mxu0 %v11890_v18  ;;  %v11916_v39 = vld [vmem:[%s15609_s17 + $0x1c4] ss:$16 sps:$4 sm:$0xff]   ;;  %v11920_v41 = vld [vmem:[%s15609_s17 + $0x1c0] ss:$16 sps:$4 sm:$0xff]  }
 0x133   :  { %1625 = vmatpush1.bf16.msra.mxu1 %v11891_v19  ;;  %1585 = vmatprep.subr.bf16.mxu0 %v11892_v20  ;;  %v11918_v40 = vld [vmem:[%s15609_s17 + $0x3c4] ss:$16 sps:$4 sm:$0xff]   ;;  %v11921_v44 = vld [vmem:[%s15609_s17 + $0x3c0] ss:$16 sps:$4 sm:$0xff]   ;;  %v11962_v19 = vld [vmem:[%s15609_s17 + $0xe8] ss:$16 sps:$4 sm:$0xff]  }
 0x134   :  { %1626 = vmatprep.subr.bf16.mxu1 %v11894_v21  ;;  %v11922_v45 = vld [vmem:[%s15609_s17 + $0x1a4] ss:$16 sps:$4 sm:$0xff]   ;;  %v11926_v47 = vld [vmem:[%s15609_s17 + $0x1a0] ss:$16 sps:$4 sm:$0xff]   ;;  %v11970_v21 = vld [vmem:[%s15609_s17 + $0xcc] ss:$16 sps:$4 sm:$0xff]  }
 0x135   :  { %v11924_v46 = vld [vmem:[%s15609_s17 + $0x3a4] ss:$16 sps:$4 sm:$0xff]   ;;  %v11927_v48 = vld [vmem:[%s15609_s17 + $0x3a0] ss:$16 sps:$4 sm:$0xff]  }
 0x136   :  { %1586 = vmatpush1.bf16.msra.mxu0 %v11896_v22  ;;  %v11928_v50 = vld [vmem:[%s15609_s17 + $0x184] ss:$16 sps:$4 sm:$0xff]   ;;  %v11932_v53 = vld [vmem:[%s15609_s17 + $0x180] ss:$16 sps:$4 sm:$0xff]  }
 0x137   :  { %1627 = vmatpush1.bf16.msra.mxu1 %v11897_v23  ;;  %1587 = vmatprep.subr.bf16.mxu0 %v11898_v24  ;;  %v11930_v51 = vld [vmem:[%s15609_s17 + $0x384] ss:$16 sps:$4 sm:$0xff]   ;;  %v11933_v56 = vld [vmem:[%s15609_s17 + $0x380] ss:$16 sps:$4 sm:$0xff]   ;;  %v11968_v23 = vld [vmem:[%s15609_s17 + $0xc8] ss:$16 sps:$4 sm:$0xff]  }
 0x138   :  { %1628 = vmatprep.subr.bf16.mxu1 %v11900_v25  ;;  %v382_v52 = vld [vmem:[%s15610_s16] sm:$0xff]  ;;  %v11976_v25 = vld [vmem:[%s15609_s17 + $0xac] ss:$16 sps:$4 sm:$0xff]  }
 0x139   :  { %v393_v54 = vrot.slane %v382_v52, %v13935_v49  ;;  %v386_v55 = vcombine.high %v382_v52, %v382_v52  ;;  %v11934_v57 = vld [vmem:[%s15609_s17 + $0x164] ss:$16 sps:$4 sm:$0xff]   ;;  %v11938_v61 = vld [vmem:[%s15609_s17 + $0x160] ss:$16 sps:$4 sm:$0xff]   ;;  %v12004_v52 = vld [vmem:[%s15609_s17 + $0x8] ss:$16 sps:$4 sm:$0xff]  }
 0x13a   :  { %1588 = vmatpush1.bf16.msra.mxu0 %v11902_v26  ;;  %v11936_v58 = vld [vmem:[%s15609_s17 + $0x364] ss:$16 sps:$4 sm:$0xff]   ;;  %v11939_v0 = vld [vmem:[%s15609_s17 + $0x360] ss:$16 sps:$4 sm:$0xff]  }
 0x13b   :  { %1629 = vmatpush1.bf16.msra.mxu1 %v11903_v27  ;;  %1589 = vmatprep.subr.bf16.mxu0 %v11904_v28  ;;  %v401_v59 = vcombine.high %v393_v54, %v393_v54  ;;  %v400_v60 = vrot.slane %v386_v55, %v13935_v49  ;;  %v11940_v1 = vld [vmem:[%s15609_s17 + $0x144] ss:$16 sps:$4 sm:$0xff]   ;;  %v11944_v4 = vld [vmem:[%s15609_s17 + $0x140] ss:$16 sps:$4 sm:$0xff]   ;;  %v13965_v16 = vpack.c.bf16 %v393_v54, %v393_v54  ;;  %v11974_v27 = vld [vmem:[%s15609_s17 + $0xa8] ss:$16 sps:$4 sm:$0xff]  }
 0x13c   :  { %1630 = vmatprep.subr.bf16.mxu1 %v11906_v29  ;;  %v11942_v2 = vld [vmem:[%s15609_s17 + $0x344] ss:$16 sps:$4 sm:$0xff]   ;;  %v11945_v5 = vld [vmem:[%s15609_s17 + $0x340] ss:$16 sps:$4 sm:$0xff]   ;;  %v11982_v29 = vld [vmem:[%s15609_s17 + $0x8c] ss:$16 sps:$4 sm:$0xff]  }
 0x13d   :  { %v418_v62 = vpack.c.bf16 %v401_v59, %v401_v59  ;;  %v402_v63 = vcombine.high %v400_v60, %v400_v60  ;;  %v11946_v6 = vld [vmem:[%s15609_s17 + $0x124] ss:$16 sps:$4 sm:$0xff]   ;;  %v11950_v8 = vld [vmem:[%s15609_s17 + $0x120] ss:$16 sps:$4 sm:$0xff]   ;;  %v13967_v17 = vpack.c.bf16 %v400_v60, %v400_v60  ;;  %v12012_v54 = vld [vmem:[%s15609_s17 + $0x1ec] ss:$16 sps:$4 sm:$0xff]  }
 0x13e   :  { %1590 = vmatpush1.bf16.msra.mxu0 %v11908_v30  ;;  %v11948_v7 = vld [vmem:[%s15609_s17 + $0x324] ss:$16 sps:$4 sm:$0xff]   ;;  %v11951_v9 = vld [vmem:[%s15609_s17 + $0x320] ss:$16 sps:$4 sm:$0xff]   ;;  %v12016_v60 = vld [vmem:[%s15609_s17 + $0x1c8] ss:$16 sps:$4 sm:$0xff]  }
 0x13f   :  { %1631 = vmatpush1.bf16.msra.mxu1 %v11909_v31  ;;  %1591 = vmatprep.subr.bf16.mxu0 %v11910_v32  ;;  %v13950_v3 = vpack.c.bf16 %v402_v63, %v402_v63  ;;  %v11952_v10 = vld [vmem:[%s15609_s17 + $0x104] ss:$16 sps:$4 sm:$0xff]   ;;  %v11956_v12 = vld [vmem:[%s15609_s17 + $0x100] ss:$16 sps:$4 sm:$0xff]   ;;  %v11980_v31 = vld [vmem:[%s15609_s17 + $0x88] ss:$16 sps:$4 sm:$0xff]  }
 0x140   :  { %1632 = vmatprep.subr.bf16.mxu1 %v11912_v33  ;;  %1607 = vmatprep.mubr.bf16.mxu0 %v418_v62  ;;  %v11954_v11 = vld [vmem:[%s15609_s17 + $0x304] ss:$16 sps:$4 sm:$0xff]   ;;  %v11957_v13 = vld [vmem:[%s15609_s17 + $0x300] ss:$16 sps:$4 sm:$0xff]   ;;  %v11988_v33 = vld [vmem:[%s15609_s17 + $0x6c] ss:$16 sps:$4 sm:$0xff]  }
 0x141   :  { %1648 = vmatprep.mubr.bf16.mxu1 %v13950_v3  ;;  %v11961_v14 = vld [vmem:[%s15609_s17 + $0x4e4] ss:$16 sps:$4 sm:$0xff]   ;;  %v11959_v18 = vld [vmem:[%s15609_s17 + $0x4e0] ss:$16 sps:$4 sm:$0xff]  }
 0x142   :  { %1592 = vmatpush2.bf16.msra.mxu0 %v11914_v34  ;;  %v11967_v20 = vld [vmem:[%s15609_s17 + $0x4c4] ss:$16 sps:$4 sm:$0xff]   ;;  %v11965_v22 = vld [vmem:[%s15609_s17 + $0x4c0] ss:$16 sps:$4 sm:$0xff]  }
 0x143   :  { %1633 = vmatpush2.bf16.msra.mxu1 %v11915_v35  ;;  %1593 = vmatprep.subr.bf16.mxu0 %v11916_v39  ;;  %v11973_v24 = vld [vmem:[%s15609_s17 + $0x4a4] ss:$16 sps:$4 sm:$0xff]   ;;  %v11971_v26 = vld [vmem:[%s15609_s17 + $0x4a0] ss:$16 sps:$4 sm:$0xff]   ;;  %v11986_v35 = vld [vmem:[%s15609_s17 + $0x68] ss:$16 sps:$4 sm:$0xff]  }
 0x144   :  { %1634 = vmatprep.subr.bf16.mxu1 %v11918_v40  ;;  %v11979_v28 = vld [vmem:[%s15609_s17 + $0x484] ss:$16 sps:$4 sm:$0xff]   ;;  %v11977_v30 = vld [vmem:[%s15609_s17 + $0x480] ss:$16 sps:$4 sm:$0xff]   ;;  %v11992_v39 = vld [vmem:[%s15609_s17 + $0x48] ss:$16 sps:$4 sm:$0xff]  }
 0x145   :  { %v11985_v32 = vld [vmem:[%s15609_s17 + $0x464] ss:$16 sps:$4 sm:$0xff]   ;;  %v11983_v34 = vld [vmem:[%s15609_s17 + $0x460] ss:$16 sps:$4 sm:$0xff]  }
 0x146   :  { %1594 = vmatpush2.bf16.msra.mxu0 %v11920_v41  ;;  %v11991_v36 = vld [vmem:[%s15609_s17 + $0x444] ss:$16 sps:$4 sm:$0xff]   ;;  %v11989_v38 = vld [vmem:[%s15609_s17 + $0x440] ss:$16 sps:$4 sm:$0xff]   ;;  %v12000_v41 = vld [vmem:[%s15609_s17 + $0x2c] ss:$16 sps:$4 sm:$0xff]  }
 0x147   :  { %1635 = vmatpush2.bf16.msra.mxu1 %v11921_v44  ;;  %1595 = vmatprep.subr.bf16.mxu0 %v11922_v45  ;;  %v11997_v40 = vld [vmem:[%s15609_s17 + $0x424] ss:$16 sps:$4 sm:$0xff]   ;;  %v13996_v42 = vld.sshfl [vmem:[%s15610_s16 + $0x8] sm:$0x33 pattern:$0x76325410] }
 0x148   :  { %1636 = vmatprep.subr.bf16.mxu1 %v11924_v46  ;;  %v11995_v44 = vld [vmem:[%s15609_s17 + $0x420] ss:$16 sps:$4 sm:$0xff]   ;;  %v11998_v45 = vld [vmem:[%s15609_s17 + $0x28] ss:$16 sps:$4 sm:$0xff]   ;;  %v410_v46 = vcombine.high %v13996_v42, %v13996_v42 }
 0x149   :  { %v12007_v55 = vld [vmem:[%s15609_s17 + $0x5e0] ss:$16 sps:$4 sm:$0xff]  }
 0x14a   :  { %1596 = vmatpush2.bf16.msra.mxu0 %v11926_v47  ;;  %v12003_v47 = vld [vmem:[%s15609_s17 + $0x404] ss:$16 sps:$4 sm:$0xff]   ;;  %v12013_v59 = vld [vmem:[%s15609_s17 + $0x5c0] ss:$16 sps:$4 sm:$0xff]  }
 0x14b   :  { %1637 = vmatpush2.bf16.msra.mxu1 %v11927_v48  ;;  %1597 = vmatprep.subr.bf16.mxu0 %v11928_v50  ;;  %v12006_v48 = vld [vmem:[%s15609_s17 + $0xc] ss:$16 sps:$4 sm:$0xff]   ;;  %v14004_v50 = vpack.c.bf16 %v410_v46, %v410_v46  ;;  %v12019_v63 = vld [vmem:[%s15609_s17 + $0x5a0] ss:$16 sps:$4 sm:$0xff]   ;;  %v12085_v46 = vld [vmem:[%s15609_s17 + $0x248] ss:$16 sps:$4 sm:$0xff]  }
 0x14c   :  { %1638 = vmatprep.subr.bf16.mxu1 %v11930_v51  ;;  %v12001_v51 = vld [vmem:[%s15609_s17 + $0x400] ss:$16 sps:$4 sm:$0xff]  }
 0x14e   :  { %1598 = vmatpush2.bf16.msra.mxu0 %v11932_v53  ;;  %v12009_v53 = vld [vmem:[%s15609_s17 + $0x5e4] ss:$16 sps:$4 sm:$0xff]  }
 0x14f   :  { %1639 = vmatpush2.bf16.msra.mxu1 %v11933_v56  ;;  %1599 = vmatprep.subr.bf16.mxu0 %v11934_v57  ;;  %v12010_v56 = vld [vmem:[%s15609_s17 + $0x1e8] ss:$16 sps:$4 sm:$0xff]   ;;  %v12015_v57 = vld [vmem:[%s15609_s17 + $0x5c4] ss:$16 sps:$4 sm:$0xff]  }
 0x150   :  { %1640 = vmatprep.subr.bf16.mxu1 %v11936_v58  ;;  %v12018_v58 = vld [vmem:[%s15609_s17 + $0x1cc] ss:$16 sps:$4 sm:$0xff]  }
 0x152   :  { %1600 = vmatpush2.bf16.msra.mxu0 %v11938_v61  ;;  %v12021_v61 = vld [vmem:[%s15609_s17 + $0x5a4] ss:$16 sps:$4 sm:$0xff]  }
 0x153   :  { %1641 = vmatpush2.bf16.msra.mxu1 %v11939_v0  ;;  %1601 = vmatprep.subr.bf16.mxu0 %v11940_v1  ;;  %v12022_v0 = vld [vmem:[%s15609_s17 + $0x1a8] ss:$16 sps:$4 sm:$0xff]   ;;  %v12027_v1 = vld [vmem:[%s15609_s17 + $0x584] ss:$16 sps:$4 sm:$0xff]  }
 0x154   :  { %1642 = vmatprep.subr.bf16.mxu1 %v11942_v2  ;;  %v12030_v2 = vld [vmem:[%s15609_s17 + $0x18c] ss:$16 sps:$4 sm:$0xff]  }
 0x156   :  { %1602 = vmatpush2.bf16.msra.mxu0 %v11944_v4  ;;  %v12025_v4 = vld [vmem:[%s15609_s17 + $0x580] ss:$16 sps:$4 sm:$0xff]  }
 0x157   :  { %1643 = vmatpush2.bf16.msra.mxu1 %v11945_v5  ;;  %1603 = vmatprep.subr.bf16.mxu0 %v11946_v6  ;;  %v12028_v5 = vld [vmem:[%s15609_s17 + $0x188] ss:$16 sps:$4 sm:$0xff]   ;;  %v12033_v6 = vld [vmem:[%s15609_s17 + $0x564] ss:$16 sps:$4 sm:$0xff]  }
 0x158   :  { %1644 = vmatprep.subr.bf16.mxu1 %v11948_v7  ;;  %v12036_v7 = vld [vmem:[%s15609_s17 + $0x16c] ss:$16 sps:$4 sm:$0xff]  }
 0x15a   :  { %1604 = vmatpush2.bf16.msra.mxu0 %v11950_v8  ;;  %v12031_v8 = vld [vmem:[%s15609_s17 + $0x560] ss:$16 sps:$4 sm:$0xff]  }
 0x15b   :  { %1645 = vmatpush2.bf16.msra.mxu1 %v11951_v9  ;;  %1605 = vmatprep.subr.bf16.mxu0 %v11952_v10  ;;  %v12034_v9 = vld [vmem:[%s15609_s17 + $0x168] ss:$16 sps:$4 sm:$0xff]   ;;  %v12039_v10 = vld [vmem:[%s15609_s17 + $0x544] ss:$16 sps:$4 sm:$0xff]  }
 0x15c   :  { %1646 = vmatprep.subr.bf16.mxu1 %v11954_v11  ;;  %v12042_v11 = vld [vmem:[%s15609_s17 + $0x14c] ss:$16 sps:$4 sm:$0xff]  }
 0x15e   :  { %1606 = vmatpush2.bf16.msra.mxu0 %v11956_v12  ;;  %v12037_v12 = vld [vmem:[%s15609_s17 + $0x540] ss:$16 sps:$4 sm:$0xff]  }
 0x15f   :  { %1647 = vmatpush2.bf16.msra.mxu1 %v11957_v13  ;;  %1657 = vmatprep.subr.bf16.mxu0 %v11961_v14  ;;  %v12040_v13 = vld [vmem:[%s15609_s17 + $0x148] ss:$16 sps:$4 sm:$0xff]   ;;  %v12045_v14 = vld [vmem:[%s15609_s17 + $0x524] ss:$16 sps:$4 sm:$0xff]  }
 0x160   :  { %1698 = vmatprep.subr.bf16.mxu1 %v11964_v15  ;;  %v12048_v15 = vld [vmem:[%s15609_s17 + $0x12c] ss:$16 sps:$4 sm:$0xff]  }
 0x161   :  { %1608 = vmatmul.mubr.bf16.vlgmr.msra.gmra.mxu0 %v13965_v16 }
 0x162   :  { %1649 = vmatmul.mubr.bf16.vlgmr.msra.gmra.mxu1 %v13967_v17  ;;  %1658 = vmatpush1.bf16.msra.mxu0 %v11959_v18  ;;  %v12043_v18 = vld [vmem:[%s15609_s17 + $0x520] ss:$16 sps:$4 sm:$0xff]  }
 0x163   :  { %1699 = vmatpush1.bf16.msra.mxu1 %v11962_v19  ;;  %1659 = vmatprep.subr.bf16.mxu0 %v11967_v20  ;;  %v12046_v19 = vld [vmem:[%s15609_s17 + $0x128] ss:$16 sps:$4 sm:$0xff]   ;;  %v12051_v20 = vld [vmem:[%s15609_s17 + $0x504] ss:$16 sps:$4 sm:$0xff]  }
 0x164   :  { %1700 = vmatprep.subr.bf16.mxu1 %v11970_v21  ;;  %1730 = vmatprep.mubr.bf16.mxu1 %v418_v62  ;;  %v12024_v62 = vld [vmem:[%s15609_s17 + $0x1ac] ss:$16 sps:$4 sm:$0xff]  }
 0x165   :  { %1689 = vmatprep.mubr.bf16.mxu0 %v14004_v50  ;;  %v12054_v21 = vld [vmem:[%s15609_s17 + $0x10c] ss:$16 sps:$4 sm:$0xff]  }
 0x166   :  { %1660 = vmatpush1.bf16.msra.mxu0 %v11965_v22  ;;  %v12049_v22 = vld [vmem:[%s15609_s17 + $0x500] ss:$16 sps:$4 sm:$0xff]  }
 0x167   :  { %1701 = vmatpush1.bf16.msra.mxu1 %v11968_v23  ;;  %1661 = vmatprep.subr.bf16.mxu0 %v11973_v24  ;;  %v12052_v23 = vld [vmem:[%s15609_s17 + $0x108] ss:$16 sps:$4 sm:$0xff]   ;;  %v12057_v24 = vld [vmem:[%s15609_s17 + $0x2ec] ss:$16 sps:$4 sm:$0xff]  }
 0x168   :  { %1702 = vmatprep.subr.bf16.mxu1 %v11976_v25  ;;  %v12060_v25 = vld [vmem:[%s15609_s17 + $0x4ec] ss:$16 sps:$4 sm:$0xff]  }
 0x16a   :  { %1662 = vmatpush1.bf16.msra.mxu0 %v11971_v26  ;;  %v12055_v26 = vld [vmem:[%s15609_s17 + $0x2e8] ss:$16 sps:$4 sm:$0xff]  }
 0x16b   :  { %1703 = vmatpush1.bf16.msra.mxu1 %v11974_v27  ;;  %1663 = vmatprep.subr.bf16.mxu0 %v11979_v28  ;;  %v14046_v27 = vpack.c.bf16 %v13996_v42, %v13996_v42  ;;  %v12058_v28 = vld [vmem:[%s15609_s17 + $0x4e8] ss:$16 sps:$4 sm:$0xff]  }
 0x16c   :  { %1704 = vmatprep.subr.bf16.mxu1 %v11982_v29  ;;  %v12063_v29 = vld [vmem:[%s15609_s17 + $0x2cc] ss:$16 sps:$4 sm:$0xff]   ;;  %v12082_v42 = vld [vmem:[%s15609_s17 + $0x468] ss:$16 sps:$4 sm:$0xff]  }
 0x16e   :  { %1664 = vmatpush1.bf16.msra.mxu0 %v11977_v30  ;;  %v12066_v30 = vld [vmem:[%s15609_s17 + $0x4cc] ss:$16 sps:$4 sm:$0xff]  }
 0x16f   :  { %1705 = vmatpush1.bf16.msra.mxu1 %v11980_v31  ;;  %1665 = vmatprep.subr.bf16.mxu0 %v11985_v32  ;;  %v12061_v31 = vld [vmem:[%s15609_s17 + $0x2c8] ss:$16 sps:$4 sm:$0xff]  }
 0x170   :  { %1706 = vmatprep.subr.bf16.mxu1 %v11988_v33  ;;  %v12064_v32 = vld [vmem:[%s15609_s17 + $0x4c8] ss:$16 sps:$4 sm:$0xff]   ;;  %v12069_v33 = vld [vmem:[%s15609_s17 + $0x2ac] ss:$16 sps:$4 sm:$0xff]  }
 0x172   :  { %1666 = vmatpush1.bf16.msra.mxu0 %v11983_v34  ;;  %v12072_v34 = vld [vmem:[%s15609_s17 + $0x4ac] ss:$16 sps:$4 sm:$0xff]  }
 0x173   :  { %1707 = vmatpush1.bf16.msra.mxu1 %v11986_v35  ;;  %1667 = vmatprep.subr.bf16.mxu0 %v11991_v36  ;;  %v12067_v35 = vld [vmem:[%s15609_s17 + $0x2a8] ss:$16 sps:$4 sm:$0xff]  }
 0x174   :  { %1708 = vmatprep.subr.bf16.mxu1 %v11994_v37  ;;  %v12070_v36 = vld [vmem:[%s15609_s17 + $0x4a8] ss:$16 sps:$4 sm:$0xff]   ;;  %v12078_v37 = vld [vmem:[%s15609_s17 + $0x48c] ss:$16 sps:$4 sm:$0xff]  }
 0x176   :  { %1668 = vmatpush1.bf16.msra.mxu0 %v11989_v38  ;;  %v12073_v38 = vld [vmem:[%s15609_s17 + $0x288] ss:$16 sps:$4 sm:$0xff]  }
 0x177   :  { %1709 = vmatpush1.bf16.msra.mxu1 %v11992_v39  ;;  %1669 = vmatprep.subr.bf16.mxu0 %v11997_v40  ;;  %v12076_v39 = vld [vmem:[%s15609_s17 + $0x488] ss:$16 sps:$4 sm:$0xff]   ;;  %v12084_v40 = vld [vmem:[%s15609_s17 + $0x46c] ss:$16 sps:$4 sm:$0xff]  }
 0x178   :  { %1710 = vmatprep.subr.bf16.mxu1 %v12000_v41  ;;  %v12079_v41 = vld [vmem:[%s15609_s17 + $0x268] ss:$16 sps:$4 sm:$0xff]  }
 0x17a   :  { %1670 = vmatpush1.bf16.msra.mxu0 %v11995_v44  ;;  %v12087_v44 = vld [vmem:[%s15609_s17 + $0x24c] ss:$16 sps:$4 sm:$0xff]  }
 0x17b   :  { %1711 = vmatpush1.bf16.msra.mxu1 %v11998_v45  ;;  %1671 = vmatprep.subr.bf16.mxu0 %v12003_v47  ;;  %v12090_v45 = vld [vmem:[%s15609_s17 + $0x44c] ss:$16 sps:$4 sm:$0xff]   ;;  %v12088_v47 = vld [vmem:[%s15609_s17 + $0x448] ss:$16 sps:$4 sm:$0xff]  }
 0x17c   :  { %1712 = vmatprep.subr.bf16.mxu1 %v12006_v48  ;;  %v12093_v48 = vld [vmem:[%s15609_s17 + $0x22c] ss:$16 sps:$4 sm:$0xff]  }
 0x17e   :  { %1672 = vmatpush1.bf16.msra.mxu0 %v12001_v51  ;;  %v12091_v51 = vld [vmem:[%s15609_s17 + $0x228] ss:$16 sps:$4 sm:$0xff]  }
 0x17f   :  { %1713 = vmatpush1.bf16.msra.mxu1 %v12004_v52  ;;  %1673 = vmatprep.subr.bf16.mxu0 %v12009_v53  ;;  %v12094_v52 = vld [vmem:[%s15609_s17 + $0x428] ss:$16 sps:$4 sm:$0xff]   ;;  %v12099_v53 = vld [vmem:[%s15609_s17 + $0x20c] ss:$16 sps:$4 sm:$0xff]  }
 0x180   :  { %1714 = vmatprep.subr.bf16.mxu1 %v12012_v54  ;;  %v12102_v54 = vld [vmem:[%s15609_s17 + $0x40c] ss:$16 sps:$4 sm:$0xff]  }
 0x182   :  { %1674 = vmatpush2.bf16.msra.mxu0 %v12007_v55  ;;  %v12097_v55 = vld [vmem:[%s15609_s17 + $0x208] ss:$16 sps:$4 sm:$0xff]  }
 0x183   :  { %1715 = vmatpush2.bf16.msra.mxu1 %v12010_v56  ;;  %1675 = vmatprep.subr.bf16.mxu0 %v12015_v57  ;;  %v12100_v56 = vld [vmem:[%s15609_s17 + $0x408] ss:$16 sps:$4 sm:$0xff]   ;;  %v12105_v57 = vld [vmem:[%s15609_s17 + $0x3ec] ss:$16 sps:$4 sm:$0xff]  }
 0x184   :  { %1716 = vmatprep.subr.bf16.mxu1 %v12018_v58  ;;  %v12108_v58 = vld [vmem:[%s15609_s17 + $0x5ec] ss:$16 sps:$4 sm:$0xff]  }
 0x186   :  { %1676 = vmatpush2.bf16.msra.mxu0 %v12013_v59  ;;  %v12103_v59 = vld [vmem:[%s15609_s17 + $0x3e8] ss:$16 sps:$4 sm:$0xff]  }
 0x187   :  { %1717 = vmatpush2.bf16.msra.mxu1 %v12016_v60  ;;  %1677 = vmatprep.subr.bf16.mxu0 %v12021_v61  ;;  %v12106_v60 = vld [vmem:[%s15609_s17 + $0x5e8] ss:$16 sps:$4 sm:$0xff]   ;;  %v12111_v61 = vld [vmem:[%s15609_s17 + $0x3cc] ss:$16 sps:$4 sm:$0xff]  }
 0x188   :  { %1718 = vmatprep.subr.bf16.mxu1 %v12024_v62  ;;  %v12114_v62 = vld [vmem:[%s15609_s17 + $0x5cc] ss:$16 sps:$4 sm:$0xff]  }
 0x18a   :  { %1678 = vmatpush2.bf16.msra.mxu0 %v12019_v63  ;;  %v12109_v63 = vld [vmem:[%s15609_s17 + $0x3c8] ss:$16 sps:$4 sm:$0xff]  }
 0x18b   :  { %1719 = vmatpush2.bf16.msra.mxu1 %v12022_v0  ;;  %1679 = vmatprep.subr.bf16.mxu0 %v12027_v1  ;;  %v12112_v0 = vld [vmem:[%s15609_s17 + $0x5c8] ss:$16 sps:$4 sm:$0xff]   ;;  %v12117_v1 = vld [vmem:[%s15609_s17 + $0x3ac] ss:$16 sps:$4 sm:$0xff]  }
 0x18c   :  { %1720 = vmatprep.subr.bf16.mxu1 %v12030_v2  ;;  %v12120_v2 = vld [vmem:[%s15609_s17 + $0x5ac] ss:$16 sps:$4 sm:$0xff]  }
 0x18e   :  { %1680 = vmatpush2.bf16.msra.mxu0 %v12025_v4  ;;  %v12115_v4 = vld [vmem:[%s15609_s17 + $0x3a8] ss:$16 sps:$4 sm:$0xff]  }
 0x18f   :  { %1721 = vmatpush2.bf16.msra.mxu1 %v12028_v5  ;;  %1681 = vmatprep.subr.bf16.mxu0 %v12033_v6  ;;  %v12118_v5 = vld [vmem:[%s15609_s17 + $0x5a8] ss:$16 sps:$4 sm:$0xff]   ;;  %v12123_v6 = vld [vmem:[%s15609_s17 + $0x38c] ss:$16 sps:$4 sm:$0xff]  }
 0x190   :  { %1722 = vmatprep.subr.bf16.mxu1 %v12036_v7  ;;  %v12126_v7 = vld [vmem:[%s15609_s17 + $0x58c] ss:$16 sps:$4 sm:$0xff]  }
 0x192   :  { %1682 = vmatpush2.bf16.msra.mxu0 %v12031_v8  ;;  %v12121_v8 = vld [vmem:[%s15609_s17 + $0x388] ss:$16 sps:$4 sm:$0xff]  }
 0x193   :  { %1723 = vmatpush2.bf16.msra.mxu1 %v12034_v9  ;;  %1683 = vmatprep.subr.bf16.mxu0 %v12039_v10  ;;  %v12124_v9 = vld [vmem:[%s15609_s17 + $0x588] ss:$16 sps:$4 sm:$0xff]   ;;  %v12129_v10 = vld [vmem:[%s15609_s17 + $0x36c] ss:$16 sps:$4 sm:$0xff]  }
 0x194   :  { %1724 = vmatprep.subr.bf16.mxu1 %v12042_v11  ;;  %v12132_v11 = vld [vmem:[%s15609_s17 + $0x56c] ss:$16 sps:$4 sm:$0xff]  }
 0x196   :  { %1684 = vmatpush2.bf16.msra.mxu0 %v12037_v12  ;;  %v12127_v12 = vld [vmem:[%s15609_s17 + $0x368] ss:$16 sps:$4 sm:$0xff]  }
 0x197   :  { %1725 = vmatpush2.bf16.msra.mxu1 %v12040_v13  ;;  %1685 = vmatprep.subr.bf16.mxu0 %v12045_v14  ;;  %v12130_v13 = vld [vmem:[%s15609_s17 + $0x568] ss:$16 sps:$4 sm:$0xff]   ;;  %v12135_v14 = vld [vmem:[%s15609_s17 + $0x34c] ss:$16 sps:$4 sm:$0xff]  }
 0x198   :  { %1726 = vmatprep.subr.bf16.mxu1 %v12048_v15  ;;  %v12138_v15 = vld [vmem:[%s15609_s17 + $0x54c] ss:$16 sps:$4 sm:$0xff]  }
 0x19a   :  { %1686 = vmatpush2.bf16.msra.mxu0 %v12043_v18  ;;  %v12133_v18 = vld [vmem:[%s15609_s17 + $0x348] ss:$16 sps:$4 sm:$0xff]  }
 0x19b   :  { %1727 = vmatpush2.bf16.msra.mxu1 %v12046_v19  ;;  %1687 = vmatprep.subr.bf16.mxu0 %v12051_v20  ;;  %v12136_v19 = vld [vmem:[%s15609_s17 + $0x548] ss:$16 sps:$4 sm:$0xff]   ;;  %v12141_v20 = vld [vmem:[%s15609_s17 + $0x32c] ss:$16 sps:$4 sm:$0xff]  }
 0x19c   :  { %1728 = vmatprep.subr.bf16.mxu1 %v12054_v21  ;;  %v12144_v21 = vld [vmem:[%s15609_s17 + $0x52c] ss:$16 sps:$4 sm:$0xff]  }
 0x19e   :  { %1688 = vmatpush2.bf16.msra.mxu0 %v12049_v22  ;;  %v12139_v22 = vld [vmem:[%s15609_s17 + $0x328] ss:$16 sps:$4 sm:$0xff]  }
 0x19f   :  { %1729 = vmatpush2.bf16.msra.mxu1 %v12052_v23  ;;  %1739 = vmatprep.subr.bf16.mxu0 %v12057_v24  ;;  %v12142_v23 = vld [vmem:[%s15609_s17 + $0x528] ss:$16 sps:$4 sm:$0xff]   ;;  %v12147_v24 = vld [vmem:[%s15609_s17 + $0x30c] ss:$16 sps:$4 sm:$0xff]  }
 0x1a0   :  { %1780 = vmatprep.subr.bf16.mxu1 %v12060_v25  ;;  %v12150_v25 = vld [vmem:[%s15609_s17 + $0x50c] ss:$16 sps:$4 sm:$0xff]  }
 0x1a1   :  { %1690 = vmatmul.mubr.bf16.vlgmr.msra.gmra.mxu0 %v14046_v27 }
 0x1a2   :  { %1731 = vmatmul.mubr.bf16.vlgmr.msra.gmra.mxu1 %v13965_v16  ;;  %1740 = vmatpush1.bf16.msra.mxu0 %v12055_v26  ;;  %v12075_v16 = vld [vmem:[%s15609_s17 + $0x28c] ss:$16 sps:$4 sm:$0xff]   ;;  %v12145_v26 = vld [vmem:[%s15609_s17 + $0x308] ss:$16 sps:$4 sm:$0xff]  }
 0x1a3   :  { %1781 = vmatpush1.bf16.msra.mxu1 %v12058_v28  ;;  %1741 = vmatprep.subr.bf16.mxu0 %v12063_v29  ;;  %v12148_v28 = vld [vmem:[%s15609_s17 + $0x508] ss:$16 sps:$4 sm:$0xff]   ;;  %v12153_v29 = vld [vmem:[%s15612_s18 + $0x74] ss:$8 sps:$4 sm:$0xff]  }
 0x1a4   :  { %1782 = vmatprep.subr.bf16.mxu1 %v12066_v30  ;;  %1771 = vmatprep.mubr.bf16.mxu0 %v13950_v3  ;;  %v12081_v3 = vld [vmem:[%s15609_s17 + $0x26c] ss:$16 sps:$4 sm:$0xff]   ;;  %v12151_v30 = vld [vmem:[%s15612_s18 + $0x70] ss:$8 sps:$4 sm:$0xff]  }
 0x1a5   :  { %1812 = vmatprep.mubr.bf16.mxu1 %v14004_v50  ;;  %v12096_v50 = vld [vmem:[%s15609_s17 + $0x42c] ss:$16 sps:$4 sm:$0xff]  }
 0x1a6   :  { %1742 = vmatpush1.bf16.msra.mxu0 %v12061_v31  ;;  %v12156_v31 = vld [vmem:[%s15612_s18 + $0x64] ss:$8 sps:$4 sm:$0xff]  }
 0x1a7   :  { %1783 = vmatpush1.bf16.msra.mxu1 %v12064_v32  ;;  %1743 = vmatprep.subr.bf16.mxu0 %v12069_v33  ;;  %v12154_v32 = vld [vmem:[%s15612_s18 + $0x60] ss:$8 sps:$4 sm:$0xff]   ;;  %v12159_v33 = vld [vmem:[%s15612_s18 + $0x54] ss:$8 sps:$4 sm:$0xff]  }
 0x1a8   :  { %1784 = vmatprep.subr.bf16.mxu1 %v12072_v34  ;;  %v12157_v34 = vld [vmem:[%s15612_s18 + $0x50] ss:$8 sps:$4 sm:$0xff]  }
 0x1aa   :  { %1744 = vmatpush1.bf16.msra.mxu0 %v12067_v35  ;;  %v12162_v35 = vld [vmem:[%s15612_s18 + $0x44] ss:$8 sps:$4 sm:$0xff]  }
 0x1ab   :  { %1785 = vmatpush1.bf16.msra.mxu1 %v12070_v36  ;;  %1745 = vmatprep.subr.bf16.mxu0 %v12075_v16  ;;  %v12160_v36 = vld [vmem:[%s15612_s18 + $0x40] ss:$8 sps:$4 sm:$0xff]   ;;  %v12165_v16 = vld [vmem:[%s15612_s18 + $0x34] ss:$8 sps:$4 sm:$0xff]  }
 0x1ac   :  { %1786 = vmatprep.subr.bf16.mxu1 %v12078_v37  ;;  %v12204_v37 = vld [vmem:[%s15612_s18 + $0x164] ss:$8 sps:$4 sm:$0xff]  }
 0x1ae   :  { %1746 = vmatpush1.bf16.msra.mxu0 %v12073_v38  ;;  %v12163_v38 = vld [vmem:[%s15612_s18 + $0x30] ss:$8 sps:$4 sm:$0xff]  }
 0x1af   :  { %1787 = vmatpush1.bf16.msra.mxu1 %v12076_v39  ;;  %1747 = vmatprep.subr.bf16.mxu0 %v12081_v3  ;;  %v12168_v39 = vld [vmem:[%s15612_s18 + $0x24] ss:$8 sps:$4 sm:$0xff]   ;;  %v12202_v3 = vld [vmem:[%s15612_s18 + $0x160] ss:$8 sps:$4 sm:$0xff]  }
 0x1b0   :  { %1788 = vmatprep.subr.bf16.mxu1 %v12084_v40  ;;  %v12207_v40 = vld [vmem:[%s15612_s18 + $0x154] ss:$8 sps:$4 sm:$0xff]  }
 0x1b2   :  { %1748 = vmatpush1.bf16.msra.mxu0 %v12079_v41  ;;  %v12166_v41 = vld [vmem:[%s15612_s18 + $0x20] ss:$8 sps:$4 sm:$0xff]  }
 0x1b3   :  { %1789 = vmatpush1.bf16.msra.mxu1 %v12082_v42  ;;  %1749 = vmatprep.subr.bf16.mxu0 %v12087_v44  ;;  %v12171_v42 = vld [vmem:[%s15612_s18 + $0x14] ss:$8 sps:$4 sm:$0xff]   ;;  %v12205_v44 = vld [vmem:[%s15612_s18 + $0x150] ss:$8 sps:$4 sm:$0xff]  }
 0x1b4   :  { %1790 = vmatprep.subr.bf16.mxu1 %v12090_v45  ;;  %v12169_v45 = vld [vmem:[%s15612_s18 + $0x10] ss:$8 sps:$4 sm:$0xff]  }
 0x1b6   :  { %1750 = vmatpush1.bf16.msra.mxu0 %v12085_v46  ;;  %v12210_v46 = vld [vmem:[%s15612_s18 + $0x144] ss:$8 sps:$4 sm:$0xff]  }
 0x1b7   :  { %1791 = vmatpush1.bf16.msra.mxu1 %v12088_v47  ;;  %1751 = vmatprep.subr.bf16.mxu0 %v12093_v48  ;;  %v12174_v47 = vld [vmem:[%s15612_s18 + $0x4] ss:$8 sps:$4 sm:$0xff]   ;;  %v12208_v48 = vld [vmem:[%s15612_s18 + $0x140] ss:$8 sps:$4 sm:$0xff]  }
 0x1b8   :  { %1792 = vmatprep.subr.bf16.mxu1 %v12096_v50  ;;  %v12213_v50 = vld [vmem:[%s15612_s18 + $0x134] ss:$8 sps:$4 sm:$0xff]  }
 0x1ba   :  { %1752 = vmatpush1.bf16.msra.mxu0 %v12091_v51  ;;  %v12172_v51 = vld [vmem:[%s15612_s18] ss:$8 sps:$4 sm:$0xff]  }
 0x1bb   :  { %1793 = vmatpush1.bf16.msra.mxu1 %v12094_v52  ;;  %1753 = vmatprep.subr.bf16.mxu0 %v12099_v53  ;;  %v12177_v52 = vld [vmem:[%s15612_s18 + $0xf4] ss:$8 sps:$4 sm:$0xff]   ;;  %v12211_v53 = vld [vmem:[%s15612_s18 + $0x130] ss:$8 sps:$4 sm:$0xff]  }
 0x1bc   :  { %1794 = vmatprep.subr.bf16.mxu1 %v12102_v54  ;;  %v12216_v54 = vld [vmem:[%s15612_s18 + $0x124] ss:$8 sps:$4 sm:$0xff]  }
 0x1be   :  { %1754 = vmatpush1.bf16.msra.mxu0 %v12097_v55  ;;  %v12175_v55 = vld [vmem:[%s15612_s18 + $0xf0] ss:$8 sps:$4 sm:$0xff]  }
 0x1bf   :  { %1795 = vmatpush1.bf16.msra.mxu1 %v12100_v56  ;;  %1755 = vmatprep.subr.bf16.mxu0 %v12105_v57  ;;  %v12180_v56 = vld [vmem:[%s15612_s18 + $0xe4] ss:$8 sps:$4 sm:$0xff]   ;;  %v12214_v57 = vld [vmem:[%s15612_s18 + $0x120] ss:$8 sps:$4 sm:$0xff]  }
 0x1c0   :  { %1796 = vmatprep.subr.bf16.mxu1 %v12108_v58  ;;  %v12219_v58 = vld [vmem:[%s15612_s18 + $0x114] ss:$8 sps:$4 sm:$0xff]  }
 0x1c2   :  { %1756 = vmatpush2.bf16.msra.mxu0 %v12103_v59  ;;  %v12178_v59 = vld [vmem:[%s15612_s18 + $0xe0] ss:$8 sps:$4 sm:$0xff]  }
 0x1c3   :  { %1797 = vmatpush2.bf16.msra.mxu1 %v12106_v60  ;;  %1757 = vmatprep.subr.bf16.mxu0 %v12111_v61  ;;  %v12183_v60 = vld [vmem:[%s15612_s18 + $0xd4] ss:$8 sps:$4 sm:$0xff]   ;;  %v12217_v61 = vld [vmem:[%s15612_s18 + $0x110] ss:$8 sps:$4 sm:$0xff]  }
 0x1c4   :  { %1798 = vmatprep.subr.bf16.mxu1 %v12114_v62  ;;  %v12222_v62 = vld [vmem:[%s15612_s18 + $0x104] ss:$8 sps:$4 sm:$0xff]  }
 0x1c6   :  { %1758 = vmatpush2.bf16.msra.mxu0 %v12109_v63  ;;  %v12181_v63 = vld [vmem:[%s15612_s18 + $0xd0] ss:$8 sps:$4 sm:$0xff]  }
 0x1c7   :  { %1799 = vmatpush2.bf16.msra.mxu1 %v12112_v0  ;;  %1759 = vmatprep.subr.bf16.mxu0 %v12117_v1  ;;  %v12186_v0 = vld [vmem:[%s15612_s18 + $0xc4] ss:$8 sps:$4 sm:$0xff]   ;;  %v12220_v1 = vld [vmem:[%s15612_s18 + $0x100] ss:$8 sps:$4 sm:$0xff]  }
 0x1c8   :  { %1800 = vmatprep.subr.bf16.mxu1 %v12120_v2  ;;  %v12225_v2 = vld [vmem:[%s15612_s18 + $0x1f4] ss:$8 sps:$4 sm:$0xff]  }
 0x1ca   :  { %1760 = vmatpush2.bf16.msra.mxu0 %v12115_v4  ;;  %v12184_v4 = vld [vmem:[%s15612_s18 + $0xc0] ss:$8 sps:$4 sm:$0xff]  }
 0x1cb   :  { %1801 = vmatpush2.bf16.msra.mxu1 %v12118_v5  ;;  %1761 = vmatprep.subr.bf16.mxu0 %v12123_v6  ;;  %v12189_v5 = vld [vmem:[%s15612_s18 + $0xb4] ss:$8 sps:$4 sm:$0xff]   ;;  %v12223_v6 = vld [vmem:[%s15612_s18 + $0x1f0] ss:$8 sps:$4 sm:$0xff]  }
 0x1cc   :  { %1802 = vmatprep.subr.bf16.mxu1 %v12126_v7  ;;  %v12228_v7 = vld [vmem:[%s15612_s18 + $0x1e4] ss:$8 sps:$4 sm:$0xff]  }
 0x1ce   :  { %1762 = vmatpush2.bf16.msra.mxu0 %v12121_v8  ;;  %v12187_v8 = vld [vmem:[%s15612_s18 + $0xb0] ss:$8 sps:$4 sm:$0xff]  }
 0x1cf   :  { %1803 = vmatpush2.bf16.msra.mxu1 %v12124_v9  ;;  %1763 = vmatprep.subr.bf16.mxu0 %v12129_v10  ;;  %v12192_v9 = vld [vmem:[%s15612_s18 + $0xa4] ss:$8 sps:$4 sm:$0xff]   ;;  %v12226_v10 = vld [vmem:[%s15612_s18 + $0x1e0] ss:$8 sps:$4 sm:$0xff]  }
 0x1d0   :  { %1804 = vmatprep.subr.bf16.mxu1 %v12132_v11  ;;  %v12231_v11 = vld [vmem:[%s15612_s18 + $0x1d4] ss:$8 sps:$4 sm:$0xff]  }
 0x1d2   :  { %1764 = vmatpush2.bf16.msra.mxu0 %v12127_v12  ;;  %v12190_v12 = vld [vmem:[%s15612_s18 + $0xa0] ss:$8 sps:$4 sm:$0xff]  }
 0x1d3   :  { %1805 = vmatpush2.bf16.msra.mxu1 %v12130_v13  ;;  %1765 = vmatprep.subr.bf16.mxu0 %v12135_v14  ;;  %v12195_v13 = vld [vmem:[%s15612_s18 + $0x94] ss:$8 sps:$4 sm:$0xff]   ;;  %v12229_v14 = vld [vmem:[%s15612_s18 + $0x1d0] ss:$8 sps:$4 sm:$0xff]  }
 0x1d4   :  { %1806 = vmatprep.subr.bf16.mxu1 %v12138_v15  ;;  %v12234_v15 = vld [vmem:[%s15612_s18 + $0x1c4] ss:$8 sps:$4 sm:$0xff]  }
 0x1d6   :  { %1766 = vmatpush2.bf16.msra.mxu0 %v12133_v18  ;;  %v12193_v18 = vld [vmem:[%s15612_s18 + $0x90] ss:$8 sps:$4 sm:$0xff]  }
 0x1d7   :  { %1807 = vmatpush2.bf16.msra.mxu1 %v12136_v19  ;;  %1767 = vmatprep.subr.bf16.mxu0 %v12141_v20  ;;  %v12198_v19 = vld [vmem:[%s15612_s18 + $0x84] ss:$8 sps:$4 sm:$0xff]   ;;  %v12232_v20 = vld [vmem:[%s15612_s18 + $0x1c0] ss:$8 sps:$4 sm:$0xff]  }
 0x1d8   :  { %1808 = vmatprep.subr.bf16.mxu1 %v12144_v21  ;;  %v12237_v21 = vld [vmem:[%s15612_s18 + $0x1b4] ss:$8 sps:$4 sm:$0xff]  }
 0x1da   :  { %1768 = vmatpush2.bf16.msra.mxu0 %v12139_v22  ;;  %v12196_v22 = vld [vmem:[%s15612_s18 + $0x80] ss:$8 sps:$4 sm:$0xff]  }
 0x1db   :  { %1809 = vmatpush2.bf16.msra.mxu1 %v12142_v23  ;;  %1769 = vmatprep.subr.bf16.mxu0 %v12147_v24  ;;  %v12235_v23 = vld [vmem:[%s15612_s18 + $0x1b0] ss:$8 sps:$4 sm:$0xff]   ;;  %v12240_v24 = vld [vmem:[%s15612_s18 + $0x1a4] ss:$8 sps:$4 sm:$0xff]  }
 0x1dc   :  { %1810 = vmatprep.subr.bf16.mxu1 %v12150_v25 }
 0x1de   :  { %1770 = vmatpush2.bf16.msra.mxu0 %v12145_v26 }
 0x1df   :  { %1811 = vmatpush2.bf16.msra.mxu1 %v12148_v28  ;;  %2221 = vmatprep.subr.bf16.mxu0 %v12153_v29  ;;  %v12238_v28 = vld [vmem:[%s15612_s18 + $0x1a0] ss:$8 sps:$4 sm:$0xff]  }
 0x1e1   :  { %1772 = vmatmul.mubr.bf16.vlgmr.msra.gmra.mxu0 %v13967_v17  ;;  %v12199_v17 = vld [vmem:[%s15612_s18 + $0x170] ss:$8 sps:$4 sm:$0xff]  }
 0x1e2   :  { %1813 = vmatmul.mubr.bf16.vlgmr.msra.gmra.mxu1 %v14046_v27  ;;  %2222 = vmatpush1.bf16.msra.mxu0 %v12151_v30  ;;  %v12201_v27 = vld [vmem:[%s15612_s18 + $0x174] ss:$8 sps:$4 sm:$0xff]  }
 0x1e3   :  { %2223 = vmatprep.subr.bf16.mxu0 %v12156_v31  ;;  %2262 = vmatprep.subr.bf16.mxu1 %v12201_v27  ;;  %v12244_v27 = vld [vmem:[%s15612_s18 + $0x180] ss:$8 sps:$4 sm:$0xff]  }
 0x1e4   :  { %2263 = vmatpush1.bf16.msra.mxu1 %v12199_v17  ;;  %v12246_v17 = vld [vmem:[%s15612_s18 + $0x184] ss:$8 sps:$4 sm:$0xff]  }
 0x1e5   :  { %2264 = vmatprep.subr.bf16.mxu1 %v12204_v37 }
 0x1e6   :  { %2224 = vmatpush1.bf16.msra.mxu0 %v12154_v32  ;;  %v12243_v32 = vld [vmem:[%s15612_s18 + $0x194] ss:$8 sps:$4 sm:$0xff]  }
 0x1e7   :  { %2225 = vmatprep.subr.bf16.mxu0 %v12159_v33 }
 0x1e8   :  { %2265 = vmatpush1.bf16.msra.mxu1 %v12202_v3 }
 0x1e9   :  { %2266 = vmatprep.subr.bf16.mxu1 %v12207_v40 }
 0x1ea   :  { %2226 = vmatpush1.bf16.msra.mxu0 %v12157_v34 }
 0x1eb   :  { %2227 = vmatprep.subr.bf16.mxu0 %v12162_v35  ;;  %v12241_v35 = vld [vmem:[%s15612_s18 + $0x190] ss:$8 sps:$4 sm:$0xff]  }
 0x1ec   :  { %2267 = vmatpush1.bf16.msra.mxu1 %v12205_v44 }
 0x1ed   :  { %2268 = vmatprep.subr.bf16.mxu1 %v12210_v46 }
 0x1ee   :  { %2228 = vmatpush1.bf16.msra.mxu0 %v12160_v36 }
 0x1ef   :  { %2229 = vmatprep.subr.bf16.mxu0 %v12165_v16 }
 0x1f0   :  { %2269 = vmatpush1.bf16.msra.mxu1 %v12208_v48 }
 0x1f1   :  { %2270 = vmatprep.subr.bf16.mxu1 %v12213_v50 }
 0x1f2   :  { %2230 = vmatpush1.bf16.msra.mxu0 %v12163_v38 }
 0x1f3   :  { %2231 = vmatprep.subr.bf16.mxu0 %v12168_v39 }
 0x1f4   :  { %2271 = vmatpush1.bf16.msra.mxu1 %v12211_v53 }
 0x1f5   :  { %2272 = vmatprep.subr.bf16.mxu1 %v12216_v54 }
 0x1f6   :  { %2232 = vmatpush1.bf16.msra.mxu0 %v12166_v41 }
 0x1f7   :  { %2233 = vmatprep.subr.bf16.mxu0 %v12171_v42 }
 0x1f8   :  { %2273 = vmatpush1.bf16.msra.mxu1 %v12214_v57 }
 0x1f9   :  { %2274 = vmatprep.subr.bf16.mxu1 %v12219_v58 }
 0x1fa   :  { %2234 = vmatpush1.bf16.msra.mxu0 %v12169_v45 }
 0x1fb   :  { %2235 = vmatprep.subr.bf16.mxu0 %v12174_v47 }
 0x1fc   :  { %2275 = vmatpush1.bf16.msra.mxu1 %v12217_v61 }
 0x1fd   :  { %2276 = vmatprep.subr.bf16.mxu1 %v12222_v62 }
 0x1fe   :  { %2236 = vmatpush1.bf16.msra.mxu0 %v12172_v51 }
 0x1ff   :  { %2237 = vmatprep.subr.bf16.mxu0 %v12177_v52 }
 0x200   :  { %2277 = vmatpush1.bf16.msra.mxu1 %v12220_v1 }
 0x201   :  { %2278 = vmatprep.subr.bf16.mxu1 %v12225_v2 }
 0x202   :  { %2238 = vmatpush2.bf16.msra.mxu0 %v12175_v55 }
 0x203   :  { %2239 = vmatprep.subr.bf16.mxu0 %v12180_v56 }
 0x204   :  { %2279 = vmatpush2.bf16.msra.mxu1 %v12223_v6 }
 0x205   :  { %2280 = vmatprep.subr.bf16.mxu1 %v12228_v7 }
 0x206   :  { %2240 = vmatpush2.bf16.msra.mxu0 %v12178_v59 }
 0x207   :  { %2241 = vmatprep.subr.bf16.mxu0 %v12183_v60 }
 0x208   :  { %2281 = vmatpush2.bf16.msra.mxu1 %v12226_v10  ;;  %v2367_v10 = vld [vmem:[%s15613_s25 + $0xf8] sm:$0xff] }
 0x209   :  { %2282 = vmatprep.subr.bf16.mxu1 %v12231_v11  ;;  %v2351_v11 = vld [vmem:[%s15613_s25 + $0x78] sm:$0xff] }
 0x20a   :  { %2242 = vmatpush2.bf16.msra.mxu0 %v12181_v63 }
 0x20b   :  { %2243 = vmatprep.subr.bf16.mxu0 %v12186_v0 }
 0x20c   :  { %2283 = vmatpush2.bf16.msra.mxu1 %v12229_v14  ;;  %v2365_v14 = vld [vmem:[%s15613_s25 + $0xe8] sm:$0xff] }
 0x20d   :  { %2284 = vmatprep.subr.bf16.mxu1 %v12234_v15  ;;  %v2349_v15 = vld [vmem:[%s15613_s25 + $0x68] sm:$0xff] }
 0x20e   :  { %2244 = vmatpush2.bf16.msra.mxu0 %v12184_v4 }
 0x20f   :  { %2245 = vmatprep.subr.bf16.mxu0 %v12189_v5 }
 0x210   :  { %2285 = vmatpush2.bf16.msra.mxu1 %v12232_v20  ;;  %v2363_v20 = vld [vmem:[%s15613_s25 + $0xd8] sm:$0xff] }
 0x211   :  { %2286 = vmatprep.subr.bf16.mxu1 %v12237_v21  ;;  %v2347_v21 = vld [vmem:[%s15613_s25 + $0x58] sm:$0xff] }
 0x212   :  { %2246 = vmatpush2.bf16.msra.mxu0 %v12187_v8 }
 0x213   :  { %2247 = vmatprep.subr.bf16.mxu0 %v12192_v9 }
 0x214   :  { %2287 = vmatpush2.bf16.msra.mxu1 %v12235_v23  ;;  %v2346_v23 = vld [vmem:[%s15613_s25 + $0x50] sm:$0xff] }
 0x215   :  { %2288 = vmatprep.subr.bf16.mxu1 %v12240_v24  ;;  %v2361_v24 = vld [vmem:[%s15613_s25 + $0xc8] sm:$0xff] }
 0x216   :  { %2248 = vmatpush2.bf16.msra.mxu0 %v12190_v12  ;;  %v2366_v12 = vld [vmem:[%s15613_s25 + $0xf0] sm:$0xff] }
 0x217   :  { %2249 = vmatprep.subr.bf16.mxu0 %v12195_v13  ;;  %v2350_v13 = vld [vmem:[%s15613_s25 + $0x70] sm:$0xff] }
 0x218   :  { %2289 = vmatpush2.bf16.msra.mxu1 %v12238_v28  ;;  %v2344_v28 = vld [vmem:[%s15613_s25 + $0x40] sm:$0xff] }
 0x219   :  { %2290 = vmatprep.subr.bf16.mxu1 %v12243_v32  ;;  %v2342_v32 = vld [vmem:[%s15613_s25 + $0x30] sm:$0xff] }
 0x21a   :  { %2250 = vmatpush2.bf16.msra.mxu0 %v12193_v18  ;;  %v2364_v18 = vld [vmem:[%s15613_s25 + $0xe0] sm:$0xff] }
 0x21b   :  { %2251 = vmatprep.subr.bf16.mxu0 %v12198_v19  ;;  %v2348_v19 = vld [vmem:[%s15613_s25 + $0x60] sm:$0xff] }
 0x21c   :  { %2291 = vmatpush2.bf16.msra.mxu1 %v12241_v35  ;;  %v2356_v35 = vld [vmem:[%s15613_s25 + $0xa0] sm:$0xff] }
 0x21d   :  { %2292 = vmatprep.subr.bf16.mxu1 %v12246_v17  ;;  %v2339_v17 = vld [vmem:[%s15613_s25 + $0x18] sm:$0xff] }
 0x21e   :  { %2252 = vmatpush2.bf16.msra.mxu0 %v12196_v22  ;;  %v2362_v22 = vld [vmem:[%s15613_s25 + $0xd0] sm:$0xff] }
 0x21f   :  { %10903 = vmatprep.subr.mxu0 %v2367_v10 }
 0x220   :  { %2293 = vmatpush2.bf16.msra.mxu1 %v12244_v27  ;;  %v2354_v27 = vld [vmem:[%s15613_s25 + $0x90] sm:$0xff] }
 0x221   :  { %v1609_v25 = vpop.f32.mrf.mxu0  ;;  %10938 = vmatprep.subr.mxu1 %v2367_v10 }
 0x222   :  { %v1650_v26 = vpop.f32.mrf.mxu1 }
 0x223   :  { %v1651_v29 = vadd.f32 %v1650_v26, %v1609_v25  ;;  %v1611_v30 = vpop.f32.mrf.mxu0  ;;  %v2345_v25 = vld [vmem:[%s15613_s25 + $0x48] sm:$0xff]  ;;  %v2360_v26 = vld [vmem:[%s15613_s25 + $0xc0] sm:$0xff] }
 0x224   :  { %v1652_v31 = vpop.f32.mrf.mxu1 }
 0x225   :  { %v1613_v33 = vpop.f32.mrf.mxu0  ;;  %v1653_v39 = vadd.f32 %v1652_v31, %v1611_v30  ;;  %v2343_v30 = vld [vmem:[%s15613_s25 + $0x38] sm:$0xff]  ;;  %v2358_v31 = vld [vmem:[%s15613_s25 + $0xb0] sm:$0xff] }
 0x226   :  { %v1654_v34 = vpop.f32.mrf.mxu1  ;;  %v2357_v33 = vld [vmem:[%s15613_s25 + $0xa8] sm:$0xff] }
 0x227   :  { %v1614_v36 = vpop.f32.mrf.mxu0  ;;  %v2341_v34 = vld [vmem:[%s15613_s25 + $0x28] sm:$0xff] }
 0x228   :  { %v1655_v16 = vpop.f32.mrf.mxu1  ;;  %v2340_v36 = vld [vmem:[%s15613_s25 + $0x20] sm:$0xff] }
 0x229   :  { %v2355_v16 = vld [vmem:[%s15613_s25 + $0x98] sm:$0xff] }
 0x261   :  { %v1691_v37 = vpop.f32.mrf.mxu0 }
 0x262   :  { %v1732_v38 = vpop.f32.mrf.mxu1  ;;  %v1692_v3 = vadd.f32 %v1691_v37, %v1651_v29  ;;  %v2359_v29 = vld [vmem:[%s15613_s25 + $0xb8] sm:$0xff]  ;;  %v2338_v37 = vld [vmem:[%s15613_s25 + $0x10] sm:$0xff] }
 0x263   :  { %v1693_v40 = vpop.f32.mrf.mxu0 }
 0x264   :  { %v1734_v41 = vpop.f32.mrf.mxu1  ;;  %vm1821_vm0 = vcmp.gt.f32.partialorder %v1692_v3, 0.0  ;;  %v1825_v42 = vmul.f32 0.2, %v1692_v3  ;;  %v1694_v44 = vadd.f32 %v1693_v40, %v1653_v39  ;;  %v2337_v39 = vld [vmem:[%s15613_s25 + $0x8] sm:$0xff]  ;;  %v2336_v40 = vld [vmem:[%s15613_s25] sm:$0xff] }
 0x265   :  { %v1695_v45 = vpop.f32.mrf.mxu0 }
 0x266   :  { %v1736_v46 = vpop.f32.mrf.mxu1  ;;  %vm1822_vm1 = vcmp.gt.f32.partialorder %v1694_v44, 0.0  ;;  %v1826_v47 = vmul.f32 0.2, %v1694_v44  ;;  %v1829_v48 = vsel %vm1821_vm0, %v1692_v3, %v1825_v42  ;;  %v2352_v3 = vld [vmem:[%s15613_s25 + $0x80] sm:$0xff] }
 0x267   :  { %v1696_v50 = vpop.f32.mrf.mxu0  ;;  %v1833_v54 = vpack.c.bf16 %v1829_v48, %v1829_v48 }
 0x268   :  { %v1737_v51 = vpop.f32.mrf.mxu1  ;;  %v1830_v52 = vsel %vm1822_vm1, %v1694_v44, %v1826_v47 }
 0x269   :  { %v1834_v53 = vpack.c.bf16 %v1830_v52, %v1830_v52 }
 0x26b   :  { %2253 = vmatprep.mubr.bf16.mxu0 %v1834_v53 }
 0x26c   :  { %2254 = vmatmul.mubr.bf16.vlgmr.msra.gmra.mxu0 %v1833_v54 }
 0x26d   :  { %10904 = vmatpush3.msra.mxu0 %v2351_v11 }
 0x26e   :  { %10905 = vmatprep.subr.mxu0 %v2366_v12 }
 0x26f   :  { %10906 = vmatpush3.msra.mxu0 %v2350_v13 }
 0x270   :  { %10907 = vmatprep.subr.mxu0 %v2365_v14 }
 0x271   :  { %10908 = vmatpush3.msra.mxu0 %v2349_v15 }
 0x272   :  { %10909 = vmatprep.subr.mxu0 %v2364_v18 }
 0x273   :  { %10910 = vmatpush3.msra.mxu0 %v2348_v19 }
 0x274   :  { %10911 = vmatprep.subr.mxu0 %v2363_v20 }
 0x275   :  { %10912 = vmatpush3.msra.mxu0 %v2347_v21 }
 0x276   :  { %10913 = vmatprep.subr.mxu0 %v2362_v22 }
 0x277   :  { %10914 = vmatpush3.msra.mxu0 %v2346_v23 }
 0x278   :  { %10915 = vmatprep.subr.mxu0 %v2361_v24 }
 0x279   :  { %10916 = vmatpush3.msra.mxu0 %v2345_v25 }
 0x27a   :  { %10917 = vmatprep.subr.mxu0 %v2360_v26 }
 0x27b   :  { %10918 = vmatpush3.msra.mxu0 %v2344_v28 }
 0x27c   :  { %10919 = vmatprep.subr.mxu0 %v2359_v29 }
 0x27d   :  { %10920 = vmatpush3.msra.mxu0 %v2343_v30 }
 0x27e   :  { %10921 = vmatprep.subr.mxu0 %v2358_v31 }
 0x27f   :  { %10922 = vmatpush3.msra.mxu0 %v2342_v32 }
 0x280   :  { %10923 = vmatprep.subr.mxu0 %v2357_v33 }
 0x281   :  { %10924 = vmatpush3.msra.mxu0 %v2341_v34 }
 0x282   :  { %10925 = vmatprep.subr.mxu0 %v2356_v35 }
 0x283   :  { %10926 = vmatpush3.msra.mxu0 %v2340_v36 }
 0x284   :  { %10927 = vmatprep.subr.mxu0 %v2355_v16 }
 0x285   :  { %10928 = vmatpush3.msra.mxu0 %v2339_v17 }
 0x286   :  { %10929 = vmatprep.subr.mxu0 %v2354_v27 }
 0x287   :  { %10930 = vmatpush3.msra.mxu0 %v2338_v37 }
 0x2a1   :  { %v1773_v55 = vpop.f32.mrf.mxu0 }
 0x2a2   :  { %v1814_v56 = vpop.f32.mrf.mxu1  ;;  %v1774_v57 = vadd.f32 %v1773_v55, %v1732_v38  ;;  %v2353_v38 = vld [vmem:[%s15613_s25 + $0x88] sm:$0xff] }
 0x2a3   :  { %v1775_v58 = vpop.f32.mrf.mxu0  ;;  %10931 = vmatprep.subr.mxu0 %v2353_v38 }
 0x2a4   :  { %v1816_v59 = vpop.f32.mrf.mxu1  ;;  %v1815_v60 = vadd.f32 %v1814_v56, %v1774_v57  ;;  %v1776_v61 = vadd.f32 %v1775_v58, %v1734_v41  ;;  %10932 = vmatpush3.msra.mxu0 %v2337_v39 }
 0x2a5   :  { %v1777_v62 = vpop.f32.mrf.mxu0  ;;  %10933 = vmatprep.subr.mxu0 %v2352_v3 }
 0x2a6   :  { %v1818_v63 = vpop.f32.mrf.mxu1  ;;  %vm1823_vm2 = vcmp.gt.f32.partialorder %v1815_v60, 0.0  ;;  %v1827_v0 = vmul.f32 0.2, %v1815_v60  ;;  %v1817_v1 = vadd.f32 %v1816_v59, %v1776_v61  ;;  %10934 = vmatpush3.msra.mxu0 %v2336_v40 }
 0x2a7   :  { %v1778_v2 = vpop.f32.mrf.mxu0 }
 0x2a8   :  { %v1819_v4 = vpop.f32.mrf.mxu1  ;;  %vm1824_vm3 = vcmp.gt.f32.partialorder %v1817_v1, 0.0  ;;  %v1828_v5 = vmul.f32 0.2, %v1817_v1  ;;  %v1831_v6 = vsel %vm1823_vm2, %v1815_v60, %v1827_v0  ;;  %vm3321_vm2 = vcmask 517120  }
 0x2a9   :  { %v1835_v9 = vpack.c.bf16 %v1831_v6, %v1831_v6 }
 0x2aa   :  { %v1832_v7 = vsel %vm1824_vm3, %v1817_v1, %v1828_v5 }
 0x2ab   :  { %v1836_v8 = vpack.c.bf16 %v1832_v7, %v1832_v7 }
 0x2ad   :  { %2294 = vmatprep.mubr.bf16.mxu1 %v1836_v8 }
 0x2ae   :  { %2295 = vmatmul.mubr.bf16.vlgmr.msra.gmra.mxu1 %v1835_v9 }
 0x2af   :  { %10939 = vmatpush3.msra.mxu1 %v2351_v11 }
 0x2b0   :  { %10940 = vmatprep.subr.mxu1 %v2366_v12 }
 0x2b1   :  { %10941 = vmatpush3.msra.mxu1 %v2350_v13 }
 0x2b2   :  { %10942 = vmatprep.subr.mxu1 %v2365_v14 }
 0x2b3   :  { %10943 = vmatpush3.msra.mxu1 %v2349_v15 }
 0x2b4   :  { %10944 = vmatprep.subr.mxu1 %v2364_v18 }
 0x2b5   :  { %10945 = vmatpush3.msra.mxu1 %v2348_v19 }
 0x2b6   :  { %10946 = vmatprep.subr.mxu1 %v2363_v20 }
 0x2b7   :  { %10947 = vmatpush3.msra.mxu1 %v2347_v21 }
 0x2b8   :  { %10948 = vmatprep.subr.mxu1 %v2362_v22  ;;  %v2521_v22 = vld [vmem:[#allocation24 + $0x18] sm:$0xff] }
 0x2b9   :  { %10949 = vmatpush3.msra.mxu1 %v2346_v23  ;;  %v2520_v23 = vld [vmem:[#allocation24 + $0x10] sm:$0xff]  ;;  %2554 = vmatprep.subr.mxu0 %v2521_v22 }
 0x2ba   :  { %10950 = vmatprep.subr.mxu1 %v2361_v24  ;;  %v2519_v24 = vld [vmem:[#allocation24 + $0x8] sm:$0xff] }
 0x2bb   :  { %10951 = vmatpush3.msra.mxu1 %v2345_v25  ;;  %v2518_v25 = vld [vmem:[#allocation24] sm:$0xff] }
 0x2bc   :  { %10952 = vmatprep.subr.mxu1 %v2360_v26  ;;  %v15551_v26 = vmov 0.0  }
 0x2bd   :  { %10953 = vmatpush3.msra.mxu1 %v2344_v28  ;;  %v12247_v28 = vld [vmem:[%s15614_s10 + $0x78] sm:$0xff]  }
 0x2be   :  { %10954 = vmatprep.subr.mxu1 %v2359_v29 }
 0x2bf   :  { %10955 = vmatpush3.msra.mxu1 %v2343_v30 }
 0x2c0   :  { %10956 = vmatprep.subr.mxu1 %v2358_v31 }
 0x2c1   :  { %10957 = vmatpush3.msra.mxu1 %v2342_v32 }
 0x2c2   :  { %10958 = vmatprep.subr.mxu1 %v2357_v33 }
 0x2c3   :  { %10959 = vmatpush3.msra.mxu1 %v2341_v34 }
 0x2c4   :  { %10960 = vmatprep.subr.mxu1 %v2356_v35 }
 0x2c5   :  { %10961 = vmatpush3.msra.mxu1 %v2340_v36 }
 0x2c6   :  { %10962 = vmatprep.subr.mxu1 %v2355_v16 }
 0x2c7   :  { %10963 = vmatpush3.msra.mxu1 %v2339_v17 }
 0x2c8   :  { %10964 = vmatprep.subr.mxu1 %v2354_v27 }
 0x2c9   :  { %10965 = vmatpush3.msra.mxu1 %v2338_v37  ;;  %v2303_v37 = vld [vmem:[%s15615_s3] sm:$0x1] }
 0x2ca   :  { %10966 = vmatprep.subr.mxu1 %v2353_v38 }
 0x2cb   :  { %10967 = vmatpush3.msra.mxu1 %v2337_v39  ;;  %v12248_v39 = vld [vmem:[%s15614_s10 + $0x38] sm:$0xff]  }
 0x2cc   :  { %10968 = vmatprep.subr.mxu1 %v2352_v3 }
 0x2cd   :  { %10969 = vmatpush3.msra.mxu1 %v2336_v40  ;;  %v12249_v40 = vld [vmem:[%s15614_s10 + $0x70] sm:$0xff]  }
 0x2ce   :  { %2628 = vmatprep.subr.mxu1 %v2521_v22 }
 0x32c   :  { %v2255_v41 = vpop.f32.mrf.mxu0 }
 0x32e   :  { %v2257_v42 = vpop.f32.mrf.mxu0 }
 0x330   :  { %v2259_v44 = vpop.f32.mrf.mxu0 }
 0x331   :  { %v12250_v44 = vld [vmem:[%s15614_s10 + $0x30] sm:$0xff]  }
 0x332   :  { %v2260_v45 = vpop.f32.mrf.mxu0 }
 0x36e   :  { %v2296_v46 = vpop.f32.mrf.mxu1 }
 0x36f   :  { %v14211_v47 = vadd.f32 %v2296_v46, %v2255_v41  ;;  %v2304_v41 = vld [vmem:[%s15615_s3 + $0x1] sm:$0x1]  ;;  %v12251_v46 = vld [vmem:[%s15614_s10 + $0x68] sm:$0xff]  }
 0x370   :  { %v2298_v48 = vpop.f32.mrf.mxu1 }
 0x371   :  { %v2306_v50 = vsel %vm2305_vm4, %v14211_v47, 0.0  ;;  %v2320_v51 = vmul.f32 %v14211_v47, %v14211_v47  ;;  %v14217_v52 = vadd.f32 %v2298_v48, %v2257_v42  ;;  %v12252_v48 = vld [vmem:[%s15614_s10 + $0x28] sm:$0xff]  }
 0x372   :  { %v2307_v53 = vrot.slane %v2306_v50, 4  ;;  %v2300_v54 = vpop.f32.mrf.mxu1 }
 0x373   :  { %v2322_v55 = vsel %vm2305_vm4, %v2320_v51, 0.0  ;;  %v2313_v56 = vsel %vm2305_vm4, %v14217_v52, 0.0  ;;  %v2321_v57 = vmul.f32 %v14217_v52, %v14217_v52  ;;  %v12254_v51 = vld [vmem:[%s15614_s10 + $0x20] sm:$0xff]   ;;  %v12256_v54 = vld [vmem:[%s15614_s10 + $0x18] sm:$0xff]  }
 0x374   :  { %v2308_v58 = vadd.f32 %v2307_v53, %v2306_v50  ;;  %v2323_v59 = vrot.slane %v2322_v55, 4  ;;  %v2314_v60 = vrot.slane %v2313_v56, 4  ;;  %v2301_v61 = vpop.f32.mrf.mxu1  ;;  %v12253_v50 = vld [vmem:[%s15614_s10 + $0x60] sm:$0xff]   ;;  %v12255_v53 = vld [vmem:[%s15614_s10 + $0x58] sm:$0xff]  }
 0x375   :  { %v2329_v62 = vsel %vm2305_vm4, %v2321_v57, 0.0  ;;  %v12259_v57 = vld [vmem:[%s15614_s10 + $0x48] sm:$0xff]   ;;  %v2899_v61 = vld [vmem:[%s15616_s30 + $0x78] sm:$0xff] }
 0x376   :  { %v2309_v63 = vrot.slane %v2308_v58, 2  ;;  %v2324_v0 = vadd.f32 %v2323_v59, %v2322_v55  ;;  %v2315_v1 = vadd.f32 %v2314_v60, %v2313_v56  ;;  %v2330_v2 = vrot.slane %v2329_v62, 4  ;;  %v12257_v55 = vld [vmem:[%s15614_s10 + $0x50] sm:$0xff]   ;;  %v12261_v59 = vld [vmem:[%s15614_s10 + $0x40] sm:$0xff]  }
 0x377   :  { %v12258_v56 = vld [vmem:[%s15614_s10 + $0x10] sm:$0xff]   ;;  %v12262_v60 = vld [vmem:[%s15614_s10] sm:$0xff]  }
 0x378   :  { %v2310_v4 = vadd.f32 %v2309_v63, %v2308_v58  ;;  %v2325_v5 = vrot.slane %v2324_v0, 2  ;;  %v2316_v6 = vrot.slane %v2315_v1, 2  ;;  %v2331_v7 = vadd.f32 %v2330_v2, %v2329_v62  ;;  %v12260_v58 = vld [vmem:[%s15614_s10 + $0x8] sm:$0xff]   ;;  %v2898_v62 = vld [vmem:[%s15616_s30 + $0x70] sm:$0xff] }
 0x379   :  { %v2897_v63 = vld [vmem:[%s15616_s30 + $0x68] sm:$0xff]  ;;  %v2894_v2 = vld [vmem:[%s15616_s30 + $0x50] sm:$0xff] }
 0x37a   :  { %v2317_v8 = vadd.f32 %v2316_v6, %v2315_v1  ;;  %v2332_v9 = vrot.slane %v2331_v7, 2  ;;  %v2326_v10 = vadd.f32 %v2325_v5, %v2324_v0  ;;  %v2311_v11 = vrot.slane %v2310_v4, 1  ;;  %v2896_v0 = vld [vmem:[%s15616_s30 + $0x60] sm:$0xff]  ;;  %v2895_v1 = vld [vmem:[%s15616_s30 + $0x58] sm:$0xff] }
 0x37b   :  { %v14264_v5 = vsub.s32 0, %v13927_v43 }
 0x37c   :  { %v2318_v12 = vrot.slane %v2317_v8, 1  ;;  %v2333_v13 = vadd.f32 %v2332_v9, %v2331_v7  ;;  %v2327_v14 = vrot.slane %v2326_v10, 1  ;;  %v2312_v19 = vadd.f32 %v2311_v11, %v2310_v4  ;;  %v2893_v4 = vld [vmem:[%s15616_s30 + $0x48] sm:$0xff] }
 0x37d   :  { %15617 = vst [vmem:[#allocation59_spill] sm:$0xff] %v14264_v5 }
 0x37e   :  { %v2319_v15 = vadd.f32 %v2318_v12, %v2317_v8  ;;  %v2334_v18 = vrot.slane %v2333_v13, 1  ;;  %v2328_v21 = vadd.f32 %v2327_v14, %v2326_v10 }
 0x380   :  { %2432 = vmatprep.mubr.f32.mxu0 %v2319_v15  ;;  %v2335_v20 = vadd.f32 %v2334_v18, %v2333_v13 }
 0x381   :  { %2433 = vmatmul.mubr.f32.vlgmr.msra.gmra.mxu0 %v2312_v19 }
 0x382   :  { %2502 = vmatprep.mubr.f32.mxu1 %v2335_v20  ;;  %2590 = vmatprep.mubr.f32.mxu0 %v15551_v26 }
 0x383   :  { %2503 = vmatmul.mubr.f32.vlgmr.msra.gmra.mxu1 %v2328_v21  ;;  %2555 = vmatpush1.msra.mxu0 %v2520_v23 }
 0x384   :  { %2556 = vmatprep.subr.mxu0 %v2519_v24  ;;  %2629 = vmatpush1.msra.mxu1 %v2520_v23 }
 0x385   :  { %2557 = vmatpush1.msra.mxu0 %v2518_v25  ;;  %2630 = vmatprep.subr.mxu1 %v2519_v24 }
 0x386   :  { %2631 = vmatpush1.msra.mxu1 %v2518_v25  ;;  %2664 = vmatprep.mubr.f32.mxu1 %v15551_v26  ;;  %v2890_v25 = vld [vmem:[%s15616_s30 + $0x30] sm:$0xff] }
 0x387   :  { %11457 = vmatprep.subr.mxu1 %v15551_v26  ;;  %10973 = vmatprep.subr.bf16.mxu0 %v12247_v28  ;;  %v2889_v28 = vld [vmem:[%s15616_s30 + $0x28] sm:$0xff] }
 0x441   :  { %v10935_v29 = vpop.f32.mrf.mxu0 }
 0x443   :  { %v10936_v30 = vpop.f32.mrf.mxu0  ;;  %v10970_v31 = vpop.f32.mrf.mxu1 }
 0x444   :  { %v10937_v32 = vadd.f32 %v10936_v30, %v10935_v29  ;;  %v2888_v29 = vld [vmem:[%s15616_s30 + $0x20] sm:$0xff]  ;;  %v2887_v30 = vld [vmem:[%s15616_s30 + $0x18] sm:$0xff] }
 0x445   :  { %v10971_v33 = vpop.f32.mrf.mxu1 }
 0x446   :  { %v2509_v34 = vmul.f32 0.03125, %v10937_v32  ;;  %v10972_v35 = vadd.f32 %v10971_v33, %v10970_v31  ;;  %v2886_v31 = vld [vmem:[%s15616_s30 + $0x10] sm:$0xff]  ;;  %v2885_v32 = vld [vmem:[%s15616_s30 + $0x8] sm:$0xff]  ;;  %v2884_v33 = vld [vmem:[%s15616_s30] sm:$0xff] }
 0x448   :  { %v2511_v36 = vmul.f32 %v2509_v34, %v2509_v34  ;;  %v2510_v16 = vmul.f32 0.03125, %v10972_v35 }
 0x44a   :  { %v2512_v17 = vsub.f32 %v2510_v16, %v2511_v36 }
 0x44c   :  { %v2513_v27 = vadd.f32 1e-05, %v2512_v17 }
 0x44e   :  { %13096 = vrsqrt.f32 %v2513_v27 }
 0x45b   :  { %v13097_v38 = vpop.eup %13096 }
 0x45c   :  { %v2515_v3 = vmul.f32 %v13097_v38, %v2303_v37 }
 0x45e   :  { %10300 = vmatmul.mubr.msk.f32.vlgmr.msra.gmra.mxu0 %vm2522_vm5, %v2515_v3  ;;  %v2516_v42 = vmul.f32 %v2515_v3, %v2509_v34 }
 0x45f   :  { %10974 = vmatpush3.bf16.msra.mxu0 %v12248_v39 }
 0x460   :  { %v2517_v45 = vsub.f32 %v2304_v41, %v2516_v42  ;;  %10975 = vmatprep.subr.bf16.mxu0 %v12249_v40 }
 0x462   :  { %10301 = vmatmul.mubr.msk.f32.vlgmr.msra.gmra.mxu1 %vm2522_vm5, %v2517_v45 }
 0x463   :  { %10976 = vmatpush3.bf16.msra.mxu0 %v12250_v44  ;;  %11458 = vmatpush3.msra.mxu1 %v2899_v61 }
 0x464   :  { %10977 = vmatprep.subr.bf16.mxu0 %v12251_v46  ;;  %11459 = vmatprep.subr.mxu1 %v15551_v26 }
 0x465   :  { %11460 = vmatpush3.msra.mxu1 %v2898_v62  ;;  %11489 = vmatprep.mubr.msk.f32.mxu1 %vm13660_vm8, %v15551_v26 }
 0x466   :  { %11461 = vmatprep.subr.mxu1 %v15551_v26 }
 0x467   :  { %10978 = vmatpush3.bf16.msra.mxu0 %v12252_v48  ;;  %11462 = vmatpush3.msra.mxu1 %v2897_v63 }
 0x468   :  { %10979 = vmatprep.subr.bf16.mxu0 %v12253_v50  ;;  %11463 = vmatprep.subr.mxu1 %v15551_v26 }
 0x469   :  { %11464 = vmatpush3.msra.mxu1 %v2896_v0 }
 0x46a   :  { %11465 = vmatprep.subr.mxu1 %v15551_v26 }
 0x46b   :  { %10980 = vmatpush3.bf16.msra.mxu0 %v12254_v51  ;;  %11466 = vmatpush3.msra.mxu1 %v2895_v1 }
 0x46c   :  { %10981 = vmatprep.subr.bf16.mxu0 %v12255_v53  ;;  %11467 = vmatprep.subr.mxu1 %v15551_v26 }
 0x46d   :  { %11468 = vmatpush3.msra.mxu1 %v2894_v2 }
 0x46e   :  { %11469 = vmatprep.subr.mxu1 %v15551_v26 }
 0x46f   :  { %10982 = vmatpush3.bf16.msra.mxu0 %v12256_v54  ;;  %11470 = vmatpush3.msra.mxu1 %v2893_v4  ;;  %v14318_v54 = vld [vmem:[#allocation25 + $0x18] sm:$0xff] }
 0x470   :  { %10983 = vmatprep.subr.bf16.mxu0 %v12257_v55  ;;  %11471 = vmatprep.subr.mxu1 %v15551_v26  ;;  %v14320_v55 = vld [vmem:[#allocation25 + $0x10] sm:$0xff] }
 0x473   :  { %10984 = vmatpush3.bf16.msra.mxu0 %v12258_v56  ;;  %v14324_v56 = vld [vmem:[#allocation25 + $0x8] sm:$0xff] }
 0x474   :  { %10985 = vmatprep.subr.bf16.mxu0 %v12259_v57  ;;  %v14328_v57 = vld [vmem:[#allocation25] sm:$0xff] }
 0x477   :  { %10986 = vmatpush3.bf16.msra.mxu0 %v12260_v58  ;;  %v12263_v58 = vld [vmem:[%s15618_s1 + $0xe0] ss:$16 sps:$4 sm:$0xff]  }
 0x478   :  { %10987 = vmatprep.subr.bf16.mxu0 %v12261_v59  ;;  %v12265_v59 = vld [vmem:[%s15618_s1 + $0xe4] ss:$16 sps:$4 sm:$0xff]  }
 0x47b   :  { %10988 = vmatpush3.bf16.msra.mxu0 %v12262_v60  ;;  %v12268_v60 = vld [vmem:[%s15618_s1 + $0xc4] ss:$16 sps:$4 sm:$0xff]  }
 0x47c   :  { %11492 = vmatprep.subr.mxu0 %v15551_v26 }
 0x51e   :  { %v2592_v6 = vpop.f32.mrf.mxu0 }
 0x51f   :  { %v2674_v7 = vrot.slane %v2592_v6, %v14264_v5  ;;  %v12280_v6 = vld [vmem:[%s15618_s1 + $0x44] ss:$16 sps:$4 sm:$0xff]  }
 0x520   :  { %v2594_v8 = vpop.f32.mrf.mxu0 }
 0x521   :  { %v2678_v9 = vrot.slane %v2594_v8, %v14264_v5  ;;  %v2679_v11 = vmul.f32 %v2674_v7, %v14211_v47  ;;  %v2892_v47 = vld [vmem:[%s15616_s30 + $0x40] sm:$0xff] }
 0x522   :  { %v2666_v10 = vpop.f32.mrf.mxu1  ;;  %11472 = vmatpush3.msra.mxu1 %v2892_v47  ;;  %v12278_v7 = vld [vmem:[%s15618_s1 + $0x40] ss:$16 sps:$4 sm:$0xff]   ;;  %v12283_v8 = vld [vmem:[%s15618_s1 + $0x24] ss:$16 sps:$4 sm:$0xff]  }
 0x523   :  { %v2684_v12 = vrot.slane %v2666_v10, %v14264_v5  ;;  %v2680_v14 = vmul.f32 %v2678_v9, %v14217_v52  ;;  %11473 = vmatprep.subr.mxu1 %v15551_v26  ;;  %v2891_v52 = vld [vmem:[%s15616_s30 + $0x38] sm:$0xff]  ;;  %v12281_v9 = vld [vmem:[%s15618_s1 + $0x20] ss:$16 sps:$4 sm:$0xff]   ;;  %v12286_v10 = vld [vmem:[%s15618_s1 + $0x4] ss:$16 sps:$4 sm:$0xff]  }
 0x524   :  { %v2668_v13 = vpop.f32.mrf.mxu1  ;;  %11474 = vmatpush3.msra.mxu1 %v2891_v52 }
 0x525   :  { %v2689_v15 = vadd.f32 %v2684_v12, %v2679_v11  ;;  %v2688_v18 = vrot.slane %v2668_v13, %v14264_v5  ;;  %11475 = vmatprep.subr.mxu1 %v15551_v26  ;;  %v12284_v11 = vld [vmem:[%s15618_s1] ss:$16 sps:$4 sm:$0xff]   ;;  %v12289_v12 = vld [vmem:[%s15618_s1 + $0x1e4] ss:$16 sps:$4 sm:$0xff]  }
 0x526   :  { %11476 = vmatpush3.msra.mxu1 %v2890_v25  ;;  %v12287_v13 = vld [vmem:[%s15618_s1 + $0x1e0] ss:$16 sps:$4 sm:$0xff]  }
 0x527   :  { %vm2691_vm6 = vcmp.gt.f32.partialorder %v2689_v15, 0.0  ;;  %v2693_v43 = vmul.f32 0.2, %v2689_v15  ;;  %v2690_v19 = vadd.f32 %v2688_v18, %v2680_v14  ;;  %11477 = vmatprep.subr.mxu1 %v15551_v26  ;;  %v12293_v14 = vld [vmem:[%s15618_s1 + $0x1c4] ss:$16 sps:$4 sm:$0xff]  }
 0x528   :  { %11478 = vmatpush3.msra.mxu1 %v2889_v28  ;;  %v12297_v18 = vld [vmem:[%s15618_s1 + $0x1a4] ss:$16 sps:$4 sm:$0xff]  }
 0x529   :  { %v2694_v20 = vmul.f32 0.2, %v2690_v19  ;;  %vm2692_vm7 = vcmp.gt.f32.partialorder %v2690_v19, 0.0  ;;  %v2695_v21 = vsel %vm2691_vm6, %v2689_v15, %v2693_v43  ;;  %11479 = vmatprep.subr.mxu1 %v15551_v26  ;;  %v12291_v15 = vld [vmem:[%s15618_s1 + $0x1c0] ss:$16 sps:$4 sm:$0xff]   ;;  %vm6317_vm6 = vcmask 523264  }
 0x52a   :  { %v2697_v24 = vpack.c.bf16 %v2695_v21, %v2695_v21  ;;  %11480 = vmatpush3.msra.mxu1 %v2888_v29  ;;  %v12295_v43 = vld [vmem:[%s15618_s1 + $0x1a0] ss:$16 sps:$4 sm:$0xff]  }
 0x52b   :  { %v2696_v22 = vsel %vm2692_vm7, %v2690_v19, %v2694_v20  ;;  %11481 = vmatprep.subr.mxu1 %v15551_v26  ;;  %v12301_v19 = vld [vmem:[%s15618_s1 + $0x184] ss:$16 sps:$4 sm:$0xff]   ;;  %v12299_v20 = vld [vmem:[%s15618_s1 + $0x180] ss:$16 sps:$4 sm:$0xff]  }
 0x52c   :  { %v2698_v23 = vpack.c.bf16 %v2696_v22, %v2696_v22  ;;  %11482 = vmatpush3.msra.mxu1 %v2887_v30 }
 0x52d   :  { %11483 = vmatprep.subr.mxu1 %v15551_v26 }
 0x52e   :  { %2859 = vmatprep.mubr.bf16.mxu0 %v2698_v23  ;;  %11484 = vmatpush3.msra.mxu1 %v2886_v31 }
 0x52f   :  { %2860 = vmatmul.mubr.bf16.vlgmr.msra.gmra.mxu0 %v2697_v24  ;;  %11485 = vmatprep.subr.mxu1 %v15551_v26 }
 0x530   :  { %11493 = vmatpush3.msra.mxu0 %v2899_v61  ;;  %11486 = vmatpush3.msra.mxu1 %v2885_v32  ;;  %v12266_v61 = vld [vmem:[%s15618_s1 + $0xc0] ss:$16 sps:$4 sm:$0xff]  }
 0x531   :  { %11494 = vmatprep.subr.mxu0 %v15551_v26  ;;  %11487 = vmatprep.subr.mxu1 %v15551_v26 }
 0x532   :  { %11495 = vmatpush3.msra.mxu0 %v2898_v62  ;;  %11488 = vmatpush3.msra.mxu1 %v2884_v33  ;;  %v12271_v62 = vld [vmem:[%s15618_s1 + $0xa4] ss:$16 sps:$4 sm:$0xff]  }
 0x533   :  { %11496 = vmatprep.subr.mxu0 %v15551_v26  ;;  %11524 = vmatprep.mubr.msk.f32.mxu0 %vm13660_vm8, %v15551_v26 }
 0x534   :  { %11497 = vmatpush3.msra.mxu0 %v2897_v63  ;;  %11527 = vmatprep.subr.mxu1 %v15551_v26  ;;  %v12269_v63 = vld [vmem:[%s15618_s1 + $0xa0] ss:$16 sps:$4 sm:$0xff]  }
 0x535   :  { %11498 = vmatprep.subr.mxu0 %v15551_v26 }
 0x536   :  { %11499 = vmatpush3.msra.mxu0 %v2896_v0  ;;  %v12274_v0 = vld [vmem:[%s15618_s1 + $0x84] ss:$16 sps:$4 sm:$0xff]  }
 0x537   :  { %11500 = vmatprep.subr.mxu0 %v15551_v26 }
 0x538   :  { %11501 = vmatpush3.msra.mxu0 %v2895_v1  ;;  %v12272_v1 = vld [vmem:[%s15618_s1 + $0x80] ss:$16 sps:$4 sm:$0xff]  }
 0x539   :  { %11502 = vmatprep.subr.mxu0 %v15551_v26 }
 0x53a   :  { %11503 = vmatpush3.msra.mxu0 %v2894_v2  ;;  %v12277_v2 = vld [vmem:[%s15618_s1 + $0x64] ss:$16 sps:$4 sm:$0xff]  }
 0x53b   :  { %11504 = vmatprep.subr.mxu0 %v15551_v26 }
 0x53c   :  { %11505 = vmatpush3.msra.mxu0 %v2893_v4  ;;  %v12275_v4 = vld [vmem:[%s15618_s1 + $0x60] ss:$16 sps:$4 sm:$0xff]  }
 0x53d   :  { %11506 = vmatprep.subr.mxu0 %v15551_v26 }
 0x53e   :  { %11507 = vmatpush3.msra.mxu0 %v2892_v47 }
 0x53f   :  { %11508 = vmatprep.subr.mxu0 %v15551_v26 }
 0x540   :  { %11509 = vmatpush3.msra.mxu0 %v2891_v52 }
 0x541   :  { %11510 = vmatprep.subr.mxu0 %v15551_v26 }
 0x542   :  { %11511 = vmatpush3.msra.mxu0 %v2890_v25 }
 0x543   :  { %11512 = vmatprep.subr.mxu0 %v15551_v26 }
 0x544   :  { %11513 = vmatpush3.msra.mxu0 %v2889_v28 }
 0x545   :  { %11514 = vmatprep.subr.mxu0 %v15551_v26 }
 0x546   :  { %11515 = vmatpush3.msra.mxu0 %v2888_v29 }
 0x547   :  { %11516 = vmatprep.subr.mxu0 %v15551_v26 }
 0x548   :  { %11517 = vmatpush3.msra.mxu0 %v2887_v30  ;;  %v2867_v30 = vld [vmem:[#allocation4] sm:$0x1] }
 0x549   :  { %11518 = vmatprep.subr.mxu0 %v15551_v26 }
 0x54a   :  { %11519 = vmatpush3.msra.mxu0 %v2886_v31 }
 0x54b   :  { %11520 = vmatprep.subr.mxu0 %v15551_v26 }
 0x54c   :  { %11521 = vmatpush3.msra.mxu0 %v2885_v32 }
 0x54d   :  { %11522 = vmatprep.subr.mxu0 %v15551_v26 }
 0x54e   :  { %11523 = vmatpush3.msra.mxu0 %v2884_v33 }
 0x54f   :  { %4553 = vmatprep.subr.bf16.mxu0 %v12265_v59  ;;  %v12322_v59 = vld [vmem:[%s15618_s1 + $0x4e0] ss:$16 sps:$4 sm:$0xff]  }
 0x5ef   :  { %v10989_v34 = vpop.f32.mrf.mxu0 }
 0x5f1   :  { %v10990_v35 = vpop.f32.mrf.mxu0 }
 0x5f2   :  { %v14309_v36 = vadd.f32 %v10990_v35, %v10989_v34  ;;  %v2868_v34 = vld [vmem:[#allocation4 + $0x1] sm:$0x1]  ;;  %v12290_v35 = vld [vmem:[%s15619_s24 + $0x38] sm:$0xff]  }
 0x5f3   :  { %v10992_v16 = vpop.f32.mrf.mxu0 }
 0x5f4   :  { %v2869_v17 = vsel %vm2305_vm4, %v14309_v36, 0.0  ;;  %v2876_v27 = vmul.f32 %v14309_v36, %v14309_v36 }
 0x5f5   :  { %v2870_v37 = vrot.slane %v2869_v17, 4  ;;  %v10993_v38 = vpop.f32.mrf.mxu0 }
 0x5f6   :  { %v2877_v39 = vsel %vm2305_vm4, %v2876_v27, 0.0  ;;  %v12298_v27 = vld [vmem:[%s15619_s24 + $0x28] sm:$0xff]   ;;  %v12305_v38 = vld [vmem:[%s15618_s1 + $0x164] ss:$16 sps:$4 sm:$0xff]  }
 0x5f7   :  { %v2871_v3 = vadd.f32 %v2870_v37, %v2869_v17  ;;  %v2878_v40 = vrot.slane %v2877_v39, 4  ;;  %v12294_v17 = vld [vmem:[%s15619_s24 + $0x30] sm:$0xff]   ;;  %v12302_v37 = vld [vmem:[%s15619_s24 + $0x20] sm:$0xff]  }
 0x5f9   :  { %v2872_v41 = vrot.slane %v2871_v3, 2  ;;  %v2879_v42 = vadd.f32 %v2878_v40, %v2877_v39  ;;  %v12303_v39 = vld [vmem:[%s15618_s1 + $0x160] ss:$16 sps:$4 sm:$0xff]  }
 0x5fa   :  { %v12307_v40 = vld [vmem:[%s15618_s1 + $0x140] ss:$16 sps:$4 sm:$0xff]  }
 0x5fb   :  { %v2873_v44 = vadd.f32 %v2872_v41, %v2871_v3  ;;  %v2880_v45 = vrot.slane %v2879_v42, 2  ;;  %v12306_v3 = vld [vmem:[%s15619_s24 + $0x18] sm:$0xff]   ;;  %v12309_v41 = vld [vmem:[%s15618_s1 + $0x144] ss:$16 sps:$4 sm:$0xff]  }
 0x5fd   :  { %v2874_v46 = vrot.slane %v2873_v44, 1  ;;  %v2881_v48 = vadd.f32 %v2880_v45, %v2879_v42  ;;  %v12310_v42 = vld [vmem:[%s15619_s24 + $0x10] sm:$0xff]  }
 0x5fe   :  { %v12311_v45 = vld [vmem:[%s15618_s1 + $0x120] ss:$16 sps:$4 sm:$0xff]  }
 0x5ff   :  { %v2875_v50 = vadd.f32 %v2874_v46, %v2873_v44  ;;  %v2882_v51 = vrot.slane %v2881_v48, 1  ;;  %v12313_v44 = vld [vmem:[%s15618_s1 + $0x124] ss:$16 sps:$4 sm:$0xff]   ;;  %v12314_v46 = vld [vmem:[%s15619_s24 + $0x8] sm:$0xff]  }
 0x601   :  { %11490 = vmatmul.mubr.f32.vlgmr.msra.gmra.mxu1 %v2875_v50  ;;  %v2883_v53 = vadd.f32 %v2882_v51, %v2881_v48  ;;  %v14392_v48 = vld [vmem:[%s15620_s2] sm:$0xff] }
 0x602   :  { %11535 = vmatprep.mubr.msk.f32.mxu1 %vm13660_vm8, %v15551_v26  ;;  %11528 = vmatpush3.msra.mxu1 %v14318_v54  ;;  %v12317_v50 = vld [vmem:[%s15618_s1 + $0x104] ss:$16 sps:$4 sm:$0xff]   ;;  %v3371_v51 = vrot.slane %v14392_v48, %v13935_v49 }
 0x603   :  { %11525 = vmatmul.mubr.f32.vlgmr.msra.gmra.mxu0 %v2883_v53  ;;  %11529 = vmatprep.subr.mxu1 %v15551_v26  ;;  %v12315_v53 = vld [vmem:[%s15618_s1 + $0x100] ss:$16 sps:$4 sm:$0xff]  }
 0x604   :  { %11530 = vmatpush3.msra.mxu1 %v14320_v55  ;;  %4554 = vmatpush1.bf16.msra.mxu0 %v12263_v58  ;;  %v12324_v58 = vld [vmem:[%s15618_s1 + $0x4e4] ss:$16 sps:$4 sm:$0xff]  }
 0x605   :  { %11531 = vmatprep.subr.mxu1 %v15551_v26  ;;  %4555 = vmatprep.subr.bf16.mxu0 %v12268_v60  ;;  %v14405_v60 = vpack.c.bf16 %v3371_v51, %v3371_v51 }
 0x606   :  { %11532 = vmatpush3.msra.mxu1 %v14324_v56 }
 0x607   :  { %11533 = vmatprep.subr.mxu1 %v15551_v26 }
 0x608   :  { %11534 = vmatpush3.msra.mxu1 %v14328_v57  ;;  %4556 = vmatpush1.bf16.msra.mxu0 %v12266_v61  ;;  %v12328_v61 = vld [vmem:[%s15618_s1 + $0x4c0] ss:$16 sps:$4 sm:$0xff]  }
 0x609   :  { %11538 = vmatprep.subr.mxu1 %v15551_v26  ;;  %4557 = vmatprep.subr.bf16.mxu0 %v12271_v62  ;;  %v12330_v62 = vld [vmem:[%s15618_s1 + $0x4c4] ss:$16 sps:$4 sm:$0xff]  }
 0x60c   :  { %4558 = vmatpush1.bf16.msra.mxu0 %v12269_v63  ;;  %v12334_v63 = vld [vmem:[%s15618_s1 + $0x4a0] ss:$16 sps:$4 sm:$0xff]  }
 0x60d   :  { %4559 = vmatprep.subr.bf16.mxu0 %v12274_v0  ;;  %v12336_v0 = vld [vmem:[%s15618_s1 + $0x4a4] ss:$16 sps:$4 sm:$0xff]  }
 0x610   :  { %4560 = vmatpush1.bf16.msra.mxu0 %v12272_v1  ;;  %v12340_v1 = vld [vmem:[%s15618_s1 + $0x480] ss:$16 sps:$4 sm:$0xff]  }
 0x611   :  { %4561 = vmatprep.subr.bf16.mxu0 %v12277_v2  ;;  %v12342_v2 = vld [vmem:[%s15618_s1 + $0x484] ss:$16 sps:$4 sm:$0xff]  }
 0x614   :  { %4562 = vmatpush1.bf16.msra.mxu0 %v12275_v4  ;;  %v12346_v4 = vld [vmem:[%s15618_s1 + $0x460] ss:$16 sps:$4 sm:$0xff]  }
 0x615   :  { %4563 = vmatprep.subr.bf16.mxu0 %v12280_v6  ;;  %v12348_v6 = vld [vmem:[%s15618_s1 + $0x464] ss:$16 sps:$4 sm:$0xff]  }
 0x618   :  { %4564 = vmatpush1.bf16.msra.mxu0 %v12278_v7  ;;  %v12352_v7 = vld [vmem:[%s15618_s1 + $0x440] ss:$16 sps:$4 sm:$0xff]  }
 0x619   :  { %4565 = vmatprep.subr.bf16.mxu0 %v12283_v8  ;;  %v12354_v8 = vld [vmem:[%s15618_s1 + $0x444] ss:$16 sps:$4 sm:$0xff]  }
 0x61c   :  { %4566 = vmatpush1.bf16.msra.mxu0 %v12281_v9  ;;  %v12358_v9 = vld [vmem:[%s15618_s1 + $0x420] ss:$16 sps:$4 sm:$0xff]  }
 0x61d   :  { %4567 = vmatprep.subr.bf16.mxu0 %v12286_v10  ;;  %v12360_v10 = vld [vmem:[%s15618_s1 + $0x424] ss:$16 sps:$4 sm:$0xff]  }
 0x620   :  { %4568 = vmatpush1.bf16.msra.mxu0 %v12284_v11  ;;  %v12364_v11 = vld [vmem:[%s15618_s1 + $0x400] ss:$16 sps:$4 sm:$0xff]  }
 0x621   :  { %4569 = vmatprep.subr.bf16.mxu0 %v12289_v12  ;;  %v12366_v12 = vld [vmem:[%s15618_s1 + $0x404] ss:$16 sps:$4 sm:$0xff]  }
 0x624   :  { %4570 = vmatpush2.bf16.msra.mxu0 %v12287_v13  ;;  %v12370_v13 = vld [vmem:[%s15618_s1 + $0x5e0] ss:$16 sps:$4 sm:$0xff]  }
 0x625   :  { %4571 = vmatprep.subr.bf16.mxu0 %v12293_v14  ;;  %v12372_v14 = vld [vmem:[%s15618_s1 + $0x5e4] ss:$16 sps:$4 sm:$0xff]  }
 0x628   :  { %4572 = vmatpush2.bf16.msra.mxu0 %v12291_v15  ;;  %v12376_v15 = vld [vmem:[%s15618_s1 + $0x5c0] ss:$16 sps:$4 sm:$0xff]  }
 0x629   :  { %4573 = vmatprep.subr.bf16.mxu0 %v12297_v18  ;;  %v12378_v18 = vld [vmem:[%s15618_s1 + $0x5c4] ss:$16 sps:$4 sm:$0xff]  }
 0x62c   :  { %4574 = vmatpush2.bf16.msra.mxu0 %v12295_v43  ;;  %v12382_v43 = vld [vmem:[%s15618_s1 + $0x5a0] ss:$16 sps:$4 sm:$0xff]  }
 0x62d   :  { %4575 = vmatprep.subr.bf16.mxu0 %v12301_v19  ;;  %v12384_v19 = vld [vmem:[%s15618_s1 + $0x5a4] ss:$16 sps:$4 sm:$0xff]  }
 0x630   :  { %4576 = vmatpush2.bf16.msra.mxu0 %v12299_v20  ;;  %v12388_v20 = vld [vmem:[%s15618_s1 + $0x580] ss:$16 sps:$4 sm:$0xff]  }
 0x631   :  { %4577 = vmatprep.subr.bf16.mxu0 %v12305_v38  ;;  %v12425_v38 = vld [vmem:[%s15618_s1 + $0x2c8] ss:$16 sps:$4 sm:$0xff]  }
 0x634   :  { %4578 = vmatpush2.bf16.msra.mxu0 %v12303_v39  ;;  %v12427_v39 = vld [vmem:[%s15618_s1 + $0x2cc] ss:$16 sps:$4 sm:$0xff]  }
 0x635   :  { %4579 = vmatprep.subr.bf16.mxu0 %v12309_v41  ;;  %v12437_v41 = vld [vmem:[%s15618_s1 + $0x288] ss:$16 sps:$4 sm:$0xff]  }
 0x638   :  { %4580 = vmatpush2.bf16.msra.mxu0 %v12307_v40  ;;  %v12433_v40 = vld [vmem:[%s15618_s1 + $0x2ac] ss:$16 sps:$4 sm:$0xff]  }
 0x639   :  { %4581 = vmatprep.subr.bf16.mxu0 %v12313_v44  ;;  %v12443_v44 = vld [vmem:[%s15618_s1 + $0x268] ss:$16 sps:$4 sm:$0xff]  }
 0x63c   :  { %4582 = vmatpush2.bf16.msra.mxu0 %v12311_v45  ;;  %v12445_v45 = vld [vmem:[%s15618_s1 + $0x26c] ss:$16 sps:$4 sm:$0xff]  }
 0x63d   :  { %4583 = vmatprep.subr.bf16.mxu0 %v12317_v50  ;;  %v12455_v50 = vld [vmem:[%s15618_s1 + $0x228] ss:$16 sps:$4 sm:$0xff]  }
 0x640   :  { %4584 = vmatpush2.bf16.msra.mxu0 %v12315_v53  ;;  %v12461_v53 = vld [vmem:[%s15618_s1 + $0x208] ss:$16 sps:$4 sm:$0xff]  }
 0x641   :  { %4635 = vmatprep.subr.bf16.mxu0 %v12324_v58  ;;  %v12473_v58 = vld [vmem:[%s15618_s1 + $0x3c8] ss:$16 sps:$4 sm:$0xff]  }
 0x6c1   :  { %v2966_v21 = vpop.f32.mrf.mxu1 }
 0x6c2   :  { %v3041_v22 = vmul.f32 0.125, %v2966_v21  ;;  %v12390_v21 = vld [vmem:[%s15618_s1 + $0x584] ss:$16 sps:$4 sm:$0xff]  }
 0x6c3   :  { %v11491_v23 = vpop.f32.mrf.mxu1  ;;  %v3036_v24 = vpop.f32.mrf.mxu0 }
 0x6c4   :  { %v3043_v47 = vmul.f32 %v3041_v22, %v3041_v22  ;;  %v3042_v52 = vmul.f32 0.125, %v3036_v24  ;;  %v12396_v23 = vld [vmem:[%s15618_s1 + $0x564] ss:$16 sps:$4 sm:$0xff]   ;;  %v12400_v24 = vld [vmem:[%s15618_s1 + $0x540] ss:$16 sps:$4 sm:$0xff]  }
 0x6c5   :  { %v11526_v25 = vpop.f32.mrf.mxu0 }
 0x6c6   :  { %v3044_v28 = vsub.f32 %v3042_v52, %v3043_v47  ;;  %v12402_v47 = vld [vmem:[%s15618_s1 + $0x544] ss:$16 sps:$4 sm:$0xff]   ;;  %v12406_v52 = vld [vmem:[%s15618_s1 + $0x520] ss:$16 sps:$4 sm:$0xff]  }
 0x6c7   :  { %v12408_v25 = vld [vmem:[%s15618_s1 + $0x524] ss:$16 sps:$4 sm:$0xff]  }
 0x6c8   :  { %v3045_v29 = vadd.f32 1e-05, %v3044_v28  ;;  %v3364_v28 = vcombine.high %v14392_v48, %v14392_v48  ;;  %v12451_v48 = vld [vmem:[%s15618_s1 + $0x24c] ss:$16 sps:$4 sm:$0xff]  }
 0x6ca   :  { %13098 = vrsqrt.f32 %v3045_v29  ;;  %v14440_v29 = vrot.slane %v3364_v28, %v13935_v49  ;;  %v12339_v28 = vld [vmem:[%s15618_s1 + $0x284] ss:$16 sps:$4 sm:$0xff]  }
 0x6cb   :  { %v15374_v49 = vld [vmem:[%s13830_s21] sm:$0xff] }
 0x6cc   :  { %15653 = vst [vmem:[#allocation88_spill] sm:$0xff] %v15374_v49 }
 0x6d7   :  { %v13099_v31 = vpop.eup %13098 }
 0x6d8   :  { %v3047_v32 = vmul.f32 %v13099_v31, %v2867_v30  ;;  %v12412_v30 = vld [vmem:[%s15618_s1 + $0x500] ss:$16 sps:$4 sm:$0xff]   ;;  %v12414_v31 = vld [vmem:[%s15618_s1 + $0x504] ss:$16 sps:$4 sm:$0xff]  }
 0x6da   :  { %11536 = vmatmul.mubr.msk.f32.vlgmr.msra.gmra.mxu1 %vm3054_vm9, %v3047_v32  ;;  %v3048_v33 = vmul.f32 %v3047_v32, %v3041_v22  ;;  %v12394_v22 = vld [vmem:[%s15618_s1 + $0x560] ss:$16 sps:$4 sm:$0xff]   ;;  %v10328_v32 = vld.sshfl [vmem:[%s15620_s2 + $0x8] sm:$0x33 pattern:$0x76325410] }
 0x6db   :  { %11539 = vmatpush3.msra.mxu1 %v14318_v54  ;;  %11546 = vmatprep.mubr.msk.f32.mxu1 %vm13660_vm8, %v15551_v26  ;;  %v12318_v54 = vld [vmem:[%s15619_s24] sm:$0xff]  }
 0x6dc   :  { %11540 = vmatprep.subr.mxu1 %v15551_v26  ;;  %v3049_v16 = vsub.f32 %v2868_v34, %v3048_v33  ;;  %v3380_v33 = vcombine.high %v14440_v29, %v14440_v29  ;;  %v3388_v34 = vcombine.high %v10328_v32, %v10328_v32 }
 0x6dd   :  { %11541 = vmatpush3.msra.mxu1 %v14320_v55  ;;  %v3379_v55 = vcombine.high %v3371_v51, %v3371_v51  ;;  %v12457_v51 = vld [vmem:[%s15618_s1 + $0x22c] ss:$16 sps:$4 sm:$0xff]  }
 0x6de   :  { %11542 = vmatprep.subr.mxu1 %v15551_v26 }
 0x6df   :  { %11543 = vmatpush3.msra.mxu1 %v14324_v56  ;;  %v14400_v56 = vpack.c.bf16 %v3379_v55, %v3379_v55  ;;  %v12467_v55 = vld [vmem:[%s15618_s1 + $0x3e8] ss:$16 sps:$4 sm:$0xff]  }
 0x6e0   :  { %11544 = vmatprep.subr.mxu1 %v15551_v26 }
 0x6e1   :  { %11545 = vmatpush3.msra.mxu1 %v14328_v57  ;;  %v12321_v57 = vld [vmem:[%s15618_s1 + $0x2e4] ss:$16 sps:$4 sm:$0xff]   ;;  %4585 = vmatprep.mubr.bf16.mxu0 %v14400_v56 }
 0x6e2   :  { %11547 = vmatmul.mubr.msk.f32.vlgmr.msra.gmra.mxu1 %vm3054_vm9, %v3049_v16  ;;  %11549 = vmatprep.subr.bf16.mxu1 %v15551_v26  ;;  %v12421_v16 = vld [vmem:[%s15618_s1 + $0x2ec] ss:$16 sps:$4 sm:$0xff]  }
 0x6e3   :  { %11550 = vmatpush3.bf16.msra.mxu1 %v12290_v35  ;;  %11565 = vmatprep.mubr.msk.bf16.mxu1 %vm13660_vm8, %v15551_v26  ;;  %v14447_v35 = vpack.c.bf16 %v3388_v34, %v3388_v34  ;;  %v12357_v34 = vld [vmem:[%s15618_s1 + $0x224] ss:$16 sps:$4 sm:$0xff]  }
 0x6e4   :  { %11551 = vmatprep.subr.bf16.mxu1 %v15551_v26  ;;  %4586 = vmatmul.mubr.bf16.vlgmr.msra.gmra.mxu0 %v14405_v60 }
 0x6e5   :  { %4636 = vmatpush1.bf16.msra.mxu0 %v12322_v59  ;;  %4667 = vmatprep.mubr.bf16.mxu0 %v14447_v35  ;;  %v12475_v59 = vld [vmem:[%s15618_s1 + $0x3cc] ss:$16 sps:$4 sm:$0xff]  }
 0x6e6   :  { %4637 = vmatprep.subr.bf16.mxu0 %v12330_v62  ;;  %v12481_v62 = vld [vmem:[%s15618_s1 + $0x3ac] ss:$16 sps:$4 sm:$0xff]  }
 0x6e7   :  { %11552 = vmatpush3.bf16.msra.mxu1 %v12294_v17  ;;  %v14450_v17 = vpack.c.bf16 %v10328_v32, %v10328_v32  ;;  %v12351_v32 = vld [vmem:[%s15618_s1 + $0x244] ss:$16 sps:$4 sm:$0xff]  }
 0x6e8   :  { %11553 = vmatprep.subr.bf16.mxu1 %v15551_v26 }
 0x6e9   :  { %4638 = vmatpush1.bf16.msra.mxu0 %v12328_v61  ;;  %v12479_v61 = vld [vmem:[%s15618_s1 + $0x3a8] ss:$16 sps:$4 sm:$0xff]  }
 0x6ea   :  { %4639 = vmatprep.subr.bf16.mxu0 %v12336_v0  ;;  %v12487_v0 = vld [vmem:[%s15618_s1 + $0x38c] ss:$16 sps:$4 sm:$0xff]  }
 0x6eb   :  { %11554 = vmatpush3.bf16.msra.mxu1 %v12298_v27  ;;  %v12419_v27 = vld [vmem:[%s15618_s1 + $0x2e8] ss:$16 sps:$4 sm:$0xff]  }
 0x6ec   :  { %11555 = vmatprep.subr.bf16.mxu1 %v15551_v26 }
 0x6ed   :  { %4640 = vmatpush1.bf16.msra.mxu0 %v12334_v63  ;;  %v12485_v63 = vld [vmem:[%s15618_s1 + $0x388] ss:$16 sps:$4 sm:$0xff]  }
 0x6ee   :  { %4641 = vmatprep.subr.bf16.mxu0 %v12342_v2  ;;  %v12491_v2 = vld [vmem:[%s15618_s1 + $0x368] ss:$16 sps:$4 sm:$0xff]  }
 0x6ef   :  { %11556 = vmatpush3.bf16.msra.mxu1 %v12302_v37  ;;  %v14453_v37 = vpack.c.bf16 %v3380_v33, %v3380_v33  ;;  %v12349_v33 = vld [vmem:[%s15618_s1 + $0x240] ss:$16 sps:$4 sm:$0xff]  }
 0x6f0   :  { %11557 = vmatprep.subr.bf16.mxu1 %v15551_v26 }
 0x6f1   :  { %4642 = vmatpush1.bf16.msra.mxu0 %v12340_v1 }
 0x6f2   :  { %4643 = vmatprep.subr.bf16.mxu0 %v12348_v6 }
 0x6f3   :  { %11558 = vmatpush3.bf16.msra.mxu1 %v12306_v3  ;;  %v12431_v3 = vld [vmem:[%s15618_s1 + $0x2a8] ss:$16 sps:$4 sm:$0xff]  }
 0x6f4   :  { %11559 = vmatprep.subr.bf16.mxu1 %v15551_v26 }
 0x6f5   :  { %4644 = vmatpush1.bf16.msra.mxu0 %v12346_v4  ;;  %v12493_v4 = vld [vmem:[%s15618_s1 + $0x36c] ss:$16 sps:$4 sm:$0xff]  }
 0x6f6   :  { %4645 = vmatprep.subr.bf16.mxu0 %v12354_v8  ;;  %v12499_v8 = vld [vmem:[%s15618_s1 + $0x34c] ss:$16 sps:$4 sm:$0xff]  }
 0x6f7   :  { %11560 = vmatpush3.bf16.msra.mxu1 %v12310_v42  ;;  %v12439_v42 = vld [vmem:[%s15618_s1 + $0x28c] ss:$16 sps:$4 sm:$0xff]  }
 0x6f8   :  { %11561 = vmatprep.subr.bf16.mxu1 %v15551_v26 }
 0x6f9   :  { %4646 = vmatpush1.bf16.msra.mxu0 %v12352_v7  ;;  %v12497_v7 = vld [vmem:[%s15618_s1 + $0x348] ss:$16 sps:$4 sm:$0xff]  }
 0x6fa   :  { %4647 = vmatprep.subr.bf16.mxu0 %v12360_v10 }
 0x6fb   :  { %11562 = vmatpush3.bf16.msra.mxu1 %v12314_v46  ;;  %v12449_v46 = vld [vmem:[%s15618_s1 + $0x248] ss:$16 sps:$4 sm:$0xff]  }
 0x6fc   :  { %11563 = vmatprep.subr.bf16.mxu1 %v15551_v26 }
 0x6fd   :  { %4648 = vmatpush1.bf16.msra.mxu0 %v12358_v9 }
 0x6fe   :  { %4649 = vmatprep.subr.bf16.mxu0 %v12366_v12  ;;  %v12505_v12 = vld [vmem:[%s15618_s1 + $0x32c] ss:$16 sps:$4 sm:$0xff]  }
 0x6ff   :  { %11564 = vmatpush3.bf16.msra.mxu1 %v12318_v54  ;;  %v12463_v54 = vld [vmem:[%s15618_s1 + $0x20c] ss:$16 sps:$4 sm:$0xff]  }
 0x700   :  { %4594 = vmatprep.subr.bf16.mxu1 %v12321_v57  ;;  %v12469_v57 = vld [vmem:[%s15618_s1 + $0x3ec] ss:$16 sps:$4 sm:$0xff]  }
 0x701   :  { %4650 = vmatpush1.bf16.msra.mxu0 %v12364_v11  ;;  %v12503_v11 = vld [vmem:[%s15618_s1 + $0x328] ss:$16 sps:$4 sm:$0xff]  }
 0x702   :  { %4651 = vmatprep.subr.bf16.mxu0 %v12372_v14 }
 0x705   :  { %4652 = vmatpush2.bf16.msra.mxu0 %v12370_v13 }
 0x706   :  { %4653 = vmatprep.subr.bf16.mxu0 %v12378_v18 }
 0x709   :  { %4654 = vmatpush2.bf16.msra.mxu0 %v12376_v15 }
 0x70a   :  { %4655 = vmatprep.subr.bf16.mxu0 %v12384_v19  ;;  %v12511_v19 = vld [vmem:[%s15618_s1 + $0x30c] ss:$16 sps:$4 sm:$0xff]  }
 0x70d   :  { %4656 = vmatpush2.bf16.msra.mxu0 %v12382_v43  ;;  %v12509_v43 = vld [vmem:[%s15618_s1 + $0x308] ss:$16 sps:$4 sm:$0xff]  }
 0x70e   :  { %4657 = vmatprep.subr.bf16.mxu0 %v12390_v21 }
 0x711   :  { %4658 = vmatpush2.bf16.msra.mxu0 %v12388_v20 }
 0x712   :  { %4659 = vmatprep.subr.bf16.mxu0 %v12396_v23 }
 0x715   :  { %4660 = vmatpush2.bf16.msra.mxu0 %v12394_v22  ;;  %v12319_v22 = vld [vmem:[%s15618_s1 + $0x2e0] ss:$16 sps:$4 sm:$0xff]  }
 0x716   :  { %4661 = vmatprep.subr.bf16.mxu0 %v12402_v47  ;;  %v12325_v47 = vld [vmem:[%s15618_s1 + $0x2c0] ss:$16 sps:$4 sm:$0xff]  }
 0x719   :  { %4662 = vmatpush2.bf16.msra.mxu0 %v12400_v24  ;;  %v14495_v24 = vpack.c.bf16 %v14440_v29, %v14440_v29  ;;  %v12337_v29 = vld [vmem:[%s15618_s1 + $0x280] ss:$16 sps:$4 sm:$0xff]  }
 0x71a   :  { %4663 = vmatprep.subr.bf16.mxu0 %v12408_v25  ;;  %v12331_v25 = vld [vmem:[%s15618_s1 + $0x2a0] ss:$16 sps:$4 sm:$0xff]  }
 0x71d   :  { %4664 = vmatpush2.bf16.msra.mxu0 %v12406_v52  ;;  %v12333_v52 = vld [vmem:[%s15618_s1 + $0x2a4] ss:$16 sps:$4 sm:$0xff]  }
 0x71e   :  { %4665 = vmatprep.subr.bf16.mxu0 %v12414_v31  ;;  %v12343_v31 = vld [vmem:[%s15618_s1 + $0x260] ss:$16 sps:$4 sm:$0xff]  }
 0x721   :  { %4666 = vmatpush2.bf16.msra.mxu0 %v12412_v30  ;;  %v12345_v30 = vld [vmem:[%s15618_s1 + $0x264] ss:$16 sps:$4 sm:$0xff]  }
 0x722   :  { %4717 = vmatprep.subr.bf16.mxu0 %v12421_v16  ;;  %v12355_v16 = vld [vmem:[%s15618_s1 + $0x220] ss:$16 sps:$4 sm:$0xff]  }
 0x724   :  { %4668 = vmatmul.mubr.bf16.vlgmr.msra.gmra.mxu0 %v14450_v17 }
 0x725   :  { %4718 = vmatpush1.bf16.msra.mxu0 %v12419_v27  ;;  %4749 = vmatprep.mubr.bf16.mxu0 %v14453_v37  ;;  %v12363_v27 = vld [vmem:[%s15618_s1 + $0x204] ss:$16 sps:$4 sm:$0xff]  }
 0x726   :  { %4719 = vmatprep.subr.bf16.mxu0 %v12427_v39  ;;  %v12367_v39 = vld [vmem:[%s15618_s1 + $0x3e0] ss:$16 sps:$4 sm:$0xff]  }
 0x729   :  { %4720 = vmatpush1.bf16.msra.mxu0 %v12425_v38  ;;  %v12369_v38 = vld [vmem:[%s15618_s1 + $0x3e4] ss:$16 sps:$4 sm:$0xff]  }
 0x72a   :  { %4721 = vmatprep.subr.bf16.mxu0 %v12433_v40  ;;  %v12373_v40 = vld [vmem:[%s15618_s1 + $0x3c0] ss:$16 sps:$4 sm:$0xff]  }
 0x72d   :  { %4722 = vmatpush1.bf16.msra.mxu0 %v12431_v3  ;;  %v12375_v3 = vld [vmem:[%s15618_s1 + $0x3c4] ss:$16 sps:$4 sm:$0xff]  }
 0x72e   :  { %4723 = vmatprep.subr.bf16.mxu0 %v12439_v42  ;;  %v12379_v42 = vld [vmem:[%s15618_s1 + $0x3a0] ss:$16 sps:$4 sm:$0xff]  }
 0x731   :  { %4724 = vmatpush1.bf16.msra.mxu0 %v12437_v41  ;;  %v12381_v41 = vld [vmem:[%s15618_s1 + $0x3a4] ss:$16 sps:$4 sm:$0xff]  }
 0x732   :  { %4725 = vmatprep.subr.bf16.mxu0 %v12445_v45  ;;  %v12385_v45 = vld [vmem:[%s15618_s1 + $0x380] ss:$16 sps:$4 sm:$0xff]  }
 0x735   :  { %4726 = vmatpush1.bf16.msra.mxu0 %v12443_v44  ;;  %v12387_v44 = vld [vmem:[%s15618_s1 + $0x384] ss:$16 sps:$4 sm:$0xff]  }
 0x736   :  { %4727 = vmatprep.subr.bf16.mxu0 %v12451_v48  ;;  %v12391_v48 = vld [vmem:[%s15618_s1 + $0x360] ss:$16 sps:$4 sm:$0xff]  }
 0x739   :  { %4728 = vmatpush1.bf16.msra.mxu0 %v12449_v46  ;;  %v12393_v46 = vld [vmem:[%s15618_s1 + $0x364] ss:$16 sps:$4 sm:$0xff]  }
 0x73a   :  { %4729 = vmatprep.subr.bf16.mxu0 %v12457_v51  ;;  %v12397_v51 = vld [vmem:[%s15618_s1 + $0x340] ss:$16 sps:$4 sm:$0xff]  }
 0x73d   :  { %4730 = vmatpush1.bf16.msra.mxu0 %v12455_v50  ;;  %v12399_v50 = vld [vmem:[%s15618_s1 + $0x344] ss:$16 sps:$4 sm:$0xff]  }
 0x73e   :  { %4731 = vmatprep.subr.bf16.mxu0 %v12463_v54  ;;  %v12403_v54 = vld [vmem:[%s15618_s1 + $0x320] ss:$16 sps:$4 sm:$0xff]  }
 0x741   :  { %4732 = vmatpush1.bf16.msra.mxu0 %v12461_v53  ;;  %v12405_v53 = vld [vmem:[%s15618_s1 + $0x324] ss:$16 sps:$4 sm:$0xff]  }
 0x742   :  { %4733 = vmatprep.subr.bf16.mxu0 %v12469_v57  ;;  %v12409_v57 = vld [vmem:[%s15618_s1 + $0x300] ss:$16 sps:$4 sm:$0xff]  }
 0x745   :  { %4734 = vmatpush2.bf16.msra.mxu0 %v12467_v55  ;;  %v12411_v55 = vld [vmem:[%s15618_s1 + $0x304] ss:$16 sps:$4 sm:$0xff]  }
 0x746   :  { %4735 = vmatprep.subr.bf16.mxu0 %v12475_v59  ;;  %v12416_v59 = vld [vmem:[%s15618_s1 + $0xe8] ss:$16 sps:$4 sm:$0xff]  }
 0x749   :  { %4736 = vmatpush2.bf16.msra.mxu0 %v12473_v58  ;;  %v12418_v58 = vld [vmem:[%s15618_s1 + $0xec] ss:$16 sps:$4 sm:$0xff]  }
 0x74a   :  { %4737 = vmatprep.subr.bf16.mxu0 %v12481_v62  ;;  %v12422_v62 = vld [vmem:[%s15618_s1 + $0xc8] ss:$16 sps:$4 sm:$0xff]  }
 0x74d   :  { %4738 = vmatpush2.bf16.msra.mxu0 %v12479_v61  ;;  %v12424_v61 = vld [vmem:[%s15618_s1 + $0xcc] ss:$16 sps:$4 sm:$0xff]  }
 0x74e   :  { %4739 = vmatprep.subr.bf16.mxu0 %v12487_v0  ;;  %v12428_v0 = vld [vmem:[%s15618_s1 + $0xa8] ss:$16 sps:$4 sm:$0xff]  }
 0x751   :  { %4740 = vmatpush2.bf16.msra.mxu0 %v12485_v63  ;;  %v12430_v63 = vld [vmem:[%s15618_s1 + $0xac] ss:$16 sps:$4 sm:$0xff]  }
 0x752   :  { %4741 = vmatprep.subr.bf16.mxu0 %v12493_v4  ;;  %v12442_v4 = vld [vmem:[%s15618_s1 + $0x6c] ss:$16 sps:$4 sm:$0xff]  }
 0x755   :  { %4742 = vmatpush2.bf16.msra.mxu0 %v12491_v2  ;;  %v12434_v2 = vld [vmem:[%s15618_s1 + $0x88] ss:$16 sps:$4 sm:$0xff]  }
 0x756   :  { %4743 = vmatprep.subr.bf16.mxu0 %v12499_v8  ;;  %v12440_v8 = vld [vmem:[%s15618_s1 + $0x68] ss:$16 sps:$4 sm:$0xff]  }
 0x759   :  { %4744 = vmatpush2.bf16.msra.mxu0 %v12497_v7  ;;  %v12560_v7 = vld [vmem:[#allocation2 + $0x70] ss:$8 sps:$4 sm:$0xff]  }
 0x75a   :  { %4745 = vmatprep.subr.bf16.mxu0 %v12505_v12  ;;  %v12454_v12 = vld [vmem:[%s15618_s1 + $0x2c] ss:$16 sps:$4 sm:$0xff]  }
 0x75d   :  { %4746 = vmatpush2.bf16.msra.mxu0 %v12503_v11  ;;  %v12446_v11 = vld [vmem:[%s15618_s1 + $0x48] ss:$16 sps:$4 sm:$0xff]  }
 0x75e   :  { %4747 = vmatprep.subr.bf16.mxu0 %v12511_v19  ;;  %v12569_v19 = vld [vmem:[#allocation2 + $0x40] ss:$8 sps:$4 sm:$0xff]  }
 0x761   :  { %4748 = vmatpush2.bf16.msra.mxu0 %v12509_v43  ;;  %v12571_v43 = vld [vmem:[#allocation2 + $0x44] ss:$8 sps:$4 sm:$0xff]  }
 0x764   :  { %4750 = vmatmul.mubr.bf16.vlgmr.msra.gmra.mxu0 %v14495_v24 }
 0x79a   :  { %v3124_v1 = vpop.f32.mrf.mxu1 }
 0x79b   :  { %v3204_v9 = vrot.slane %v3124_v1, %v14264_v5  ;;  %v12436_v1 = vld [vmem:[%s15618_s1 + $0x8c] ss:$16 sps:$4 sm:$0xff]  }
 0x79c   :  { %v11537_v6 = vpop.f32.mrf.mxu1 }
 0x79d   :  { %v3205_v13 = vmul.f32 %v14309_v36, %v3204_v9  ;;  %v12327_v36 = vld [vmem:[%s15618_s1 + $0x2c4] ss:$16 sps:$4 sm:$0xff]  }
 0x79e   :  { %v12562_v6 = vld [vmem:[#allocation2 + $0x74] ss:$8 sps:$4 sm:$0xff]   ;;  %v12565_v9 = vld [vmem:[#allocation2 + $0x64] ss:$8 sps:$4 sm:$0xff]  }
 0x79f   :  { %5199 = vmatprep.subr.bf16.mxu0 %v12562_v6  ;;  %v12515_v6 = vld [vmem:[%s15618_s1 + $0x4c8] ss:$16 sps:$4 sm:$0xff]  }
 0x7a0   :  { %5200 = vmatpush1.bf16.msra.mxu0 %v12560_v7  ;;  %v12520_v7 = vld [vmem:[%s15618_s1 + $0x4ac] ss:$16 sps:$4 sm:$0xff]  }
 0x7a1   :  { %5201 = vmatprep.subr.bf16.mxu0 %v12565_v9 }
 0x7a2   :  { %v3197_v10 = vpop.f32.mrf.mxu1 }
 0x7a3   :  { %v3209_v14 = vrot.slane %v3197_v10, %v14264_v5  ;;  %v12563_v10 = vld [vmem:[#allocation2 + $0x60] ss:$8 sps:$4 sm:$0xff]  }
 0x7a4   :  { %v11548_v15 = vpop.f32.mrf.mxu1  ;;  %5202 = vmatpush1.bf16.msra.mxu0 %v12563_v10  ;;  %v12602_v10 = vld [vmem:[#allocation2 + $0x90] ss:$8 sps:$4 sm:$0xff]  }
 0x7a5   :  { %v3210_v18 = vadd.f32 %v3209_v14, %v3205_v13  ;;  %v12568_v13 = vld [vmem:[#allocation2 + $0x54] ss:$8 sps:$4 sm:$0xff]   ;;  %v12566_v14 = vld [vmem:[#allocation2 + $0x50] ss:$8 sps:$4 sm:$0xff]  }
 0x7a6   :  { %v12452_v15 = vld [vmem:[%s15618_s1 + $0x28] ss:$16 sps:$4 sm:$0xff]   ;;  %5203 = vmatprep.subr.bf16.mxu0 %v12568_v13 }
 0x7a7   :  { %vm3211_vm10 = vcmp.gt.f32.partialorder %v3210_v18, 0.0  ;;  %v3212_v20 = vmul.f32 0.2, %v3210_v18  ;;  %v12605_v13 = vld [vmem:[#allocation2 + $0x80] ss:$8 sps:$4 sm:$0xff]  }
 0x7a8   :  { %5204 = vmatpush1.bf16.msra.mxu0 %v12566_v14 }
 0x7a9   :  { %v3213_v21 = vsel %vm3211_vm10, %v3210_v18, %v3212_v20  ;;  %v12460_v18 = vld [vmem:[%s15618_s1 + $0xc] ss:$16 sps:$4 sm:$0xff]   ;;  %v12458_v20 = vld [vmem:[%s15618_s1 + $0x8] ss:$16 sps:$4 sm:$0xff]   ;;  %5205 = vmatprep.subr.bf16.mxu0 %v12571_v43 }
 0x7aa   :  { %v3214_v23 = vpack.c.bf16 %v3213_v21, %v3213_v21  ;;  %v12466_v21 = vld [vmem:[%s15618_s1 + $0x1ec] ss:$16 sps:$4 sm:$0xff]  }
 0x7ab   :  { %v14582_v43 = vld [vmem:[%s15613_s25 + $0xf8] sm:$0xff] }
 0x7ac   :  { %11566 = vmatmul.mubr.bf16.vlgmr.msra.gmra.mxu1 %v3214_v23  ;;  %5206 = vmatpush1.bf16.msra.mxu0 %v12569_v19  ;;  %v12572_v23 = vld [vmem:[#allocation2 + $0x30] ss:$8 sps:$4 sm:$0xff]  }
 0x7ad   :  { %4595 = vmatpush1.bf16.msra.mxu1 %v12319_v22  ;;  %4626 = vmatprep.mubr.bf16.mxu1 %v14453_v37  ;;  %v12361_v37 = vld [vmem:[%s15618_s1 + $0x200] ss:$16 sps:$4 sm:$0xff]   ;;  %v12574_v22 = vld [vmem:[#allocation2 + $0x34] ss:$8 sps:$4 sm:$0xff]   ;;  %v12524_v19 = vld [vmem:[%s15618_s1 + $0x468] ss:$16 sps:$4 sm:$0xff]  }
 0x7ae   :  { %4596 = vmatprep.subr.bf16.mxu1 %v12327_v36  ;;  %v12464_v36 = vld [vmem:[%s15618_s1 + $0x1e8] ss:$16 sps:$4 sm:$0xff]   ;;  %5207 = vmatprep.subr.bf16.mxu0 %v12574_v22  ;;  %v12532_v22 = vld [vmem:[%s15618_s1 + $0x42c] ss:$16 sps:$4 sm:$0xff]  }
 0x7b0   :  { %5208 = vmatpush1.bf16.msra.mxu0 %v12572_v23  ;;  %v12530_v23 = vld [vmem:[%s15618_s1 + $0x428] ss:$16 sps:$4 sm:$0xff]  }
 0x7b1   :  { %4597 = vmatpush1.bf16.msra.mxu1 %v12325_v47  ;;  %v12577_v47 = vld [vmem:[#allocation2 + $0x24] ss:$8 sps:$4 sm:$0xff]  }
 0x7b2   :  { %4598 = vmatprep.subr.bf16.mxu1 %v12333_v52  ;;  %v12575_v52 = vld [vmem:[#allocation2 + $0x20] ss:$8 sps:$4 sm:$0xff]   ;;  %5209 = vmatprep.subr.bf16.mxu0 %v12577_v47  ;;  %v12538_v47 = vld [vmem:[%s15618_s1 + $0x5ec] ss:$16 sps:$4 sm:$0xff]  }
 0x7b4   :  { %5210 = vmatpush1.bf16.msra.mxu0 %v12575_v52  ;;  %v12536_v52 = vld [vmem:[%s15618_s1 + $0x5e8] ss:$16 sps:$4 sm:$0xff]  }
 0x7b5   :  { %4599 = vmatpush1.bf16.msra.mxu1 %v12331_v25  ;;  %v12470_v25 = vld [vmem:[%s15618_s1 + $0x1c8] ss:$16 sps:$4 sm:$0xff]  }
 0x7b6   :  { %4600 = vmatprep.subr.bf16.mxu1 %v12339_v28  ;;  %v12478_v28 = vld [vmem:[%s15618_s1 + $0x1ac] ss:$16 sps:$4 sm:$0xff]  }
 0x7b9   :  { %4601 = vmatpush1.bf16.msra.mxu1 %v12337_v29  ;;  %v12580_v29 = vld [vmem:[#allocation2 + $0x14] ss:$8 sps:$4 sm:$0xff]  }
 0x7ba   :  { %4602 = vmatprep.subr.bf16.mxu1 %v12345_v30  ;;  %v12578_v30 = vld [vmem:[#allocation2 + $0x10] ss:$8 sps:$4 sm:$0xff]   ;;  %5211 = vmatprep.subr.bf16.mxu0 %v12580_v29  ;;  %v12544_v29 = vld [vmem:[%s15618_s1 + $0x5ac] ss:$16 sps:$4 sm:$0xff]  }
 0x7bb   :  { %5212 = vmatpush1.bf16.msra.mxu0 %v12578_v30  ;;  %v12542_v30 = vld [vmem:[%s15618_s1 + $0x5a8] ss:$16 sps:$4 sm:$0xff]  }
 0x7bd   :  { %4603 = vmatpush1.bf16.msra.mxu1 %v12343_v31  ;;  %v12476_v31 = vld [vmem:[%s15618_s1 + $0x1a8] ss:$16 sps:$4 sm:$0xff]  }
 0x7be   :  { %4604 = vmatprep.subr.bf16.mxu1 %v12351_v32  ;;  %v12484_v32 = vld [vmem:[%s15618_s1 + $0x18c] ss:$16 sps:$4 sm:$0xff]  }
 0x7c1   :  { %4605 = vmatpush1.bf16.msra.mxu1 %v12349_v33  ;;  %v12583_v33 = vld [vmem:[#allocation2 + $0x4] ss:$8 sps:$4 sm:$0xff]  }
 0x7c2   :  { %4606 = vmatprep.subr.bf16.mxu1 %v12357_v34  ;;  %v12581_v34 = vld [vmem:[#allocation2] ss:$8 sps:$4 sm:$0xff]   ;;  %5213 = vmatprep.subr.bf16.mxu0 %v12583_v33  ;;  %v12550_v33 = vld [vmem:[%s15618_s1 + $0x56c] ss:$16 sps:$4 sm:$0xff]  }
 0x7c3   :  { %5214 = vmatpush1.bf16.msra.mxu0 %v12581_v34  ;;  %v12548_v34 = vld [vmem:[%s15618_s1 + $0x568] ss:$16 sps:$4 sm:$0xff]  }
 0x7c5   :  { %4607 = vmatpush1.bf16.msra.mxu1 %v12355_v16  ;;  %v12482_v16 = vld [vmem:[%s15618_s1 + $0x188] ss:$16 sps:$4 sm:$0xff]  }
 0x7c6   :  { %4608 = vmatprep.subr.bf16.mxu1 %v12363_v27  ;;  %v12490_v27 = vld [vmem:[%s15618_s1 + $0x16c] ss:$16 sps:$4 sm:$0xff]  }
 0x7c9   :  { %4609 = vmatpush1.bf16.msra.mxu1 %v12361_v37  ;;  %v12586_v37 = vld [vmem:[#allocation2 + $0xf4] ss:$8 sps:$4 sm:$0xff]  }
 0x7ca   :  { %4610 = vmatprep.subr.bf16.mxu1 %v12369_v38  ;;  %v12584_v38 = vld [vmem:[#allocation2 + $0xf0] ss:$8 sps:$4 sm:$0xff]   ;;  %5215 = vmatprep.subr.bf16.mxu0 %v12586_v37  ;;  %v12556_v37 = vld [vmem:[%s15618_s1 + $0x52c] ss:$16 sps:$4 sm:$0xff]  }
 0x7cb   :  { %5216 = vmatpush2.bf16.msra.mxu0 %v12584_v38  ;;  %v12554_v38 = vld [vmem:[%s15618_s1 + $0x528] ss:$16 sps:$4 sm:$0xff]  }
 0x7cd   :  { %4611 = vmatpush2.bf16.msra.mxu1 %v12367_v39  ;;  %v12488_v39 = vld [vmem:[%s15618_s1 + $0x168] ss:$16 sps:$4 sm:$0xff]  }
 0x7ce   :  { %4612 = vmatprep.subr.bf16.mxu1 %v12375_v3  ;;  %v12496_v3 = vld [vmem:[%s15618_s1 + $0x14c] ss:$16 sps:$4 sm:$0xff]  }
 0x7d1   :  { %4613 = vmatpush2.bf16.msra.mxu1 %v12373_v40  ;;  %v12589_v40 = vld [vmem:[#allocation2 + $0xe4] ss:$8 sps:$4 sm:$0xff]  }
 0x7d2   :  { %4614 = vmatprep.subr.bf16.mxu1 %v12381_v41  ;;  %v12587_v41 = vld [vmem:[#allocation2 + $0xe0] ss:$8 sps:$4 sm:$0xff]   ;;  %5217 = vmatprep.subr.bf16.mxu0 %v12589_v40 }
 0x7d3   :  { %5218 = vmatpush2.bf16.msra.mxu0 %v12587_v41 }
 0x7d5   :  { %4615 = vmatpush2.bf16.msra.mxu1 %v12379_v42  ;;  %v12494_v42 = vld [vmem:[%s15618_s1 + $0x148] ss:$16 sps:$4 sm:$0xff]  }
 0x7d6   :  { %4616 = vmatprep.subr.bf16.mxu1 %v12387_v44  ;;  %v12592_v44 = vld [vmem:[#allocation2 + $0xd4] ss:$8 sps:$4 sm:$0xff]  }
 0x7d7   :  { %5219 = vmatprep.subr.bf16.mxu0 %v12592_v44 }
 0x7d9   :  { %4617 = vmatpush2.bf16.msra.mxu1 %v12385_v45  ;;  %v14558_v45 = vpop.f32.mrf.mxu0 }
 0x7da   :  { %4618 = vmatprep.subr.bf16.mxu1 %v12393_v46  ;;  %v12502_v46 = vld [vmem:[%s15618_s1 + $0x12c] ss:$16 sps:$4 sm:$0xff]  }
 0x7dd   :  { %4619 = vmatpush2.bf16.msra.mxu1 %v12391_v48  ;;  %v12590_v48 = vld [vmem:[#allocation2 + $0xd0] ss:$8 sps:$4 sm:$0xff]  }
 0x7de   :  { %4620 = vmatprep.subr.bf16.mxu1 %v12399_v50  ;;  %v12595_v50 = vld [vmem:[#allocation2 + $0xc4] ss:$8 sps:$4 sm:$0xff]   ;;  %5220 = vmatpush2.bf16.msra.mxu0 %v12590_v48 }
 0x7df   :  { %5221 = vmatprep.subr.bf16.mxu0 %v12595_v50  ;;  %v12608_v50 = vld [vmem:[#allocation2 + $0x170] ss:$8 sps:$4 sm:$0xff]  }
 0x7e1   :  { %4621 = vmatpush2.bf16.msra.mxu1 %v12397_v51  ;;  %v14561_v51 = vpop.f32.mrf.mxu0 }
 0x7e2   :  { %4622 = vmatprep.subr.bf16.mxu1 %v12405_v53  ;;  %v12500_v53 = vld [vmem:[%s15618_s1 + $0x128] ss:$16 sps:$4 sm:$0xff]  }
 0x7e5   :  { %4623 = vmatpush2.bf16.msra.mxu1 %v12403_v54  ;;  %v4591_v54 = vpop.f32.mrf.mxu0 }
 0x7e6   :  { %4624 = vmatprep.subr.bf16.mxu1 %v12411_v55  ;;  %v12508_v55 = vld [vmem:[%s15618_s1 + $0x10c] ss:$16 sps:$4 sm:$0xff]  }
 0x7e9   :  { %4625 = vmatpush2.bf16.msra.mxu1 %v12409_v57  ;;  %v12593_v57 = vld [vmem:[#allocation2 + $0xc0] ss:$8 sps:$4 sm:$0xff]  }
 0x7ea   :  { %4676 = vmatprep.subr.bf16.mxu1 %v12418_v58  ;;  %v12598_v58 = vld [vmem:[#allocation2 + $0xb4] ss:$8 sps:$4 sm:$0xff]   ;;  %5222 = vmatpush2.bf16.msra.mxu0 %v12593_v57 }
 0x7eb   :  { %5223 = vmatprep.subr.bf16.mxu0 %v12598_v58  ;;  %v12611_v58 = vld [vmem:[#allocation2 + $0x160] ss:$8 sps:$4 sm:$0xff]  }
 0x7ec   :  { %4627 = vmatmul.mubr.bf16.vlgmr.msra.gmra.mxu1 %v14495_v24  ;;  %v12472_v24 = vld [vmem:[%s15618_s1 + $0x1cc] ss:$16 sps:$4 sm:$0xff]  }
 0x7ed   :  { %4677 = vmatpush1.bf16.msra.mxu1 %v12416_v59  ;;  %4708 = vmatprep.mubr.bf16.mxu1 %v14400_v56  ;;  %v12448_v56 = vld [vmem:[%s15618_s1 + $0x4c] ss:$16 sps:$4 sm:$0xff]   ;;  %v4592_v59 = vpop.f32.mrf.mxu0 }
 0x7ee   :  { %4678 = vmatprep.subr.bf16.mxu1 %v12424_v61  ;;  %v12506_v61 = vld [vmem:[%s15618_s1 + $0x108] ss:$16 sps:$4 sm:$0xff]   ;;  %v12616_v59 = vld [vmem:[#allocation2 + $0x154] ss:$8 sps:$4 sm:$0xff]  }
 0x7f1   :  { %4679 = vmatpush1.bf16.msra.mxu1 %v12422_v62  ;;  %v12514_v62 = vld [vmem:[%s15618_s1 + $0x4ec] ss:$16 sps:$4 sm:$0xff]  }
 0x7f2   :  { %4680 = vmatprep.subr.bf16.mxu1 %v12430_v63  ;;  %v12596_v63 = vld [vmem:[#allocation2 + $0xb0] ss:$8 sps:$4 sm:$0xff]  }
 0x7f3   :  { %5224 = vmatpush2.bf16.msra.mxu0 %v12596_v63  ;;  %v12622_v63 = vld [vmem:[#allocation2 + $0x134] ss:$8 sps:$4 sm:$0xff]  }
 0x7f5   :  { %4681 = vmatpush1.bf16.msra.mxu1 %v12428_v0  ;;  %v12512_v0 = vld [vmem:[%s15618_s1 + $0x4e8] ss:$16 sps:$4 sm:$0xff]  }
 0x7f6   :  { %4682 = vmatprep.subr.bf16.mxu1 %v12436_v1  ;;  %v12517_v1 = vld [vmem:[%s15618_s1 + $0x4cc] ss:$16 sps:$4 sm:$0xff]  }
 0x7f9   :  { %4683 = vmatpush1.bf16.msra.mxu1 %v12434_v2  ;;  %v12601_v2 = vld [vmem:[#allocation2 + $0xa4] ss:$8 sps:$4 sm:$0xff]  }
 0x7fa   :  { %4684 = vmatprep.subr.bf16.mxu1 %v12442_v4  ;;  %v12599_v4 = vld [vmem:[#allocation2 + $0xa0] ss:$8 sps:$4 sm:$0xff]   ;;  %5225 = vmatprep.subr.bf16.mxu0 %v12601_v2 }
 0x7fb   :  { %5226 = vmatpush2.bf16.msra.mxu0 %v12599_v4  ;;  %v12623_v2 = vld [vmem:[#allocation2 + $0x120] ss:$8 sps:$4 sm:$0xff]   ;;  %v12628_v4 = vld [vmem:[#allocation2 + $0x114] ss:$8 sps:$4 sm:$0xff]  }
 0x7fd   :  { %4685 = vmatpush1.bf16.msra.mxu1 %v12440_v8  ;;  %v14573_v8 = vpop.f32.mrf.mxu0 }
 0x7fe   :  { %4686 = vmatprep.subr.bf16.mxu1 %v12448_v56  ;;  %v12604_v56 = vld [vmem:[#allocation2 + $0x94] ss:$8 sps:$4 sm:$0xff]  }
 0x7ff   :  { %v14575_v9 = vpop.f32.mrf.mxu0  ;;  %5227 = vmatprep.subr.bf16.mxu0 %v12604_v56  ;;  %v12629_v56 = vld [vmem:[#allocation2 + $0x100] ss:$8 sps:$4 sm:$0xff]  }
 0x800   :  { %5228 = vmatpush2.bf16.msra.mxu0 %v12602_v10  ;;  %v12634_v10 = vld [vmem:[#allocation2 + $0x1f4] ss:$8 sps:$4 sm:$0xff]  }
 0x801   :  { %4687 = vmatpush1.bf16.msra.mxu1 %v12446_v11  ;;  %v12523_v11 = vld [vmem:[%s15618_s1 + $0x48c] ss:$16 sps:$4 sm:$0xff]  }
 0x802   :  { %4688 = vmatprep.subr.bf16.mxu1 %v12454_v12  ;;  %v12607_v12 = vld [vmem:[#allocation2 + $0x84] ss:$8 sps:$4 sm:$0xff]  }
 0x803   :  { %5229 = vmatprep.subr.bf16.mxu0 %v12607_v12  ;;  %v12640_v12 = vld [vmem:[#allocation2 + $0x1d4] ss:$8 sps:$4 sm:$0xff]  }
 0x804   :  { %5230 = vmatpush2.bf16.msra.mxu0 %v12605_v13  ;;  %v12638_v13 = vld [vmem:[#allocation2 + $0x1d0] ss:$8 sps:$4 sm:$0xff]  }
 0x805   :  { %4689 = vmatpush1.bf16.msra.mxu1 %v12452_v15  ;;  %v12521_v15 = vld [vmem:[%s15618_s1 + $0x488] ss:$16 sps:$4 sm:$0xff]   ;;  %11048 = vmatprep.subr.mxu0 %v14582_v43 }
 0x806   :  { %4690 = vmatprep.subr.bf16.mxu1 %v12460_v18  ;;  %v12526_v18 = vld [vmem:[%s15618_s1 + $0x46c] ss:$16 sps:$4 sm:$0xff]  }
 0x809   :  { %4691 = vmatpush1.bf16.msra.mxu1 %v12458_v20  ;;  %v12529_v20 = vld [vmem:[%s15618_s1 + $0x44c] ss:$16 sps:$4 sm:$0xff]  }
 0x80a   :  { %4692 = vmatprep.subr.bf16.mxu1 %v12466_v21  ;;  %v12527_v21 = vld [vmem:[%s15618_s1 + $0x448] ss:$16 sps:$4 sm:$0xff]  }
 0x80d   :  { %4693 = vmatpush2.bf16.msra.mxu1 %v12464_v36  ;;  %v12535_v36 = vld [vmem:[%s15618_s1 + $0x40c] ss:$16 sps:$4 sm:$0xff]  }
 0x80e   :  { %4694 = vmatprep.subr.bf16.mxu1 %v12472_v24  ;;  %v12533_v24 = vld [vmem:[%s15618_s1 + $0x408] ss:$16 sps:$4 sm:$0xff]  }
 0x811   :  { %4695 = vmatpush2.bf16.msra.mxu1 %v12470_v25  ;;  %v12541_v25 = vld [vmem:[%s15618_s1 + $0x5cc] ss:$16 sps:$4 sm:$0xff]  }
 0x812   :  { %4696 = vmatprep.subr.bf16.mxu1 %v12478_v28  ;;  %v12539_v28 = vld [vmem:[%s15618_s1 + $0x5c8] ss:$16 sps:$4 sm:$0xff]  }
 0x815   :  { %4697 = vmatpush2.bf16.msra.mxu1 %v12476_v31  ;;  %v12547_v31 = vld [vmem:[%s15618_s1 + $0x58c] ss:$16 sps:$4 sm:$0xff]  }
 0x816   :  { %4698 = vmatprep.subr.bf16.mxu1 %v12484_v32  ;;  %v12545_v32 = vld [vmem:[%s15618_s1 + $0x588] ss:$16 sps:$4 sm:$0xff]  }
 0x819   :  { %4699 = vmatpush2.bf16.msra.mxu1 %v12482_v16  ;;  %v12553_v16 = vld [vmem:[%s15618_s1 + $0x54c] ss:$16 sps:$4 sm:$0xff]  }
 0x81a   :  { %4700 = vmatprep.subr.bf16.mxu1 %v12490_v27  ;;  %v12551_v27 = vld [vmem:[%s15618_s1 + $0x548] ss:$16 sps:$4 sm:$0xff]  }
 0x81d   :  { %4701 = vmatpush2.bf16.msra.mxu1 %v12488_v39  ;;  %v12559_v39 = vld [vmem:[%s15618_s1 + $0x50c] ss:$16 sps:$4 sm:$0xff]  }
 0x81e   :  { %4702 = vmatprep.subr.bf16.mxu1 %v12496_v3  ;;  %v12557_v3 = vld [vmem:[%s15618_s1 + $0x508] ss:$16 sps:$4 sm:$0xff]  }
 0x821   :  { %4703 = vmatpush2.bf16.msra.mxu1 %v12494_v42 }
 0x822   :  { %4704 = vmatprep.subr.bf16.mxu1 %v12502_v46 }
 0x825   :  { %4705 = vmatpush2.bf16.msra.mxu1 %v12500_v53  ;;  %v12610_v53 = vld [vmem:[#allocation2 + $0x174] ss:$8 sps:$4 sm:$0xff]  }
 0x826   :  { %4706 = vmatprep.subr.bf16.mxu1 %v12508_v55  ;;  %v12613_v55 = vld [vmem:[#allocation2 + $0x164] ss:$8 sps:$4 sm:$0xff]  }
 0x829   :  { %4707 = vmatpush2.bf16.msra.mxu1 %v12506_v61  ;;  %v12619_v61 = vld [vmem:[#allocation2 + $0x144] ss:$8 sps:$4 sm:$0xff]  }
 0x82a   :  { %4758 = vmatprep.subr.bf16.mxu1 %v12514_v62  ;;  %v12617_v62 = vld [vmem:[#allocation2 + $0x140] ss:$8 sps:$4 sm:$0xff]  }
 0x82c   :  { %4709 = vmatmul.mubr.bf16.vlgmr.msra.gmra.mxu1 %v14405_v60  ;;  %v12518_v60 = vld [vmem:[%s15618_s1 + $0x4a8] ss:$16 sps:$4 sm:$0xff]  }
 0x82d   :  { %4759 = vmatpush1.bf16.msra.mxu1 %v12512_v0  ;;  %4790 = vmatprep.mubr.bf16.mxu1 %v14447_v35  ;;  %v4673_v35 = vpop.f32.mrf.mxu0  ;;  %v12620_v0 = vld [vmem:[#allocation2 + $0x130] ss:$8 sps:$4 sm:$0xff]  }
 0x82e   :  { %4760 = vmatprep.subr.bf16.mxu1 %v12517_v1  ;;  %v12625_v1 = vld [vmem:[#allocation2 + $0x124] ss:$8 sps:$4 sm:$0xff]   ;;  %v12635_v35 = vld [vmem:[#allocation2 + $0x1e0] ss:$8 sps:$4 sm:$0xff]  }
 0x82f   :  { %v4674_v14 = vpop.f32.mrf.mxu0 }
 0x830   :  { %v12643_v14 = vld [vmem:[#allocation2 + $0x1c4] ss:$8 sps:$4 sm:$0xff]  }
 0x831   :  { %4761 = vmatpush1.bf16.msra.mxu1 %v12515_v6  ;;  %v14611_v42 = vpop.f32.mrf.mxu0  ;;  %v12626_v6 = vld [vmem:[#allocation2 + $0x110] ss:$8 sps:$4 sm:$0xff]  }
 0x832   :  { %4762 = vmatprep.subr.bf16.mxu1 %v12520_v7  ;;  %v12631_v7 = vld [vmem:[#allocation2 + $0x104] ss:$8 sps:$4 sm:$0xff]  }
 0x833   :  { %v14613_v46 = vpop.f32.mrf.mxu0 }
 0x835   :  { %4763 = vmatpush1.bf16.msra.mxu1 %v12518_v60  ;;  %v4755_v54 = vpop.f32.mrf.mxu0  ;;  %v12632_v60 = vld [vmem:[#allocation2 + $0x1f0] ss:$8 sps:$4 sm:$0xff]  }
 0x836   :  { %4764 = vmatprep.subr.bf16.mxu1 %v12523_v11  ;;  %v12637_v11 = vld [vmem:[#allocation2 + $0x1e4] ss:$8 sps:$4 sm:$0xff]  }
 0x837   :  { %v4756_v57 = vpop.f32.mrf.mxu0  ;;  %v14669_v54 = vld [vmem:[%s15613_s25 + $0x48] sm:$0xff] }
 0x838   :  { %v14677_v57 = vld [vmem:[%s15613_s25 + $0x40] sm:$0xff] }
 0x839   :  { %4765 = vmatpush1.bf16.msra.mxu1 %v12521_v15  ;;  %v12641_v15 = vld [vmem:[#allocation2 + $0x1c0] ss:$8 sps:$4 sm:$0xff]  }
 0x83a   :  { %4766 = vmatprep.subr.bf16.mxu1 %v12526_v18  ;;  %v12646_v18 = vld [vmem:[#allocation2 + $0x1b4] ss:$8 sps:$4 sm:$0xff]  }
 0x83d   :  { %4767 = vmatpush1.bf16.msra.mxu1 %v12524_v19  ;;  %v12644_v19 = vld [vmem:[#allocation2 + $0x1b0] ss:$8 sps:$4 sm:$0xff]  }
 0x83e   :  { %4768 = vmatprep.subr.bf16.mxu1 %v12529_v20  ;;  %v12649_v20 = vld [vmem:[#allocation2 + $0x1a4] ss:$8 sps:$4 sm:$0xff]  }
 0x841   :  { %4769 = vmatpush1.bf16.msra.mxu1 %v12527_v21  ;;  %v12647_v21 = vld [vmem:[#allocation2 + $0x1a0] ss:$8 sps:$4 sm:$0xff]  }
 0x842   :  { %4770 = vmatprep.subr.bf16.mxu1 %v12532_v22 }
 0x845   :  { %4771 = vmatpush1.bf16.msra.mxu1 %v12530_v23 }
 0x846   :  { %4772 = vmatprep.subr.bf16.mxu1 %v12535_v36  ;;  %v12652_v36 = vld [vmem:[#allocation2 + $0x194] ss:$8 sps:$4 sm:$0xff]  }
 0x849   :  { %4773 = vmatpush1.bf16.msra.mxu1 %v12533_v24 }
 0x84a   :  { %4774 = vmatprep.subr.bf16.mxu1 %v12538_v47  ;;  %v12650_v47 = vld [vmem:[#allocation2 + $0x190] ss:$8 sps:$4 sm:$0xff]  }
 0x84d   :  { %4775 = vmatpush2.bf16.msra.mxu1 %v12536_v52 }
 0x84e   :  { %4776 = vmatprep.subr.bf16.mxu1 %v12541_v25 }
 0x851   :  { %4777 = vmatpush2.bf16.msra.mxu1 %v12539_v28 }
 0x852   :  { %4778 = vmatprep.subr.bf16.mxu1 %v12544_v29 }
 0x855   :  { %4779 = vmatpush2.bf16.msra.mxu1 %v12542_v30 }
 0x856   :  { %4780 = vmatprep.subr.bf16.mxu1 %v12547_v31  ;;  %v12655_v31 = vld [vmem:[#allocation2 + $0x184] ss:$8 sps:$4 sm:$0xff]  }
 0x859   :  { %4781 = vmatpush2.bf16.msra.mxu1 %v12545_v32 }
 0x85a   :  { %4782 = vmatprep.subr.bf16.mxu1 %v12550_v33  ;;  %v12653_v33 = vld [vmem:[#allocation2 + $0x180] ss:$8 sps:$4 sm:$0xff]  }
 0x85d   :  { %4783 = vmatpush2.bf16.msra.mxu1 %v12548_v34 }
 0x85e   :  { %4784 = vmatprep.subr.bf16.mxu1 %v12553_v16 }
 0x861   :  { %4785 = vmatpush2.bf16.msra.mxu1 %v12551_v27  ;;  %v14625_v27 = vld [vmem:[%s15613_s25 + $0xf0] sm:$0xff] }
 0x862   :  { %4786 = vmatprep.subr.bf16.mxu1 %v12556_v37  ;;  %v14629_v37 = vld [vmem:[%s15613_s25 + $0x70] sm:$0xff] }
 0x865   :  { %4787 = vmatpush2.bf16.msra.mxu1 %v12554_v38  ;;  %v14637_v38 = vld [vmem:[%s15613_s25 + $0x68] sm:$0xff] }
 0x866   :  { %4788 = vmatprep.subr.bf16.mxu1 %v12559_v39  ;;  %v14641_v39 = vld [vmem:[%s15613_s25 + $0xe0] sm:$0xff] }
 0x869   :  { %4789 = vmatpush2.bf16.msra.mxu1 %v12557_v3  ;;  %v14645_v3 = vld [vmem:[%s15613_s25 + $0x60] sm:$0xff] }
 0x86a   :  { %5240 = vmatprep.subr.bf16.mxu1 %v12610_v53  ;;  %v14665_v53 = vld [vmem:[%s15613_s25 + $0xc8] sm:$0xff] }
 0x86c   :  { %4791 = vmatmul.mubr.bf16.vlgmr.msra.gmra.mxu1 %v14450_v17  ;;  %v14609_v40 = vpop.f32.mrf.mxu1  ;;  %v12614_v17 = vld [vmem:[#allocation2 + $0x150] ss:$8 sps:$4 sm:$0xff]  }
 0x86d   :  { %5241 = vmatpush1.bf16.msra.mxu1 %v12608_v50  ;;  %v14661_v50 = vld [vmem:[%s15613_s25 + $0x50] sm:$0xff] }
 0x86e   :  { %v11567_v41 = vpop.f32.mrf.mxu1  ;;  %5242 = vmatprep.subr.bf16.mxu1 %v12613_v55  ;;  %v14673_v55 = vld [vmem:[%s15613_s25 + $0xc0] sm:$0xff] }
 0x86f   :  { %v14649_v41 = vld [vmem:[%s15613_s25 + $0xd8] sm:$0xff] }
 0x870   :  { %v3316_v44 = vpop.f32.mrf.mxu1 }
 0x871   :  { %5243 = vmatpush1.bf16.msra.mxu1 %v12611_v58  ;;  %v14653_v44 = vld [vmem:[%s15613_s25 + $0x58] sm:$0xff] }
 0x872   :  { %v11568_v48 = vpop.f32.mrf.mxu1  ;;  %5244 = vmatprep.subr.bf16.mxu1 %v12616_v59  ;;  %v14681_v58 = vld [vmem:[%s15613_s25 + $0xb8] sm:$0xff] }
 0x873   :  { %v14657_v48 = vld [vmem:[%s15613_s25 + $0xd0] sm:$0xff]  ;;  %v14685_v59 = vld [vmem:[%s15613_s25 + $0x38] sm:$0xff] }
 0x875   :  { %5245 = vmatpush1.bf16.msra.mxu1 %v12614_v17  ;;  %v14689_v17 = vld [vmem:[%s15613_s25 + $0xb0] sm:$0xff] }
 0x876   :  { %5246 = vmatprep.subr.bf16.mxu1 %v12619_v61  ;;  %v14693_v61 = vld [vmem:[%s15613_s25 + $0x30] sm:$0xff] }
 0x879   :  { %5247 = vmatpush1.bf16.msra.mxu1 %v12617_v62  ;;  %v14697_v62 = vld [vmem:[%s15613_s25 + $0xa8] sm:$0xff] }
 0x87a   :  { %5248 = vmatprep.subr.bf16.mxu1 %v12622_v63  ;;  %v14701_v63 = vld [vmem:[%s15613_s25 + $0x28] sm:$0xff] }
 0x87d   :  { %5249 = vmatpush1.bf16.msra.mxu1 %v12620_v0  ;;  %v14705_v0 = vld [vmem:[%s15613_s25 + $0xa0] sm:$0xff] }
 0x87e   :  { %5250 = vmatprep.subr.bf16.mxu1 %v12625_v1  ;;  %v14709_v1 = vld [vmem:[%s15613_s25 + $0x20] sm:$0xff] }
 0x881   :  { %5251 = vmatpush1.bf16.msra.mxu1 %v12623_v2  ;;  %v13162_v2 = vld [vmem:[%s15613_s25 + $0x98] sm:$0xff] }
 0x882   :  { %5252 = vmatprep.subr.bf16.mxu1 %v12628_v4  ;;  %v13163_v4 = vld [vmem:[%s15613_s25 + $0x18] sm:$0xff] }
 0x885   :  { %5253 = vmatpush1.bf16.msra.mxu1 %v12626_v6  ;;  %v13164_v6 = vld [vmem:[%s15613_s25 + $0x90] sm:$0xff] }
 0x886   :  { %5254 = vmatprep.subr.bf16.mxu1 %v12631_v7  ;;  %v13165_v7 = vld [vmem:[%s15613_s25 + $0x10] sm:$0xff] }
 0x889   :  { %5255 = vmatpush1.bf16.msra.mxu1 %v12629_v56  ;;  %v13166_v56 = vld [vmem:[%s15613_s25 + $0x88] sm:$0xff] }
 0x88a   :  { %5256 = vmatprep.subr.bf16.mxu1 %v12634_v10  ;;  %v13167_v10 = vld [vmem:[%s15613_s25 + $0x8] sm:$0xff] }
 0x88d   :  { %5257 = vmatpush2.bf16.msra.mxu1 %v12632_v60  ;;  %v13168_v60 = vld [vmem:[%s15613_s25 + $0x80] sm:$0xff] }
 0x88e   :  { %5258 = vmatprep.subr.bf16.mxu1 %v12637_v11  ;;  %v13169_v11 = vld [vmem:[%s15613_s25] sm:$0xff] }
 0x891   :  { %5259 = vmatpush2.bf16.msra.mxu1 %v12635_v35  ;;  %v14720_v35 = vld [vmem:[#allocation24 + $0x18] sm:$0xff] }
 0x892   :  { %5260 = vmatprep.subr.bf16.mxu1 %v12640_v12 }
 0x895   :  { %5261 = vmatpush2.bf16.msra.mxu1 %v12638_v13 }
 0x896   :  { %5262 = vmatprep.subr.bf16.mxu1 %v12643_v14 }
 0x899   :  { %5263 = vmatpush2.bf16.msra.mxu1 %v12641_v15 }
 0x89a   :  { %5264 = vmatprep.subr.bf16.mxu1 %v12646_v18 }
 0x89d   :  { %5265 = vmatpush2.bf16.msra.mxu1 %v12644_v19 }
 0x89e   :  { %5266 = vmatprep.subr.bf16.mxu1 %v12649_v20 }
 0x8a1   :  { %5267 = vmatpush2.bf16.msra.mxu1 %v12647_v21 }
 0x8a2   :  { %5268 = vmatprep.subr.bf16.mxu1 %v12652_v36 }
 0x8a5   :  { %5269 = vmatpush2.bf16.msra.mxu1 %v12650_v47 }
 0x8a6   :  { %5270 = vmatprep.subr.bf16.mxu1 %v12655_v31 }
 0x8a9   :  { %5271 = vmatpush2.bf16.msra.mxu1 %v12653_v33 }
 0x8aa   :  { %11083 = vmatprep.subr.mxu1 %v14582_v43  ;;  %v14633_v43 = vld [vmem:[%s15613_s25 + $0xe8] sm:$0xff] }
 0x8ac   :  { %v4628_v22 = vpop.f32.mrf.mxu1 }
 0x8ad   :  { %v4629_v23 = vadd.f32 %v4628_v22, %v14558_v45 }
 0x8ae   :  { %v4630_v24 = vpop.f32.mrf.mxu1 }
 0x8af   :  { %v4631_v52 = vadd.f32 %v4630_v24, %v14561_v51  ;;  %v4670_v25 = vadd.f32 %v14573_v8, %v4629_v23 }
 0x8b0   :  { %v4632_v28 = vpop.f32.mrf.mxu1 }
 0x8b1   :  { %vm4799_vm11 = vcmp.gt.f32.partialorder %v4670_v25, 0.0  ;;  %v4803_v29 = vmul.f32 0.2, %v4670_v25  ;;  %v4672_v30 = vadd.f32 %v14575_v9, %v4631_v52  ;;  %v14621_v9 = vld [vmem:[%s15613_s25 + $0x78] sm:$0xff] }
 0x8b2   :  { %v4633_v32 = vpop.f32.mrf.mxu1 }
 0x8b3   :  { %vm4800_vm12 = vcmp.gt.f32.partialorder %v4672_v30, 0.0  ;;  %v4804_v45 = vmul.f32 0.2, %v4672_v30  ;;  %v4807_v51 = vsel %vm4799_vm11, %v4670_v25, %v4803_v29 }
 0x8b4   :  { %v4811_v16 = vpack.c.bf16 %v4807_v51, %v4807_v51 }
 0x8b5   :  { %v4808_v8 = vsel %vm4800_vm12, %v4672_v30, %v4804_v45 }
 0x8b6   :  { %v4812_v34 = vpack.c.bf16 %v4808_v8, %v4808_v8 }
 0x8b8   :  { %5231 = vmatprep.mubr.bf16.mxu0 %v4812_v34 }
 0x8b9   :  { %5232 = vmatmul.mubr.bf16.vlgmr.msra.gmra.mxu0 %v4811_v16 }
 0x8ba   :  { %11049 = vmatpush3.msra.mxu0 %v14621_v9 }
 0x8bb   :  { %11050 = vmatprep.subr.mxu0 %v14625_v27 }
 0x8bc   :  { %11051 = vmatpush3.msra.mxu0 %v14629_v37 }
 0x8bd   :  { %11052 = vmatprep.subr.mxu0 %v14633_v43 }
 0x8be   :  { %11053 = vmatpush3.msra.mxu0 %v14637_v38 }
 0x8bf   :  { %11054 = vmatprep.subr.mxu0 %v14641_v39 }
 0x8c0   :  { %11055 = vmatpush3.msra.mxu0 %v14645_v3 }
 0x8c1   :  { %11056 = vmatprep.subr.mxu0 %v14649_v41 }
 0x8c2   :  { %11057 = vmatpush3.msra.mxu0 %v14653_v44 }
 0x8c3   :  { %11058 = vmatprep.subr.mxu0 %v14657_v48 }
 0x8c4   :  { %11059 = vmatpush3.msra.mxu0 %v14661_v50 }
 0x8c5   :  { %11060 = vmatprep.subr.mxu0 %v14665_v53 }
 0x8c6   :  { %11061 = vmatpush3.msra.mxu0 %v14669_v54 }
 0x8c7   :  { %11062 = vmatprep.subr.mxu0 %v14673_v55 }
 0x8c8   :  { %11063 = vmatpush3.msra.mxu0 %v14677_v57 }
 0x8c9   :  { %11064 = vmatprep.subr.mxu0 %v14681_v58 }
 0x8ca   :  { %11065 = vmatpush3.msra.mxu0 %v14685_v59 }
 0x8cb   :  { %11066 = vmatprep.subr.mxu0 %v14689_v17 }
 0x8cc   :  { %11067 = vmatpush3.msra.mxu0 %v14693_v61 }
 0x8cd   :  { %11068 = vmatprep.subr.mxu0 %v14697_v62 }
 0x8ce   :  { %11069 = vmatpush3.msra.mxu0 %v14701_v63 }
 0x8cf   :  { %11070 = vmatprep.subr.mxu0 %v14705_v0 }
 0x8d0   :  { %11071 = vmatpush3.msra.mxu0 %v14709_v1 }
 0x8d1   :  { %11072 = vmatprep.subr.mxu0 %v13162_v2 }
 0x8d2   :  { %11073 = vmatpush3.msra.mxu0 %v13163_v4 }
 0x8d3   :  { %11074 = vmatprep.subr.mxu0 %v13164_v6 }
 0x8d4   :  { %11075 = vmatpush3.msra.mxu0 %v13165_v7 }
 0x8d5   :  { %11076 = vmatprep.subr.mxu0 %v13166_v56 }
 0x8d6   :  { %11077 = vmatpush3.msra.mxu0 %v13167_v10 }
 0x8d7   :  { %11078 = vmatprep.subr.mxu0 %v13168_v60 }
 0x8d8   :  { %11079 = vmatpush3.msra.mxu0 %v13169_v11 }
 0x8d9   :  { %5493 = vmatprep.subr.mxu0 %v14720_v35 }
 0x8ec   :  { %v4710_v12 = vpop.f32.mrf.mxu1 }
 0x8ed   :  { %v4752_v18 = vadd.f32 %v14611_v42, %v4710_v12  ;;  %v14766_v12 = vld [vmem:[#allocation24 + $0x8] sm:$0xff] }
 0x8ee   :  { %v4712_v13 = vpop.f32.mrf.mxu1 }
 0x8ef   :  { %v4754_v20 = vadd.f32 %v14613_v46, %v4712_v13  ;;  %v14769_v13 = vld [vmem:[#allocation24] sm:$0xff] }
 0x8f0   :  { %v4714_v14 = vpop.f32.mrf.mxu1 }
 0x8f1   :  { %v14775_v14 = vld [vmem:[%s15616_s30 + $0x78] sm:$0xff] }
 0x8f2   :  { %v4715_v15 = vpop.f32.mrf.mxu1 }
 0x8f3   :  { %v14782_v15 = vld [vmem:[%s15616_s30 + $0x70] sm:$0xff] }
 0x92c   :  { %v4792_v19 = vpop.f32.mrf.mxu1 }
 0x92d   :  { %v4793_v21 = vadd.f32 %v4792_v19, %v4752_v18  ;;  %v14787_v18 = vld [vmem:[%s15616_s30 + $0x68] sm:$0xff]  ;;  %v14797_v19 = vld [vmem:[%s15616_s30 + $0x58] sm:$0xff] }
 0x92e   :  { %v4794_v22 = vpop.f32.mrf.mxu1 }
 0x92f   :  { %vm4801_vm13 = vcmp.gt.f32.partialorder %v4793_v21, 0.0  ;;  %v4805_v23 = vmul.f32 0.2, %v4793_v21  ;;  %v4795_v36 = vadd.f32 %v4794_v22, %v4754_v20  ;;  %v14802_v20 = vld [vmem:[%s15616_s30 + $0x50] sm:$0xff]  ;;  %v14812_v22 = vld [vmem:[%s15616_s30 + $0x40] sm:$0xff] }
 0x930   :  { %v4796_v24 = vpop.f32.mrf.mxu1 }
 0x931   :  { %vm4802_vm14 = vcmp.gt.f32.partialorder %v4795_v36, 0.0  ;;  %v4806_v47 = vmul.f32 0.2, %v4795_v36  ;;  %v4809_v52 = vsel %vm4801_vm13, %v4793_v21, %v4805_v23  ;;  %v14807_v21 = vld [vmem:[%s15616_s30 + $0x48] sm:$0xff]  ;;  %v14817_v23 = vld [vmem:[%s15616_s30 + $0x38] sm:$0xff] }
 0x932   :  { %v4797_v25 = vpop.f32.mrf.mxu1  ;;  %v4813_v30 = vpack.c.bf16 %v4809_v52, %v4809_v52  ;;  %v14827_v24 = vld [vmem:[%s15616_s30 + $0x28] sm:$0xff]  ;;  %v14837_v52 = vld [vmem:[%s15616_s30 + $0x18] sm:$0xff] }
 0x933   :  { %v4810_v28 = vsel %vm4802_vm14, %v4795_v36, %v4806_v47  ;;  %v14822_v36 = vld [vmem:[%s15616_s30 + $0x30] sm:$0xff]  ;;  %v14832_v47 = vld [vmem:[%s15616_s30 + $0x20] sm:$0xff] }
 0x934   :  { %v4814_v29 = vpack.c.bf16 %v4810_v28, %v4810_v28  ;;  %v14842_v25 = vld [vmem:[%s15616_s30 + $0x10] sm:$0xff]  ;;  %v14847_v28 = vld [vmem:[%s15616_s30 + $0x8] sm:$0xff] }
 0x936   :  { %5272 = vmatprep.mubr.bf16.mxu1 %v4814_v29  ;;  %v14852_v29 = vld [vmem:[%s15616_s30] sm:$0xff] }
 0x937   :  { %5273 = vmatmul.mubr.bf16.vlgmr.msra.gmra.mxu1 %v4813_v30 }
 0x938   :  { %11084 = vmatpush3.msra.mxu1 %v14621_v9 }
 0x939   :  { %11085 = vmatprep.subr.mxu1 %v14625_v27 }
 0x93a   :  { %11086 = vmatpush3.msra.mxu1 %v14629_v37 }
 0x93b   :  { %11087 = vmatprep.subr.mxu1 %v14633_v43 }
 0x93c   :  { %11088 = vmatpush3.msra.mxu1 %v14637_v38 }
 0x93d   :  { %11089 = vmatprep.subr.mxu1 %v14641_v39 }
 0x93e   :  { %11090 = vmatpush3.msra.mxu1 %v14645_v3 }
 0x93f   :  { %11091 = vmatprep.subr.mxu1 %v14649_v41 }
 0x940   :  { %11092 = vmatpush3.msra.mxu1 %v14653_v44 }
 0x941   :  { %11093 = vmatprep.subr.mxu1 %v14657_v48 }
 0x942   :  { %11094 = vmatpush3.msra.mxu1 %v14661_v50 }
 0x943   :  { %11095 = vmatprep.subr.mxu1 %v14665_v53 }
 0x944   :  { %11096 = vmatpush3.msra.mxu1 %v14669_v54 }
 0x945   :  { %11097 = vmatprep.subr.mxu1 %v14673_v55 }
 0x946   :  { %11098 = vmatpush3.msra.mxu1 %v14677_v57 }
 0x947   :  { %11099 = vmatprep.subr.mxu1 %v14681_v58 }
 0x948   :  { %11100 = vmatpush3.msra.mxu1 %v14685_v59 }
 0x949   :  { %11101 = vmatprep.subr.mxu1 %v14689_v17 }
 0x94a   :  { %11102 = vmatpush3.msra.mxu1 %v14693_v61 }
 0x94b   :  { %11103 = vmatprep.subr.mxu1 %v14697_v62 }
 0x94c   :  { %11104 = vmatpush3.msra.mxu1 %v14701_v63 }
 0x94d   :  { %11105 = vmatprep.subr.mxu1 %v14705_v0 }
 0x94e   :  { %11106 = vmatpush3.msra.mxu1 %v14709_v1 }
 0x94f   :  { %11107 = vmatprep.subr.mxu1 %v13162_v2 }
 0x950   :  { %11108 = vmatpush3.msra.mxu1 %v13163_v4 }
 0x951   :  { %11109 = vmatprep.subr.mxu1 %v13164_v6 }
 0x952   :  { %11110 = vmatpush3.msra.mxu1 %v13165_v7 }
 0x953   :  { %11111 = vmatprep.subr.mxu1 %v13166_v56 }
 0x954   :  { %11112 = vmatpush3.msra.mxu1 %v13167_v10 }
 0x955   :  { %11113 = vmatprep.subr.mxu1 %v13168_v60 }
 0x956   :  { %11114 = vmatpush3.msra.mxu1 %v13169_v11  ;;  %v14763_v11 = vld [vmem:[#allocation24 + $0x10] sm:$0xff] }
 0x957   :  { %11569 = vmatprep.subr.mxu1 %v15551_v26 }
 0x979   :  { %v5233_v42 = vpop.f32.mrf.mxu0 }
 0x97b   :  { %v5235_v46 = vpop.f32.mrf.mxu0 }
 0x97d   :  { %v5237_v31 = vpop.f32.mrf.mxu0 }
 0x97f   :  { %v5238_v32 = vpop.f32.mrf.mxu0 }
 0x9f7   :  { %v5274_v33 = vpop.f32.mrf.mxu1 }
 0x9f8   :  { %v14749_v45 = vadd.f32 %v5274_v33, %v5233_v42 }
 0x9f9   :  { %v5276_v51 = vpop.f32.mrf.mxu1 }
 0x9fa   :  { %v5283_v8 = vsel %vm2305_vm4, %v14749_v45, 0.0  ;;  %v5297_v34 = vmul.f32 %v14749_v45, %v14749_v45  ;;  %v14755_v16 = vadd.f32 %v5276_v51, %v5235_v46 }
 0x9fb   :  { %v5284_v9 = vrot.slane %v5283_v8, 4  ;;  %v5278_v27 = vpop.f32.mrf.mxu1 }
 0x9fc   :  { %v5299_v37 = vsel %vm2305_vm4, %v5297_v34, 0.0  ;;  %v5290_v43 = vsel %vm2305_vm4, %v14755_v16, 0.0  ;;  %v5298_v38 = vmul.f32 %v14755_v16, %v14755_v16 }
 0x9fd   :  { %v5285_v39 = vadd.f32 %v5284_v9, %v5283_v8  ;;  %v5300_v3 = vrot.slane %v5299_v37, 4  ;;  %v5291_v41 = vrot.slane %v5290_v43, 4  ;;  %v5279_v44 = vpop.f32.mrf.mxu1 }
 0x9fe   :  { %v5306_v48 = vsel %vm2305_vm4, %v5298_v38, 0.0  ;;  %v12657_v44 = vld [vmem:[%s15621_s7 + $0x38] sm:$0xff]  }
 0x9ff   :  { %v5286_v50 = vrot.slane %v5285_v39, 2  ;;  %v5301_v53 = vadd.f32 %v5300_v3, %v5299_v37  ;;  %v5292_v54 = vadd.f32 %v5291_v41, %v5290_v43  ;;  %v5307_v55 = vrot.slane %v5306_v48, 4  ;;  %v5281_v37 = vld [vmem:[#allocation7] sm:$0x1]  ;;  %v12656_v41 = vld [vmem:[%s15621_s7 + $0x78] sm:$0xff]  }
 0xa01   :  { %v5287_v57 = vadd.f32 %v5286_v50, %v5285_v39  ;;  %v5302_v58 = vrot.slane %v5301_v53, 2  ;;  %v5293_v59 = vrot.slane %v5292_v54, 2  ;;  %v5308_v17 = vadd.f32 %v5307_v55, %v5306_v48  ;;  %v5282_v39 = vld [vmem:[#allocation7 + $0x1] sm:$0x1]  ;;  %v12658_v50 = vld [vmem:[%s15621_s7 + $0x70] sm:$0xff]   ;;  %v12661_v55 = vld [vmem:[%s15621_s7 + $0x28] sm:$0xff]  }
 0xa03   :  { %v5294_v61 = vadd.f32 %v5293_v59, %v5292_v54  ;;  %v5309_v62 = vrot.slane %v5308_v17, 2  ;;  %v5303_v63 = vadd.f32 %v5302_v58, %v5301_v53  ;;  %v5288_v0 = vrot.slane %v5287_v57, 1  ;;  %v12659_v53 = vld [vmem:[%s15621_s7 + $0x30] sm:$0xff]   ;;  %v12660_v54 = vld [vmem:[%s15621_s7 + $0x68] sm:$0xff]   ;;  %v12663_v58 = vld [vmem:[%s15621_s7 + $0x20] sm:$0xff]  }
 0xa04   :  { %v12664_v59 = vld [vmem:[%s15621_s7 + $0x58] sm:$0xff]  }
 0xa05   :  { %v5295_v1 = vrot.slane %v5294_v61, 1  ;;  %v5310_v2 = vadd.f32 %v5309_v62, %v5308_v17  ;;  %v5304_v4 = vrot.slane %v5303_v63, 1  ;;  %v5289_v56 = vadd.f32 %v5288_v0, %v5287_v57  ;;  %v12662_v57 = vld [vmem:[%s15621_s7 + $0x60] sm:$0xff]   ;;  %v12665_v17 = vld [vmem:[%s15621_s7 + $0x18] sm:$0xff]   ;;  %v12667_v62 = vld [vmem:[%s15621_s7 + $0x10] sm:$0xff]  }
 0xa06   :  { %v12669_v0 = vld [vmem:[%s15621_s7 + $0x8] sm:$0xff]  }
 0xa07   :  { %v5296_v6 = vadd.f32 %v5295_v1, %v5294_v61  ;;  %v5311_v7 = vrot.slane %v5310_v2, 1  ;;  %v5305_v60 = vadd.f32 %v5304_v4, %v5303_v63  ;;  %v12666_v61 = vld [vmem:[%s15621_s7 + $0x50] sm:$0xff]   ;;  %v12668_v63 = vld [vmem:[%s15621_s7 + $0x48] sm:$0xff]   ;;  %v12670_v1 = vld [vmem:[%s15621_s7 + $0x40] sm:$0xff]  }
 0xa09   :  { %5377 = vmatprep.mubr.f32.mxu0 %v5296_v6  ;;  %v5312_v10 = vadd.f32 %v5311_v7, %v5310_v2  ;;  %v12671_v2 = vld [vmem:[%s15621_s7] sm:$0xff]  }
 0xa0a   :  { %5378 = vmatmul.mubr.f32.vlgmr.msra.gmra.mxu0 %v5289_v56 }
 0xa0b   :  { %5447 = vmatprep.mubr.f32.mxu1 %v5312_v10  ;;  %5494 = vmatpush1.msra.mxu0 %v14763_v11 }
 0xa0c   :  { %5448 = vmatmul.mubr.f32.vlgmr.msra.gmra.mxu1 %v5305_v60  ;;  %5495 = vmatprep.subr.mxu0 %v14766_v12 }
 0xa0d   :  { %5496 = vmatpush1.msra.mxu0 %v14769_v13  ;;  %5529 = vmatprep.mubr.f32.mxu0 %v15551_v26 }
 0xa0e   :  { %5567 = vmatprep.subr.mxu0 %v14720_v35  ;;  %11570 = vmatpush3.msra.mxu1 %v14775_v14  ;;  %v14792_v35 = vld [vmem:[%s15616_s30 + $0x60] sm:$0xff] }
 0xa0f   :  { %11571 = vmatprep.subr.mxu1 %v15551_v26  ;;  %11601 = vmatprep.mubr.msk.f32.mxu1 %vm13660_vm8, %v15551_v26 }
 0xa10   :  { %11572 = vmatpush3.msra.mxu1 %v14782_v15 }
 0xa11   :  { %11573 = vmatprep.subr.mxu1 %v15551_v26 }
 0xa12   :  { %11574 = vmatpush3.msra.mxu1 %v14787_v18 }
 0xa13   :  { %11575 = vmatprep.subr.mxu1 %v15551_v26 }
 0xa14   :  { %11576 = vmatpush3.msra.mxu1 %v14792_v35 }
 0xa15   :  { %11577 = vmatprep.subr.mxu1 %v15551_v26 }
 0xa16   :  { %11578 = vmatpush3.msra.mxu1 %v14797_v19 }
 0xa17   :  { %11579 = vmatprep.subr.mxu1 %v15551_v26 }
 0xa18   :  { %11580 = vmatpush3.msra.mxu1 %v14802_v20 }
 0xa19   :  { %11581 = vmatprep.subr.mxu1 %v15551_v26 }
 0xa1a   :  { %11582 = vmatpush3.msra.mxu1 %v14807_v21 }
 0xa1b   :  { %11583 = vmatprep.subr.mxu1 %v15551_v26 }
 0xa1c   :  { %11584 = vmatpush3.msra.mxu1 %v14812_v22 }
 0xa1d   :  { %11585 = vmatprep.subr.mxu1 %v15551_v26 }
 0xa1e   :  { %11586 = vmatpush3.msra.mxu1 %v14817_v23 }
 0xa1f   :  { %11587 = vmatprep.subr.mxu1 %v15551_v26 }
 0xa20   :  { %11588 = vmatpush3.msra.mxu1 %v14822_v36 }
 0xa21   :  { %11589 = vmatprep.subr.mxu1 %v15551_v26 }
 0xa22   :  { %11590 = vmatpush3.msra.mxu1 %v14827_v24 }
 0xa23   :  { %11591 = vmatprep.subr.mxu1 %v15551_v26 }
 0xa24   :  { %11592 = vmatpush3.msra.mxu1 %v14832_v47 }
 0xa25   :  { %11593 = vmatprep.subr.mxu1 %v15551_v26 }
 0xa26   :  { %11594 = vmatpush3.msra.mxu1 %v14837_v52 }
 0xa27   :  { %11595 = vmatprep.subr.mxu1 %v15551_v26 }
 0xa28   :  { %11596 = vmatpush3.msra.mxu1 %v14842_v25 }
 0xa29   :  { %11597 = vmatprep.subr.mxu1 %v15551_v26 }
 0xa2a   :  { %11598 = vmatpush3.msra.mxu1 %v14847_v28 }
 0xa2b   :  { %11599 = vmatprep.subr.mxu1 %v15551_v26 }
 0xa2c   :  { %11600 = vmatpush3.msra.mxu1 %v14852_v29 }
 0xa2d   :  { %11639 = vmatprep.subr.mxu1 %v15551_v26 }
 0xaca   :  { %v11080_v30 = vpop.f32.mrf.mxu0 }
 0xacc   :  { %v11081_v42 = vpop.f32.mrf.mxu0  ;;  %v11115_v46 = vpop.f32.mrf.mxu1 }
 0xacd   :  { %v11082_v31 = vadd.f32 %v11081_v42, %v11080_v30 }
 0xace   :  { %v11116_v32 = vpop.f32.mrf.mxu1 }
 0xacf   :  { %v5453_v33 = vmul.f32 0.03125, %v11082_v31  ;;  %v11117_v51 = vadd.f32 %v11116_v32, %v11115_v46 }
 0xad1   :  { %v5455_v8 = vmul.f32 %v5453_v33, %v5453_v33  ;;  %v5454_v34 = vmul.f32 0.03125, %v11117_v51 }
 0xad3   :  { %v5456_v9 = vsub.f32 %v5454_v34, %v5455_v8 }
 0xad5   :  { %v5457_v27 = vadd.f32 1e-05, %v5456_v9 }
 0xad7   :  { %13100 = vrsqrt.f32 %v5457_v27 }
 0xae4   :  { %v13101_v43 = vpop.eup %13100 }
 0xae5   :  { %v5459_v38 = vmul.f32 %v13101_v43, %v5281_v37  ;;  %v13190_v37 = vld [vmem:[#allocation25 + $0x18] sm:$0xff]  ;;  %v13191_v43 = vld [vmem:[#allocation25 + $0x10] sm:$0xff] }
 0xae7   :  { %10585 = vmatmul.mubr.msk.f32.vlgmr.msra.gmra.mxu0 %vm2522_vm5, %v5459_v38  ;;  %v5460_v3 = vmul.f32 %v5459_v38, %v5453_v33  ;;  %v13192_v38 = vld [vmem:[#allocation25 + $0x8] sm:$0xff] }
 0xae8   :  { %5568 = vmatpush1.msra.mxu0 %v14763_v11  ;;  %5603 = vmatprep.mubr.f32.mxu0 %v15551_v26 }
 0xae9   :  { %5569 = vmatprep.subr.mxu0 %v14766_v12  ;;  %v5461_v48 = vsub.f32 %v5282_v39, %v5460_v3  ;;  %v13193_v39 = vld [vmem:[#allocation25] sm:$0xff] }
 0xaea   :  { %5570 = vmatpush1.msra.mxu0 %v14769_v13 }
 0xaeb   :  { %10586 = vmatmul.mubr.msk.f32.vlgmr.msra.gmra.mxu0 %vm2522_vm5, %v5461_v48  ;;  %11118 = vmatprep.subr.bf16.mxu0 %v12656_v41 }
 0xaec   :  { %11119 = vmatpush3.bf16.msra.mxu0 %v12657_v44 }
 0xaed   :  { %11120 = vmatprep.subr.bf16.mxu0 %v12658_v50 }
 0xaf0   :  { %11121 = vmatpush3.bf16.msra.mxu0 %v12659_v53 }
 0xaf1   :  { %11122 = vmatprep.subr.bf16.mxu0 %v12660_v54 }
 0xaf4   :  { %11123 = vmatpush3.bf16.msra.mxu0 %v12661_v55 }
 0xaf5   :  { %11124 = vmatprep.subr.bf16.mxu0 %v12662_v57 }
 0xaf8   :  { %11125 = vmatpush3.bf16.msra.mxu0 %v12663_v58  ;;  %v5806_v58 = vld [vmem:[#allocation9] sm:$0x1] }
 0xaf9   :  { %11126 = vmatprep.subr.bf16.mxu0 %v12664_v59 }
 0xafc   :  { %11127 = vmatpush3.bf16.msra.mxu0 %v12665_v17 }
 0xafd   :  { %11128 = vmatprep.subr.bf16.mxu0 %v12666_v61 }
 0xb00   :  { %11129 = vmatpush3.bf16.msra.mxu0 %v12667_v62  ;;  %v5807_v62 = vld [vmem:[#allocation9 + $0x1] sm:$0x1] }
 0xb01   :  { %11130 = vmatprep.subr.bf16.mxu0 %v12668_v63  ;;  %v12672_v63 = vld [vmem:[%s15622_s12 + $0x38] sm:$0xff]  }
 0xb04   :  { %11131 = vmatpush3.bf16.msra.mxu0 %v12669_v0 }
 0xb05   :  { %11132 = vmatprep.subr.bf16.mxu0 %v12670_v1  ;;  %v12673_v1 = vld [vmem:[%s15622_s12 + $0x30] sm:$0xff]  }
 0xb08   :  { %11133 = vmatpush3.bf16.msra.mxu0 %v12671_v2  ;;  %v12674_v2 = vld [vmem:[%s15622_s12 + $0x28] sm:$0xff]  }
 0xb09   :  { %11604 = vmatprep.subr.mxu0 %v15551_v26 }
 0xba7   :  { %v5531_v4 = vpop.f32.mrf.mxu0 }
 0xba8   :  { %v5613_v6 = vrot.slane %v5531_v4, %v14264_v5  ;;  %v12675_v4 = vld [vmem:[%s15622_s12 + $0x20] sm:$0xff]  }
 0xba9   :  { %v5533_v7 = vpop.f32.mrf.mxu0 }
 0xbaa   :  { %v5617_v56 = vrot.slane %v5533_v7, %v14264_v5  ;;  %v5618_v60 = vmul.f32 %v5613_v6, %v14749_v45  ;;  %v12676_v6 = vld [vmem:[%s15622_s12 + $0x18] sm:$0xff]   ;;  %v12677_v7 = vld [vmem:[%s15622_s12 + $0x10] sm:$0xff]  }
 0xbab   :  { %v5605_v10 = vpop.f32.mrf.mxu0 }
 0xbac   :  { %v5623_v11 = vrot.slane %v5605_v10, %v14264_v5  ;;  %v5619_v13 = vmul.f32 %v5617_v56, %v14755_v16  ;;  %v12678_v56 = vld [vmem:[%s15622_s12 + $0x8] sm:$0xff]   ;;  %v12679_v10 = vld [vmem:[%s15622_s12] sm:$0xff]  }
 0xbad   :  { %v5607_v12 = vpop.f32.mrf.mxu0 }
 0xbae   :  { %v5628_v30 = vadd.f32 %v5623_v11, %v5618_v60  ;;  %v5627_v42 = vrot.slane %v5607_v12, %v14264_v5 }
 0xbb0   :  { %vm5630_vm15 = vcmp.gt.f32.partialorder %v5628_v30, 0.0  ;;  %v5632_v46 = vmul.f32 0.2, %v5628_v30  ;;  %v5629_v31 = vadd.f32 %v5627_v42, %v5619_v13 }
 0xbb2   :  { %v5633_v32 = vmul.f32 0.2, %v5629_v31  ;;  %vm5631_vm0 = vcmp.gt.f32.partialorder %v5629_v31, 0.0  ;;  %v5634_v33 = vsel %vm5630_vm15, %v5628_v30, %v5632_v46 }
 0xbb3   :  { %v5636_v34 = vpack.c.bf16 %v5634_v33, %v5634_v33 }
 0xbb4   :  { %v5635_v51 = vsel %vm5631_vm0, %v5629_v31, %v5633_v32 }
 0xbb5   :  { %v5637_v8 = vpack.c.bf16 %v5635_v51, %v5635_v51 }
 0xbb7   :  { %5798 = vmatprep.mubr.bf16.mxu0 %v5637_v8  ;;  %v12680_v8 = vld [vmem:[#allocation13 + $0x18] sm:$0xff]  }
 0xbb8   :  { %5799 = vmatmul.mubr.bf16.vlgmr.msra.gmra.mxu0 %v5636_v34  ;;  %v12681_v34 = vld [vmem:[#allocation13 + $0x10] sm:$0xff]  }
 0xbb9   :  { %11605 = vmatpush3.msra.mxu0 %v14775_v14  ;;  %11636 = vmatprep.mubr.msk.f32.mxu0 %vm13660_vm8, %v15551_v26 }
 0xbba   :  { %11606 = vmatprep.subr.mxu0 %v15551_v26 }
 0xbbb   :  { %11607 = vmatpush3.msra.mxu0 %v14782_v15 }
 0xbbc   :  { %11608 = vmatprep.subr.mxu0 %v15551_v26 }
 0xbbd   :  { %11609 = vmatpush3.msra.mxu0 %v14787_v18 }
 0xbbe   :  { %11610 = vmatprep.subr.mxu0 %v15551_v26 }
 0xbbf   :  { %11611 = vmatpush3.msra.mxu0 %v14792_v35 }
 0xbc0   :  { %11612 = vmatprep.subr.mxu0 %v15551_v26 }
 0xbc1   :  { %11613 = vmatpush3.msra.mxu0 %v14797_v19 }
 0xbc2   :  { %11614 = vmatprep.subr.mxu0 %v15551_v26 }
 0xbc3   :  { %11615 = vmatpush3.msra.mxu0 %v14802_v20 }
 0xbc4   :  { %11616 = vmatprep.subr.mxu0 %v15551_v26 }
 0xbc5   :  { %11617 = vmatpush3.msra.mxu0 %v14807_v21 }
 0xbc6   :  { %11618 = vmatprep.subr.mxu0 %v15551_v26 }
 0xbc7   :  { %11619 = vmatpush3.msra.mxu0 %v14812_v22 }
 0xbc8   :  { %11620 = vmatprep.subr.mxu0 %v15551_v26 }
 0xbc9   :  { %11621 = vmatpush3.msra.mxu0 %v14817_v23 }
 0xbca   :  { %11622 = vmatprep.subr.mxu0 %v15551_v26 }
 0xbcb   :  { %11623 = vmatpush3.msra.mxu0 %v14822_v36 }
 0xbcc   :  { %11624 = vmatprep.subr.mxu0 %v15551_v26 }
 0xbcd   :  { %11625 = vmatpush3.msra.mxu0 %v14827_v24 }
 0xbce   :  { %11626 = vmatprep.subr.mxu0 %v15551_v26 }
 0xbcf   :  { %11627 = vmatpush3.msra.mxu0 %v14832_v47 }
 0xbd0   :  { %11628 = vmatprep.subr.mxu0 %v15551_v26 }
 0xbd1   :  { %11629 = vmatpush3.msra.mxu0 %v14837_v52 }
 0xbd2   :  { %11630 = vmatprep.subr.mxu0 %v15551_v26 }
 0xbd3   :  { %11631 = vmatpush3.msra.mxu0 %v14842_v25 }
 0xbd4   :  { %11632 = vmatprep.subr.mxu0 %v15551_v26 }
 0xbd5   :  { %11633 = vmatpush3.msra.mxu0 %v14847_v28 }
 0xbd6   :  { %11634 = vmatprep.subr.mxu0 %v15551_v26 }
 0xbd7   :  { %11635 = vmatpush3.msra.mxu0 %v14852_v29 }
 0xbd8   :  { %11681 = vmatprep.subr.bf16.mxu0 %v15551_v26 }
 0xc78   :  { %v11134_v45 = vpop.f32.mrf.mxu0 }
 0xc7a   :  { %v11135_v16 = vpop.f32.mrf.mxu0 }
 0xc7b   :  { %v14919_v14 = vadd.f32 %v11135_v16, %v11134_v45  ;;  %v12682_v45 = vld [vmem:[#allocation13 + $0x8] sm:$0xff]   ;;  %v12683_v16 = vld [vmem:[#allocation13] sm:$0xff]  }
 0xc7c   :  { %v11137_v15 = vpop.f32.mrf.mxu0 }
 0xc7d   :  { %v5808_v18 = vsel %vm2305_vm4, %v14919_v14, 0.0  ;;  %v5815_v35 = vmul.f32 %v14919_v14, %v14919_v14  ;;  %v3329_v15 = vmul.f32 %v14609_v40, %v14609_v40 }
 0xc7e   :  { %v5809_v19 = vrot.slane %v5808_v18, 4  ;;  %v11138_v20 = vpop.f32.mrf.mxu0 }
 0xc7f   :  { %v5816_v21 = vsel %vm2305_vm4, %v5815_v35, 0.0  ;;  %v3330_v35 = vsel %vm3321_vm2, %v3329_v15, 0.0 }
 0xc80   :  { %v5810_v22 = vadd.f32 %v5809_v19, %v5808_v18  ;;  %v5817_v23 = vrot.slane %v5816_v21, 4  ;;  %v3331_v20 = vrot.slane %v3330_v35, 4 }
 0xc82   :  { %v5811_v36 = vrot.slane %v5810_v22, 2  ;;  %v5818_v24 = vadd.f32 %v5817_v23, %v5816_v21 }
 0xc84   :  { %v5812_v47 = vadd.f32 %v5811_v36, %v5810_v22  ;;  %v5819_v52 = vrot.slane %v5818_v24, 2  ;;  %v3332_v22 = vadd.f32 %v3331_v20, %v3330_v35  ;;  %v12684_v35 = vld [vmem:[#allocation12 + $0x18] sm:$0xff]  }
 0xc86   :  { %v5813_v25 = vrot.slane %v5812_v47, 1  ;;  %v5820_v28 = vadd.f32 %v5819_v52, %v5818_v24  ;;  %v3333_v36 = vrot.slane %v3332_v22, 2 }
 0xc88   :  { %v5814_v29 = vadd.f32 %v5813_v25, %v5812_v47  ;;  %v5821_v9 = vrot.slane %v5820_v28, 1  ;;  %v3334_v47 = vadd.f32 %v3333_v36, %v3332_v22  ;;  %v12685_v22 = vld [vmem:[#allocation12 + $0x10] sm:$0xff]   ;;  %v12686_v36 = vld [vmem:[#allocation12 + $0x8] sm:$0xff]  }
 0xc8a   :  { %11602 = vmatmul.mubr.f32.vlgmr.msra.gmra.mxu1 %v5814_v29  ;;  %v5822_v27 = vadd.f32 %v5821_v9, %v5820_v28  ;;  %v3335_v28 = vrot.slane %v3334_v47, 1 }
 0xc8b   :  { %11640 = vmatpush3.msra.mxu1 %v13190_v37  ;;  %11647 = vmatprep.mubr.msk.f32.mxu1 %vm13660_vm8, %v15551_v26 }
 0xc8c   :  { %11637 = vmatmul.mubr.f32.vlgmr.msra.gmra.mxu0 %v5822_v27  ;;  %11641 = vmatprep.subr.mxu1 %v15551_v26 }
 0xc8d   :  { %11642 = vmatpush3.msra.mxu1 %v13191_v43  ;;  %11689 = vmatprep.mubr.msk.bf16.mxu0 %vm13660_vm8, %v15551_v26 }
 0xc8e   :  { %11643 = vmatprep.subr.mxu1 %v15551_v26  ;;  %11682 = vmatpush3.bf16.msra.mxu0 %v12680_v8 }
 0xc8f   :  { %11644 = vmatpush3.msra.mxu1 %v13192_v38  ;;  %11683 = vmatprep.subr.bf16.mxu0 %v15551_v26 }
 0xc90   :  { %11645 = vmatprep.subr.mxu1 %v15551_v26 }
 0xc91   :  { %11646 = vmatpush3.msra.mxu1 %v13193_v39 }
 0xc92   :  { %11650 = vmatprep.subr.mxu1 %v15551_v26  ;;  %11684 = vmatpush3.bf16.msra.mxu0 %v12681_v34  ;;  %v3320_v34 = vld [vmem:[#allocation6 + $0x1] sm:$0x1] }
 0xc93   :  { %11685 = vmatprep.subr.bf16.mxu0 %v15551_v26 }
 0xc96   :  { %11686 = vmatpush3.bf16.msra.mxu0 %v12682_v45 }
 0xc97   :  { %11687 = vmatprep.subr.bf16.mxu0 %v15551_v26 }
 0xc9a   :  { %11688 = vmatpush3.bf16.msra.mxu0 %v12683_v16 }
 0xc9b   :  { %11693 = vmatprep.subr.bf16.mxu0 %v15551_v26 }
 0xd4a   :  { %v5889_v3 = vpop.f32.mrf.mxu1 }
 0xd4b   :  { %v5963_v41 = vmul.f32 0.125, %v5889_v3 }
 0xd4c   :  { %v11603_v44 = vpop.f32.mrf.mxu1  ;;  %v5959_v48 = vpop.f32.mrf.mxu0 }
 0xd4d   :  { %v5965_v50 = vmul.f32 %v5963_v41, %v5963_v41  ;;  %v5964_v53 = vmul.f32 0.125, %v5959_v48 }
 0xd4e   :  { %v11638_v54 = vpop.f32.mrf.mxu0 }
 0xd4f   :  { %v5966_v55 = vsub.f32 %v5964_v53, %v5965_v50 }
 0xd51   :  { %v5967_v57 = vadd.f32 1e-05, %v5966_v55 }
 0xd53   :  { %13102 = vrsqrt.f32 %v5967_v57 }
 0xd60   :  { %v13103_v59 = vpop.eup %13102 }
 0xd61   :  { %v5969_v17 = vmul.f32 %v13103_v59, %v5806_v58 }
 0xd63   :  { %11648 = vmatmul.mubr.msk.f32.vlgmr.msra.gmra.mxu1 %vm3054_vm9, %v5969_v17  ;;  %v5970_v61 = vmul.f32 %v5969_v17, %v5963_v41  ;;  %v3336_v41 = vadd.f32 %v3335_v28, %v3334_v47  ;;  %v12687_v47 = vld [vmem:[#allocation12] sm:$0xff]  }
 0xd64   :  { %11651 = vmatpush3.msra.mxu1 %v13190_v37  ;;  %11658 = vmatprep.mubr.msk.f32.mxu1 %vm13660_vm8, %v15551_v26  ;;  %v6459_v28 = vld [vmem:[%s15623_s27 + $0x70] sm:$0xff] }
 0xd65   :  { %11652 = vmatprep.subr.mxu1 %v15551_v26  ;;  %v5971_v0 = vsub.f32 %v5807_v62, %v5970_v61  ;;  %v3339_v57 = vmul.f32 0.5, %v3336_v41  ;;  %v6450_v41 = vld [vmem:[%s15623_s27 + $0x28] sm:$0xff] }
 0xd66   :  { %11653 = vmatpush3.msra.mxu1 %v13191_v43 }
 0xd67   :  { %11654 = vmatprep.subr.mxu1 %v15551_v26 }
 0xd68   :  { %11655 = vmatpush3.msra.mxu1 %v13192_v38 }
 0xd69   :  { %11656 = vmatprep.subr.mxu1 %v15551_v26 }
 0xd6a   :  { %11657 = vmatpush3.msra.mxu1 %v13193_v39 }
 0xd6b   :  { %11659 = vmatmul.mubr.msk.f32.vlgmr.msra.gmra.mxu1 %vm3054_vm9, %v5971_v0  ;;  %11661 = vmatprep.subr.bf16.mxu1 %v15551_v26 }
 0xd6c   :  { %11662 = vmatpush3.bf16.msra.mxu1 %v12672_v63  ;;  %11677 = vmatprep.mubr.msk.bf16.mxu1 %vm13660_vm8, %v15551_v26 }
 0xd6d   :  { %11663 = vmatprep.subr.bf16.mxu1 %v15551_v26 }
 0xd70   :  { %11664 = vmatpush3.bf16.msra.mxu1 %v12673_v1 }
 0xd71   :  { %11665 = vmatprep.subr.bf16.mxu1 %v15551_v26 }
 0xd74   :  { %11666 = vmatpush3.bf16.msra.mxu1 %v12674_v2 }
 0xd75   :  { %11667 = vmatprep.subr.bf16.mxu1 %v15551_v26 }
 0xd78   :  { %11668 = vmatpush3.bf16.msra.mxu1 %v12675_v4 }
 0xd79   :  { %11669 = vmatprep.subr.bf16.mxu1 %v15551_v26 }
 0xd7c   :  { %11670 = vmatpush3.bf16.msra.mxu1 %v12676_v6 }
 0xd7d   :  { %11671 = vmatprep.subr.bf16.mxu1 %v15551_v26 }
 0xd80   :  { %11672 = vmatpush3.bf16.msra.mxu1 %v12677_v7 }
 0xd81   :  { %11673 = vmatprep.subr.bf16.mxu1 %v15551_v26 }
 0xd84   :  { %11674 = vmatpush3.bf16.msra.mxu1 %v12678_v56 }
 0xd85   :  { %11675 = vmatprep.subr.bf16.mxu1 %v15551_v26 }
 0xd88   :  { %11676 = vmatpush3.bf16.msra.mxu1 %v12679_v10  ;;  %v6236_v10 = vld [vmem:[#allocation10] sm:$0x1] }
 0xd89   :  { %11705 = vmatprep.subr.mxu1 %v15551_v26 }
 0xe23   :  { %v6041_v60 = vpop.f32.mrf.mxu1 }
 0xe24   :  { %v6121_v12 = vrot.slane %v6041_v60, %v14264_v5 }
 0xe25   :  { %v11649_v11 = vpop.f32.mrf.mxu1 }
 0xe26   :  { %v6122_v30 = vmul.f32 %v14919_v14, %v6121_v12  ;;  %v3322_v14 = vsel %vm3321_vm2, %v14609_v40, 0.0  ;;  %v3319_v12 = vld [vmem:[#allocation6] sm:$0x1] }
 0xe27   :  { %v3323_v18 = vrot.slane %v3322_v14, 4 }
 0xe29   :  { %v3324_v19 = vadd.f32 %v3323_v18, %v3322_v14 }
 0xe2b   :  { %v6114_v13 = vpop.f32.mrf.mxu1  ;;  %v3325_v21 = vrot.slane %v3324_v19, 2 }
 0xe2c   :  { %v6126_v42 = vrot.slane %v6114_v13, %v14264_v5 }
 0xe2d   :  { %v11660_v46 = vpop.f32.mrf.mxu1  ;;  %v3326_v23 = vadd.f32 %v3325_v21, %v3324_v19 }
 0xe2e   :  { %v6127_v31 = vadd.f32 %v6126_v42, %v6122_v30  ;;  %v6237_v30 = vld [vmem:[#allocation10 + $0x1] sm:$0x1] }
 0xe2f   :  { %v3327_v24 = vrot.slane %v3326_v23, 1 }
 0xe30   :  { %vm6128_vm1 = vcmp.gt.f32.partialorder %v6127_v31, 0.0  ;;  %v6129_v32 = vmul.f32 0.2, %v6127_v31 }
 0xe31   :  { %v3328_v25 = vadd.f32 %v3327_v24, %v3326_v23 }
 0xe32   :  { %v6130_v33 = vsel %vm6128_vm1, %v6127_v31, %v6129_v32 }
 0xe33   :  { %v6131_v51 = vpack.c.bf16 %v6130_v33, %v6130_v33  ;;  %v3338_v44 = vmul.f32 0.5, %v3328_v25  ;;  %v6460_v25 = vld [vmem:[%s15623_s27 + $0x78] sm:$0xff] }
 0xe35   :  { %11678 = vmatmul.mubr.bf16.vlgmr.msra.gmra.mxu1 %v6131_v51  ;;  %v3340_v58 = vmul.f32 %v3338_v44, %v3338_v44 }
 0xe36   :  { %11737 = vmatprep.mubr.msk.f32.mxu1 %vm13660_vm8, %v15551_v26  ;;  %11706 = vmatpush3.msra.mxu1 %v6460_v25 }
 0xe37   :  { %v3341_v63 = vsub.f32 %v3339_v57, %v3340_v58  ;;  %11707 = vmatprep.subr.mxu1 %v15551_v26 }
 0xe38   :  { %11708 = vmatpush3.msra.mxu1 %v6459_v28 }
 0xe39   :  { %v3342_v6 = vadd.f32 1e-05, %v3341_v63  ;;  %11709 = vmatprep.subr.mxu1 %v15551_v26 }
 0xe3b   :  { %13104 = vrsqrt.f32 %v3342_v6 }
 0xe48   :  { %v13105_v60 = vpop.eup %13104 }
 0xe49   :  { %v3344_v42 = vmul.f32 %v13105_v60, %v3319_v12 }
 0xe4b   :  { %v3345_v33 = vmul.f32 %v3344_v42, %v3338_v44  ;;  %v3350_v15 = vrot.slane %v3344_v42, %v14264_v5  ;;  %v6449_v44 = vld [vmem:[%s15623_s27 + $0x20] sm:$0xff] }
 0xe4d   :  { %v3346_v16 = vsub.f32 %v3320_v34, %v3345_v33  ;;  %v3351_v21 = vmul.f32 %v3350_v15, %v14609_v40  ;;  %v6612_v33 = vld [vmem:[#allocation27 + $0x10] sm:$0xff] }
 0xe4e   :  { %v12690_v34 = vld [vmem:[#allocation15 + $0x74] ss:$8 sps:$4 sm:$0xff]  }
 0xe4f   :  { %v3355_v20 = vrot.slane %v3346_v16, %v14264_v5 }
 0xe51   :  { %v3356_v23 = vadd.f32 %v3355_v20, %v3351_v21 }
 0xe53   :  { %v3358_v24 = vmul.f32 0.2, %v3356_v23  ;;  %vm3357_vm7 = vcmp.gt.f32.partialorder %v3356_v23, 0.0 }
 0xe55   :  { %v3359_v40 = vsel %vm3357_vm7, %v3356_v23, %v3358_v24 }
 0xef5   :  { %v6230_v52 = vpop.f32.mrf.mxu1 }
 0xef6   :  { %v6238_v29 = vsel %vm3321_vm2, %v6230_v52, 0.0  ;;  %v6245_v9 = vmul.f32 %v6230_v52, %v6230_v52 }
 0xef7   :  { %v6239_v27 = vrot.slane %v6238_v29, 4  ;;  %v11679_v37 = vpop.f32.mrf.mxu1 }
 0xef8   :  { %v6246_v43 = vsel %vm3321_vm2, %v6245_v9, 0.0  ;;  %v6457_v9 = vld [vmem:[%s15623_s27 + $0x60] sm:$0xff]  ;;  %v6455_v37 = vld [vmem:[%s15623_s27 + $0x50] sm:$0xff] }
 0xef9   :  { %v6240_v38 = vadd.f32 %v6239_v27, %v6238_v29  ;;  %v6247_v39 = vrot.slane %v6246_v43, 4  ;;  %v6233_v3 = vpop.f32.mrf.mxu1  ;;  %v6458_v29 = vld [vmem:[%s15623_s27 + $0x68] sm:$0xff]  ;;  %v6456_v27 = vld [vmem:[%s15623_s27 + $0x58] sm:$0xff] }
 0xefa   :  { %11710 = vmatpush3.msra.mxu1 %v6458_v29  ;;  %v6451_v3 = vld [vmem:[%s15623_s27 + $0x30] sm:$0xff] }
 0xefb   :  { %v6241_v48 = vrot.slane %v6240_v38, 2  ;;  %v6248_v50 = vadd.f32 %v6247_v39, %v6246_v43  ;;  %v11680_v53 = vpop.f32.mrf.mxu1  ;;  %11711 = vmatprep.subr.mxu1 %v15551_v26  ;;  %v6454_v43 = vld [vmem:[%s15623_s27 + $0x48] sm:$0xff]  ;;  %v6452_v39 = vld [vmem:[%s15623_s27 + $0x38] sm:$0xff] }
 0xefc   :  { %11712 = vmatpush3.msra.mxu1 %v6457_v9  ;;  %v6446_v53 = vld [vmem:[%s15623_s27 + $0x8] sm:$0xff] }
 0xefd   :  { %v6242_v54 = vadd.f32 %v6241_v48, %v6240_v38  ;;  %v6249_v55 = vrot.slane %v6248_v50, 2  ;;  %11713 = vmatprep.subr.mxu1 %v15551_v26  ;;  %v6453_v38 = vld [vmem:[%s15623_s27 + $0x40] sm:$0xff]  ;;  %v6448_v48 = vld [vmem:[%s15623_s27 + $0x18] sm:$0xff] }
 0xefe   :  { %11714 = vmatpush3.msra.mxu1 %v6456_v27 }
 0xeff   :  { %v6243_v59 = vrot.slane %v6242_v54, 1  ;;  %v6250_v17 = vadd.f32 %v6249_v55, %v6248_v50  ;;  %11715 = vmatprep.subr.mxu1 %v15551_v26  ;;  %v6447_v50 = vld [vmem:[%s15623_s27 + $0x10] sm:$0xff] }
 0xf00   :  { %11716 = vmatpush3.msra.mxu1 %v6455_v37 }
 0xf01   :  { %v6244_v61 = vadd.f32 %v6243_v59, %v6242_v54  ;;  %v6251_v62 = vrot.slane %v6250_v17, 1  ;;  %11717 = vmatprep.subr.mxu1 %v15551_v26  ;;  %v6445_v54 = vld [vmem:[%s15623_s27] sm:$0xff] }
 0xf02   :  { %11718 = vmatpush3.msra.mxu1 %v6454_v43 }
 0xf03   :  { %v6252_v0 = vadd.f32 %v6251_v62, %v6250_v17  ;;  %v6253_v1 = vmul.f32 0.5, %v6244_v61  ;;  %11719 = vmatprep.subr.mxu1 %v15551_v26 }
 0xf04   :  { %11720 = vmatpush3.msra.mxu1 %v6453_v38 }
 0xf05   :  { %v6254_v2 = vmul.f32 0.5, %v6252_v0  ;;  %v6255_v4 = vmul.f32 %v6253_v1, %v6253_v1  ;;  %11721 = vmatprep.subr.mxu1 %v15551_v26 }
 0xf06   :  { %11722 = vmatpush3.msra.mxu1 %v6452_v39 }
 0xf07   :  { %v6256_v7 = vsub.f32 %v6254_v2, %v6255_v4  ;;  %11723 = vmatprep.subr.mxu1 %v15551_v26 }
 0xf08   :  { %11724 = vmatpush3.msra.mxu1 %v6451_v3 }
 0xf09   :  { %v6257_v56 = vadd.f32 1e-05, %v6256_v7  ;;  %11725 = vmatprep.subr.mxu1 %v15551_v26 }
 0xf0a   :  { %11726 = vmatpush3.msra.mxu1 %v6450_v41 }
 0xf0b   :  { %13106 = vrsqrt.f32 %v6257_v56  ;;  %11727 = vmatprep.subr.mxu1 %v15551_v26 }
 0xf0c   :  { %11728 = vmatpush3.msra.mxu1 %v6449_v44 }
 0xf0d   :  { %11729 = vmatprep.subr.mxu1 %v15551_v26 }
 0xf0e   :  { %11730 = vmatpush3.msra.mxu1 %v6448_v48 }
 0xf0f   :  { %11731 = vmatprep.subr.mxu1 %v15551_v26 }
 0xf10   :  { %11732 = vmatpush3.msra.mxu1 %v6447_v50 }
 0xf11   :  { %11733 = vmatprep.subr.mxu1 %v15551_v26 }
 0xf12   :  { %11734 = vmatpush3.msra.mxu1 %v6446_v53 }
 0xf13   :  { %11735 = vmatprep.subr.mxu1 %v15551_v26 }
 0xf14   :  { %11736 = vmatpush3.msra.mxu1 %v6445_v54 }
 0xf15   :  { %11775 = vmatprep.subr.mxu1 %v15551_v26 }
 0xf18   :  { %v13107_v11 = vpop.eup %13106 }
 0xf19   :  { %v6259_v13 = vmul.f32 %v13107_v11, %v6236_v10 }
 0xf1b   :  { %v6260_v46 = vmul.f32 %v6259_v13, %v6253_v1  ;;  %v6265_v31 = vrot.slane %v6259_v13, %v14264_v5 }
 0xf1d   :  { %v6261_v32 = vsub.f32 %v6237_v30, %v6260_v46  ;;  %v6266_v51 = vmul.f32 %v6265_v31, %v6230_v52  ;;  %v6275_v52 = vpack.c.bf16 %v3359_v40, %v3359_v40  ;;  %v6429_v40 = vld [vmem:[#allocation19 + $0x1] sm:$0x1] }
 0xf1f   :  { %v6270_v8 = vrot.slane %v6261_v32, %v14264_v5  ;;  %v6613_v32 = vld [vmem:[#allocation27 + $0x18] sm:$0xff] }
 0xf21   :  { %v6271_v45 = vadd.f32 %v6270_v8, %v6266_v51  ;;  %v6611_v51 = vld [vmem:[#allocation27 + $0x8] sm:$0xff]  ;;  %v6610_v8 = vld [vmem:[#allocation27] sm:$0xff] }
 0xf23   :  { %vm6272_vm3 = vcmp.gt.f32.partialorder %v6271_v45, 0.0  ;;  %v6273_v14 = vmul.f32 0.2, %v6271_v45 }
 0xf25   :  { %v6274_v18 = vsel %vm6272_vm3, %v6271_v45, %v6273_v14 }
 0xf26   :  { %v6284_v19 = vpack.c.bf16 %v6274_v18, %v6274_v18 }
 0xf28   :  { %11690 = vmatmul.mubr.msk.bf16.vlgmr.msra.gmra.mxu0 %vm6317_vm6, %v6284_v19 }
 0xf29   :  { %11694 = vmatpush3.bf16.msra.mxu0 %v12684_v35  ;;  %11701 = vmatprep.mubr.msk.bf16.mxu0 %vm13660_vm8, %v15551_v26 }
 0xf2a   :  { %11695 = vmatprep.subr.bf16.mxu0 %v15551_v26 }
 0xf2d   :  { %11696 = vmatpush3.bf16.msra.mxu0 %v12685_v22  ;;  %v6428_v22 = vld [vmem:[#allocation19] sm:$0x1] }
 0xf2e   :  { %11697 = vmatprep.subr.bf16.mxu0 %v15551_v26 }
 0xf31   :  { %11698 = vmatpush3.bf16.msra.mxu0 %v12686_v36  ;;  %v12688_v36 = vld [vmem:[#allocation15 + $0x70] ss:$8 sps:$4 sm:$0xff]  }
 0xf32   :  { %11699 = vmatprep.subr.bf16.mxu0 %v15551_v26 }
 0xf35   :  { %11700 = vmatpush3.bf16.msra.mxu0 %v12687_v47  ;;  %v12693_v47 = vld [vmem:[#allocation15 + $0x64] ss:$8 sps:$4 sm:$0xff]  }
 0xf36   :  { %11740 = vmatprep.subr.mxu0 %v15551_v26 }
 0xf38   :  { %11702 = vmatmul.mubr.msk.bf16.vlgmr.msra.gmra.mxu0 %vm6317_vm6, %v6275_v52 }
 0xf39   :  { %11772 = vmatprep.mubr.msk.f32.mxu0 %vm13660_vm8, %v15551_v26  ;;  %11741 = vmatpush3.msra.mxu0 %v6460_v25  ;;  %v12691_v25 = vld [vmem:[#allocation15 + $0x60] ss:$8 sps:$4 sm:$0xff]  }
 0xf3a   :  { %11742 = vmatprep.subr.mxu0 %v15551_v26 }
 0xf3b   :  { %11743 = vmatpush3.msra.mxu0 %v6459_v28 }
 0xf3c   :  { %11744 = vmatprep.subr.mxu0 %v15551_v26 }
 0xf3d   :  { %11745 = vmatpush3.msra.mxu0 %v6458_v29  ;;  %v12696_v29 = vld [vmem:[#allocation15 + $0x54] ss:$8 sps:$4 sm:$0xff]  }
 0xf3e   :  { %11746 = vmatprep.subr.mxu0 %v15551_v26 }
 0xf3f   :  { %11747 = vmatpush3.msra.mxu0 %v6457_v9  ;;  %v12694_v9 = vld [vmem:[#allocation15 + $0x50] ss:$8 sps:$4 sm:$0xff]  }
 0xf40   :  { %11748 = vmatprep.subr.mxu0 %v15551_v26 }
 0xf41   :  { %11749 = vmatpush3.msra.mxu0 %v6456_v27  ;;  %v12699_v27 = vld [vmem:[#allocation15 + $0x44] ss:$8 sps:$4 sm:$0xff]  }
 0xf42   :  { %11750 = vmatprep.subr.mxu0 %v15551_v26 }
 0xf43   :  { %11751 = vmatpush3.msra.mxu0 %v6455_v37  ;;  %v12697_v37 = vld [vmem:[#allocation15 + $0x40] ss:$8 sps:$4 sm:$0xff]  }
 0xf44   :  { %11752 = vmatprep.subr.mxu0 %v15551_v26 }
 0xf45   :  { %11753 = vmatpush3.msra.mxu0 %v6454_v43  ;;  %v12702_v43 = vld [vmem:[#allocation15 + $0x34] ss:$8 sps:$4 sm:$0xff]  }
 0xf46   :  { %11754 = vmatprep.subr.mxu0 %v15551_v26 }
 0xf47   :  { %11755 = vmatpush3.msra.mxu0 %v6453_v38  ;;  %v12700_v38 = vld [vmem:[#allocation15 + $0x30] ss:$8 sps:$4 sm:$0xff]  }
 0xf48   :  { %11756 = vmatprep.subr.mxu0 %v15551_v26 }
 0xf49   :  { %11757 = vmatpush3.msra.mxu0 %v6452_v39  ;;  %v12705_v39 = vld [vmem:[#allocation15 + $0x24] ss:$8 sps:$4 sm:$0xff]  }
 0xf4a   :  { %11758 = vmatprep.subr.mxu0 %v15551_v26 }
 0xf4b   :  { %11759 = vmatpush3.msra.mxu0 %v6451_v3  ;;  %v12703_v3 = vld [vmem:[#allocation15 + $0x20] ss:$8 sps:$4 sm:$0xff]  }
 0xf4c   :  { %11760 = vmatprep.subr.mxu0 %v15551_v26 }
 0xf4d   :  { %11761 = vmatpush3.msra.mxu0 %v6450_v41  ;;  %v12708_v41 = vld [vmem:[#allocation15 + $0x14] ss:$8 sps:$4 sm:$0xff]  }
 0xf4e   :  { %11762 = vmatprep.subr.mxu0 %v15551_v26 }
 0xf4f   :  { %11763 = vmatpush3.msra.mxu0 %v6449_v44  ;;  %v12706_v44 = vld [vmem:[#allocation15 + $0x10] ss:$8 sps:$4 sm:$0xff]  }
 0xf50   :  { %11764 = vmatprep.subr.mxu0 %v15551_v26 }
 0xf51   :  { %11765 = vmatpush3.msra.mxu0 %v6448_v48  ;;  %v12711_v48 = vld [vmem:[#allocation15 + $0x4] ss:$8 sps:$4 sm:$0xff]  }
 0xf52   :  { %11766 = vmatprep.subr.mxu0 %v15551_v26 }
 0xf53   :  { %11767 = vmatpush3.msra.mxu0 %v6447_v50  ;;  %v12709_v50 = vld [vmem:[#allocation15] ss:$8 sps:$4 sm:$0xff]  }
 0xf54   :  { %11768 = vmatprep.subr.mxu0 %v15551_v26 }
 0xf55   :  { %11769 = vmatpush3.msra.mxu0 %v6446_v53  ;;  %v13661_v53 = vmov 0  }
 0xf56   :  { %11770 = vmatprep.subr.mxu0 %v15551_v26 }
 0xf57   :  { %11771 = vmatpush3.msra.mxu0 %v6445_v54  ;;  %v6972_v54 = vld [vmem:[%s15624_s6 + $0xf8] sm:$0xff] }
 0xf58   :  { %11786 = vmatprep.subr.mxu0 %v15551_v26 }
 0xfe8   :  { %v6355_v55 = vpop.f32.mrf.mxu0 }
 0xfea   :  { %v11691_v57 = vpop.f32.mrf.mxu0 }
 0xfeb   :  { %v6971_v57 = vld [vmem:[%s15624_s6 + $0xf0] sm:$0xff] }
 0xfec   :  { %v6358_v58 = vpop.f32.mrf.mxu0 }
 0xfed   :  { %v6955_v58 = vld [vmem:[%s15624_s6 + $0x70] sm:$0xff] }
 0xfee   :  { %v11692_v59 = vpop.f32.mrf.mxu0 }
 0xfef   :  { %v6970_v59 = vld [vmem:[%s15624_s6 + $0xe8] sm:$0xff] }
 0xff8   :  { %v6422_v17 = vpop.f32.mrf.mxu0 }
 0xff9   :  { %v15039_v61 = vadd.f32 %v6422_v17, %v6355_v55  ;;  %v6956_v55 = vld [vmem:[%s15624_s6 + $0x78] sm:$0xff]  ;;  %v6954_v17 = vld [vmem:[%s15624_s6 + $0x68] sm:$0xff] }
 0xffa   :  { %v11703_v62 = vpop.f32.mrf.mxu0 }
 0xffb   :  { %v6430_v63 = vsel %vm2305_vm4, %v15039_v61, 0.0  ;;  %v6437_v0 = vmul.f32 %v15039_v61, %v15039_v61  ;;  %v6969_v62 = vld [vmem:[%s15624_s6 + $0xe0] sm:$0xff] }
 0xffc   :  { %v6431_v1 = vrot.slane %v6430_v63, 4  ;;  %v6425_v2 = vpop.f32.mrf.mxu0 }
 0xffd   :  { %v6438_v4 = vsel %vm2305_vm4, %v6437_v0, 0.0  ;;  %v6968_v0 = vld [vmem:[%s15624_s6 + $0xd8] sm:$0xff]  ;;  %v6967_v2 = vld [vmem:[%s15624_s6 + $0xd0] sm:$0xff] }
 0xffe   :  { %v6432_v6 = vadd.f32 %v6431_v1, %v6430_v63  ;;  %v6439_v7 = vrot.slane %v6438_v4, 4  ;;  %v11704_v56 = vpop.f32.mrf.mxu0  ;;  %v6953_v63 = vld [vmem:[%s15624_s6 + $0x60] sm:$0xff]  ;;  %v6952_v1 = vld [vmem:[%s15624_s6 + $0x58] sm:$0xff] }
 0xfff   :  { %v6965_v56 = vld [vmem:[%s15624_s6 + $0xc0] sm:$0xff] }
0x1000   :  { %v6433_v10 = vrot.slane %v6432_v6, 2  ;;  %v6440_v60 = vadd.f32 %v6439_v7, %v6438_v4  ;;  %v6951_v4 = vld [vmem:[%s15624_s6 + $0x50] sm:$0xff]  ;;  %v6950_v7 = vld [vmem:[%s15624_s6 + $0x48] sm:$0xff] }
0x1002   :  { %v6434_v11 = vadd.f32 %v6433_v10, %v6432_v6  ;;  %v6441_v12 = vrot.slane %v6440_v60, 2  ;;  %v6966_v6 = vld [vmem:[%s15624_s6 + $0xc8] sm:$0xff] }
0x1004   :  { %v6435_v13 = vrot.slane %v6434_v11, 1  ;;  %v6442_v30 = vadd.f32 %v6441_v12, %v6440_v60 }
0x1006   :  { %v6436_v42 = vadd.f32 %v6435_v13, %v6434_v11  ;;  %v6443_v46 = vrot.slane %v6442_v30, 1 }
0x1008   :  { %11738 = vmatmul.mubr.f32.vlgmr.msra.gmra.mxu1 %v6436_v42  ;;  %v6444_v31 = vadd.f32 %v6443_v46, %v6442_v30 }
0x1009   :  { %11783 = vmatprep.mubr.msk.f32.mxu1 %vm13660_vm8, %v15551_v26  ;;  %11776 = vmatpush3.msra.mxu1 %v6613_v32 }
0x100a   :  { %11773 = vmatmul.mubr.f32.vlgmr.msra.gmra.mxu0 %v6444_v31  ;;  %11777 = vmatprep.subr.mxu1 %v15551_v26 }
0x100b   :  { %11794 = vmatprep.mubr.msk.f32.mxu0 %vm13660_vm8, %v15551_v26  ;;  %11787 = vmatpush3.msra.mxu0 %v6613_v32 }
0x100c   :  { %11788 = vmatprep.subr.mxu0 %v15551_v26  ;;  %11778 = vmatpush3.msra.mxu1 %v6612_v33 }
0x100d   :  { %11789 = vmatpush3.msra.mxu0 %v6612_v33  ;;  %11779 = vmatprep.subr.mxu1 %v15551_v26  ;;  %v6964_v33 = vld [vmem:[%s15624_s6 + $0xb8] sm:$0xff] }
0x100e   :  { %11790 = vmatprep.subr.mxu0 %v15551_v26  ;;  %11780 = vmatpush3.msra.mxu1 %v6611_v51 }
0x100f   :  { %11791 = vmatpush3.msra.mxu0 %v6611_v51  ;;  %11781 = vmatprep.subr.mxu1 %v15551_v26  ;;  %v6948_v51 = vld [vmem:[%s15624_s6 + $0x38] sm:$0xff] }
0x1010   :  { %11792 = vmatprep.subr.mxu0 %v15551_v26  ;;  %11782 = vmatpush3.msra.mxu1 %v6610_v8 }
0x1011   :  { %11793 = vmatpush3.msra.mxu0 %v6610_v8  ;;  %6868 = vmatprep.subr.bf16.mxu1 %v12690_v34  ;;  %v6963_v8 = vld [vmem:[%s15624_s6 + $0xb0] sm:$0xff] }
0x1012   :  { %11247 = vmatprep.subr.mxu0 %v6972_v54  ;;  %v6947_v34 = vld [vmem:[%s15624_s6 + $0x30] sm:$0xff] }
0x10c8   :  { %v6527_v45 = vpop.f32.mrf.mxu1 }
0x10c9   :  { %v6601_v16 = vmul.f32 0.125, %v6527_v45  ;;  %v6962_v45 = vld [vmem:[%s15624_s6 + $0xa8] sm:$0xff] }
0x10ca   :  { %v11739_v14 = vpop.f32.mrf.mxu1  ;;  %v6597_v15 = vpop.f32.mrf.mxu0 }
0x10cb   :  { %v6603_v18 = vmul.f32 %v6601_v16, %v6601_v16  ;;  %v6602_v35 = vmul.f32 0.125, %v6597_v15  ;;  %v6961_v14 = vld [vmem:[%s15624_s6 + $0xa0] sm:$0xff] }
0x10cc   :  { %v11774_v19 = vpop.f32.mrf.mxu0  ;;  %v6945_v15 = vld [vmem:[%s15624_s6 + $0x20] sm:$0xff] }
0x10cd   :  { %v6604_v20 = vsub.f32 %v6602_v35, %v6603_v18  ;;  %v6960_v18 = vld [vmem:[%s15624_s6 + $0x98] sm:$0xff]  ;;  %v6959_v19 = vld [vmem:[%s15624_s6 + $0x90] sm:$0xff] }
0x10ce   :  { %v6944_v35 = vld [vmem:[%s15624_s6 + $0x18] sm:$0xff] }
0x10cf   :  { %v6605_v21 = vadd.f32 1e-05, %v6604_v20  ;;  %v6943_v20 = vld [vmem:[%s15624_s6 + $0x10] sm:$0xff] }
0x10d1   :  { %13108 = vrsqrt.f32 %v6605_v21  ;;  %v6958_v21 = vld [vmem:[%s15624_s6 + $0x88] sm:$0xff] }
0x10de   :  { %v13109_v23 = vpop.eup %13108 }
0x10df   :  { %v6607_v24 = vmul.f32 %v13109_v23, %v6428_v22  ;;  %v6942_v22 = vld [vmem:[%s15624_s6 + $0x8] sm:$0xff]  ;;  %v6957_v23 = vld [vmem:[%s15624_s6 + $0x80] sm:$0xff] }
0x10e1   :  { %11784 = vmatmul.mubr.msk.f32.vlgmr.msra.gmra.mxu1 %vm3054_vm9, %v6607_v24  ;;  %v6608_v52 = vmul.f32 %v6607_v24, %v6601_v16  ;;  %v6946_v16 = vld [vmem:[%s15624_s6 + $0x28] sm:$0xff] }
0x10e2   :  { %6869 = vmatpush1.bf16.msra.mxu1 %v12688_v36  ;;  %6900 = vmatprep.mubr.bf16.mxu1 %v13661_v53  ;;  %v6941_v36 = vld [vmem:[%s15624_s6] sm:$0xff] }
0x10e3   :  { %v6609_v28 = vsub.f32 %v6429_v40, %v6608_v52  ;;  %6870 = vmatprep.subr.bf16.mxu1 %v12693_v47 }
0x10e5   :  { %11795 = vmatmul.mubr.msk.f32.vlgmr.msra.gmra.mxu0 %vm3054_vm9, %v6609_v28 }
0x10e6   :  { %6871 = vmatpush1.bf16.msra.mxu1 %v12691_v25  ;;  %11248 = vmatpush3.msra.mxu0 %v6956_v55 }
0x10e7   :  { %6872 = vmatprep.subr.bf16.mxu1 %v12696_v29  ;;  %11249 = vmatprep.subr.mxu0 %v6971_v57 }
0x10e8   :  { %11250 = vmatpush3.msra.mxu0 %v6955_v58 }
0x10e9   :  { %11251 = vmatprep.subr.mxu0 %v6970_v59 }
0x10ea   :  { %6873 = vmatpush1.bf16.msra.mxu1 %v12694_v9  ;;  %11252 = vmatpush3.msra.mxu0 %v6954_v17 }
0x10eb   :  { %6874 = vmatprep.subr.bf16.mxu1 %v12699_v27  ;;  %11253 = vmatprep.subr.mxu0 %v6969_v62 }
0x10ec   :  { %11254 = vmatpush3.msra.mxu0 %v6953_v63 }
0x10ed   :  { %11255 = vmatprep.subr.mxu0 %v6968_v0 }
0x10ee   :  { %6875 = vmatpush1.bf16.msra.mxu1 %v12697_v37  ;;  %11256 = vmatpush3.msra.mxu0 %v6952_v1 }
0x10ef   :  { %6876 = vmatprep.subr.bf16.mxu1 %v12702_v43  ;;  %11257 = vmatprep.subr.mxu0 %v6967_v2 }
0x10f0   :  { %11258 = vmatpush3.msra.mxu0 %v6951_v4 }
0x10f1   :  { %11259 = vmatprep.subr.mxu0 %v6966_v6 }
0x10f2   :  { %6877 = vmatpush1.bf16.msra.mxu1 %v12700_v38  ;;  %11260 = vmatpush3.msra.mxu0 %v6950_v7 }
0x10f3   :  { %6878 = vmatprep.subr.bf16.mxu1 %v12705_v39  ;;  %11261 = vmatprep.subr.mxu0 %v6965_v56 }
0x10f6   :  { %6879 = vmatpush1.bf16.msra.mxu1 %v12703_v3 }
0x10f7   :  { %6880 = vmatprep.subr.bf16.mxu1 %v12708_v41 }
0x10fa   :  { %6881 = vmatpush1.bf16.msra.mxu1 %v12706_v44 }
0x10fb   :  { %6882 = vmatprep.subr.bf16.mxu1 %v12711_v48 }
0x10fe   :  { %6883 = vmatpush1.bf16.msra.mxu1 %v12709_v50 }
0x10ff   :  { %11282 = vmatprep.subr.mxu1 %v6972_v54 }
0x11a1   :  { %v6683_v10 = vpop.f32.mrf.mxu1 }
0x11a2   :  { %v6763_v60 = vrot.slane %v6683_v10, %v14264_v5  ;;  %v7125_v10 = vld [vmem:[#allocation28 + $0x18] sm:$0xff] }
0x11a3   :  { %v11785_v11 = vpop.f32.mrf.mxu1 }
0x11a4   :  { %v6764_v13 = vmul.f32 %v6763_v60, %v15039_v61  ;;  %v6949_v61 = vld [vmem:[%s15624_s6 + $0x40] sm:$0xff]  ;;  %v15110_v11 = vld [vmem:[#allocation28 + $0x8] sm:$0xff] }
0x11a5   :  { %v6756_v12 = vpop.f32.mrf.mxu0  ;;  %11262 = vmatpush3.msra.mxu0 %v6949_v61  ;;  %v15108_v60 = vld [vmem:[#allocation28 + $0x10] sm:$0xff] }
0x11a6   :  { %v6768_v30 = vrot.slane %v6756_v12, %v14264_v5  ;;  %11263 = vmatprep.subr.mxu0 %v6964_v33  ;;  %v15112_v12 = vld [vmem:[#allocation28] sm:$0xff] }
0x11a7   :  { %v11796_v42 = vpop.f32.mrf.mxu0  ;;  %11264 = vmatpush3.msra.mxu0 %v6948_v51 }
0x11a8   :  { %v6769_v46 = vadd.f32 %v6768_v30, %v6764_v13  ;;  %11265 = vmatprep.subr.mxu0 %v6963_v8  ;;  %v12715_v13 = vld [vmem:[#allocation16 + $0xe8] ss:$16 sps:$4 sm:$0xff]   ;;  %v12717_v30 = vld [vmem:[#allocation16 + $0xec] ss:$16 sps:$4 sm:$0xff]  }
0x11a9   :  { %11266 = vmatpush3.msra.mxu0 %v6947_v34  ;;  %v12723_v42 = vld [vmem:[#allocation16 + $0xcc] ss:$16 sps:$4 sm:$0xff]  }
0x11aa   :  { %v6770_v31 = vmax.f32 %v6769_v46, 0.0  ;;  %11267 = vmatprep.subr.mxu0 %v6962_v45  ;;  %v12721_v46 = vld [vmem:[#allocation16 + $0xc8] ss:$16 sps:$4 sm:$0xff]  }
0x11ab   :  { %11268 = vmatpush3.msra.mxu0 %v6946_v16 }
0x11ac   :  { %v6771_v32 = vpack.c.bf16 %v6770_v31, %v6770_v31  ;;  %11269 = vmatprep.subr.mxu0 %v6961_v14  ;;  %v12729_v31 = vld [vmem:[#allocation16 + $0xac] ss:$16 sps:$4 sm:$0xff]  }
0x11ad   :  { %11270 = vmatpush3.msra.mxu0 %v6945_v15 }
0x11ae   :  { %6901 = vmatmul.mubr.bf16.vlgmr.msra.gmra.mxu1 %v6771_v32  ;;  %11271 = vmatprep.subr.mxu0 %v6960_v18  ;;  %v12727_v32 = vld [vmem:[#allocation16 + $0xa8] ss:$16 sps:$4 sm:$0xff]  }
0x11af   :  { %11283 = vmatpush3.msra.mxu1 %v6956_v55  ;;  %11272 = vmatpush3.msra.mxu0 %v6944_v35 }
0x11b0   :  { %11284 = vmatprep.subr.mxu1 %v6971_v57  ;;  %11273 = vmatprep.subr.mxu0 %v6959_v19 }
0x11b1   :  { %11285 = vmatpush3.msra.mxu1 %v6955_v58  ;;  %11274 = vmatpush3.msra.mxu0 %v6943_v20 }
0x11b2   :  { %11286 = vmatprep.subr.mxu1 %v6970_v59  ;;  %11275 = vmatprep.subr.mxu0 %v6958_v21 }
0x11b3   :  { %11287 = vmatpush3.msra.mxu1 %v6954_v17  ;;  %11276 = vmatpush3.msra.mxu0 %v6942_v22 }
0x11b4   :  { %11288 = vmatprep.subr.mxu1 %v6969_v62  ;;  %11277 = vmatprep.subr.mxu0 %v6957_v23 }
0x11b5   :  { %11289 = vmatpush3.msra.mxu1 %v6953_v63  ;;  %11278 = vmatpush3.msra.mxu0 %v6941_v36 }
0x11b6   :  { %11290 = vmatprep.subr.mxu1 %v6968_v0  ;;  %7157 = vmatprep.subr.mxu0 %v7125_v10 }
0x11b7   :  { %11291 = vmatpush3.msra.mxu1 %v6952_v1 }
0x11b8   :  { %11292 = vmatprep.subr.mxu1 %v6967_v2 }
0x11b9   :  { %11293 = vmatpush3.msra.mxu1 %v6951_v4 }
0x11ba   :  { %11294 = vmatprep.subr.mxu1 %v6966_v6 }
0x11bb   :  { %11295 = vmatpush3.msra.mxu1 %v6950_v7 }
0x11bc   :  { %11296 = vmatprep.subr.mxu1 %v6965_v56 }
0x11bd   :  { %11297 = vmatpush3.msra.mxu1 %v6949_v61  ;;  %v12735_v61 = vld [vmem:[#allocation16 + $0x8c] ss:$16 sps:$4 sm:$0xff]  }
0x11be   :  { %11298 = vmatprep.subr.mxu1 %v6964_v33  ;;  %v12733_v33 = vld [vmem:[#allocation16 + $0x88] ss:$16 sps:$4 sm:$0xff]  }
0x11bf   :  { %11299 = vmatpush3.msra.mxu1 %v6948_v51  ;;  %v12741_v51 = vld [vmem:[#allocation16 + $0x6c] ss:$16 sps:$4 sm:$0xff]  }
0x11c0   :  { %11300 = vmatprep.subr.mxu1 %v6963_v8  ;;  %v12739_v8 = vld [vmem:[#allocation16 + $0x68] ss:$16 sps:$4 sm:$0xff]  }
0x11c1   :  { %11301 = vmatpush3.msra.mxu1 %v6947_v34  ;;  %v12747_v34 = vld [vmem:[#allocation16 + $0x4c] ss:$16 sps:$4 sm:$0xff]  }
0x11c2   :  { %11302 = vmatprep.subr.mxu1 %v6962_v45  ;;  %v12745_v45 = vld [vmem:[#allocation16 + $0x48] ss:$16 sps:$4 sm:$0xff]  }
0x11c3   :  { %11303 = vmatpush3.msra.mxu1 %v6946_v16  ;;  %v12753_v16 = vld [vmem:[#allocation16 + $0x2c] ss:$16 sps:$4 sm:$0xff]  }
0x11c4   :  { %11304 = vmatprep.subr.mxu1 %v6961_v14  ;;  %v12751_v14 = vld [vmem:[#allocation16 + $0x28] ss:$16 sps:$4 sm:$0xff]  }
0x11c5   :  { %11305 = vmatpush3.msra.mxu1 %v6945_v15  ;;  %v12759_v15 = vld [vmem:[#allocation16 + $0xc] ss:$16 sps:$4 sm:$0xff]  }
0x11c6   :  { %11306 = vmatprep.subr.mxu1 %v6960_v18  ;;  %v12757_v18 = vld [vmem:[#allocation16 + $0x8] ss:$16 sps:$4 sm:$0xff]  }
0x11c7   :  { %11307 = vmatpush3.msra.mxu1 %v6944_v35  ;;  %v12765_v35 = vld [vmem:[#allocation16 + $0x1ec] ss:$16 sps:$4 sm:$0xff]  }
0x11c8   :  { %11308 = vmatprep.subr.mxu1 %v6959_v19  ;;  %v12763_v19 = vld [vmem:[#allocation16 + $0x1e8] ss:$16 sps:$4 sm:$0xff]  }
0x11c9   :  { %11309 = vmatpush3.msra.mxu1 %v6943_v20  ;;  %v12771_v20 = vld [vmem:[#allocation16 + $0x1cc] ss:$16 sps:$4 sm:$0xff]  }
0x11ca   :  { %11310 = vmatprep.subr.mxu1 %v6958_v21  ;;  %v12769_v21 = vld [vmem:[#allocation16 + $0x1c8] ss:$16 sps:$4 sm:$0xff]  }
0x11cb   :  { %11311 = vmatpush3.msra.mxu1 %v6942_v22  ;;  %v12777_v22 = vld [vmem:[#allocation16 + $0x1ac] ss:$16 sps:$4 sm:$0xff]  }
0x11cc   :  { %11312 = vmatprep.subr.mxu1 %v6957_v23  ;;  %v12775_v23 = vld [vmem:[#allocation16 + $0x1a8] ss:$16 sps:$4 sm:$0xff]  }
0x11cd   :  { %11313 = vmatpush3.msra.mxu1 %v6941_v36  ;;  %v12783_v36 = vld [vmem:[#allocation16 + $0x18c] ss:$16 sps:$4 sm:$0xff]  }
0x11ce   :  { %7723 = vmatprep.subr.bf16.mxu1 %v12717_v30  ;;  %v12766_v30 = vld [vmem:[#allocation16 + $0x1c0] ss:$16 sps:$4 sm:$0xff]  }
0x126e   :  { %v15093_v24 = vpop.f32.mrf.mxu1 }
0x126f   :  { %v6911_v47 = vsel %vm2305_vm4, %v15093_v24, 0.0  ;;  %v6925_v40 = vmul.f32 %v15093_v24, %v15093_v24 }
0x1270   :  { %v6912_v52 = vrot.slane %v6911_v47, 4  ;;  %v15099_v25 = vpop.f32.mrf.mxu1 }
0x1271   :  { %v6927_v28 = vsel %vm2305_vm4, %v6925_v40, 0.0  ;;  %v6918_v29 = vsel %vm2305_vm4, %v15099_v25, 0.0  ;;  %v6926_v9 = vmul.f32 %v15099_v25, %v15099_v25 }
0x1272   :  { %v6913_v27 = vadd.f32 %v6912_v52, %v6911_v47  ;;  %v6928_v37 = vrot.slane %v6927_v28, 4  ;;  %v6919_v43 = vrot.slane %v6918_v29, 4  ;;  %v6906_v38 = vpop.f32.mrf.mxu1  ;;  %v12781_v47 = vld [vmem:[#allocation16 + $0x188] ss:$16 sps:$4 sm:$0xff]  }
0x1273   :  { %v6934_v39 = vsel %vm2305_vm4, %v6926_v9, 0.0 }
0x1274   :  { %v6914_v3 = vrot.slane %v6913_v27, 2  ;;  %v6929_v41 = vadd.f32 %v6928_v37, %v6927_v28  ;;  %v6920_v44 = vadd.f32 %v6919_v43, %v6918_v29  ;;  %v6935_v48 = vrot.slane %v6934_v39, 4  ;;  %v6907_v50 = vpop.f32.mrf.mxu1 }
0x1275   :  { %v6910_v50 = vld [vmem:[#allocation21 + $0x1] sm:$0x1] }
0x1276   :  { %v6915_v53 = vadd.f32 %v6914_v3, %v6913_v27  ;;  %v6930_v54 = vrot.slane %v6929_v41, 2  ;;  %v6921_v55 = vrot.slane %v6920_v44, 2  ;;  %v6936_v57 = vadd.f32 %v6935_v48, %v6934_v39 }
0x1278   :  { %v6931_v58 = vadd.f32 %v6930_v54, %v6929_v41  ;;  %v6922_v59 = vadd.f32 %v6921_v55, %v6920_v44  ;;  %v6937_v17 = vrot.slane %v6936_v57, 2  ;;  %v6916_v62 = vrot.slane %v6915_v53, 1  ;;  %v6909_v41 = vld [vmem:[#allocation21] sm:$0x1]  ;;  %v12714_v54 = vld [vmem:[#allocation16 + $0xe4] ss:$16 sps:$4 sm:$0xff]  }
0x1279   :  { %v12712_v55 = vld [vmem:[#allocation16 + $0xe0] ss:$16 sps:$4 sm:$0xff]  }
0x127a   :  { %v6923_v63 = vrot.slane %v6922_v59, 1  ;;  %v6938_v0 = vadd.f32 %v6937_v17, %v6936_v57  ;;  %v6932_v1 = vrot.slane %v6931_v58, 1  ;;  %v6917_v6 = vadd.f32 %v6916_v62, %v6915_v53  ;;  %v12726_v17 = vld [vmem:[#allocation16 + $0xa4] ss:$16 sps:$4 sm:$0xff]   ;;  %v12724_v62 = vld [vmem:[#allocation16 + $0xa0] ss:$16 sps:$4 sm:$0xff]  }
0x127c   :  { %v6924_v2 = vadd.f32 %v6923_v63, %v6922_v59  ;;  %v6939_v4 = vrot.slane %v6938_v0, 1  ;;  %v6933_v56 = vadd.f32 %v6932_v1, %v6931_v58  ;;  %v12720_v58 = vld [vmem:[#allocation16 + $0xc4] ss:$16 sps:$4 sm:$0xff]   ;;  %v12718_v59 = vld [vmem:[#allocation16 + $0xc0] ss:$16 sps:$4 sm:$0xff]  }
0x127d   :  { %v12732_v63 = vld [vmem:[#allocation16 + $0x84] ss:$16 sps:$4 sm:$0xff]  }
0x127e   :  { %7037 = vmatprep.mubr.f32.mxu0 %v6924_v2  ;;  %v6940_v7 = vadd.f32 %v6939_v4, %v6938_v0  ;;  %v12730_v0 = vld [vmem:[#allocation16 + $0x80] ss:$16 sps:$4 sm:$0xff]   ;;  %v12738_v1 = vld [vmem:[#allocation16 + $0x64] ss:$16 sps:$4 sm:$0xff]  }
0x127f   :  { %7038 = vmatmul.mubr.f32.vlgmr.msra.gmra.mxu0 %v6917_v6  ;;  %v12736_v2 = vld [vmem:[#allocation16 + $0x60] ss:$16 sps:$4 sm:$0xff]   ;;  %v12744_v4 = vld [vmem:[#allocation16 + $0x44] ss:$16 sps:$4 sm:$0xff]  }
0x1280   :  { %7107 = vmatprep.mubr.f32.mxu1 %v6940_v7  ;;  %7193 = vmatprep.mubr.f32.mxu0 %v15551_v26  ;;  %v12742_v6 = vld [vmem:[#allocation16 + $0x40] ss:$16 sps:$4 sm:$0xff]   ;;  %v12750_v7 = vld [vmem:[#allocation16 + $0x24] ss:$16 sps:$4 sm:$0xff]  }
0x1281   :  { %7108 = vmatmul.mubr.f32.vlgmr.msra.gmra.mxu1 %v6933_v56  ;;  %7158 = vmatpush1.msra.mxu0 %v15108_v60  ;;  %v12748_v56 = vld [vmem:[#allocation16 + $0x20] ss:$16 sps:$4 sm:$0xff]  }
0x1282   :  { %7159 = vmatprep.subr.mxu0 %v15110_v11  ;;  %7724 = vmatpush1.bf16.msra.mxu1 %v12715_v13  ;;  %v12768_v13 = vld [vmem:[#allocation16 + $0x1c4] ss:$16 sps:$4 sm:$0xff]  }
0x1283   :  { %7160 = vmatpush1.msra.mxu0 %v15112_v12  ;;  %7725 = vmatprep.subr.bf16.mxu1 %v12723_v42  ;;  %v12774_v42 = vld [vmem:[#allocation16 + $0x1a4] ss:$16 sps:$4 sm:$0xff]  }
0x1284   :  { %7231 = vmatprep.subr.mxu0 %v7125_v10  ;;  %v12756_v10 = vld [vmem:[#allocation16 + $0x4] ss:$16 sps:$4 sm:$0xff]  }
0x1286   :  { %7726 = vmatpush1.bf16.msra.mxu1 %v12721_v46  ;;  %v12772_v46 = vld [vmem:[#allocation16 + $0x1a0] ss:$16 sps:$4 sm:$0xff]  }
0x1287   :  { %7727 = vmatprep.subr.bf16.mxu1 %v12729_v31  ;;  %v12780_v31 = vld [vmem:[#allocation16 + $0x184] ss:$16 sps:$4 sm:$0xff]  }
0x128a   :  { %7728 = vmatpush1.bf16.msra.mxu1 %v12727_v32  ;;  %v12778_v32 = vld [vmem:[#allocation16 + $0x180] ss:$16 sps:$4 sm:$0xff]  }
0x128b   :  { %7729 = vmatprep.subr.bf16.mxu1 %v12735_v61  ;;  %v12786_v61 = vld [vmem:[#allocation16 + $0x164] ss:$16 sps:$4 sm:$0xff]  }
0x128e   :  { %7730 = vmatpush1.bf16.msra.mxu1 %v12733_v33  ;;  %v12789_v33 = vld [vmem:[#allocation16 + $0x16c] ss:$16 sps:$4 sm:$0xff]  }
0x128f   :  { %7731 = vmatprep.subr.bf16.mxu1 %v12741_v51  ;;  %v12784_v51 = vld [vmem:[#allocation16 + $0x160] ss:$16 sps:$4 sm:$0xff]  }
0x1292   :  { %7732 = vmatpush1.bf16.msra.mxu1 %v12739_v8  ;;  %v12787_v8 = vld [vmem:[#allocation16 + $0x168] ss:$16 sps:$4 sm:$0xff]  }
0x1293   :  { %7733 = vmatprep.subr.bf16.mxu1 %v12747_v34  ;;  %v12792_v34 = vld [vmem:[#allocation16 + $0x144] ss:$16 sps:$4 sm:$0xff]  }
0x1296   :  { %7734 = vmatpush1.bf16.msra.mxu1 %v12745_v45  ;;  %v12795_v45 = vld [vmem:[#allocation16 + $0x14c] ss:$16 sps:$4 sm:$0xff]  }
0x1297   :  { %7735 = vmatprep.subr.bf16.mxu1 %v12753_v16  ;;  %v12790_v16 = vld [vmem:[#allocation16 + $0x140] ss:$16 sps:$4 sm:$0xff]  }
0x129a   :  { %7736 = vmatpush1.bf16.msra.mxu1 %v12751_v14  ;;  %v12793_v14 = vld [vmem:[#allocation16 + $0x148] ss:$16 sps:$4 sm:$0xff]  }
0x129b   :  { %7737 = vmatprep.subr.bf16.mxu1 %v12759_v15  ;;  %v12798_v15 = vld [vmem:[#allocation16 + $0x124] ss:$16 sps:$4 sm:$0xff]  }
0x129e   :  { %7738 = vmatpush1.bf16.msra.mxu1 %v12757_v18  ;;  %v12801_v18 = vld [vmem:[#allocation16 + $0x12c] ss:$16 sps:$4 sm:$0xff]  }
0x129f   :  { %7739 = vmatprep.subr.bf16.mxu1 %v12765_v35  ;;  %v12796_v35 = vld [vmem:[#allocation16 + $0x120] ss:$16 sps:$4 sm:$0xff]  }
0x12a2   :  { %7740 = vmatpush2.bf16.msra.mxu1 %v12763_v19  ;;  %v12799_v19 = vld [vmem:[#allocation16 + $0x128] ss:$16 sps:$4 sm:$0xff]  }
0x12a3   :  { %7741 = vmatprep.subr.bf16.mxu1 %v12771_v20  ;;  %v12804_v20 = vld [vmem:[#allocation16 + $0x104] ss:$16 sps:$4 sm:$0xff]  }
0x12a6   :  { %7742 = vmatpush2.bf16.msra.mxu1 %v12769_v21  ;;  %v12807_v21 = vld [vmem:[#allocation16 + $0x10c] ss:$16 sps:$4 sm:$0xff]  }
0x12a7   :  { %7743 = vmatprep.subr.bf16.mxu1 %v12777_v22  ;;  %v12802_v22 = vld [vmem:[#allocation16 + $0x100] ss:$16 sps:$4 sm:$0xff]  }
0x12aa   :  { %7744 = vmatpush2.bf16.msra.mxu1 %v12775_v23  ;;  %v12805_v23 = vld [vmem:[#allocation16 + $0x108] ss:$16 sps:$4 sm:$0xff]  }
0x12ab   :  { %7745 = vmatprep.subr.bf16.mxu1 %v12783_v36  ;;  %v15124_v36 = vld [vmem:[%s13830_s21 + $0xf8] sm:$0xff] }
0x12ae   :  { %7746 = vmatpush2.bf16.msra.mxu1 %v12781_v47  ;;  %v15127_v47 = vld [vmem:[%s13830_s21 + $0x1f8] sm:$0xff] }
0x12af   :  { %7747 = vmatprep.subr.bf16.mxu1 %v12789_v33  ;;  %v15246_v33 = vld [vmem:[%s13830_s21 + $0x40] sm:$0xff] }
0x12b2   :  { %7748 = vmatpush2.bf16.msra.mxu1 %v12787_v8  ;;  %v15258_v8 = vld [vmem:[%s13830_s21 + $0xb8] sm:$0xff] }
0x12b3   :  { %7749 = vmatprep.subr.bf16.mxu1 %v12795_v45  ;;  %v15266_v45 = vld [vmem:[%s13830_s21 + $0x38] sm:$0xff] }
0x12b4   :  { %15625 = vst [vmem:[#allocation60_spill] sm:$0xff] %v15266_v45 }
0x12b6   :  { %7750 = vmatpush2.bf16.msra.mxu1 %v12793_v14  ;;  %v15274_v14 = vld [vmem:[%s13830_s21 + $0xb0] sm:$0xff] }
0x12b7   :  { %7751 = vmatprep.subr.bf16.mxu1 %v12801_v18  ;;  %15627 = vst [vmem:[#allocation62_spill] sm:$0xff] %v15274_v14  ;;  %v15282_v18 = vld [vmem:[%s13830_s21 + $0x30] sm:$0xff] }
0x12b8   :  { %15629 = vst [vmem:[#allocation64_spill] sm:$0xff] %v15282_v18 }
0x12ba   :  { %7752 = vmatpush2.bf16.msra.mxu1 %v12799_v19  ;;  %v15290_v19 = vld [vmem:[%s13830_s21 + $0xa8] sm:$0xff] }
0x12bb   :  { %7753 = vmatprep.subr.bf16.mxu1 %v12807_v21  ;;  %15631 = vst [vmem:[#allocation66_spill] sm:$0xff] %v15290_v19  ;;  %v15298_v21 = vld [vmem:[%s13830_s21 + $0x28] sm:$0xff] }
0x12bc   :  { %15633 = vst [vmem:[#allocation68_spill] sm:$0xff] %v15298_v21 }
0x12be   :  { %7754 = vmatpush2.bf16.msra.mxu1 %v12805_v23  ;;  %v15306_v23 = vld [vmem:[%s13830_s21 + $0xa0] sm:$0xff] }
0x12bf   :  { %11352 = vmatprep.subr.mxu1 %v15127_v47  ;;  %15635 = vst [vmem:[#allocation70_spill] sm:$0xff] %v15306_v23 }
0x133f   :  { %v11279_v40 = vpop.f32.mrf.mxu0 }
0x1341   :  { %v11280_v52 = vpop.f32.mrf.mxu0  ;;  %v11314_v28 = vpop.f32.mrf.mxu1 }
0x1342   :  { %v11281_v29 = vadd.f32 %v11280_v52, %v11279_v40 }
0x1343   :  { %v11315_v9 = vpop.f32.mrf.mxu1 }
0x1344   :  { %v7113_v27 = vmul.f32 0.03125, %v11281_v29  ;;  %v11316_v37 = vadd.f32 %v11315_v9, %v11314_v28 }
0x1346   :  { %v7115_v43 = vmul.f32 %v7113_v27, %v7113_v27  ;;  %v7114_v38 = vmul.f32 0.03125, %v11316_v37 }
0x1348   :  { %v7116_v39 = vsub.f32 %v7114_v38, %v7115_v43 }
0x134a   :  { %v7117_v3 = vadd.f32 1e-05, %v7116_v39 }
0x134c   :  { %13110 = vrsqrt.f32 %v7117_v3 }
0x1359   :  { %v13111_v44 = vpop.eup %13110 }
0x135a   :  { %v7119_v48 = vmul.f32 %v13111_v44, %v6909_v41 }
0x135c   :  { %10641 = vmatmul.mubr.msk.f32.vlgmr.msra.gmra.mxu0 %vm2522_vm5, %v7119_v48  ;;  %v7120_v53 = vmul.f32 %v7119_v48, %v7113_v27 }
0x135d   :  { %7232 = vmatpush1.msra.mxu0 %v15108_v60  ;;  %7267 = vmatprep.mubr.f32.mxu0 %v15551_v26  ;;  %v12754_v60 = vld [vmem:[#allocation16] ss:$16 sps:$4 sm:$0xff]   ;;  %v15369_v26 = vld [vmem:[%s13830_s21 + $0x180] sm:$0xff] }
0x135e   :  { %7233 = vmatprep.subr.mxu0 %v15110_v11  ;;  %v7121_v57 = vsub.f32 %v6910_v50, %v7120_v53  ;;  %v12762_v11 = vld [vmem:[#allocation16 + $0x1e4] ss:$16 sps:$4 sm:$0xff]   ;;  %15652 = vst [vmem:[#allocation87_spill] sm:$0xff] %v15369_v26 }
0x135f   :  { %7234 = vmatpush1.msra.mxu0 %v15112_v12  ;;  %v12760_v12 = vld [vmem:[#allocation16 + $0x1e0] ss:$16 sps:$4 sm:$0xff]  }
0x1360   :  { %10642 = vmatmul.mubr.msk.f32.vlgmr.msra.gmra.mxu0 %vm2522_vm5, %v7121_v57  ;;  %7682 = vmatprep.subr.bf16.mxu0 %v12714_v54  ;;  %v15138_v54 = vld [vmem:[%s13830_s21 + $0x78] sm:$0xff]  ;;  %v15150_v57 = vld [vmem:[%s13830_s21 + $0x70] sm:$0xff] }
0x1361   :  { %7683 = vmatpush1.bf16.msra.mxu0 %v12712_v55  ;;  %v15147_v55 = vld [vmem:[%s13830_s21 + $0x1f0] sm:$0xff] }
0x1362   :  { %7684 = vmatprep.subr.bf16.mxu0 %v12720_v58  ;;  %v15153_v58 = vld [vmem:[%s13830_s21 + $0x170] sm:$0xff] }
0x1365   :  { %7685 = vmatpush1.bf16.msra.mxu0 %v12718_v59  ;;  %v15158_v59 = vld [vmem:[%s13830_s21 + $0xe8] sm:$0xff] }
0x1366   :  { %7686 = vmatprep.subr.bf16.mxu0 %v12726_v17  ;;  %v15161_v17 = vld [vmem:[%s13830_s21 + $0x1e8] sm:$0xff] }
0x1369   :  { %7687 = vmatpush1.bf16.msra.mxu0 %v12724_v62  ;;  %v15166_v62 = vld [vmem:[%s13830_s21 + $0x68] sm:$0xff] }
0x136a   :  { %7688 = vmatprep.subr.bf16.mxu0 %v12732_v63  ;;  %v15169_v63 = vld [vmem:[%s13830_s21 + $0x168] sm:$0xff] }
0x136d   :  { %7689 = vmatpush1.bf16.msra.mxu0 %v12730_v0  ;;  %v15174_v0 = vld [vmem:[%s13830_s21 + $0xe0] sm:$0xff] }
0x136e   :  { %7690 = vmatprep.subr.bf16.mxu0 %v12738_v1  ;;  %v15177_v1 = vld [vmem:[%s13830_s21 + $0x1e0] sm:$0xff] }
0x1371   :  { %7691 = vmatpush1.bf16.msra.mxu0 %v12736_v2  ;;  %v15182_v2 = vld [vmem:[%s13830_s21 + $0x60] sm:$0xff] }
0x1372   :  { %7692 = vmatprep.subr.bf16.mxu0 %v12744_v4  ;;  %v15185_v4 = vld [vmem:[%s13830_s21 + $0x160] sm:$0xff] }
0x1375   :  { %7693 = vmatpush1.bf16.msra.mxu0 %v12742_v6  ;;  %v15190_v6 = vld [vmem:[%s13830_s21 + $0xd8] sm:$0xff] }
0x1376   :  { %7694 = vmatprep.subr.bf16.mxu0 %v12750_v7  ;;  %v15193_v7 = vld [vmem:[%s13830_s21 + $0x1d8] sm:$0xff] }
0x1379   :  { %7695 = vmatpush1.bf16.msra.mxu0 %v12748_v56  ;;  %v15198_v56 = vld [vmem:[%s13830_s21 + $0x58] sm:$0xff] }
0x137a   :  { %7696 = vmatprep.subr.bf16.mxu0 %v12756_v10  ;;  %v15201_v10 = vld [vmem:[%s13830_s21 + $0x158] sm:$0xff] }
0x137d   :  { %7697 = vmatpush1.bf16.msra.mxu0 %v12754_v60  ;;  %v15206_v60 = vld [vmem:[%s13830_s21 + $0xd0] sm:$0xff] }
0x137e   :  { %7698 = vmatprep.subr.bf16.mxu0 %v12762_v11  ;;  %v15209_v11 = vld [vmem:[%s13830_s21 + $0x1d0] sm:$0xff] }
0x1381   :  { %7699 = vmatpush2.bf16.msra.mxu0 %v12760_v12  ;;  %v15214_v12 = vld [vmem:[%s13830_s21 + $0x50] sm:$0xff] }
0x1382   :  { %7700 = vmatprep.subr.bf16.mxu0 %v12768_v13  ;;  %v15217_v13 = vld [vmem:[%s13830_s21 + $0x150] sm:$0xff] }
0x1385   :  { %7701 = vmatpush2.bf16.msra.mxu0 %v12766_v30  ;;  %v15222_v30 = vld [vmem:[%s13830_s21 + $0xc8] sm:$0xff] }
0x1386   :  { %7702 = vmatprep.subr.bf16.mxu0 %v12774_v42  ;;  %v15225_v42 = vld [vmem:[%s13830_s21 + $0x1c8] sm:$0xff] }
0x1389   :  { %7703 = vmatpush2.bf16.msra.mxu0 %v12772_v46  ;;  %v15230_v46 = vld [vmem:[%s13830_s21 + $0x48] sm:$0xff] }
0x138a   :  { %7704 = vmatprep.subr.bf16.mxu0 %v12780_v31  ;;  %v15233_v31 = vld [vmem:[%s13830_s21 + $0x148] sm:$0xff] }
0x138d   :  { %7705 = vmatpush2.bf16.msra.mxu0 %v12778_v32  ;;  %v15238_v32 = vld [vmem:[%s13830_s21 + $0xc0] sm:$0xff] }
0x138e   :  { %7706 = vmatprep.subr.bf16.mxu0 %v12786_v61  ;;  %v15241_v61 = vld [vmem:[%s13830_s21 + $0x1c0] sm:$0xff] }
0x1391   :  { %7707 = vmatpush2.bf16.msra.mxu0 %v12784_v51  ;;  %v15249_v51 = vld [vmem:[%s13830_s21 + $0x140] sm:$0xff] }
0x1392   :  { %7708 = vmatprep.subr.bf16.mxu0 %v12792_v34  ;;  %v15261_v34 = vld [vmem:[%s13830_s21 + $0x1b8] sm:$0xff] }
0x1395   :  { %7709 = vmatpush2.bf16.msra.mxu0 %v12790_v16  ;;  %v15269_v16 = vld [vmem:[%s13830_s21 + $0x138] sm:$0xff] }
0x1396   :  { %7710 = vmatprep.subr.bf16.mxu0 %v12798_v15  ;;  %15626 = vst [vmem:[#allocation61_spill] sm:$0xff] %v15269_v16  ;;  %v15277_v15 = vld [vmem:[%s13830_s21 + $0x1b0] sm:$0xff] }
0x1397   :  { %15628 = vst [vmem:[#allocation63_spill] sm:$0xff] %v15277_v15 }
0x1399   :  { %7711 = vmatpush2.bf16.msra.mxu0 %v12796_v35  ;;  %v15285_v35 = vld [vmem:[%s13830_s21 + $0x130] sm:$0xff] }
0x139a   :  { %7712 = vmatprep.subr.bf16.mxu0 %v12804_v20  ;;  %15630 = vst [vmem:[#allocation65_spill] sm:$0xff] %v15285_v35  ;;  %v15293_v20 = vld [vmem:[%s13830_s21 + $0x1a8] sm:$0xff] }
0x139b   :  { %15632 = vst [vmem:[#allocation67_spill] sm:$0xff] %v15293_v20 }
0x139d   :  { %7713 = vmatpush2.bf16.msra.mxu0 %v12802_v22  ;;  %v15301_v22 = vld [vmem:[%s13830_s21 + $0x128] sm:$0xff] }
0x139e   :  { %11317 = vmatprep.subr.mxu0 %v15124_v36  ;;  %15634 = vst [vmem:[#allocation69_spill] sm:$0xff] %v15301_v22 }
0x141c   :  { %v7195_v40 = vpop.f32.mrf.mxu0 }
0x141d   :  { %v7277_v52 = vrot.slane %v7195_v40, %v14264_v5  ;;  %v15309_v40 = vld [vmem:[%s13830_s21 + $0x1a0] sm:$0xff] }
0x141e   :  { %v7197_v28 = vpop.f32.mrf.mxu0  ;;  %15636 = vst [vmem:[#allocation71_spill] sm:$0xff] %v15309_v40 }
0x141f   :  { %v7281_v29 = vrot.slane %v7197_v28, %v14264_v5  ;;  %v7282_v27 = vmul.f32 %v7277_v52, %v15093_v24  ;;  %v15141_v24 = vld [vmem:[%s13830_s21 + $0x178] sm:$0xff]  ;;  %v15314_v52 = vld [vmem:[%s13830_s21 + $0x20] sm:$0xff] }
0x1420   :  { %v7269_v9 = vpop.f32.mrf.mxu0  ;;  %15637 = vst [vmem:[#allocation72_spill] sm:$0xff] %v15314_v52  ;;  %v15317_v28 = vld [vmem:[%s13830_s21 + $0x120] sm:$0xff] }
0x1421   :  { %v7287_v37 = vrot.slane %v7269_v9, %v14264_v5  ;;  %v7283_v38 = vmul.f32 %v7281_v29, %v15099_v25  ;;  %v15144_v25 = vld [vmem:[%s13830_s21 + $0xf0] sm:$0xff]  ;;  %15638 = vst [vmem:[#allocation73_spill] sm:$0xff] %v15317_v28  ;;  %v15322_v29 = vld [vmem:[%s13830_s21 + $0x98] sm:$0xff] }
0x1422   :  { %v7271_v43 = vpop.f32.mrf.mxu0  ;;  %15639 = vst [vmem:[#allocation74_spill] sm:$0xff] %v15322_v29  ;;  %v15325_v9 = vld [vmem:[%s13830_s21 + $0x198] sm:$0xff] }
0x1423   :  { %v7292_v39 = vadd.f32 %v7287_v37, %v7282_v27  ;;  %v7291_v3 = vrot.slane %v7271_v43, %v14264_v5  ;;  %15640 = vst [vmem:[#allocation75_spill] sm:$0xff] %v15325_v9  ;;  %v15330_v27 = vld [vmem:[%s13830_s21 + $0x18] sm:$0xff]  ;;  %v15336_v43 = vld [vmem:[%s13830_s21 + $0x90] sm:$0xff]  ;;  %v15377_v5 = vld [vmem:[%s13830_s21 + $0x100] sm:$0xff] }
0x1424   :  { %15641 = vst [vmem:[#allocation76_spill] sm:$0xff] %v15330_v27  ;;  %v15333_v37 = vld [vmem:[%s13830_s21 + $0x118] sm:$0xff]  ;;  %15643 = vst [vmem:[#allocation78_spill] sm:$0xff] %v15336_v43 }
0x1425   :  { %v7293_v41 = vadd.f32 %v7291_v3, %v7283_v38  ;;  %v7294_v44 = vmax.f32 %v7292_v39, 0.0  ;;  %15642 = vst [vmem:[#allocation77_spill] sm:$0xff] %v15333_v37  ;;  %v15341_v38 = vld [vmem:[%s13830_s21 + $0x190] sm:$0xff]  ;;  %15654 = vst [vmem:[#allocation89_spill] sm:$0xff] %v15377_v5 }
0x1426   :  { %15644 = vst [vmem:[#allocation79_spill] sm:$0xff] %v15341_v38  ;;  %v15344_v39 = vld [vmem:[%s13830_s21 + $0x10] sm:$0xff] }
0x1427   :  { %v7295_v48 = vmax.f32 %v7293_v41, 0.0  ;;  %v7296_v53 = vpack.c.bf16 %v7294_v44, %v7294_v44  ;;  %15645 = vst [vmem:[#allocation80_spill] sm:$0xff] %v15344_v39  ;;  %v15347_v3 = vld [vmem:[%s13830_s21 + $0x110] sm:$0xff]  ;;  %v15352_v41 = vld [vmem:[%s13830_s21 + $0x88] sm:$0xff] }
0x1428   :  { %15646 = vst [vmem:[#allocation81_spill] sm:$0xff] %v15347_v3  ;;  %15647 = vst [vmem:[#allocation82_spill] sm:$0xff] %v15352_v41  ;;  %v15355_v44 = vld [vmem:[%s13830_s21 + $0x188] sm:$0xff] }
0x1429   :  { %v7297_v50 = vpack.c.bf16 %v7295_v48, %v7295_v48  ;;  %15648 = vst [vmem:[#allocation83_spill] sm:$0xff] %v15355_v44  ;;  %v15358_v48 = vld [vmem:[%s13830_s21 + $0x8] sm:$0xff] }
0x142a   :  { %15649 = vst [vmem:[#allocation84_spill] sm:$0xff] %v15358_v48 }
0x142b   :  { %7714 = vmatprep.mubr.bf16.mxu0 %v7297_v50  ;;  %7755 = vmatprep.mubr.bf16.mxu1 %v7297_v50  ;;  %v15363_v50 = vld [vmem:[%s13830_s21 + $0x108] sm:$0xff] }
0x142c   :  { %7715 = vmatmul.mubr.bf16.vlgmr.msra.gmra.mxu0 %v7296_v53  ;;  %7756 = vmatmul.mubr.bf16.vlgmr.msra.gmra.mxu1 %v7296_v53  ;;  %15650 = vst [vmem:[#allocation85_spill] sm:$0xff] %v15363_v50  ;;  %v15366_v53 = vld [vmem:[%s13830_s21 + $0x80] sm:$0xff] }
0x142d   :  { %11318 = vmatpush3.msra.mxu0 %v15138_v54  ;;  %11353 = vmatpush3.msra.mxu1 %v15141_v24  ;;  %15651 = vst [vmem:[#allocation86_spill] sm:$0xff] %v15366_v53 }
0x142e   :  { %11319 = vmatprep.subr.mxu0 %v15144_v25  ;;  %11354 = vmatprep.subr.mxu1 %v15147_v55 }
0x142f   :  { %11320 = vmatpush3.msra.mxu0 %v15150_v57  ;;  %11355 = vmatpush3.msra.mxu1 %v15153_v58 }
0x1430   :  { %11321 = vmatprep.subr.mxu0 %v15158_v59  ;;  %11356 = vmatprep.subr.mxu1 %v15161_v17 }
0x1431   :  { %11322 = vmatpush3.msra.mxu0 %v15166_v62  ;;  %11357 = vmatpush3.msra.mxu1 %v15169_v63 }
0x1432   :  { %11323 = vmatprep.subr.mxu0 %v15174_v0  ;;  %11358 = vmatprep.subr.mxu1 %v15177_v1 }
0x1433   :  { %11324 = vmatpush3.msra.mxu0 %v15182_v2  ;;  %11359 = vmatpush3.msra.mxu1 %v15185_v4 }
0x1434   :  { %11325 = vmatprep.subr.mxu0 %v15190_v6  ;;  %11360 = vmatprep.subr.mxu1 %v15193_v7 }
0x1435   :  { %11326 = vmatpush3.msra.mxu0 %v15198_v56  ;;  %11361 = vmatpush3.msra.mxu1 %v15201_v10 }
0x1436   :  { %11327 = vmatprep.subr.mxu0 %v15206_v60  ;;  %11362 = vmatprep.subr.mxu1 %v15209_v11 }
0x1437   :  { %11328 = vmatpush3.msra.mxu0 %v15214_v12  ;;  %11363 = vmatpush3.msra.mxu1 %v15217_v13 }
0x1438   :  { %11329 = vmatprep.subr.mxu0 %v15222_v30  ;;  %11364 = vmatprep.subr.mxu1 %v15225_v42 }
0x1439   :  { %11330 = vmatpush3.msra.mxu0 %v15230_v46  ;;  %11365 = vmatpush3.msra.mxu1 %v15233_v31 }
0x143a   :  { %11331 = vmatprep.subr.mxu0 %v15238_v32  ;;  %11366 = vmatprep.subr.mxu1 %v15241_v61 }
0x143b   :  { %11332 = vmatpush3.msra.mxu0 %v15246_v33  ;;  %11367 = vmatpush3.msra.mxu1 %v15249_v51 }
0x143c   :  { %11333 = vmatprep.subr.mxu0 %v15258_v8  ;;  %11368 = vmatprep.subr.mxu1 %v15261_v34 }
0x143d   :  { %11334 = vmatpush3.msra.mxu0 %v15266_v45  ;;  %11369 = vmatpush3.msra.mxu1 %v15269_v16 }
0x143e   :  { %11335 = vmatprep.subr.mxu0 %v15274_v14  ;;  %11370 = vmatprep.subr.mxu1 %v15277_v15 }
0x143f   :  { %11336 = vmatpush3.msra.mxu0 %v15282_v18  ;;  %11371 = vmatpush3.msra.mxu1 %v15285_v35 }
0x1440   :  { %11337 = vmatprep.subr.mxu0 %v15290_v19  ;;  %11372 = vmatprep.subr.mxu1 %v15293_v20 }
0x1441   :  { %11338 = vmatpush3.msra.mxu0 %v15298_v21  ;;  %11373 = vmatpush3.msra.mxu1 %v15301_v22 }
0x1442   :  { %11339 = vmatprep.subr.mxu0 %v15306_v23  ;;  %11374 = vmatprep.subr.mxu1 %v15309_v40 }
0x1443   :  { %11340 = vmatpush3.msra.mxu0 %v15314_v52  ;;  %11375 = vmatpush3.msra.mxu1 %v15317_v28 }
0x1444   :  { %11341 = vmatprep.subr.mxu0 %v15322_v29  ;;  %11376 = vmatprep.subr.mxu1 %v15325_v9 }
0x1445   :  { %11342 = vmatpush3.msra.mxu0 %v15330_v27  ;;  %11377 = vmatpush3.msra.mxu1 %v15333_v37 }
0x1446   :  { %11343 = vmatprep.subr.mxu0 %v15336_v43  ;;  %11378 = vmatprep.subr.mxu1 %v15341_v38 }
0x1447   :  { %11344 = vmatpush3.msra.mxu0 %v15344_v39  ;;  %11379 = vmatpush3.msra.mxu1 %v15347_v3 }
0x1448   :  { %11345 = vmatprep.subr.mxu0 %v15352_v41  ;;  %11380 = vmatprep.subr.mxu1 %v15355_v44 }
0x1449   :  { %11346 = vmatpush3.msra.mxu0 %v15358_v48  ;;  %11381 = vmatpush3.msra.mxu1 %v15363_v50 }
0x144a   :  { %11347 = vmatprep.subr.mxu0 %v15366_v53  ;;  %11382 = vmatprep.subr.mxu1 %v15369_v26 }
0x144b   :  { %11348 = vmatpush3.msra.mxu0 %v15374_v49  ;;  %11383 = vmatpush3.msra.mxu1 %v15377_v5 }
0x144c   :  { %11387 = vmatprep.subr.mxu0 %v15124_v36  ;;  %11422 = vmatprep.subr.mxu1 %v15127_v47 }
0x14ec   :  { %v15387_v44 = vpop.f32.mrf.mxu0  ;;  %v15389_v41 = vpop.f32.mrf.mxu1 }
0x14ed   :  { %v7766_v48 = vsel %vm2305_vm4, %v15387_v44, 0.0  ;;  %v7780_v53 = vsel %vm2305_vm4, %v15389_v41, 0.0 }
0x14ee   :  { %v7767_v50 = vrot.slane %v7766_v48, 4  ;;  %v7781_v26 = vrot.slane %v7780_v53, 4  ;;  %v15395_v3 = vpop.f32.mrf.mxu0  ;;  %v15397_v49 = vpop.f32.mrf.mxu1 }
0x14ef   :  { %15655 = vst [vmem:[#allocation90_spill] sm:$0xff] %v15395_v3  ;;  %15656 = vst [vmem:[#allocation91_spill] sm:$0xff] %v15397_v49  ;;  %v7773_v36 = vsel %vm2305_vm4, %v15395_v3, 0.0  ;;  %v7795_v47 = vmul.f32 %v15395_v3, %v15395_v3  ;;  %v7787_v9 = vsel %vm2305_vm4, %v15397_v49, 0.0  ;;  %v7797_v29 = vmul.f32 %v15397_v49, %v15397_v49 }
0x14f0   :  { %v7768_v5 = vadd.f32 %v7767_v50, %v7766_v48  ;;  %v7782_v39 = vadd.f32 %v7781_v26, %v7780_v53  ;;  %v7720_v38 = vpop.f32.mrf.mxu0  ;;  %v7761_v43 = vpop.f32.mrf.mxu1  ;;  %v7774_v37 = vrot.slane %v7773_v36, 4  ;;  %v7788_v3 = vrot.slane %v7787_v9, 4 }
0x14f1   :  { %v7805_v27 = vsel %vm2305_vm4, %v7795_v47, 0.0  ;;  %v7819_v26 = vsel %vm2305_vm4, %v7797_v29, 0.0 }
0x14f2   :  { %v7769_v28 = vrot.slane %v7768_v5, 2  ;;  %v7783_v52 = vrot.slane %v7782_v39, 2  ;;  %v7721_v40 = vpop.f32.mrf.mxu0  ;;  %v7762_v23 = vpop.f32.mrf.mxu1  ;;  %v7775_v22 = vadd.f32 %v7774_v37, %v7773_v36  ;;  %v7806_v21 = vrot.slane %v7805_v27, 4 }
0x14f3   :  { %v7789_v50 = vadd.f32 %v7788_v3, %v7787_v9  ;;  %v7820_v53 = vrot.slane %v7819_v26, 4 }
0x14f4   :  { %v7770_v38 = vadd.f32 %v7769_v28, %v7768_v5  ;;  %v7776_v43 = vrot.slane %v7775_v22, 2  ;;  %v7807_v48 = vadd.f32 %v7806_v21, %v7805_v27  ;;  %v7784_v47 = vadd.f32 %v7783_v52, %v7782_v39  ;;  %v15684_v27 = vld [vmem:[#allocation87_spill] sm:$0xff] }
0x14f5   :  { %v7790_v20 = vrot.slane %v7789_v50, 2  ;;  %v7821_v19 = vadd.f32 %v7820_v53, %v7819_v26  ;;  %v15685_v26 = vld [vmem:[#allocation88_spill] sm:$0xff]  ;;  %v15482_v53 = vld [vmem:[#allocation30 + $0x18] sm:$0xff] }
0x14f6   :  { %v7777_v35 = vadd.f32 %v7776_v43, %v7775_v22  ;;  %v7808_v18 = vrot.slane %v7807_v48, 2  ;;  %v7771_v49 = vrot.slane %v7770_v38, 1  ;;  %v7785_v37 = vrot.slane %v7784_v47, 1 }
0x14f7   :  { %v7791_v14 = vadd.f32 %v7790_v20, %v7789_v50  ;;  %v7822_v23 = vrot.slane %v7821_v19, 2  ;;  %v15683_v20 = vld [vmem:[#allocation86_spill] sm:$0xff]  ;;  %v15687_v43 = vmov 0.0  }
0x14f8   :  { %v7778_v15 = vrot.slane %v7777_v35, 1  ;;  %v7809_v40 = vadd.f32 %v7808_v18, %v7807_v48  ;;  %v7772_v5 = vadd.f32 %v7771_v49, %v7770_v38  ;;  %v7786_v52 = vadd.f32 %v7785_v37, %v7784_v47  ;;  %v15680_v18 = vld [vmem:[#allocation83_spill] sm:$0xff]  ;;  %v15686_v38 = vld [vmem:[#allocation89_spill] sm:$0xff]  ;;  %v15480_v50 = vld [vmem:[#allocation30] sm:$0xff] }
0x14f9   :  { %v7792_v16 = vrot.slane %v7791_v14, 1  ;;  %v7823_v29 = vadd.f32 %v7822_v23, %v7821_v19  ;;  %v7794_v49 = vmul.f32 %v15387_v44, %v15387_v44  ;;  %v15682_v19 = vld [vmem:[#allocation85_spill] sm:$0xff]  ;;  %v15478_v48 = vld [vmem:[#allocation30 + $0x8] sm:$0xff] }
0x14fa   :  { %v7779_v36 = vadd.f32 %v7778_v15, %v7777_v35  ;;  %v7810_v45 = vrot.slane %v7809_v40, 1  ;;  %v15679_v15 = vld [vmem:[#allocation82_spill] sm:$0xff]  ;;  %v15681_v35 = vld [vmem:[#allocation84_spill] sm:$0xff] }
0x14fb   :  { %v7793_v21 = vadd.f32 %v7792_v16, %v7791_v14  ;;  %v7824_v9 = vrot.slane %v7823_v29, 1  ;;  %v15677_v16 = vld [vmem:[#allocation80_spill] sm:$0xff]  ;;  %v15678_v14 = vld [vmem:[#allocation81_spill] sm:$0xff]  ;;  %v12814_v47 = vld [vmem:[#allocation18 + $0x450] ss:$24 sps:$4 sm:$0xff]  }
0x14fc   :  { %7954 = vmatprep.mubr.f32.mxu0 %v7779_v36  ;;  %v7811_v28 = vadd.f32 %v7810_v45, %v7809_v40  ;;  %v7796_v45 = vmul.f32 %v15389_v41, %v15389_v41  ;;  %v12816_v40 = vld [vmem:[#allocation18 + $0x454] ss:$24 sps:$4 sm:$0xff]   ;;  %v12820_v23 = vld [vmem:[#allocation18 + $0x420] ss:$24 sps:$4 sm:$0xff]   ;;  %v12822_v37 = vld [vmem:[#allocation18 + $0x424] ss:$24 sps:$4 sm:$0xff]  }
0x14fd   :  { %7955 = vmatmul.mubr.f32.vlgmr.msra.gmra.mxu0 %v7772_v5  ;;  %8024 = vmatprep.mubr.f32.mxu1 %v7793_v21  ;;  %v7825_v22 = vadd.f32 %v7824_v9, %v7823_v29  ;;  %v12826_v36 = vld [vmem:[#allocation18 + $0x3f0] ss:$24 sps:$4 sm:$0xff]   ;;  %v12828_v29 = vld [vmem:[#allocation18 + $0x3f4] ss:$24 sps:$4 sm:$0xff]   ;;  %v12832_v5 = vld [vmem:[#allocation18 + $0x3c0] ss:$24 sps:$4 sm:$0xff]  }
0x14fe   :  { %11388 = vmatpush3.msra.mxu0 %v15138_v54  ;;  %8025 = vmatmul.mubr.f32.vlgmr.msra.gmra.mxu1 %v7786_v52  ;;  %v7798_v54 = vsel %vm2305_vm4, %v7794_v49, 0.0  ;;  %v12834_v21 = vld [vmem:[#allocation18 + $0x3c4] ss:$24 sps:$4 sm:$0xff]   ;;  %v12840_v9 = vld [vmem:[#allocation18 + $0x394] ss:$24 sps:$4 sm:$0xff]  }
0x14ff   :  { %11389 = vmatprep.subr.mxu0 %v15144_v25  ;;  %11423 = vmatpush3.msra.mxu1 %v15141_v24  ;;  %v7812_v24 = vsel %vm2305_vm4, %v7796_v45, 0.0  ;;  %v7799_v25 = vrot.slane %v7798_v54, 4  ;;  %v12844_v52 = vld [vmem:[#allocation18 + $0x360] ss:$24 sps:$4 sm:$0xff]   ;;  %v12850_v49 = vld [vmem:[#allocation18 + $0x330] ss:$24 sps:$4 sm:$0xff]  }
0x1500   :  { %8094 = vmatprep.mubr.f32.mxu0 %v7811_v28  ;;  %11424 = vmatprep.subr.mxu1 %v15147_v55  ;;  %v7813_v55 = vrot.slane %v7812_v24, 4  ;;  %v12838_v28 = vld [vmem:[#allocation18 + $0x390] ss:$24 sps:$4 sm:$0xff]   ;;  %v12852_v45 = vld [vmem:[#allocation18 + $0x334] ss:$24 sps:$4 sm:$0xff]   ;;  %vm8184_vm4 = vcmask 64512  }
0x1501   :  { %8164 = vmatprep.mubr.f32.mxu1 %v7825_v22  ;;  %11390 = vmatpush3.msra.mxu0 %v15150_v57  ;;  %v7800_v57 = vadd.f32 %v7799_v25, %v7798_v54  ;;  %v12846_v22 = vld [vmem:[#allocation18 + $0x364] ss:$24 sps:$4 sm:$0xff]   ;;  %v12856_v54 = vld [vmem:[#allocation18 + $0x300] ss:$24 sps:$4 sm:$0xff]   ;;  %v12862_v25 = vld [vmem:[#allocation18 + $0x5d0] ss:$24 sps:$4 sm:$0xff]  }
0x1502   :  { %11425 = vmatpush3.msra.mxu1 %v15153_v58  ;;  %11391 = vmatprep.subr.mxu0 %v15158_v59  ;;  %v7814_v58 = vadd.f32 %v7813_v55, %v7812_v24  ;;  %v15657_v59 = vld [vmem:[#allocation60_spill] sm:$0xff] }
0x1503   :  { %11426 = vmatprep.subr.mxu1 %v15161_v17  ;;  %11392 = vmatpush3.msra.mxu0 %v15166_v62  ;;  %v15658_v17 = vld [vmem:[#allocation61_spill] sm:$0xff]  ;;  %v7801_v62 = vrot.slane %v7800_v57, 2  ;;  %v12864_v55 = vld [vmem:[#allocation18 + $0x5d4] ss:$24 sps:$4 sm:$0xff]  }
0x1504   :  { %11427 = vmatpush3.msra.mxu1 %v15169_v63  ;;  %11393 = vmatprep.subr.mxu0 %v15174_v0  ;;  %v7815_v63 = vrot.slane %v7814_v58, 2  ;;  %v15659_v0 = vld [vmem:[#allocation62_spill] sm:$0xff] }
0x1505   :  { %11428 = vmatprep.subr.mxu1 %v15177_v1  ;;  %11394 = vmatpush3.msra.mxu0 %v15182_v2  ;;  %v15660_v1 = vld [vmem:[#allocation63_spill] sm:$0xff]  ;;  %v15661_v2 = vld [vmem:[#allocation64_spill] sm:$0xff] }
0x1506   :  { %11429 = vmatpush3.msra.mxu1 %v15185_v4  ;;  %11395 = vmatprep.subr.mxu0 %v15190_v6  ;;  %v15662_v4 = vld [vmem:[#allocation65_spill] sm:$0xff]  ;;  %v15663_v6 = vld [vmem:[#allocation66_spill] sm:$0xff] }
0x1507   :  { %11430 = vmatprep.subr.mxu1 %v15193_v7  ;;  %11396 = vmatpush3.msra.mxu0 %v15198_v56  ;;  %v15664_v7 = vld [vmem:[#allocation67_spill] sm:$0xff]  ;;  %v15665_v56 = vld [vmem:[#allocation68_spill] sm:$0xff] }
0x1508   :  { %11431 = vmatpush3.msra.mxu1 %v15201_v10  ;;  %11397 = vmatprep.subr.mxu0 %v15206_v60  ;;  %v15666_v10 = vld [vmem:[#allocation69_spill] sm:$0xff]  ;;  %v7802_v60 = vadd.f32 %v7801_v62, %v7800_v57 }
0x1509   :  { %11432 = vmatprep.subr.mxu1 %v15209_v11  ;;  %11398 = vmatpush3.msra.mxu0 %v15214_v12  ;;  %v7816_v11 = vadd.f32 %v7815_v63, %v7814_v58  ;;  %v15667_v12 = vld [vmem:[#allocation70_spill] sm:$0xff]  ;;  %v12868_v57 = vld [vmem:[#allocation18 + $0x5a0] ss:$24 sps:$4 sm:$0xff]  }
0x150a   :  { %11433 = vmatpush3.msra.mxu1 %v15217_v13  ;;  %11399 = vmatprep.subr.mxu0 %v15222_v30  ;;  %v15668_v13 = vld [vmem:[#allocation71_spill] sm:$0xff]  ;;  %v15669_v30 = vld [vmem:[#allocation72_spill] sm:$0xff] }
0x150b   :  { %11434 = vmatprep.subr.mxu1 %v15225_v42  ;;  %11400 = vmatpush3.msra.mxu0 %v15230_v46  ;;  %v15670_v42 = vld [vmem:[#allocation73_spill] sm:$0xff]  ;;  %v15671_v46 = vld [vmem:[#allocation74_spill] sm:$0xff] }
0x150c   :  { %11435 = vmatpush3.msra.mxu1 %v15233_v31  ;;  %11401 = vmatprep.subr.mxu0 %v15238_v32  ;;  %v15672_v31 = vld [vmem:[#allocation75_spill] sm:$0xff]  ;;  %v15673_v32 = vld [vmem:[#allocation76_spill] sm:$0xff] }
0x150d   :  { %11436 = vmatprep.subr.mxu1 %v15241_v61  ;;  %11402 = vmatpush3.msra.mxu0 %v15246_v33  ;;  %v15674_v61 = vld [vmem:[#allocation77_spill] sm:$0xff]  ;;  %v15675_v33 = vld [vmem:[#allocation78_spill] sm:$0xff] }
0x150e   :  { %11437 = vmatpush3.msra.mxu1 %v15249_v51  ;;  %11403 = vmatprep.subr.mxu0 %v15258_v8  ;;  %v15676_v51 = vld [vmem:[#allocation79_spill] sm:$0xff]  ;;  %v7803_v8 = vrot.slane %v7802_v60, 1  ;;  %v12858_v24 = vld [vmem:[#allocation18 + $0x304] ss:$24 sps:$4 sm:$0xff]  }
0x150f   :  { %11438 = vmatprep.subr.mxu1 %v15261_v34  ;;  %11404 = vmatpush3.msra.mxu0 %v15657_v59  ;;  %v7817_v34 = vrot.slane %v7816_v11, 1  ;;  %v12870_v58 = vld [vmem:[#allocation18 + $0x5a4] ss:$24 sps:$4 sm:$0xff]   ;;  %v12874_v59 = vld [vmem:[#allocation18 + $0x570] ss:$24 sps:$4 sm:$0xff]  }
0x1510   :  { %11439 = vmatpush3.msra.mxu1 %v15658_v17  ;;  %11405 = vmatprep.subr.mxu0 %v15659_v0  ;;  %v7804_v39 = vadd.f32 %v7803_v8, %v7802_v60  ;;  %v12876_v17 = vld [vmem:[#allocation18 + $0x574] ss:$24 sps:$4 sm:$0xff]  }
0x1511   :  { %11440 = vmatprep.subr.mxu1 %v15660_v1  ;;  %11406 = vmatpush3.msra.mxu0 %v15661_v2  ;;  %v7818_v3 = vadd.f32 %v7817_v34, %v7816_v11  ;;  %v8182_v8 = vld [vmem:[#allocation30 + $0x10] sm:$0xff] }
0x1512   :  { %11441 = vmatpush3.msra.mxu1 %v15662_v4  ;;  %11407 = vmatprep.subr.mxu0 %v15663_v6 }
0x1513   :  { %11442 = vmatprep.subr.mxu1 %v15664_v7  ;;  %11408 = vmatpush3.msra.mxu0 %v15665_v56 }
0x1514   :  { %11443 = vmatpush3.msra.mxu1 %v15666_v10  ;;  %11409 = vmatprep.subr.mxu0 %v15667_v12 }
0x1515   :  { %11444 = vmatprep.subr.mxu1 %v15668_v13  ;;  %11410 = vmatpush3.msra.mxu0 %v15669_v30 }
0x1516   :  { %11445 = vmatpush3.msra.mxu1 %v15670_v42  ;;  %11411 = vmatprep.subr.mxu0 %v15671_v46 }
0x1517   :  { %11446 = vmatprep.subr.mxu1 %v15672_v31  ;;  %11412 = vmatpush3.msra.mxu0 %v15673_v32 }
0x1518   :  { %11447 = vmatpush3.msra.mxu1 %v15674_v61  ;;  %11413 = vmatprep.subr.mxu0 %v15675_v33  ;;  %v7764_v61 = vld [vmem:[#allocation22] sm:$0x1] }
0x1519   :  { %11448 = vmatprep.subr.mxu1 %v15676_v51  ;;  %11414 = vmatpush3.msra.mxu0 %v15677_v16  ;;  %v7765_v16 = vld [vmem:[#allocation22 + $0x1] sm:$0x1] }
0x151a   :  { %11449 = vmatpush3.msra.mxu1 %v15678_v14  ;;  %11415 = vmatprep.subr.mxu0 %v15679_v15  ;;  %v12810_v15 = vld [vmem:[#allocation18 + $0x154] ss:$24 sps:$4 sm:$0xff]  }
0x151b   :  { %11450 = vmatprep.subr.mxu1 %v15680_v18  ;;  %11416 = vmatpush3.msra.mxu0 %v15681_v35  ;;  %v12808_v18 = vld [vmem:[#allocation18 + $0x150] ss:$24 sps:$4 sm:$0xff]   ;;  %v12813_v35 = vld [vmem:[#allocation18 + $0x124] ss:$24 sps:$4 sm:$0xff]  }
0x151c   :  { %11451 = vmatpush3.msra.mxu1 %v15682_v19  ;;  %11417 = vmatprep.subr.mxu0 %v15683_v20  ;;  %v12811_v19 = vld [vmem:[#allocation18 + $0x120] ss:$24 sps:$4 sm:$0xff]   ;;  %v12819_v20 = vld [vmem:[#allocation18 + $0xf4] ss:$24 sps:$4 sm:$0xff]  }
0x151d   :  { %11452 = vmatprep.subr.mxu1 %v15684_v27  ;;  %11418 = vmatpush3.msra.mxu0 %v15685_v26  ;;  %v12817_v27 = vld [vmem:[#allocation18 + $0xf0] ss:$24 sps:$4 sm:$0xff]   ;;  %v12831_v26 = vld [vmem:[#allocation18 + $0x94] ss:$24 sps:$4 sm:$0xff]  }
0x151e   :  { %11453 = vmatpush3.msra.mxu1 %v15686_v38  ;;  %8095 = vmatmul.mubr.f32.vlgmr.msra.gmra.mxu0 %v7804_v39  ;;  %v12825_v39 = vld [vmem:[#allocation18 + $0xc4] ss:$24 sps:$4 sm:$0xff]   ;;  %v12829_v38 = vld [vmem:[#allocation18 + $0x90] ss:$24 sps:$4 sm:$0xff]  }
0x151f   :  { %8165 = vmatmul.mubr.f32.vlgmr.msra.gmra.mxu1 %v7818_v3  ;;  %8252 = vmatprep.mubr.f32.mxu0 %v15687_v43  ;;  %v12823_v3 = vld [vmem:[#allocation18 + $0xc0] ss:$24 sps:$4 sm:$0xff]  }
0x1520   :  { %8218 = vmatprep.subr.mxu0 %v15478_v48  ;;  %9716 = vmatprep.subr.bf16.mxu1 %v12816_v40  ;;  %v12847_v40 = vld [vmem:[#allocation18] ss:$24 sps:$4 sm:$0xff]  }
0x1521   :  { %8219 = vmatpush1.msra.mxu0 %v15480_v50  ;;  %9717 = vmatpush1.bf16.msra.mxu1 %v12814_v47  ;;  %v12849_v47 = vld [vmem:[#allocation18 + $0x4] ss:$24 sps:$4 sm:$0xff]  }
0x1522   :  { %8289 = vmatprep.subr.mxu0 %v15482_v53  ;;  %9718 = vmatprep.subr.bf16.mxu1 %v12822_v37  ;;  %v12853_v37 = vld [vmem:[#allocation18 + $0x2d0] ss:$24 sps:$4 sm:$0xff]  }
0x1525   :  { %9719 = vmatpush1.bf16.msra.mxu1 %v12820_v23  ;;  %v12855_v23 = vld [vmem:[#allocation18 + $0x2d4] ss:$24 sps:$4 sm:$0xff]  }
0x1526   :  { %9720 = vmatprep.subr.bf16.mxu1 %v12828_v29  ;;  %v12859_v29 = vld [vmem:[#allocation18 + $0x2a0] ss:$24 sps:$4 sm:$0xff]  }
0x1529   :  { %9721 = vmatpush1.bf16.msra.mxu1 %v12826_v36  ;;  %v12861_v36 = vld [vmem:[#allocation18 + $0x2a4] ss:$24 sps:$4 sm:$0xff]  }
0x152a   :  { %9722 = vmatprep.subr.bf16.mxu1 %v12834_v21  ;;  %v12865_v21 = vld [vmem:[#allocation18 + $0x270] ss:$24 sps:$4 sm:$0xff]  }
0x152d   :  { %9723 = vmatpush1.bf16.msra.mxu1 %v12832_v5  ;;  %v12867_v5 = vld [vmem:[#allocation18 + $0x274] ss:$24 sps:$4 sm:$0xff]  }
0x152e   :  { %9724 = vmatprep.subr.bf16.mxu1 %v12840_v9  ;;  %v12871_v9 = vld [vmem:[#allocation18 + $0x240] ss:$24 sps:$4 sm:$0xff]  }
0x1531   :  { %9725 = vmatpush1.bf16.msra.mxu1 %v12838_v28  ;;  %v12873_v28 = vld [vmem:[#allocation18 + $0x244] ss:$24 sps:$4 sm:$0xff]  }
0x1532   :  { %9726 = vmatprep.subr.bf16.mxu1 %v12846_v22  ;;  %v12882_v22 = vld [vmem:[#allocation18 + $0x544] ss:$24 sps:$4 sm:$0xff]  }
0x1535   :  { %9727 = vmatpush1.bf16.msra.mxu1 %v12844_v52  ;;  %v12879_v52 = vld [vmem:[#allocation18 + $0x214] ss:$24 sps:$4 sm:$0xff]  }
0x1536   :  { %9728 = vmatprep.subr.bf16.mxu1 %v12852_v45  ;;  %v12880_v45 = vld [vmem:[#allocation18 + $0x540] ss:$24 sps:$4 sm:$0xff]  }
0x1539   :  { %9729 = vmatpush1.bf16.msra.mxu1 %v12850_v49  ;;  %v12877_v49 = vld [vmem:[#allocation18 + $0x210] ss:$24 sps:$4 sm:$0xff]  }
0x153a   :  { %9730 = vmatprep.subr.bf16.mxu1 %v12858_v24  ;;  %v12888_v24 = vld [vmem:[#allocation18 + $0x514] ss:$24 sps:$4 sm:$0xff]  }
0x153d   :  { %9731 = vmatpush1.bf16.msra.mxu1 %v12856_v54  ;;  %v12885_v54 = vld [vmem:[#allocation18 + $0x1e4] ss:$24 sps:$4 sm:$0xff]  }
0x153e   :  { %9732 = vmatprep.subr.bf16.mxu1 %v12864_v55  ;;  %v12886_v55 = vld [vmem:[#allocation18 + $0x510] ss:$24 sps:$4 sm:$0xff]  }
0x1541   :  { %9733 = vmatpush2.bf16.msra.mxu1 %v12862_v25  ;;  %v12883_v25 = vld [vmem:[#allocation18 + $0x1e0] ss:$24 sps:$4 sm:$0xff]  }
0x1542   :  { %9734 = vmatprep.subr.bf16.mxu1 %v12870_v58  ;;  %v12894_v58 = vld [vmem:[#allocation18 + $0x4e4] ss:$24 sps:$4 sm:$0xff]  }
0x1545   :  { %9735 = vmatpush2.bf16.msra.mxu1 %v12868_v57  ;;  %v12891_v57 = vld [vmem:[#allocation18 + $0x1b4] ss:$24 sps:$4 sm:$0xff]  }
0x1546   :  { %9736 = vmatprep.subr.bf16.mxu1 %v12876_v17  ;;  %v12892_v17 = vld [vmem:[#allocation18 + $0x4e0] ss:$24 sps:$4 sm:$0xff]  }
0x1549   :  { %9737 = vmatpush2.bf16.msra.mxu1 %v12874_v59  ;;  %v12889_v59 = vld [vmem:[#allocation18 + $0x1b0] ss:$24 sps:$4 sm:$0xff]  }
0x154a   :  { %9738 = vmatprep.subr.bf16.mxu1 %v12882_v22  ;;  %v12919_v22 = vld [vmem:[#allocation18 + $0xc8] ss:$24 sps:$4 sm:$0xff]  }
0x154d   :  { %9739 = vmatpush2.bf16.msra.mxu1 %v12880_v45  ;;  %v12927_v45 = vld [vmem:[#allocation18 + $0x9c] ss:$24 sps:$4 sm:$0xff]  }
0x154e   :  { %9740 = vmatprep.subr.bf16.mxu1 %v12888_v24  ;;  %v12925_v24 = vld [vmem:[#allocation18 + $0x98] ss:$24 sps:$4 sm:$0xff]  }
0x1551   :  { %9741 = vmatpush2.bf16.msra.mxu1 %v12886_v55  ;;  %v12933_v55 = vld [vmem:[#allocation18 + $0x6c] ss:$24 sps:$4 sm:$0xff]  }
0x1552   :  { %9742 = vmatprep.subr.bf16.mxu1 %v12894_v58  ;;  %v12931_v58 = vld [vmem:[#allocation18 + $0x68] ss:$24 sps:$4 sm:$0xff]  }
0x1555   :  { %9743 = vmatpush2.bf16.msra.mxu1 %v12892_v17  ;;  %v12939_v17 = vld [vmem:[#allocation18 + $0x3c] ss:$24 sps:$4 sm:$0xff]  }
0x15bd   :  { %v11349_v62 = vpop.f32.mrf.mxu0 }
0x15be   :  { %v11384_v63 = vpop.f32.mrf.mxu1 }
0x15bf   :  { %v11350_v0 = vpop.f32.mrf.mxu0 }
0x15c0   :  { %v11385_v1 = vpop.f32.mrf.mxu1  ;;  %v11351_v2 = vadd.f32 %v11350_v0, %v11349_v62  ;;  %v12897_v62 = vld [vmem:[#allocation18 + $0x184] ss:$24 sps:$4 sm:$0xff]   ;;  %v12895_v0 = vld [vmem:[#allocation18 + $0x180] ss:$24 sps:$4 sm:$0xff]  }
0x15c1   :  { %v11386_v4 = vadd.f32 %v11385_v1, %v11384_v63  ;;  %v12900_v63 = vld [vmem:[#allocation18 + $0x4b4] ss:$24 sps:$4 sm:$0xff]   ;;  %v12898_v1 = vld [vmem:[#allocation18 + $0x4b0] ss:$24 sps:$4 sm:$0xff]  }
0x15c2   :  { %9744 = vmatprep.subr.bf16.mxu1 %v12900_v63  ;;  %v12937_v63 = vld [vmem:[#allocation18 + $0x38] ss:$24 sps:$4 sm:$0xff]  }
0x15c3   :  { %v8027_v6 = vadd.f32 %v11386_v4, %v11351_v2  ;;  %9745 = vmatpush2.bf16.msra.mxu1 %v12898_v1  ;;  %v12903_v2 = vld [vmem:[#allocation18 + $0x484] ss:$24 sps:$4 sm:$0xff]  }
0x15c4   :  { %v12906_v4 = vld [vmem:[#allocation18 + $0x15c] ss:$24 sps:$4 sm:$0xff]   ;;  %9746 = vmatprep.subr.bf16.mxu1 %v12903_v2  ;;  %v12945_v1 = vld [vmem:[#allocation18 + $0xc] ss:$24 sps:$4 sm:$0xff]  }
0x15c5   :  { %v8171_v11 = vmul.f32 0.0078125, %v8027_v6  ;;  %v12901_v6 = vld [vmem:[#allocation18 + $0x480] ss:$24 sps:$4 sm:$0xff]   ;;  %v12948_v2 = vld [vmem:[#allocation18 + $0x33c] ss:$24 sps:$4 sm:$0xff]  }
0x15c7   :  { %v8173_v42 = vmul.f32 %v8171_v11, %v8171_v11  ;;  %9747 = vmatpush2.bf16.msra.mxu1 %v12901_v6  ;;  %v12946_v6 = vld [vmem:[#allocation18 + $0x338] ss:$24 sps:$4 sm:$0xff]  }
0x15de   :  { %v11419_v7 = vpop.f32.mrf.mxu0 }
0x15df   :  { %v11454_v56 = vpop.f32.mrf.mxu1 }
0x15e0   :  { %v11420_v10 = vpop.f32.mrf.mxu0 }
0x15e1   :  { %v11455_v60 = vpop.f32.mrf.mxu1  ;;  %v11421_v12 = vadd.f32 %v11420_v10, %v11419_v7  ;;  %v12912_v7 = vld [vmem:[#allocation18 + $0x45c] ss:$24 sps:$4 sm:$0xff]  }
0x15e2   :  { %v11456_v13 = vadd.f32 %v11455_v60, %v11454_v56  ;;  %9798 = vmatprep.subr.bf16.mxu1 %v12912_v7  ;;  %v12951_v7 = vld [vmem:[#allocation18 + $0x2dc] ss:$24 sps:$4 sm:$0xff]  }
0x15e4   :  { %v8167_v30 = vadd.f32 %v11456_v13, %v11421_v12 }
0x15e6   :  { %v8172_v46 = vmul.f32 0.0078125, %v8167_v30 }
0x15e8   :  { %v8174_v31 = vsub.f32 %v8172_v46, %v8173_v42 }
0x15ea   :  { %v8175_v32 = vadd.f32 1e-05, %v8174_v31 }
0x15ec   :  { %13112 = vrsqrt.f32 %v8175_v32 }
0x15f9   :  { %v13113_v33 = vpop.eup %13112 }
0x15fa   :  { %v8177_v51 = vmul.f32 %v13113_v33, %v7764_v61  ;;  %v15689_v33 = vld [vmem:[#allocation90_spill] sm:$0xff] }
0x15fc   :  { %10707 = vmatmul.mubr.msk.f32.vlgmr.msra.gmra.mxu0 %vm8184_vm4, %v8177_v51  ;;  %v8178_v34 = vmul.f32 %v8177_v51, %v8171_v11  ;;  %v15688_v11 = vld [vmem:[#allocation59_spill] sm:$0xff] }
0x15fd   :  { %8290 = vmatpush1.msra.mxu0 %v8182_v8  ;;  %8323 = vmatprep.mubr.f32.mxu0 %v15687_v43 }
0x15fe   :  { %8363 = vmatprep.subr.mxu0 %v15478_v48  ;;  %v8179_v14 = vsub.f32 %v7765_v16, %v8178_v34  ;;  %v12835_v48 = vld [vmem:[#allocation18 + $0x60] ss:$24 sps:$4 sm:$0xff]  }
0x1600   :  { %10708 = vmatmul.mubr.msk.f32.vlgmr.msra.gmra.mxu0 %vm8184_vm4, %v8177_v51 }
0x1601   :  { %8364 = vmatpush1.msra.mxu0 %v15480_v50  ;;  %8397 = vmatprep.mubr.f32.mxu0 %v15687_v43  ;;  %v12843_v50 = vld [vmem:[#allocation18 + $0x34] ss:$24 sps:$4 sm:$0xff]  }
0x1602   :  { %8434 = vmatprep.subr.mxu0 %v15482_v53  ;;  %v12841_v53 = vld [vmem:[#allocation18 + $0x30] ss:$24 sps:$4 sm:$0xff]  }
0x1604   :  { %10709 = vmatmul.mubr.msk.f32.vlgmr.msra.gmra.mxu0 %vm8184_vm4, %v8179_v14 }
0x1605   :  { %8435 = vmatpush1.msra.mxu0 %v8182_v8  ;;  %8468 = vmatprep.mubr.f32.mxu0 %v15687_v43  ;;  %v12837_v43 = vld [vmem:[#allocation18 + $0x64] ss:$24 sps:$4 sm:$0xff]  }
0x1606   :  { %9675 = vmatprep.subr.bf16.mxu0 %v12810_v15 }
0x1608   :  { %10710 = vmatmul.mubr.msk.f32.vlgmr.msra.gmra.mxu0 %vm8184_vm4, %v8179_v14 }
0x1609   :  { %9676 = vmatpush1.bf16.msra.mxu0 %v12808_v18 }
0x160a   :  { %9677 = vmatprep.subr.bf16.mxu0 %v12813_v35 }
0x160d   :  { %9678 = vmatpush1.bf16.msra.mxu0 %v12811_v19 }
0x160e   :  { %9679 = vmatprep.subr.bf16.mxu0 %v12819_v20  ;;  %v15690_v20 = vld [vmem:[#allocation91_spill] sm:$0xff] }
0x1611   :  { %9680 = vmatpush1.bf16.msra.mxu0 %v12817_v27 }
0x1612   :  { %9681 = vmatprep.subr.bf16.mxu0 %v12825_v39 }
0x1615   :  { %9682 = vmatpush1.bf16.msra.mxu0 %v12823_v3 }
0x1616   :  { %9683 = vmatprep.subr.bf16.mxu0 %v12831_v26 }
0x1619   :  { %9684 = vmatpush1.bf16.msra.mxu0 %v12829_v38 }
0x161a   :  { %9685 = vmatprep.subr.bf16.mxu0 %v12837_v43 }
0x161d   :  { %9686 = vmatpush1.bf16.msra.mxu0 %v12835_v48  ;;  %v12904_v48 = vld [vmem:[#allocation18 + $0x158] ss:$24 sps:$4 sm:$0xff]  }
0x161e   :  { %9687 = vmatprep.subr.bf16.mxu0 %v12843_v50 }
0x1621   :  { %9688 = vmatpush1.bf16.msra.mxu0 %v12841_v53 }
0x1622   :  { %9689 = vmatprep.subr.bf16.mxu0 %v12849_v47  ;;  %v12909_v47 = vld [vmem:[#allocation18 + $0x12c] ss:$24 sps:$4 sm:$0xff]  }
0x1625   :  { %9690 = vmatpush1.bf16.msra.mxu0 %v12847_v40 }
0x1626   :  { %9691 = vmatprep.subr.bf16.mxu0 %v12855_v23  ;;  %v12907_v23 = vld [vmem:[#allocation18 + $0x128] ss:$24 sps:$4 sm:$0xff]  }
0x1629   :  { %9692 = vmatpush2.bf16.msra.mxu0 %v12853_v37  ;;  %v12910_v37 = vld [vmem:[#allocation18 + $0x458] ss:$24 sps:$4 sm:$0xff]  }
0x162a   :  { %9693 = vmatprep.subr.bf16.mxu0 %v12861_v36 }
0x162d   :  { %9694 = vmatpush2.bf16.msra.mxu0 %v12859_v29  ;;  %v12915_v29 = vld [vmem:[#allocation18 + $0xfc] ss:$24 sps:$4 sm:$0xff]  }
0x162e   :  { %9695 = vmatprep.subr.bf16.mxu0 %v12867_v5  ;;  %v12918_v5 = vld [vmem:[#allocation18 + $0x42c] ss:$24 sps:$4 sm:$0xff]  }
0x1631   :  { %9696 = vmatpush2.bf16.msra.mxu0 %v12865_v21  ;;  %v12913_v21 = vld [vmem:[#allocation18 + $0xf8] ss:$24 sps:$4 sm:$0xff]  }
0x1632   :  { %9697 = vmatprep.subr.bf16.mxu0 %v12873_v28  ;;  %v12916_v28 = vld [vmem:[#allocation18 + $0x428] ss:$24 sps:$4 sm:$0xff]  }
0x1635   :  { %9698 = vmatpush2.bf16.msra.mxu0 %v12871_v9  ;;  %v12921_v9 = vld [vmem:[#allocation18 + $0xcc] ss:$24 sps:$4 sm:$0xff]  }
0x1636   :  { %9699 = vmatprep.subr.bf16.mxu0 %v12879_v52  ;;  %v12924_v52 = vld [vmem:[#allocation18 + $0x3fc] ss:$24 sps:$4 sm:$0xff]  }
0x1639   :  { %9700 = vmatpush2.bf16.msra.mxu0 %v12877_v49  ;;  %v12922_v49 = vld [vmem:[#allocation18 + $0x3f8] ss:$24 sps:$4 sm:$0xff]  }
0x163a   :  { %9701 = vmatprep.subr.bf16.mxu0 %v12885_v54  ;;  %v12930_v54 = vld [vmem:[#allocation18 + $0x3cc] ss:$24 sps:$4 sm:$0xff]  }
0x163d   :  { %9702 = vmatpush2.bf16.msra.mxu0 %v12883_v25  ;;  %v12928_v25 = vld [vmem:[#allocation18 + $0x3c8] ss:$24 sps:$4 sm:$0xff]  }
0x163e   :  { %9703 = vmatprep.subr.bf16.mxu0 %v12891_v57  ;;  %v12936_v57 = vld [vmem:[#allocation18 + $0x39c] ss:$24 sps:$4 sm:$0xff]  }
0x1641   :  { %9704 = vmatpush2.bf16.msra.mxu0 %v12889_v59  ;;  %v12934_v59 = vld [vmem:[#allocation18 + $0x398] ss:$24 sps:$4 sm:$0xff]  }
0x1642   :  { %9705 = vmatprep.subr.bf16.mxu0 %v12897_v62  ;;  %v12942_v62 = vld [vmem:[#allocation18 + $0x36c] ss:$24 sps:$4 sm:$0xff]  }
0x1645   :  { %9706 = vmatpush2.bf16.msra.mxu0 %v12895_v0  ;;  %v12940_v0 = vld [vmem:[#allocation18 + $0x368] ss:$24 sps:$4 sm:$0xff]  }
0x1646   :  { %9757 = vmatprep.subr.bf16.mxu0 %v12906_v4  ;;  %v12943_v4 = vld [vmem:[#allocation18 + $0x8] ss:$24 sps:$4 sm:$0xff]  }
0x16bc   :  { %v8254_v56 = vpop.f32.mrf.mxu0 }
0x16bd   :  { %v8478_v12 = vrot.slane %v8254_v56, %v15688_v11  ;;  %v12954_v56 = vld [vmem:[#allocation18 + $0x30c] ss:$24 sps:$4 sm:$0xff]  }
0x16be   :  { %v8256_v10 = vpop.f32.mrf.mxu0 }
0x16bf   :  { %v8482_v30 = vrot.slane %v8256_v10, %v15688_v11  ;;  %v8491_v46 = vmul.f32 %v8478_v12, %v15387_v44  ;;  %v12949_v10 = vld [vmem:[#allocation18 + $0x2d8] ss:$24 sps:$4 sm:$0xff]   ;;  %v12960_v12 = vld [vmem:[#allocation18 + $0x5dc] ss:$24 sps:$4 sm:$0xff]  }
0x16c0   :  { %v8325_v60 = vpop.f32.mrf.mxu0 }
0x16c1   :  { %v8486_v31 = vrot.slane %v8325_v60, %v15688_v11  ;;  %v8492_v51 = vmul.f32 %v8482_v30, %v15689_v33  ;;  %v12952_v60 = vld [vmem:[#allocation18 + $0x308] ss:$24 sps:$4 sm:$0xff]   ;;  %v12958_v30 = vld [vmem:[#allocation18 + $0x5d8] ss:$24 sps:$4 sm:$0xff]   ;;  %v12972_v33 = vld [vmem:[#allocation18 + $0x57c] ss:$24 sps:$4 sm:$0xff]  }
0x16c2   :  { %v8327_v13 = vpop.f32.mrf.mxu0 }
0x16c3   :  { %v8490_v8 = vrot.slane %v8327_v13, %v15688_v11  ;;  %v8493_v15 = vmul.f32 %v8486_v31, %v15389_v41  ;;  %v12955_v13 = vld [vmem:[#allocation18 + $0x2a8] ss:$24 sps:$4 sm:$0xff]   ;;  %v12961_v31 = vld [vmem:[#allocation18 + $0x278] ss:$24 sps:$4 sm:$0xff]  }
0x16c4   :  { %v8399_v42 = vpop.f32.mrf.mxu0 }
0x16c5   :  { %v8498_v32 = vrot.slane %v8399_v42, %v15688_v11  ;;  %v8494_v27 = vmul.f32 %v8490_v8, %v15690_v20  ;;  %v12963_v42 = vld [vmem:[#allocation18 + $0x27c] ss:$24 sps:$4 sm:$0xff]   ;;  %v12970_v8 = vld [vmem:[#allocation18 + $0x578] ss:$24 sps:$4 sm:$0xff]  }
0x16c6   :  { %v8401_v61 = vpop.f32.mrf.mxu0  ;;  %v12987_v20 = vld [vmem:[#allocation18 + $0x1bc] ss:$24 sps:$4 sm:$0xff]  }
0x16c7   :  { %v8511_v34 = vadd.f32 %v8498_v32, %v8491_v46  ;;  %v8502_v16 = vrot.slane %v8401_v61, %v15688_v11  ;;  %v12966_v46 = vld [vmem:[#allocation18 + $0x5ac] ss:$24 sps:$4 sm:$0xff]   ;;  %v12964_v32 = vld [vmem:[#allocation18 + $0x5a8] ss:$24 sps:$4 sm:$0xff]  }
0x16c8   :  { %v8470_v14 = vpop.f32.mrf.mxu0  ;;  %v12969_v61 = vld [vmem:[#allocation18 + $0x24c] ss:$24 sps:$4 sm:$0xff]  }
0x16c9   :  { %v8512_v18 = vadd.f32 %v8502_v16, %v8492_v51  ;;  %v8506_v35 = vrot.slane %v8470_v14, %v15688_v11  ;;  %v8515_v19 = vmax.f32 %v8511_v34, 0.0  ;;  %v12967_v51 = vld [vmem:[#allocation18 + $0x248] ss:$24 sps:$4 sm:$0xff]   ;;  %v12975_v34 = vld [vmem:[#allocation18 + $0x21c] ss:$24 sps:$4 sm:$0xff]  }
0x16ca   :  { %v8472_v44 = vpop.f32.mrf.mxu0  ;;  %v12978_v16 = vld [vmem:[#allocation18 + $0x54c] ss:$24 sps:$4 sm:$0xff]   ;;  %v12973_v14 = vld [vmem:[#allocation18 + $0x218] ss:$24 sps:$4 sm:$0xff]  }
0x16cb   :  { %v8516_v39 = vmax.f32 %v8512_v18, 0.0  ;;  %v8513_v3 = vadd.f32 %v8506_v35, %v8493_v15  ;;  %v8510_v26 = vrot.slane %v8472_v44, %v15688_v11  ;;  %v15511_v50 = vpack.c.bf16 %v8515_v19, %v8515_v19  ;;  %v12957_v11 = vld [vmem:[#allocation18 + $0x2ac] ss:$24 sps:$4 sm:$0xff]   ;;  %v12976_v15 = vld [vmem:[#allocation18 + $0x548] ss:$24 sps:$4 sm:$0xff]  }
0x16cc   :  { %v12981_v18 = vld [vmem:[#allocation18 + $0x1ec] ss:$24 sps:$4 sm:$0xff]   ;;  %v12984_v35 = vld [vmem:[#allocation18 + $0x51c] ss:$24 sps:$4 sm:$0xff]   ;;  %v12979_v19 = vld [vmem:[#allocation18 + $0x1e8] ss:$24 sps:$4 sm:$0xff]  }
0x16cd   :  { %v15509_v38 = vpack.c.bf16 %v8516_v39, %v8516_v39  ;;  %v8514_v43 = vadd.f32 %v8510_v26, %v8494_v27  ;;  %v8517_v53 = vmax.f32 %v8513_v3, 0.0  ;;  %v12982_v44 = vld [vmem:[#allocation18 + $0x518] ss:$24 sps:$4 sm:$0xff]   ;;  %v12990_v27 = vld [vmem:[#allocation18 + $0x4ec] ss:$24 sps:$4 sm:$0xff]  }
0x16ce   :  { %v12985_v39 = vld [vmem:[#allocation18 + $0x1b8] ss:$24 sps:$4 sm:$0xff]   ;;  %v12988_v3 = vld [vmem:[#allocation18 + $0x4e8] ss:$24 sps:$4 sm:$0xff]   ;;  %v12993_v26 = vld [vmem:[#allocation18 + $0x18c] ss:$24 sps:$4 sm:$0xff]  }
0x16cf   :  { %v8518_v41 = vmax.f32 %v8514_v43, 0.0  ;;  %9707 = vmatprep.mubr.bf16.mxu0 %v15509_v38  ;;  %v15518_v36 = vpack.c.bf16 %v8517_v53, %v8517_v53  ;;  %v12996_v43 = vld [vmem:[#allocation18 + $0x4bc] ss:$24 sps:$4 sm:$0xff]   ;;  %v12994_v53 = vld [vmem:[#allocation18 + $0x4b8] ss:$24 sps:$4 sm:$0xff]  }
0x16d0   :  { %9708 = vmatmul.mubr.bf16.vlgmr.msra.gmra.mxu0 %v15511_v50 }
0x16d1   :  { %v15515_v40 = vpack.c.bf16 %v8518_v41, %v8518_v41  ;;  %9758 = vmatpush1.bf16.msra.mxu0 %v12904_v48  ;;  %9789 = vmatprep.mubr.bf16.mxu0 %v15509_v38  ;;  %v12991_v48 = vld [vmem:[#allocation18 + $0x188] ss:$24 sps:$4 sm:$0xff]   ;;  %v13002_v41 = vld [vmem:[#allocation18 + $0x164] ss:$24 sps:$4 sm:$0xff]  }
0x16d2   :  { %9759 = vmatprep.subr.bf16.mxu0 %v12909_v47  ;;  %v12999_v47 = vld [vmem:[#allocation18 + $0x48c] ss:$24 sps:$4 sm:$0xff]  }
0x16d3   :  { %9748 = vmatprep.mubr.bf16.mxu1 %v15515_v40 }
0x16d4   :  { %9749 = vmatmul.mubr.bf16.vlgmr.msra.gmra.mxu1 %v15518_v36 }
0x16d5   :  { %9760 = vmatpush1.bf16.msra.mxu0 %v12907_v23  ;;  %9799 = vmatpush1.bf16.msra.mxu1 %v12910_v37  ;;  %v12997_v23 = vld [vmem:[#allocation18 + $0x488] ss:$24 sps:$4 sm:$0xff]  }
0x16d6   :  { %9830 = vmatprep.mubr.bf16.mxu1 %v15515_v40  ;;  %9761 = vmatprep.subr.bf16.mxu0 %v12915_v29  ;;  %v13000_v37 = vld [vmem:[#allocation18 + $0x160] ss:$24 sps:$4 sm:$0xff]   ;;  %v13005_v29 = vld [vmem:[#allocation18 + $0x134] ss:$24 sps:$4 sm:$0xff]  }
0x16d7   :  { %9800 = vmatprep.subr.bf16.mxu1 %v12918_v5  ;;  %v13008_v5 = vld [vmem:[#allocation18 + $0x464] ss:$24 sps:$4 sm:$0xff]  }
0x16d9   :  { %9762 = vmatpush1.bf16.msra.mxu0 %v12913_v21  ;;  %9801 = vmatpush1.bf16.msra.mxu1 %v12916_v28  ;;  %v13003_v21 = vld [vmem:[#allocation18 + $0x130] ss:$24 sps:$4 sm:$0xff]   ;;  %v13006_v28 = vld [vmem:[#allocation18 + $0x460] ss:$24 sps:$4 sm:$0xff]  }
0x16da   :  { %9763 = vmatprep.subr.bf16.mxu0 %v12921_v9  ;;  %9802 = vmatprep.subr.bf16.mxu1 %v12924_v52  ;;  %v13011_v9 = vld [vmem:[#allocation18 + $0x104] ss:$24 sps:$4 sm:$0xff]   ;;  %v13014_v52 = vld [vmem:[#allocation18 + $0x434] ss:$24 sps:$4 sm:$0xff]  }
0x16dd   :  { %9764 = vmatpush1.bf16.msra.mxu0 %v12919_v22  ;;  %9803 = vmatpush1.bf16.msra.mxu1 %v12922_v49  ;;  %v13009_v22 = vld [vmem:[#allocation18 + $0x100] ss:$24 sps:$4 sm:$0xff]   ;;  %v13012_v49 = vld [vmem:[#allocation18 + $0x430] ss:$24 sps:$4 sm:$0xff]  }
0x16de   :  { %9765 = vmatprep.subr.bf16.mxu0 %v12927_v45  ;;  %9804 = vmatprep.subr.bf16.mxu1 %v12930_v54  ;;  %v13017_v45 = vld [vmem:[#allocation18 + $0xd4] ss:$24 sps:$4 sm:$0xff]   ;;  %v13020_v54 = vld [vmem:[#allocation18 + $0x404] ss:$24 sps:$4 sm:$0xff]  }
0x16e1   :  { %9766 = vmatpush1.bf16.msra.mxu0 %v12925_v24  ;;  %9805 = vmatpush1.bf16.msra.mxu1 %v12928_v25  ;;  %v13015_v24 = vld [vmem:[#allocation18 + $0xd0] ss:$24 sps:$4 sm:$0xff]   ;;  %v13023_v25 = vld [vmem:[#allocation18 + $0xa4] ss:$24 sps:$4 sm:$0xff]  }
0x16e2   :  { %9767 = vmatprep.subr.bf16.mxu0 %v12933_v55  ;;  %9806 = vmatprep.subr.bf16.mxu1 %v12936_v57  ;;  %v13026_v55 = vld [vmem:[#allocation18 + $0x3d4] ss:$24 sps:$4 sm:$0xff]   ;;  %v13021_v57 = vld [vmem:[#allocation18 + $0xa0] ss:$24 sps:$4 sm:$0xff]  }
0x16e5   :  { %9768 = vmatpush1.bf16.msra.mxu0 %v12931_v58  ;;  %9807 = vmatpush1.bf16.msra.mxu1 %v12934_v59  ;;  %v13024_v58 = vld [vmem:[#allocation18 + $0x3d0] ss:$24 sps:$4 sm:$0xff]   ;;  %v13029_v59 = vld [vmem:[#allocation18 + $0x74] ss:$24 sps:$4 sm:$0xff]  }
0x16e6   :  { %9769 = vmatprep.subr.bf16.mxu0 %v12939_v17  ;;  %9808 = vmatprep.subr.bf16.mxu1 %v12942_v62  ;;  %v13027_v17 = vld [vmem:[#allocation18 + $0x70] ss:$24 sps:$4 sm:$0xff]   ;;  %v13030_v62 = vld [vmem:[#allocation18 + $0x3a0] ss:$24 sps:$4 sm:$0xff]  }
0x16e9   :  { %9770 = vmatpush1.bf16.msra.mxu0 %v12937_v63  ;;  %9809 = vmatpush1.bf16.msra.mxu1 %v12940_v0  ;;  %v13035_v63 = vld [vmem:[#allocation18 + $0x44] ss:$24 sps:$4 sm:$0xff]   ;;  %v13038_v0 = vld [vmem:[#allocation18 + $0x374] ss:$24 sps:$4 sm:$0xff]  }
0x16ea   :  { %9771 = vmatprep.subr.bf16.mxu0 %v12945_v1  ;;  %9810 = vmatprep.subr.bf16.mxu1 %v12948_v2  ;;  %v13033_v1 = vld [vmem:[#allocation18 + $0x40] ss:$24 sps:$4 sm:$0xff]   ;;  %v13036_v2 = vld [vmem:[#allocation18 + $0x370] ss:$24 sps:$4 sm:$0xff]  }
0x16ed   :  { %9772 = vmatpush1.bf16.msra.mxu0 %v12943_v4  ;;  %9811 = vmatpush1.bf16.msra.mxu1 %v12946_v6  ;;  %v13041_v4 = vld [vmem:[#allocation18 + $0x14] ss:$24 sps:$4 sm:$0xff]   ;;  %v13044_v6 = vld [vmem:[#allocation18 + $0x344] ss:$24 sps:$4 sm:$0xff]  }
0x16ee   :  { %9773 = vmatprep.subr.bf16.mxu0 %v12951_v7  ;;  %9812 = vmatprep.subr.bf16.mxu1 %v12954_v56  ;;  %v13039_v7 = vld [vmem:[#allocation18 + $0x10] ss:$24 sps:$4 sm:$0xff]   ;;  %v13042_v56 = vld [vmem:[#allocation18 + $0x340] ss:$24 sps:$4 sm:$0xff]  }
0x16f1   :  { %9774 = vmatpush2.bf16.msra.mxu0 %v12949_v10  ;;  %9813 = vmatpush1.bf16.msra.mxu1 %v12952_v60  ;;  %v13047_v10 = vld [vmem:[#allocation18 + $0x2e4] ss:$24 sps:$4 sm:$0xff]   ;;  %v13050_v60 = vld [vmem:[#allocation18 + $0x314] ss:$24 sps:$4 sm:$0xff]  }
0x16f2   :  { %9775 = vmatprep.subr.bf16.mxu0 %v12957_v11  ;;  %9814 = vmatprep.subr.bf16.mxu1 %v12960_v12  ;;  %v13045_v11 = vld [vmem:[#allocation18 + $0x2e0] ss:$24 sps:$4 sm:$0xff]   ;;  %v13048_v12 = vld [vmem:[#allocation18 + $0x310] ss:$24 sps:$4 sm:$0xff]  }
0x16f5   :  { %9776 = vmatpush2.bf16.msra.mxu0 %v12955_v13  ;;  %9815 = vmatpush2.bf16.msra.mxu1 %v12958_v30  ;;  %v13053_v13 = vld [vmem:[#allocation18 + $0x2b4] ss:$24 sps:$4 sm:$0xff]   ;;  %v13056_v30 = vld [vmem:[#allocation18 + $0x5e4] ss:$24 sps:$4 sm:$0xff]  }
0x16f6   :  { %9777 = vmatprep.subr.bf16.mxu0 %v12963_v42  ;;  %9816 = vmatprep.subr.bf16.mxu1 %v12966_v46  ;;  %v13051_v42 = vld [vmem:[#allocation18 + $0x2b0] ss:$24 sps:$4 sm:$0xff]   ;;  %v13054_v46 = vld [vmem:[#allocation18 + $0x5e0] ss:$24 sps:$4 sm:$0xff]  }
0x16f9   :  { %9778 = vmatpush2.bf16.msra.mxu0 %v12961_v31  ;;  %9817 = vmatpush2.bf16.msra.mxu1 %v12964_v32  ;;  %v13059_v31 = vld [vmem:[#allocation18 + $0x284] ss:$24 sps:$4 sm:$0xff]   ;;  %v13062_v32 = vld [vmem:[#allocation18 + $0x5b4] ss:$24 sps:$4 sm:$0xff]  }
0x16fa   :  { %9779 = vmatprep.subr.bf16.mxu0 %v12969_v61  ;;  %9818 = vmatprep.subr.bf16.mxu1 %v12972_v33  ;;  %v13057_v61 = vld [vmem:[#allocation18 + $0x280] ss:$24 sps:$4 sm:$0xff]   ;;  %v13060_v33 = vld [vmem:[#allocation18 + $0x5b0] ss:$24 sps:$4 sm:$0xff]  }
0x16fd   :  { %9780 = vmatpush2.bf16.msra.mxu0 %v12967_v51  ;;  %9819 = vmatpush2.bf16.msra.mxu1 %v12970_v8  ;;  %v13065_v51 = vld [vmem:[#allocation18 + $0x254] ss:$24 sps:$4 sm:$0xff]   ;;  %v13068_v8 = vld [vmem:[#allocation18 + $0x584] ss:$24 sps:$4 sm:$0xff]  }
0x16fe   :  { %9781 = vmatprep.subr.bf16.mxu0 %v12975_v34  ;;  %9820 = vmatprep.subr.bf16.mxu1 %v12978_v16  ;;  %v13063_v34 = vld [vmem:[#allocation18 + $0x250] ss:$24 sps:$4 sm:$0xff]   ;;  %v13066_v16 = vld [vmem:[#allocation18 + $0x580] ss:$24 sps:$4 sm:$0xff]  }
0x1701   :  { %9782 = vmatpush2.bf16.msra.mxu0 %v12973_v14  ;;  %9821 = vmatpush2.bf16.msra.mxu1 %v12976_v15  ;;  %v13071_v14 = vld [vmem:[#allocation18 + $0x224] ss:$24 sps:$4 sm:$0xff]   ;;  %v13074_v15 = vld [vmem:[#allocation18 + $0x554] ss:$24 sps:$4 sm:$0xff]  }
0x1702   :  { %9783 = vmatprep.subr.bf16.mxu0 %v12981_v18  ;;  %9822 = vmatprep.subr.bf16.mxu1 %v12984_v35  ;;  %v13069_v18 = vld [vmem:[#allocation18 + $0x220] ss:$24 sps:$4 sm:$0xff]   ;;  %v13072_v35 = vld [vmem:[#allocation18 + $0x550] ss:$24 sps:$4 sm:$0xff]  }
0x1705   :  { %9784 = vmatpush2.bf16.msra.mxu0 %v12979_v19  ;;  %9823 = vmatpush2.bf16.msra.mxu1 %v12982_v44  ;;  %v13077_v19 = vld [vmem:[#allocation18 + $0x1f4] ss:$24 sps:$4 sm:$0xff]   ;;  %v13080_v44 = vld [vmem:[#allocation18 + $0x524] ss:$24 sps:$4 sm:$0xff]  }
0x1706   :  { %9785 = vmatprep.subr.bf16.mxu0 %v12987_v20  ;;  %9824 = vmatprep.subr.bf16.mxu1 %v12990_v27  ;;  %v13075_v20 = vld [vmem:[#allocation18 + $0x1f0] ss:$24 sps:$4 sm:$0xff]   ;;  %v13078_v27 = vld [vmem:[#allocation18 + $0x520] ss:$24 sps:$4 sm:$0xff]  }
0x1709   :  { %9786 = vmatpush2.bf16.msra.mxu0 %v12985_v39  ;;  %9825 = vmatpush2.bf16.msra.mxu1 %v12988_v3  ;;  %v13083_v39 = vld [vmem:[#allocation18 + $0x1c4] ss:$24 sps:$4 sm:$0xff]   ;;  %v13086_v3 = vld [vmem:[#allocation18 + $0x4f4] ss:$24 sps:$4 sm:$0xff]  }
0x170a   :  { %9787 = vmatprep.subr.bf16.mxu0 %v12993_v26  ;;  %9826 = vmatprep.subr.bf16.mxu1 %v12996_v43  ;;  %v13081_v26 = vld [vmem:[#allocation18 + $0x1c0] ss:$24 sps:$4 sm:$0xff]   ;;  %v13084_v43 = vld [vmem:[#allocation18 + $0x4f0] ss:$24 sps:$4 sm:$0xff]  }
0x170d   :  { %9788 = vmatpush2.bf16.msra.mxu0 %v12991_v48  ;;  %9827 = vmatpush2.bf16.msra.mxu1 %v12994_v53  ;;  %v13089_v48 = vld [vmem:[#allocation18 + $0x194] ss:$24 sps:$4 sm:$0xff]   ;;  %v13092_v53 = vld [vmem:[#allocation18 + $0x4c4] ss:$24 sps:$4 sm:$0xff]  }
0x170e   :  { %9828 = vmatprep.subr.bf16.mxu1 %v12999_v47  ;;  %9839 = vmatprep.subr.bf16.mxu0 %v13002_v41  ;;  %v13087_v47 = vld [vmem:[#allocation18 + $0x190] ss:$24 sps:$4 sm:$0xff]   ;;  %v13090_v41 = vld [vmem:[#allocation18 + $0x4c0] ss:$24 sps:$4 sm:$0xff]  }
0x1710   :  { %9790 = vmatmul.mubr.bf16.vlgmr.msra.gmra.mxu0 %v15511_v50 }
0x1711   :  { %9829 = vmatpush2.bf16.msra.mxu1 %v12997_v23  ;;  %9840 = vmatpush1.bf16.msra.mxu0 %v13000_v37  ;;  %v13095_v23 = vld [vmem:[#allocation18 + $0x494] ss:$24 sps:$4 sm:$0xff]   ;;  %v13093_v37 = vld [vmem:[#allocation18 + $0x490] ss:$24 sps:$4 sm:$0xff]  }
0x1712   :  { %9871 = vmatprep.mubr.bf16.mxu0 %v15509_v38  ;;  %9841 = vmatprep.subr.bf16.mxu0 %v13005_v29  ;;  %v13018_v38 = vld [vmem:[#allocation18 + $0x400] ss:$24 sps:$4 sm:$0xff]  }
0x1713   :  { %9880 = vmatprep.subr.bf16.mxu1 %v13008_v5 }
0x1714   :  { %9831 = vmatmul.mubr.bf16.vlgmr.msra.gmra.mxu1 %v15518_v36 }
0x1715   :  { %9842 = vmatpush1.bf16.msra.mxu0 %v13003_v21  ;;  %9881 = vmatpush1.bf16.msra.mxu1 %v13006_v28 }
0x1716   :  { %9912 = vmatprep.mubr.bf16.mxu1 %v15515_v40  ;;  %9843 = vmatprep.subr.bf16.mxu0 %v13011_v9  ;;  %v13032_v40 = vld [vmem:[#allocation18 + $0x3a4] ss:$24 sps:$4 sm:$0xff]  }
0x1717   :  { %9882 = vmatprep.subr.bf16.mxu1 %v13014_v52 }
0x1719   :  { %9844 = vmatpush1.bf16.msra.mxu0 %v13009_v22  ;;  %9883 = vmatpush1.bf16.msra.mxu1 %v13012_v49 }
0x171a   :  { %9845 = vmatprep.subr.bf16.mxu0 %v13017_v45  ;;  %9884 = vmatprep.subr.bf16.mxu1 %v13020_v54 }
0x171d   :  { %9846 = vmatpush1.bf16.msra.mxu0 %v13015_v24  ;;  %9885 = vmatpush1.bf16.msra.mxu1 %v13018_v38 }
0x171e   :  { %9847 = vmatprep.subr.bf16.mxu0 %v13023_v25  ;;  %9886 = vmatprep.subr.bf16.mxu1 %v13026_v55 }
0x1721   :  { %9848 = vmatpush1.bf16.msra.mxu0 %v13021_v57  ;;  %9887 = vmatpush1.bf16.msra.mxu1 %v13024_v58 }
0x1722   :  { %9849 = vmatprep.subr.bf16.mxu0 %v13029_v59  ;;  %9888 = vmatprep.subr.bf16.mxu1 %v13032_v40 }
0x1725   :  { %9850 = vmatpush1.bf16.msra.mxu0 %v13027_v17  ;;  %9889 = vmatpush1.bf16.msra.mxu1 %v13030_v62 }
0x1726   :  { %9851 = vmatprep.subr.bf16.mxu0 %v13035_v63  ;;  %9890 = vmatprep.subr.bf16.mxu1 %v13038_v0 }
0x1729   :  { %9852 = vmatpush1.bf16.msra.mxu0 %v13033_v1  ;;  %9891 = vmatpush1.bf16.msra.mxu1 %v13036_v2 }
0x172a   :  { %9853 = vmatprep.subr.bf16.mxu0 %v13041_v4  ;;  %9892 = vmatprep.subr.bf16.mxu1 %v13044_v6 }
0x172d   :  { %9854 = vmatpush1.bf16.msra.mxu0 %v13039_v7  ;;  %9893 = vmatpush1.bf16.msra.mxu1 %v13042_v56 }
0x172e   :  { %9855 = vmatprep.subr.bf16.mxu0 %v13047_v10  ;;  %9894 = vmatprep.subr.bf16.mxu1 %v13050_v60 }
0x1731   :  { %9856 = vmatpush2.bf16.msra.mxu0 %v13045_v11  ;;  %9895 = vmatpush1.bf16.msra.mxu1 %v13048_v12 }
0x1732   :  { %9857 = vmatprep.subr.bf16.mxu0 %v13053_v13  ;;  %9896 = vmatprep.subr.bf16.mxu1 %v13056_v30 }
0x1735   :  { %9858 = vmatpush2.bf16.msra.mxu0 %v13051_v42  ;;  %9897 = vmatpush2.bf16.msra.mxu1 %v13054_v46 }
0x1736   :  { %9859 = vmatprep.subr.bf16.mxu0 %v13059_v31  ;;  %9898 = vmatprep.subr.bf16.mxu1 %v13062_v32 }
0x1739   :  { %9860 = vmatpush2.bf16.msra.mxu0 %v13057_v61  ;;  %9899 = vmatpush2.bf16.msra.mxu1 %v13060_v33 }
0x173a   :  { %9861 = vmatprep.subr.bf16.mxu0 %v13065_v51  ;;  %9900 = vmatprep.subr.bf16.mxu1 %v13068_v8  ;;  %v15691_v51 = vld [vmem:[#allocation58_spill] sm:$0xff] }
0x173d   :  { %9862 = vmatpush2.bf16.msra.mxu0 %v13063_v34  ;;  %9901 = vmatpush2.bf16.msra.mxu1 %v13066_v16 }
0x173e   :  { %9863 = vmatprep.subr.bf16.mxu0 %v13071_v14  ;;  %9902 = vmatprep.subr.bf16.mxu1 %v13074_v15  ;;  %v13194_v14 = vld [vmem:[%s15610_s16] sm:$0xff] }
0x1741   :  { %9864 = vmatpush2.bf16.msra.mxu0 %v13069_v18  ;;  %9903 = vmatpush2.bf16.msra.mxu1 %v13072_v35 }
0x1742   :  { %9865 = vmatprep.subr.bf16.mxu0 %v13077_v19  ;;  %9904 = vmatprep.subr.bf16.mxu1 %v13080_v44 }
0x1745   :  { %9866 = vmatpush2.bf16.msra.mxu0 %v13075_v20  ;;  %9905 = vmatpush2.bf16.msra.mxu1 %v13078_v27 }
0x1746   :  { %9867 = vmatprep.subr.bf16.mxu0 %v13083_v39  ;;  %9906 = vmatprep.subr.bf16.mxu1 %v13086_v3 }
0x1749   :  { %9868 = vmatpush2.bf16.msra.mxu0 %v13081_v26  ;;  %9907 = vmatpush2.bf16.msra.mxu1 %v13084_v43 }
0x174a   :  { %9869 = vmatprep.subr.bf16.mxu0 %v13089_v48  ;;  %9908 = vmatprep.subr.bf16.mxu1 %v13092_v53 }
0x174d   :  { %9870 = vmatpush2.bf16.msra.mxu0 %v13087_v47  ;;  %9909 = vmatpush2.bf16.msra.mxu1 %v13090_v41 }
0x174e   :  { %9910 = vmatprep.subr.bf16.mxu1 %v13095_v23 }
0x1750   :  { %9872 = vmatmul.mubr.bf16.vlgmr.msra.gmra.mxu0 %v15511_v50 }
0x1751   :  { %9911 = vmatpush2.bf16.msra.mxu1 %v13093_v37 }
0x1754   :  { %9913 = vmatmul.mubr.bf16.vlgmr.msra.gmra.mxu1 %v15518_v36 }
0x1790   :  { %v9709_v29 = vpop.f32.mrf.mxu0 }
0x1792   :  { %v9711_v5 = vpop.f32.mrf.mxu0 }
0x1794   :  { %v9713_v21 = vpop.f32.mrf.mxu0  ;;  %v9750_v28 = vpop.f32.mrf.mxu1 }
0x1795   :  { %v9751_v9 = vadd.f32 %v9750_v28, %v9709_v29 }
0x1796   :  { %v9714_v52 = vpop.f32.mrf.mxu0  ;;  %v9752_v22 = vpop.f32.mrf.mxu1 }
0x1797   :  { %v9921_v49 = vsub.f32 0.0, %v9751_v9  ;;  %v9753_v45 = vadd.f32 %v9752_v22, %v9711_v5 }
0x1798   :  { %v9754_v54 = vpop.f32.mrf.mxu1 }
0x1799   :  { %v9927_v24 = vmul.f32 1.442695, %v9921_v49  ;;  %v9922_v38 = vsub.f32 0.0, %v9753_v45  ;;  %v13195_v49 = vld [vmem:[%s15610_s16 + $0x8] sm:$0xf] }
0x179a   :  { %v9755_v25 = vpop.f32.mrf.mxu1 }
0x179b   :  { %13114 = vpow2.f32 %v9927_v24  ;;  %v9929_v55 = vmul.f32 1.442695, %v9922_v38 }
0x179d   :  { %13116 = vpow2.f32 %v9929_v55 }
0x17a8   :  { %v13115_v50 = vpop.eup %13114 }
0x17a9   :  { %v9939_v57 = vadd.f32 1.0, %v13115_v50 }
0x17aa   :  { %v13117_v58 = vpop.eup %13116 }
0x17ab   :  { %v9940_v36 = vadd.f32 1.0, %v13117_v58  ;;  %13118 = vrcp.f32 %v9939_v57 }
0x17ad   :  { %13120 = vrcp.f32 %v9940_v36 }
0x17b8   :  { %v13119_v59 = vpop.eup %13118 }
0x17ba   :  { %v13121_v40 = vpop.eup %13120 }
0x17bb   :  { %v9963_v17 = vcombine.low %v13119_v59, %v13121_v40 }
0x17bd   :  { %v9971_v8 = vrot.slane %v9963_v17, %v15691_v51 }
0x17d0   :  { %v9791_v62 = vpop.f32.mrf.mxu0 }
0x17d2   :  { %v9793_v63 = vpop.f32.mrf.mxu0 }
0x17d4   :  { %v9795_v0 = vpop.f32.mrf.mxu0  ;;  %v9832_v1 = vpop.f32.mrf.mxu1 }
0x17d5   :  { %v9833_v2 = vadd.f32 %v9832_v1, %v9791_v62 }
0x17d6   :  { %v9796_v4 = vpop.f32.mrf.mxu0  ;;  %v9834_v6 = vpop.f32.mrf.mxu1 }
0x17d7   :  { %v9923_v7 = vsub.f32 0.0, %v9833_v2  ;;  %v9835_v56 = vadd.f32 %v9834_v6, %v9793_v63 }
0x17d8   :  { %v9836_v10 = vpop.f32.mrf.mxu1 }
0x17d9   :  { %v9931_v60 = vmul.f32 1.442695, %v9923_v7  ;;  %v9924_v11 = vsub.f32 0.0, %v9835_v56 }
0x17da   :  { %v9837_v12 = vpop.f32.mrf.mxu1 }
0x17db   :  { %13122 = vpow2.f32 %v9931_v60  ;;  %v9933_v13 = vmul.f32 1.442695, %v9924_v11 }
0x17dd   :  { %13124 = vpow2.f32 %v9933_v13 }
0x17e8   :  { %v13123_v30 = vpop.eup %13122 }
0x17e9   :  { %v9941_v42 = vadd.f32 1.0, %v13123_v30 }
0x17ea   :  { %v13125_v46 = vpop.eup %13124 }
0x17eb   :  { %v9942_v31 = vadd.f32 1.0, %v13125_v46  ;;  %13126 = vrcp.f32 %v9941_v42 }
0x17ed   :  { %13128 = vrcp.f32 %v9942_v31 }
0x17f8   :  { %v13127_v32 = vpop.eup %13126 }
0x17fa   :  { %v13129_v61 = vpop.eup %13128 }
0x17fb   :  { %v9964_v33 = vcombine.low %v13127_v32, %v13129_v61 }
0x17fd   :  { %v9978_v34 = vrot.slane %v9964_v33, %v15691_v51 }
0x17ff   :  { %v9979_v16 = vcombine.low %v9971_v8, %v9978_v34 }
0x1801   :  { %v9990_v15 = vmul.f32 %v13194_v14, %v9979_v16 }
0x1803   :  { %v9992_v18 = vmul.f32 2.0, %v9990_v15 }
0x1805   :  { %9994 = vst [vmem:[%s13840_s5] sm:$0xff] %v9992_v18 }
0x1810   :  { %v9873_v35 = vpop.f32.mrf.mxu0 }
0x1812   :  { %v9875_v19 = vpop.f32.mrf.mxu0 }
0x1814   :  { %v9877_v44 = vpop.f32.mrf.mxu0  ;;  %v9914_v20 = vpop.f32.mrf.mxu1 }
0x1815   :  { %v9915_v27 = vadd.f32 %v9914_v20, %v9873_v35 }
0x1816   :  { %v9878_v39 = vpop.f32.mrf.mxu0  ;;  %v9916_v3 = vpop.f32.mrf.mxu1 }
0x1817   :  { %v9925_v26 = vsub.f32 0.0, %v9915_v27  ;;  %v9917_v43 = vadd.f32 %v9916_v3, %v9875_v19 }
0x1818   :  { %v9918_v48 = vpop.f32.mrf.mxu1 }
0x1819   :  { %v9935_v53 = vmul.f32 1.442695, %v9925_v26  ;;  %v9926_v47 = vsub.f32 0.0, %v9917_v43 }
0x181a   :  { %v9919_v41 = vpop.f32.mrf.mxu1 }
0x181b   :  { %13130 = vpow2.f32 %v9935_v53  ;;  %v9937_v23 = vmul.f32 1.442695, %v9926_v47 }
0x181d   :  { %13132 = vpow2.f32 %v9937_v23 }
0x1828   :  { %v13131_v37 = vpop.eup %13130 }
0x1829   :  { %v9943_v29 = vadd.f32 1.0, %v13131_v37 }
0x182a   :  { %v13133_v5 = vpop.eup %13132 }
0x182b   :  { %v9944_v21 = vadd.f32 1.0, %v13133_v5  ;;  %13134 = vrcp.f32 %v9943_v29 }
0x182d   :  { %13136 = vrcp.f32 %v9944_v21 }
0x1838   :  { %v13135_v28 = vpop.eup %13134 }
0x183a   :  { %v13137_v9 = vpop.eup %13136 }
0x183b   :  { %v9980_v52 = vcombine.low %v13135_v28, %v13137_v9 }
0x183d   :  { %v9987_v22 = vrot.slane %v9980_v52, %v15691_v51 }
0x183f   :  { %v9991_v45 = vmul.f32 %v13195_v49, %v9987_v22 }
0x1841   :  { %v9993_v54 = vmul.f32 2.0, %v9991_v45 }
0x1843   :  { %9995 = vst [vmem:[%s13840_s5 + $0x8] sm:$0xf] %v9993_v54 }
0x1844   :  { %10000 = vsyncpa [#allocation3], 1 }
0x1845   :  { %10001 = vsyncpa [#allocation5], 1 }
0x1846   :  { %10002 = vsyncpa [#allocation8], 1 }
0x1847   :  { %10003 = vsyncpa [#allocation11], 1 }
0x1848   :  { %10004 = vsyncpa [#allocation14], 1 }
0x1849   :  { %10005 = vsyncpa [#allocation17], 1 }
0x184a   :  { %10006 = vsyncpa [#allocation20], 1 }
0x184b   :  { %10007 = vsyncpa [#allocation23], 1 }
0x184c   :  { %10008 = vsyncpa [#allocation26], 1 }
0x184d   :  { %10009 = vsyncpa [#allocation29], 1 }

</bundles_post_ra>
